<compile_context>
chip_gen: v5e
topology: v5e:2x2
jax: 0.10.0
libtpu: 0.0.40
codegen_flags: <defaults>
</compile_context>

<pallas_src>
import functools

import jax
import jax.numpy as jnp
from jax.experimental import pallas as pl
from jax.experimental.pallas import tpu as pltpu


def _fused_resblock_kernel(x_ref, w_ref, shift_ref, alpha_ref, out_ref,
                           act_ref, col_ref, *,
                           num_blocks, C, K, H, W, pad, mxu_dtype):
    """Full conv->BN->PReLU (x num_blocks, +residual every 2nd block) chain for one
    batch element.  Layout: channels on sublanes, flattened padded pixels on lanes."""
    Wp = W + 2 * pad
    S = (H + 2 * pad) * Wp            # padded, flattened spatial size
    P = (H - 1) * Wp + W              # span of flat positions covering all output pixels
    woff = pad * Wp + pad             # flat offset of the first interior pixel

    x0 = x_ref[0]                                        # (C, S) padded input
    act_ref[...] = x0                                    # resident activation (padded)
    res_int = x0[:, woff:woff + P]                       # residual, interior-aligned

    # Lane positions whose within-row column >= W are padding columns: they must stay
    # zero so they act as the conv zero-padding of the next block.  Hoisted out of loop.
    lane = jax.lax.broadcasted_iota(jnp.int32, (C, P), 1)
    keep = (lane % Wp) < W

    for b in range(num_blocks):                          # static unroll over blocks
        # im2col: K*K lane-shifted views of the resident activation (no retiling:
        # pure lane-offset copies in an already lane-dense layout).
        for dy in range(K):
            for dx in range(K):
                t = dy * K + dx
                off = dy * Wp + dx
                col_ref[t * C:(t + 1) * C, :] = act_ref[:, off:off + P]

        # One tap-packed MXU matmul: (C, K*K*C) @ (K*K*C, P) -> (C, P), lane-dense.
        # BN scale + conv bias are already folded into w_ref / shift_ref.
        y = jnp.dot(w_ref[b].astype(mxu_dtype), col_ref[...].astype(mxu_dtype),
                    preferred_element_type=jnp.float32)
        y = y + shift_ref[b]                             # (C, 1) broadcast along lanes
        alpha = alpha_ref[b]                             # scalar PReLU slope from SMEM
        y = jnp.where(y > 0.0, y, alpha * y)
        y = jnp.where(keep, y, 0.0)                      # re-zero the pad columns
        if (b + 1) % 2 == 0:
            y = y + res_int                              # skip connection (original x)

        act_ref[:, woff:woff + P] = y                    # write back interior; borders
                                                         # outside the span stay zero

    out_ref[0] = act_ref[...].astype(out_ref.dtype)


def advanced_residual_block(x_nchw, params, kernel_size=3, mxu_dtype=jnp.float32):
    """Forward pass matching AdvancedResidualBlock.forward.  Input/output are NCHW."""
    N, C, H, W = x_nchw.shape
    K = kernel_size
    pad = K // 2
    Hp, Wp = H + 2 * pad, W + 2 * pad
    S = Hp * Wp
    P = (H - 1) * Wp + W

    w_all = params["w"]          # (num_blocks, C, K*K*C)  BN scale folded in
    shift_all = params["shift"]  # (num_blocks, C, 1)      conv bias + BN shift
    alpha_all = params["alpha"]  # (num_blocks,)           PReLU parameters
    num_blocks = w_all.shape[0]

    # Pad ONCE on the raw input (cheap); the kernel keeps the padded activation
    # resident in VMEM for the whole chain.
    xflat = jnp.pad(x_nchw, ((0, 0), (0, 0), (pad, pad), (pad, pad))).reshape(N, C, S)

    kern = functools.partial(
        _fused_resblock_kernel,
        num_blocks=num_blocks, C=C, K=K, H=H, W=W, pad=pad, mxu_dtype=mxu_dtype)

    out_flat = pl.pallas_call(
        kern,
        out_shape=jax.ShapeDtypeStruct((N, C, S), x_nchw.dtype),
        grid=(N,),
        in_specs=[
            pl.BlockSpec((1, C, S), lambda n: (n, 0, 0)),                   # activation
            pl.BlockSpec((num_blocks, C, K * K * C), lambda n: (0, 0, 0)),  # weights
            pl.BlockSpec((num_blocks, C, 1), lambda n: (0, 0, 0)),          # shifts
            pl.BlockSpec(memory_space=pltpu.MemorySpace.SMEM),              # alphas
        ],
        out_specs=pl.BlockSpec((1, C, S), lambda n: (n, 0, 0)),
        scratch_shapes=[
            pltpu.VMEM((C, S), jnp.float32),            # resident padded activation
            pltpu.VMEM((K * K * C, P), jnp.float32),    # im2col buffer
        ],
        compiler_params=pltpu.CompilerParams(dimension_semantics=("parallel",)),
    )(xflat, w_all, shift_all, alpha_all)

    return out_flat.reshape(N, C, Hp, Wp)[:, :, pad:pad + H, pad:pad + W]


def init_params(key, n_channels, num_blocks, kernel_size, eps=1e-5):
    """Deterministic synthetic parameters.  Conv bias + BatchNorm (running stats) are
    folded: w_packed[co, (dy*K+dx)*C+ci] = scale[co] * w[co, ci, dy, dx] and a per-channel
    shift; PReLU uses PyTorch's single-parameter default init (0.25)."""
    C, K = n_channels, kernel_size
    ws, shifts, alphas = [], [], []
    for _ in range(num_blocks):
        key, k1, k2, k3, k4, k5, k6 = jax.random.split(key, 7)
        w_oihw = 0.05 * jax.random.normal(k1, (C, C, K, K), jnp.float32)
        bias = 0.01 * jax.random.normal(k2, (C,), jnp.float32)
        gamma = 1.0 + 0.1 * jax.random.normal(k3, (C,), jnp.float32)
        beta = 0.1 * jax.random.normal(k4, (C,), jnp.float32)
        mean = 0.1 * jax.random.normal(k5, (C,), jnp.float32)
        var = 1.0 + 0.1 * jnp.abs(jax.random.normal(k6, (C,), jnp.float32))
        scale = gamma / jnp.sqrt(var + eps)                    # (C,) per output channel
        shift = (bias - mean) * scale + beta                   # (C,)
        # (co,ci,kh,kw) -> (kh,kw,ci,co) -> (K*K*C_in, C_out) -> (C_out, K*K*C_in)
        w_hwio = jnp.transpose(w_oihw, (2, 3, 1, 0)).reshape(K * K * C, C)
        ws.append(w_hwio.T * scale[:, None])
        shifts.append(shift)
        alphas.append(jnp.float32(0.25))
    return dict(w=jnp.stack(ws),                     # (num_blocks, C, K*K*C)
                shift=jnp.stack(shifts)[:, :, None], # (num_blocks, C, 1)
                alpha=jnp.stack(alphas))             # (num_blocks,)


def _reference_forward(x_nchw, params, kernel_size=3):
    """Pure-JAX reference using the same folded parameters (for a sanity check)."""
    N, C, H, W = x_nchw.shape
    K = kernel_size
    w_all, shift_all, alpha_all = params["w"], params["shift"], params["alpha"]
    res = x_nchw
    h = x_nchw
    for b in range(w_all.shape[0]):
        w_hwio = jnp.transpose(w_all[b], (1, 0)).reshape(K, K, C, C)
        y = jax.lax.conv_general_dilated(
            h, w_hwio, window_strides=(1, 1), padding="SAME",
            dimension_numbers=("NCHW", "HWIO", "NCHW"),
            precision=jax.lax.Precision.HIGHEST)
        y = y + shift_all[b].reshape(1, C, 1, 1)
        y = jnp.where(y > 0.0, y, alpha_all[b] * y)
        if (b + 1) % 2 == 0:
            y = y + res
        h = y
    return h


if __name__ == "__main__":
    batch, n_channels, spatial = 2, 32, 16
    kernel_size, num_blocks = 3, 6

    key = jax.random.PRNGKey(0)
    key, kx, kp = jax.random.split(key, 3)
    x = jax.random.normal(kx, (batch, n_channels, spatial, spatial), jnp.float32)
    params = init_params(kp, n_channels, num_blocks, kernel_size)

    fwd = jax.jit(functools.partial(advanced_residual_block, kernel_size=kernel_size))
    out = jax.block_until_ready(fwd(x, params))
    assert out.shape == x.shape and out.dtype == x.dtype

    ref = _reference_forward(x, params, kernel_size=kernel_size)
    max_err = float(jnp.max(jnp.abs(out - ref)))
    assert jnp.allclose(out, ref, atol=5e-2, rtol=5e-2), f"max abs err {max_err}"

    print("KERNEL_OK")
</pallas_src>

<mosaic_0001>
module attributes {stable_mosaic.version = 11 : i64} {
  func.func @_fused_resblock_kernel(%arg0: i32, %arg1: memref<1x32x324xf32, #tpu.memory_space<vmem>>, %arg2: memref<6x32x288xf32, #tpu.memory_space<vmem>>, %arg3: memref<6x32x1xf32, #tpu.memory_space<vmem>>, %arg4: memref<6xf32, #tpu.memory_space<smem>>, %arg5: memref<1x32x324xf32, #tpu.memory_space<vmem>>, %arg6: memref<32x324xf32, #tpu.memory_space<vmem>>, %arg7: memref<288x286xf32, #tpu.memory_space<vmem>>) attributes {dimension_semantics = [#tpu.dimension_semantics<parallel>], iteration_bounds = array<i64: 2>, scalar_prefetch = 0 : i64, scratch_operands = 2 : i64, tpu.core_type = #tpu.core_type<tc>, window_params = [{transform_indices = @transform_0, window_bounds = array<i64: 1, 32, 324>}, {pipeline_mode = #tpu.pipeline_mode<synchronous>, transform_indices = @transform_1, window_bounds = array<i64: 6, 32, 288>}, {pipeline_mode = #tpu.pipeline_mode<synchronous>, transform_indices = @transform_2, window_bounds = array<i64: 6, 32, 1>}, {transform_indices = @transform_3, window_bounds = array<i64: 6>}, {transform_indices = @transform_4, window_bounds = array<i64: 1, 32, 324>}]} {
    %c0 = arith.constant 0 : index
    %c0_0 = arith.constant 0 : index
    %c0_1 = arith.constant 0 : index
    %0 = vector.load %arg1[%c0, %c0_0, %c0_1] : memref<1x32x324xf32, #tpu.memory_space<vmem>>, vector<1x32x324xf32>
    %1 = vector.shape_cast %0 : vector<1x32x324xf32> to vector<32x324xf32>
    %c0_2 = arith.constant 0 : index
    %c0_3 = arith.constant 0 : index
    %2 = vector.load %arg6[%c0_2, %c0_3] : memref<32x324xf32, #tpu.memory_space<vmem>>, vector<32x324xf32>
    tpu.vector_store %arg6[%c0_2, %c0_3], %1 {strides = array<i32>} : memref<32x324xf32, #tpu.memory_space<vmem>>, vector<32x324xf32>,
    %3 = vector.extract_strided_slice %1 {offsets = [0, 19], sizes = [32, 286], strides = [1, 1]} : vector<32x324xf32> to vector<32x286xf32>
    %4 = tpu.iota {dimensions = array<i32: 1>} : vector<32x286xi32>
    %c18_i32 = arith.constant 18 : i32
    %c0_i32 = arith.constant 0 : i32
    %5 = arith.cmpi eq, %c18_i32, %c0_i32 : i32
    %c1_i32 = arith.constant 1 : i32
    %6 = arith.select %5, %c1_i32, %c18_i32 : i32
    %7 = vector.broadcast %6 : i32 to vector<32x286xi32>
    %8 = arith.remsi %4, %7 : vector<32x286xi32>
    %c0_i32_4 = arith.constant 0 : i32
    %9 = vector.broadcast %c0_i32_4 : i32 to vector<32x286xi32>
    %10 = arith.cmpi ne, %8, %9 : vector<32x286xi32>
    %c0_i32_5 = arith.constant 0 : i32
    %11 = vector.broadcast %c0_i32_5 : i32 to vector<32x286xi32>
    %12 = arith.cmpi slt, %8, %11 : vector<32x286xi32>
    %c0_i32_6 = arith.constant 0 : i32
    %13 = arith.cmpi slt, %6, %c0_i32_6 : i32
    %14 = vector.broadcast %13 : i1 to vector<32x286xi1>
    %15 = vector.broadcast %14 : vector<32x286xi1> to vector<32x286xi1>
    %16 = arith.xori %12, %15 : vector<32x286xi1>
    %17 = arith.andi %16, %10 : vector<32x286xi1>
    %18 = vector.broadcast %6 : i32 to vector<32x286xi32>
    %19 = arith.addi %8, %18 : vector<32x286xi32>
    %20 = arith.select %17, %19, %8 : vector<32x286xi1>, vector<32x286xi32>
    %c16_i32 = arith.constant 16 : i32
    %21 = vector.broadcast %c16_i32 : i32 to vector<32x286xi32>
    %22 = arith.cmpi slt, %20, %21 : vector<32x286xi32>
    %c0_7 = arith.constant 0 : index
    %c0_8 = arith.constant 0 : index
    %23 = vector.load %arg6[%c0_7, %c0_8] : memref<32x324xf32, #tpu.memory_space<vmem>>, vector<32x286xf32>
    %c0_9 = arith.constant 0 : index
    %c0_10 = arith.constant 0 : index
    %24 = vector.load %arg7[%c0_9, %c0_10] : memref<288x286xf32, #tpu.memory_space<vmem>>, vector<32x286xf32>
    tpu.vector_store %arg7[%c0_9, %c0_10], %23 {strides = array<i32>} : memref<288x286xf32, #tpu.memory_space<vmem>>, vector<32x286xf32>,
    %c0_11 = arith.constant 0 : index
    %c1 = arith.constant 1 : index
    %25 = vector.load %arg6[%c0_11, %c1] : memref<32x324xf32, #tpu.memory_space<vmem>>, vector<32x286xf32>
    %c32 = arith.constant 32 : index
    %c0_12 = arith.constant 0 : index
    %26 = vector.load %arg7[%c32, %c0_12] : memref<288x286xf32, #tpu.memory_space<vmem>>, vector<32x286xf32>
    tpu.vector_store %arg7[%c32, %c0_12], %25 {strides = array<i32>} : memref<288x286xf32, #tpu.memory_space<vmem>>, vector<32x286xf32>,
    %c0_13 = arith.constant 0 : index
    %c2 = arith.constant 2 : index
    %27 = vector.load %arg6[%c0_13, %c2] : memref<32x324xf32, #tpu.memory_space<vmem>>, vector<32x286xf32>
    %c64 = arith.constant 64 : index
    %c0_14 = arith.constant 0 : index
    %28 = vector.load %arg7[%c64, %c0_14] : memref<288x286xf32, #tpu.memory_space<vmem>>, vector<32x286xf32>
    tpu.vector_store %arg7[%c64, %c0_14], %27 {strides = array<i32>} : memref<288x286xf32, #tpu.memory_space<vmem>>, vector<32x286xf32>,
    %c0_15 = arith.constant 0 : index
    %c18 = arith.constant 18 : index
    %29 = vector.load %arg6[%c0_15, %c18] : memref<32x324xf32, #tpu.memory_space<vmem>>, vector<32x286xf32>
    %c96 = arith.constant 96 : index
    %c0_16 = arith.constant 0 : index
    %30 = vector.load %arg7[%c96, %c0_16] : memref<288x286xf32, #tpu.memory_space<vmem>>, vector<32x286xf32>
    tpu.vector_store %arg7[%c96, %c0_16], %29 {strides = array<i32>} : memref<288x286xf32, #tpu.memory_space<vmem>>, vector<32x286xf32>,
    %c0_17 = arith.constant 0 : index
    %c19 = arith.constant 19 : index
    %31 = vector.load %arg6[%c0_17, %c19] : memref<32x324xf32, #tpu.memory_space<vmem>>, vector<32x286xf32>
    %c128 = arith.constant 128 : index
    %c0_18 = arith.constant 0 : index
    %32 = vector.load %arg7[%c128, %c0_18] : memref<288x286xf32, #tpu.memory_space<vmem>>, vector<32x286xf32>
    tpu.vector_store %arg7[%c128, %c0_18], %31 {strides = array<i32>} : memref<288x286xf32, #tpu.memory_space<vmem>>, vector<32x286xf32>,
    %c0_19 = arith.constant 0 : index
    %c20 = arith.constant 20 : index
    %33 = vector.load %arg6[%c0_19, %c20] : memref<32x324xf32, #tpu.memory_space<vmem>>, vector<32x286xf32>
    %c160 = arith.constant 160 : index
    %c0_20 = arith.constant 0 : index
    %34 = vector.load %arg7[%c160, %c0_20] : memref<288x286xf32, #tpu.memory_space<vmem>>, vector<32x286xf32>
    tpu.vector_store %arg7[%c160, %c0_20], %33 {strides = array<i32>} : memref<288x286xf32, #tpu.memory_space<vmem>>, vector<32x286xf32>,
    %c0_21 = arith.constant 0 : index
    %c36 = arith.constant 36 : index
    %35 = vector.load %arg6[%c0_21, %c36] : memref<32x324xf32, #tpu.memory_space<vmem>>, vector<32x286xf32>
    %c192 = arith.constant 192 : index
    %c0_22 = arith.constant 0 : index
    %36 = vector.load %arg7[%c192, %c0_22] : memref<288x286xf32, #tpu.memory_space<vmem>>, vector<32x286xf32>
    tpu.vector_store %arg7[%c192, %c0_22], %35 {strides = array<i32>} : memref<288x286xf32, #tpu.memory_space<vmem>>, vector<32x286xf32>,
    %c0_23 = arith.constant 0 : index
    %c37 = arith.constant 37 : index
    %37 = vector.load %arg6[%c0_23, %c37] : memref<32x324xf32, #tpu.memory_space<vmem>>, vector<32x286xf32>
    %c224 = arith.constant 224 : index
    %c0_24 = arith.constant 0 : index
    %38 = vector.load %arg7[%c224, %c0_24] : memref<288x286xf32, #tpu.memory_space<vmem>>, vector<32x286xf32>
    tpu.vector_store %arg7[%c224, %c0_24], %37 {strides = array<i32>} : memref<288x286xf32, #tpu.memory_space<vmem>>, vector<32x286xf32>,
    %c0_25 = arith.constant 0 : index
    %c38 = arith.constant 38 : index
    %39 = vector.load %arg6[%c0_25, %c38] : memref<32x324xf32, #tpu.memory_space<vmem>>, vector<32x286xf32>
    %c256 = arith.constant 256 : index
    %c0_26 = arith.constant 0 : index
    %40 = vector.load %arg7[%c256, %c0_26] : memref<288x286xf32, #tpu.memory_space<vmem>>, vector<32x286xf32>
    tpu.vector_store %arg7[%c256, %c0_26], %39 {strides = array<i32>} : memref<288x286xf32, #tpu.memory_space<vmem>>, vector<32x286xf32>,
    %c0_27 = arith.constant 0 : index
    %c0_28 = arith.constant 0 : index
    %c0_29 = arith.constant 0 : index
    %41 = vector.load %arg2[%c0_27, %c0_28, %c0_29] : memref<6x32x288xf32, #tpu.memory_space<vmem>>, vector<1x32x288xf32>
    %42 = vector.shape_cast %41 : vector<1x32x288xf32> to vector<32x288xf32>
    %c0_30 = arith.constant 0 : index
    %c0_31 = arith.constant 0 : index
    %43 = vector.load %arg7[%c0_30, %c0_31] : memref<288x286xf32, #tpu.memory_space<vmem>>, vector<288x286xf32>
    %cst = arith.constant dense<0.000000e+00> : vector<32x286xf32>
    %44 = tpu.matmul %42, %43, %cst {dimension_numbers = #tpu.dot_dimension_numbers<[1], [0], [0], [1], [0, 0, 1, 1], [], []>} : vector<32x288xf32>, vector<288x286xf32>, vector<32x286xf32> -> vector<32x286xf32>
    %c0_32 = arith.constant 0 : index
    %c0_33 = arith.constant 0 : index
    %c0_34 = arith.constant 0 : index
    %45 = vector.load %arg3[%c0_32, %c0_33, %c0_34] : memref<6x32x1xf32, #tpu.memory_space<vmem>>, vector<1x32x1xf32>
    %46 = vector.shape_cast %45 : vector<1x32x1xf32> to vector<32x1xf32>
    %47 = vector.broadcast %46 : vector<32x1xf32> to vector<32x286xf32>
    %48 = arith.addf %44, %47 : vector<32x286xf32>
    %c0_35 = arith.constant 0 : index
    %49 = memref.load %arg4[%c0_35] : memref<6xf32, #tpu.memory_space<smem>>
    %cst_36 = arith.constant 0.000000e+00 : f32
    %50 = vector.broadcast %cst_36 : f32 to vector<32x286xf32>
    %51 = arith.cmpf ogt, %48, %50 : vector<32x286xf32>
    %52 = vector.broadcast %49 : f32 to vector<32x286xf32>
    %53 = arith.mulf %52, %48 : vector<32x286xf32>
    %54 = arith.select %51, %48, %53 : vector<32x286xi1>, vector<32x286xf32>
    %cst_37 = arith.constant 0.000000e+00 : f32
    %55 = vector.broadcast %cst_37 : f32 to vector<32x286xf32>
    %56 = arith.select %22, %54, %55 : vector<32x286xi1>, vector<32x286xf32>
    %c0_38 = arith.constant 0 : index
    %c19_39 = arith.constant 19 : index
    %57 = vector.load %arg6[%c0_38, %c19_39] : memref<32x324xf32, #tpu.memory_space<vmem>>, vector<32x286xf32>
    tpu.vector_store %arg6[%c0_38, %c19_39], %56 {strides = array<i32>} : memref<32x324xf32, #tpu.memory_space<vmem>>, vector<32x286xf32>,
    %c0_40 = arith.constant 0 : index
    %c0_41 = arith.constant 0 : index
    %58 = vector.load %arg6[%c0_40, %c0_41] : memref<32x324xf32, #tpu.memory_space<vmem>>, vector<32x286xf32>
    %c0_42 = arith.constant 0 : index
    %c0_43 = arith.constant 0 : index
    %59 = vector.load %arg7[%c0_42, %c0_43] : memref<288x286xf32, #tpu.memory_space<vmem>>, vector<32x286xf32>
    tpu.vector_store %arg7[%c0_42, %c0_43], %58 {strides = array<i32>} : memref<288x286xf32, #tpu.memory_space<vmem>>, vector<32x286xf32>,
    %c0_44 = arith.constant 0 : index
    %c1_45 = arith.constant 1 : index
    %60 = vector.load %arg6[%c0_44, %c1_45] : memref<32x324xf32, #tpu.memory_space<vmem>>, vector<32x286xf32>
    %c32_46 = arith.constant 32 : index
    %c0_47 = arith.constant 0 : index
    %61 = vector.load %arg7[%c32_46, %c0_47] : memref<288x286xf32, #tpu.memory_space<vmem>>, vector<32x286xf32>
    tpu.vector_store %arg7[%c32_46, %c0_47], %60 {strides = array<i32>} : memref<288x286xf32, #tpu.memory_space<vmem>>, vector<32x286xf32>,
    %c0_48 = arith.constant 0 : index
    %c2_49 = arith.constant 2 : index
    %62 = vector.load %arg6[%c0_48, %c2_49] : memref<32x324xf32, #tpu.memory_space<vmem>>, vector<32x286xf32>
    %c64_50 = arith.constant 64 : index
    %c0_51 = arith.constant 0 : index
    %63 = vector.load %arg7[%c64_50, %c0_51] : memref<288x286xf32, #tpu.memory_space<vmem>>, vector<32x286xf32>
    tpu.vector_store %arg7[%c64_50, %c0_51], %62 {strides = array<i32>} : memref<288x286xf32, #tpu.memory_space<vmem>>, vector<32x286xf32>,
    %c0_52 = arith.constant 0 : index
    %c18_53 = arith.constant 18 : index
    %64 = vector.load %arg6[%c0_52, %c18_53] : memref<32x324xf32, #tpu.memory_space<vmem>>, vector<32x286xf32>
    %c96_54 = arith.constant 96 : index
    %c0_55 = arith.constant 0 : index
    %65 = vector.load %arg7[%c96_54, %c0_55] : memref<288x286xf32, #tpu.memory_space<vmem>>, vector<32x286xf32>
    tpu.vector_store %arg7[%c96_54, %c0_55], %64 {strides = array<i32>} : memref<288x286xf32, #tpu.memory_space<vmem>>, vector<32x286xf32>,
    %c0_56 = arith.constant 0 : index
    %c19_57 = arith.constant 19 : index
    %66 = vector.load %arg6[%c0_56, %c19_57] : memref<32x324xf32, #tpu.memory_space<vmem>>, vector<32x286xf32>
    %c128_58 = arith.constant 128 : index
    %c0_59 = arith.constant 0 : index
    %67 = vector.load %arg7[%c128_58, %c0_59] : memref<288x286xf32, #tpu.memory_space<vmem>>, vector<32x286xf32>
    tpu.vector_store %arg7[%c128_58, %c0_59], %66 {strides = array<i32>} : memref<288x286xf32, #tpu.memory_space<vmem>>, vector<32x286xf32>,
    %c0_60 = arith.constant 0 : index
    %c20_61 = arith.constant 20 : index
    %68 = vector.load %arg6[%c0_60, %c20_61] : memref<32x324xf32, #tpu.memory_space<vmem>>, vector<32x286xf32>
    %c160_62 = arith.constant 160 : index
    %c0_63 = arith.constant 0 : index
    %69 = vector.load %arg7[%c160_62, %c0_63] : memref<288x286xf32, #tpu.memory_space<vmem>>, vector<32x286xf32>
    tpu.vector_store %arg7[%c160_62, %c0_63], %68 {strides = array<i32>} : memref<288x286xf32, #tpu.memory_space<vmem>>, vector<32x286xf32>,
    %c0_64 = arith.constant 0 : index
    %c36_65 = arith.constant 36 : index
    %70 = vector.load %arg6[%c0_64, %c36_65] : memref<32x324xf32, #tpu.memory_space<vmem>>, vector<32x286xf32>
    %c192_66 = arith.constant 192 : index
    %c0_67 = arith.constant 0 : index
    %71 = vector.load %arg7[%c192_66, %c0_67] : memref<288x286xf32, #tpu.memory_space<vmem>>, vector<32x286xf32>
    tpu.vector_store %arg7[%c192_66, %c0_67], %70 {strides = array<i32>} : memref<288x286xf32, #tpu.memory_space<vmem>>, vector<32x286xf32>,
    %c0_68 = arith.constant 0 : index
    %c37_69 = arith.constant 37 : index
    %72 = vector.load %arg6[%c0_68, %c37_69] : memref<32x324xf32, #tpu.memory_space<vmem>>, vector<32x286xf32>
    %c224_70 = arith.constant 224 : index
    %c0_71 = arith.constant 0 : index
    %73 = vector.load %arg7[%c224_70, %c0_71] : memref<288x286xf32, #tpu.memory_space<vmem>>, vector<32x286xf32>
    tpu.vector_store %arg7[%c224_70, %c0_71], %72 {strides = array<i32>} : memref<288x286xf32, #tpu.memory_space<vmem>>, vector<32x286xf32>,
    %c0_72 = arith.constant 0 : index
    %c38_73 = arith.constant 38 : index
    %74 = vector.load %arg6[%c0_72, %c38_73] : memref<32x324xf32, #tpu.memory_space<vmem>>, vector<32x286xf32>
    %c256_74 = arith.constant 256 : index
    %c0_75 = arith.constant 0 : index
    %75 = vector.load %arg7[%c256_74, %c0_75] : memref<288x286xf32, #tpu.memory_space<vmem>>, vector<32x286xf32>
    tpu.vector_store %arg7[%c256_74, %c0_75], %74 {strides = array<i32>} : memref<288x286xf32, #tpu.memory_space<vmem>>, vector<32x286xf32>,
    %c1_76 = arith.constant 1 : index
    %c0_77 = arith.constant 0 : index
    %c0_78 = arith.constant 0 : index
    %76 = vector.load %arg2[%c1_76, %c0_77, %c0_78] : memref<6x32x288xf32, #tpu.memory_space<vmem>>, vector<1x32x288xf32>
    %77 = vector.shape_cast %76 : vector<1x32x288xf32> to vector<32x288xf32>
    %c0_79 = arith.constant 0 : index
    %c0_80 = arith.constant 0 : index
    %78 = vector.load %arg7[%c0_79, %c0_80] : memref<288x286xf32, #tpu.memory_space<vmem>>, vector<288x286xf32>
    %cst_81 = arith.constant dense<0.000000e+00> : vector<32x286xf32>
    %79 = tpu.matmul %77, %78, %cst_81 {dimension_numbers = #tpu.dot_dimension_numbers<[1], [0], [0], [1], [0, 0, 1, 1], [], []>} : vector<32x288xf32>, vector<288x286xf32>, vector<32x286xf32> -> vector<32x286xf32>
    %c1_82 = arith.constant 1 : index
    %c0_83 = arith.constant 0 : index
    %c0_84 = arith.constant 0 : index
    %80 = vector.load %arg3[%c1_82, %c0_83, %c0_84] : memref<6x32x1xf32, #tpu.memory_space<vmem>>, vector<1x32x1xf32>
    %81 = vector.shape_cast %80 : vector<1x32x1xf32> to vector<32x1xf32>
    %82 = vector.broadcast %81 : vector<32x1xf32> to vector<32x286xf32>
    %83 = arith.addf %79, %82 : vector<32x286xf32>
    %c1_85 = arith.constant 1 : index
    %84 = memref.load %arg4[%c1_85] : memref<6xf32, #tpu.memory_space<smem>>
    %cst_86 = arith.constant 0.000000e+00 : f32
    %85 = vector.broadcast %cst_86 : f32 to vector<32x286xf32>
    %86 = arith.cmpf ogt, %83, %85 : vector<32x286xf32>
    %87 = vector.broadcast %84 : f32 to vector<32x286xf32>
    %88 = arith.mulf %87, %83 : vector<32x286xf32>
    %89 = arith.select %86, %83, %88 : vector<32x286xi1>, vector<32x286xf32>
    %cst_87 = arith.constant 0.000000e+00 : f32
    %90 = vector.broadcast %cst_87 : f32 to vector<32x286xf32>
    %91 = arith.select %22, %89, %90 : vector<32x286xi1>, vector<32x286xf32>
    %92 = arith.addf %91, %3 : vector<32x286xf32>
    %c0_88 = arith.constant 0 : index
    %c19_89 = arith.constant 19 : index
    %93 = vector.load %arg6[%c0_88, %c19_89] : memref<32x324xf32, #tpu.memory_space<vmem>>, vector<32x286xf32>
    tpu.vector_store %arg6[%c0_88, %c19_89], %92 {strides = array<i32>} : memref<32x324xf32, #tpu.memory_space<vmem>>, vector<32x286xf32>,
    %c0_90 = arith.constant 0 : index
    %c0_91 = arith.constant 0 : index
    %94 = vector.load %arg6[%c0_90, %c0_91] : memref<32x324xf32, #tpu.memory_space<vmem>>, vector<32x286xf32>
    %c0_92 = arith.constant 0 : index
    %c0_93 = arith.constant 0 : index
    %95 = vector.load %arg7[%c0_92, %c0_93] : memref<288x286xf32, #tpu.memory_space<vmem>>, vector<32x286xf32>
    tpu.vector_store %arg7[%c0_92, %c0_93], %94 {strides = array<i32>} : memref<288x286xf32, #tpu.memory_space<vmem>>, vector<32x286xf32>,
    %c0_94 = arith.constant 0 : index
    %c1_95 = arith.constant 1 : index
    %96 = vector.load %arg6[%c0_94, %c1_95] : memref<32x324xf32, #tpu.memory_space<vmem>>, vector<32x286xf32>
    %c32_96 = arith.constant 32 : index
    %c0_97 = arith.constant 0 : index
    %97 = vector.load %arg7[%c32_96, %c0_97] : memref<288x286xf32, #tpu.memory_space<vmem>>, vector<32x286xf32>
    tpu.vector_store %arg7[%c32_96, %c0_97], %96 {strides = array<i32>} : memref<288x286xf32, #tpu.memory_space<vmem>>, vector<32x286xf32>,
    %c0_98 = arith.constant 0 : index
    %c2_99 = arith.constant 2 : index
    %98 = vector.load %arg6[%c0_98, %c2_99] : memref<32x324xf32, #tpu.memory_space<vmem>>, vector<32x286xf32>
    %c64_100 = arith.constant 64 : index
    %c0_101 = arith.constant 0 : index
    %99 = vector.load %arg7[%c64_100, %c0_101] : memref<288x286xf32, #tpu.memory_space<vmem>>, vector<32x286xf32>
    tpu.vector_store %arg7[%c64_100, %c0_101], %98 {strides = array<i32>} : memref<288x286xf32, #tpu.memory_space<vmem>>, vector<32x286xf32>,
    %c0_102 = arith.constant 0 : index
    %c18_103 = arith.constant 18 : index
    %100 = vector.load %arg6[%c0_102, %c18_103] : memref<32x324xf32, #tpu.memory_space<vmem>>, vector<32x286xf32>
    %c96_104 = arith.constant 96 : index
    %c0_105 = arith.constant 0 : index
    %101 = vector.load %arg7[%c96_104, %c0_105] : memref<288x286xf32, #tpu.memory_space<vmem>>, vector<32x286xf32>
    tpu.vector_store %arg7[%c96_104, %c0_105], %100 {strides = array<i32>} : memref<288x286xf32, #tpu.memory_space<vmem>>, vector<32x286xf32>,
    %c0_106 = arith.constant 0 : index
    %c19_107 = arith.constant 19 : index
    %102 = vector.load %arg6[%c0_106, %c19_107] : memref<32x324xf32, #tpu.memory_space<vmem>>, vector<32x286xf32>
    %c128_108 = arith.constant 128 : index
    %c0_109 = arith.constant 0 : index
    %103 = vector.load %arg7[%c128_108, %c0_109] : memref<288x286xf32, #tpu.memory_space<vmem>>, vector<32x286xf32>
    tpu.vector_store %arg7[%c128_108, %c0_109], %102 {strides = array<i32>} : memref<288x286xf32, #tpu.memory_space<vmem>>, vector<32x286xf32>,
    %c0_110 = arith.constant 0 : index
    %c20_111 = arith.constant 20 : index
    %104 = vector.load %arg6[%c0_110, %c20_111] : memref<32x324xf32, #tpu.memory_space<vmem>>, vector<32x286xf32>
    %c160_112 = arith.constant 160 : index
    %c0_113 = arith.constant 0 : index
    %105 = vector.load %arg7[%c160_112, %c0_113] : memref<288x286xf32, #tpu.memory_space<vmem>>, vector<32x286xf32>
    tpu.vector_store %arg7[%c160_112, %c0_113], %104 {strides = array<i32>} : memref<288x286xf32, #tpu.memory_space<vmem>>, vector<32x286xf32>,
    %c0_114 = arith.constant 0 : index
    %c36_115 = arith.constant 36 : index
    %106 = vector.load %arg6[%c0_114, %c36_115] : memref<32x324xf32, #tpu.memory_space<vmem>>, vector<32x286xf32>
    %c192_116 = arith.constant 192 : index
    %c0_117 = arith.constant 0 : index
    %107 = vector.load %arg7[%c192_116, %c0_117] : memref<288x286xf32, #tpu.memory_space<vmem>>, vector<32x286xf32>
    tpu.vector_store %arg7[%c192_116, %c0_117], %106 {strides = array<i32>} : memref<288x286xf32, #tpu.memory_space<vmem>>, vector<32x286xf32>,
    %c0_118 = arith.constant 0 : index
    %c37_119 = arith.constant 37 : index
    %108 = vector.load %arg6[%c0_118, %c37_119] : memref<32x324xf32, #tpu.memory_space<vmem>>, vector<32x286xf32>
    %c224_120 = arith.constant 224 : index
    %c0_121 = arith.constant 0 : index
    %109 = vector.load %arg7[%c224_120, %c0_121] : memref<288x286xf32, #tpu.memory_space<vmem>>, vector<32x286xf32>
    tpu.vector_store %arg7[%c224_120, %c0_121], %108 {strides = array<i32>} : memref<288x286xf32, #tpu.memory_space<vmem>>, vector<32x286xf32>,
    %c0_122 = arith.constant 0 : index
    %c38_123 = arith.constant 38 : index
    %110 = vector.load %arg6[%c0_122, %c38_123] : memref<32x324xf32, #tpu.memory_space<vmem>>, vector<32x286xf32>
    %c256_124 = arith.constant 256 : index
    %c0_125 = arith.constant 0 : index
    %111 = vector.load %arg7[%c256_124, %c0_125] : memref<288x286xf32, #tpu.memory_space<vmem>>, vector<32x286xf32>
    tpu.vector_store %arg7[%c256_124, %c0_125], %110 {strides = array<i32>} : memref<288x286xf32, #tpu.memory_space<vmem>>, vector<32x286xf32>,
    %c2_126 = arith.constant 2 : index
    %c0_127 = arith.constant 0 : index
    %c0_128 = arith.constant 0 : index
    %112 = vector.load %arg2[%c2_126, %c0_127, %c0_128] : memref<6x32x288xf32, #tpu.memory_space<vmem>>, vector<1x32x288xf32>
    %113 = vector.shape_cast %112 : vector<1x32x288xf32> to vector<32x288xf32>
    %c0_129 = arith.constant 0 : index
    %c0_130 = arith.constant 0 : index
    %114 = vector.load %arg7[%c0_129, %c0_130] : memref<288x286xf32, #tpu.memory_space<vmem>>, vector<288x286xf32>
    %cst_131 = arith.constant dense<0.000000e+00> : vector<32x286xf32>
    %115 = tpu.matmul %113, %114, %cst_131 {dimension_numbers = #tpu.dot_dimension_numbers<[1], [0], [0], [1], [0, 0, 1, 1], [], []>} : vector<32x288xf32>, vector<288x286xf32>, vector<32x286xf32> -> vector<32x286xf32>
    %c2_132 = arith.constant 2 : index
    %c0_133 = arith.constant 0 : index
    %c0_134 = arith.constant 0 : index
    %116 = vector.load %arg3[%c2_132, %c0_133, %c0_134] : memref<6x32x1xf32, #tpu.memory_space<vmem>>, vector<1x32x1xf32>
    %117 = vector.shape_cast %116 : vector<1x32x1xf32> to vector<32x1xf32>
    %118 = vector.broadcast %117 : vector<32x1xf32> to vector<32x286xf32>
    %119 = arith.addf %115, %118 : vector<32x286xf32>
    %c2_135 = arith.constant 2 : index
    %120 = memref.load %arg4[%c2_135] : memref<6xf32, #tpu.memory_space<smem>>
    %cst_136 = arith.constant 0.000000e+00 : f32
    %121 = vector.broadcast %cst_136 : f32 to vector<32x286xf32>
    %122 = arith.cmpf ogt, %119, %121 : vector<32x286xf32>
    %123 = vector.broadcast %120 : f32 to vector<32x286xf32>
    %124 = arith.mulf %123, %119 : vector<32x286xf32>
    %125 = arith.select %122, %119, %124 : vector<32x286xi1>, vector<32x286xf32>
    %cst_137 = arith.constant 0.000000e+00 : f32
    %126 = vector.broadcast %cst_137 : f32 to vector<32x286xf32>
    %127 = arith.select %22, %125, %126 : vector<32x286xi1>, vector<32x286xf32>
    %c0_138 = arith.constant 0 : index
    %c19_139 = arith.constant 19 : index
    %128 = vector.load %arg6[%c0_138, %c19_139] : memref<32x324xf32, #tpu.memory_space<vmem>>, vector<32x286xf32>
    tpu.vector_store %arg6[%c0_138, %c19_139], %127 {strides = array<i32>} : memref<32x324xf32, #tpu.memory_space<vmem>>, vector<32x286xf32>,
    %c0_140 = arith.constant 0 : index
    %c0_141 = arith.constant 0 : index
    %129 = vector.load %arg6[%c0_140, %c0_141] : memref<32x324xf32, #tpu.memory_space<vmem>>, vector<32x286xf32>
    %c0_142 = arith.constant 0 : index
    %c0_143 = arith.constant 0 : index
    %130 = vector.load %arg7[%c0_142, %c0_143] : memref<288x286xf32, #tpu.memory_space<vmem>>, vector<32x286xf32>
    tpu.vector_store %arg7[%c0_142, %c0_143], %129 {strides = array<i32>} : memref<288x286xf32, #tpu.memory_space<vmem>>, vector<32x286xf32>,
    %c0_144 = arith.constant 0 : index
    %c1_145 = arith.constant 1 : index
    %131 = vector.load %arg6[%c0_144, %c1_145] : memref<32x324xf32, #tpu.memory_space<vmem>>, vector<32x286xf32>
    %c32_146 = arith.constant 32 : index
    %c0_147 = arith.constant 0 : index
    %132 = vector.load %arg7[%c32_146, %c0_147] : memref<288x286xf32, #tpu.memory_space<vmem>>, vector<32x286xf32>
    tpu.vector_store %arg7[%c32_146, %c0_147], %131 {strides = array<i32>} : memref<288x286xf32, #tpu.memory_space<vmem>>, vector<32x286xf32>,
    %c0_148 = arith.constant 0 : index
    %c2_149 = arith.constant 2 : index
    %133 = vector.load %arg6[%c0_148, %c2_149] : memref<32x324xf32, #tpu.memory_space<vmem>>, vector<32x286xf32>
    %c64_150 = arith.constant 64 : index
    %c0_151 = arith.constant 0 : index
    %134 = vector.load %arg7[%c64_150, %c0_151] : memref<288x286xf32, #tpu.memory_space<vmem>>, vector<32x286xf32>
    tpu.vector_store %arg7[%c64_150, %c0_151], %133 {strides = array<i32>} : memref<288x286xf32, #tpu.memory_space<vmem>>, vector<32x286xf32>,
    %c0_152 = arith.constant 0 : index
    %c18_153 = arith.constant 18 : index
    %135 = vector.load %arg6[%c0_152, %c18_153] : memref<32x324xf32, #tpu.memory_space<vmem>>, vector<32x286xf32>
    %c96_154 = arith.constant 96 : index
    %c0_155 = arith.constant 0 : index
    %136 = vector.load %arg7[%c96_154, %c0_155] : memref<288x286xf32, #tpu.memory_space<vmem>>, vector<32x286xf32>
    tpu.vector_store %arg7[%c96_154, %c0_155], %135 {strides = array<i32>} : memref<288x286xf32, #tpu.memory_space<vmem>>, vector<32x286xf32>,
    %c0_156 = arith.constant 0 : index
    %c19_157 = arith.constant 19 : index
    %137 = vector.load %arg6[%c0_156, %c19_157] : memref<32x324xf32, #tpu.memory_space<vmem>>, vector<32x286xf32>
    %c128_158 = arith.constant 128 : index
    %c0_159 = arith.constant 0 : index
    %138 = vector.load %arg7[%c128_158, %c0_159] : memref<288x286xf32, #tpu.memory_space<vmem>>, vector<32x286xf32>
    tpu.vector_store %arg7[%c128_158, %c0_159], %137 {strides = array<i32>} : memref<288x286xf32, #tpu.memory_space<vmem>>, vector<32x286xf32>,
    %c0_160 = arith.constant 0 : index
    %c20_161 = arith.constant 20 : index
    %139 = vector.load %arg6[%c0_160, %c20_161] : memref<32x324xf32, #tpu.memory_space<vmem>>, vector<32x286xf32>
    %c160_162 = arith.constant 160 : index
    %c0_163 = arith.constant 0 : index
    %140 = vector.load %arg7[%c160_162, %c0_163] : memref<288x286xf32, #tpu.memory_space<vmem>>, vector<32x286xf32>
    tpu.vector_store %arg7[%c160_162, %c0_163], %139 {strides = array<i32>} : memref<288x286xf32, #tpu.memory_space<vmem>>, vector<32x286xf32>,
    %c0_164 = arith.constant 0 : index
    %c36_165 = arith.constant 36 : index
    %141 = vector.load %arg6[%c0_164, %c36_165] : memref<32x324xf32, #tpu.memory_space<vmem>>, vector<32x286xf32>
    %c192_166 = arith.constant 192 : index
    %c0_167 = arith.constant 0 : index
    %142 = vector.load %arg7[%c192_166, %c0_167] : memref<288x286xf32, #tpu.memory_space<vmem>>, vector<32x286xf32>
    tpu.vector_store %arg7[%c192_166, %c0_167], %141 {strides = array<i32>} : memref<288x286xf32, #tpu.memory_space<vmem>>, vector<32x286xf32>,
    %c0_168 = arith.constant 0 : index
    %c37_169 = arith.constant 37 : index
    %143 = vector.load %arg6[%c0_168, %c37_169] : memref<32x324xf32, #tpu.memory_space<vmem>>, vector<32x286xf32>
    %c224_170 = arith.constant 224 : index
    %c0_171 = arith.constant 0 : index
    %144 = vector.load %arg7[%c224_170, %c0_171] : memref<288x286xf32, #tpu.memory_space<vmem>>, vector<32x286xf32>
    tpu.vector_store %arg7[%c224_170, %c0_171], %143 {strides = array<i32>} : memref<288x286xf32, #tpu.memory_space<vmem>>, vector<32x286xf32>,
    %c0_172 = arith.constant 0 : index
    %c38_173 = arith.constant 38 : index
    %145 = vector.load %arg6[%c0_172, %c38_173] : memref<32x324xf32, #tpu.memory_space<vmem>>, vector<32x286xf32>
    %c256_174 = arith.constant 256 : index
    %c0_175 = arith.constant 0 : index
    %146 = vector.load %arg7[%c256_174, %c0_175] : memref<288x286xf32, #tpu.memory_space<vmem>>, vector<32x286xf32>
    tpu.vector_store %arg7[%c256_174, %c0_175], %145 {strides = array<i32>} : memref<288x286xf32, #tpu.memory_space<vmem>>, vector<32x286xf32>,
    %c3 = arith.constant 3 : index
    %c0_176 = arith.constant 0 : index
    %c0_177 = arith.constant 0 : index
    %147 = vector.load %arg2[%c3, %c0_176, %c0_177] : memref<6x32x288xf32, #tpu.memory_space<vmem>>, vector<1x32x288xf32>
    %148 = vector.shape_cast %147 : vector<1x32x288xf32> to vector<32x288xf32>
    %c0_178 = arith.constant 0 : index
    %c0_179 = arith.constant 0 : index
    %149 = vector.load %arg7[%c0_178, %c0_179] : memref<288x286xf32, #tpu.memory_space<vmem>>, vector<288x286xf32>
    %cst_180 = arith.constant dense<0.000000e+00> : vector<32x286xf32>
    %150 = tpu.matmul %148, %149, %cst_180 {dimension_numbers = #tpu.dot_dimension_numbers<[1], [0], [0], [1], [0, 0, 1, 1], [], []>} : vector<32x288xf32>, vector<288x286xf32>, vector<32x286xf32> -> vector<32x286xf32>
    %c3_181 = arith.constant 3 : index
    %c0_182 = arith.constant 0 : index
    %c0_183 = arith.constant 0 : index
    %151 = vector.load %arg3[%c3_181, %c0_182, %c0_183] : memref<6x32x1xf32, #tpu.memory_space<vmem>>, vector<1x32x1xf32>
    %152 = vector.shape_cast %151 : vector<1x32x1xf32> to vector<32x1xf32>
    %153 = vector.broadcast %152 : vector<32x1xf32> to vector<32x286xf32>
    %154 = arith.addf %150, %153 : vector<32x286xf32>
    %c3_184 = arith.constant 3 : index
    %155 = memref.load %arg4[%c3_184] : memref<6xf32, #tpu.memory_space<smem>>
    %cst_185 = arith.constant 0.000000e+00 : f32
    %156 = vector.broadcast %cst_185 : f32 to vector<32x286xf32>
    %157 = arith.cmpf ogt, %154, %156 : vector<32x286xf32>
    %158 = vector.broadcast %155 : f32 to vector<32x286xf32>
    %159 = arith.mulf %158, %154 : vector<32x286xf32>
    %160 = arith.select %157, %154, %159 : vector<32x286xi1>, vector<32x286xf32>
    %cst_186 = arith.constant 0.000000e+00 : f32
    %161 = vector.broadcast %cst_186 : f32 to vector<32x286xf32>
    %162 = arith.select %22, %160, %161 : vector<32x286xi1>, vector<32x286xf32>
    %163 = arith.addf %162, %3 : vector<32x286xf32>
    %c0_187 = arith.constant 0 : index
    %c19_188 = arith.constant 19 : index
    %164 = vector.load %arg6[%c0_187, %c19_188] : memref<32x324xf32, #tpu.memory_space<vmem>>, vector<32x286xf32>
    tpu.vector_store %arg6[%c0_187, %c19_188], %163 {strides = array<i32>} : memref<32x324xf32, #tpu.memory_space<vmem>>, vector<32x286xf32>,
    %c0_189 = arith.constant 0 : index
    %c0_190 = arith.constant 0 : index
    %165 = vector.load %arg6[%c0_189, %c0_190] : memref<32x324xf32, #tpu.memory_space<vmem>>, vector<32x286xf32>
    %c0_191 = arith.constant 0 : index
    %c0_192 = arith.constant 0 : index
    %166 = vector.load %arg7[%c0_191, %c0_192] : memref<288x286xf32, #tpu.memory_space<vmem>>, vector<32x286xf32>
    tpu.vector_store %arg7[%c0_191, %c0_192], %165 {strides = array<i32>} : memref<288x286xf32, #tpu.memory_space<vmem>>, vector<32x286xf32>,
    %c0_193 = arith.constant 0 : index
    %c1_194 = arith.constant 1 : index
    %167 = vector.load %arg6[%c0_193, %c1_194] : memref<32x324xf32, #tpu.memory_space<vmem>>, vector<32x286xf32>
    %c32_195 = arith.constant 32 : index
    %c0_196 = arith.constant 0 : index
    %168 = vector.load %arg7[%c32_195, %c0_196] : memref<288x286xf32, #tpu.memory_space<vmem>>, vector<32x286xf32>
    tpu.vector_store %arg7[%c32_195, %c0_196], %167 {strides = array<i32>} : memref<288x286xf32, #tpu.memory_space<vmem>>, vector<32x286xf32>,
    %c0_197 = arith.constant 0 : index
    %c2_198 = arith.constant 2 : index
    %169 = vector.load %arg6[%c0_197, %c2_198] : memref<32x324xf32, #tpu.memory_space<vmem>>, vector<32x286xf32>
    %c64_199 = arith.constant 64 : index
    %c0_200 = arith.constant 0 : index
    %170 = vector.load %arg7[%c64_199, %c0_200] : memref<288x286xf32, #tpu.memory_space<vmem>>, vector<32x286xf32>
    tpu.vector_store %arg7[%c64_199, %c0_200], %169 {strides = array<i32>} : memref<288x286xf32, #tpu.memory_space<vmem>>, vector<32x286xf32>,
    %c0_201 = arith.constant 0 : index
    %c18_202 = arith.constant 18 : index
    %171 = vector.load %arg6[%c0_201, %c18_202] : memref<32x324xf32, #tpu.memory_space<vmem>>, vector<32x286xf32>
    %c96_203 = arith.constant 96 : index
    %c0_204 = arith.constant 0 : index
    %172 = vector.load %arg7[%c96_203, %c0_204] : memref<288x286xf32, #tpu.memory_space<vmem>>, vector<32x286xf32>
    tpu.vector_store %arg7[%c96_203, %c0_204], %171 {strides = array<i32>} : memref<288x286xf32, #tpu.memory_space<vmem>>, vector<32x286xf32>,
    %c0_205 = arith.constant 0 : index
    %c19_206 = arith.constant 19 : index
    %173 = vector.load %arg6[%c0_205, %c19_206] : memref<32x324xf32, #tpu.memory_space<vmem>>, vector<32x286xf32>
    %c128_207 = arith.constant 128 : index
    %c0_208 = arith.constant 0 : index
    %174 = vector.load %arg7[%c128_207, %c0_208] : memref<288x286xf32, #tpu.memory_space<vmem>>, vector<32x286xf32>
    tpu.vector_store %arg7[%c128_207, %c0_208], %173 {strides = array<i32>} : memref<288x286xf32, #tpu.memory_space<vmem>>, vector<32x286xf32>,
    %c0_209 = arith.constant 0 : index
    %c20_210 = arith.constant 20 : index
    %175 = vector.load %arg6[%c0_209, %c20_210] : memref<32x324xf32, #tpu.memory_space<vmem>>, vector<32x286xf32>
    %c160_211 = arith.constant 160 : index
    %c0_212 = arith.constant 0 : index
    %176 = vector.load %arg7[%c160_211, %c0_212] : memref<288x286xf32, #tpu.memory_space<vmem>>, vector<32x286xf32>
    tpu.vector_store %arg7[%c160_211, %c0_212], %175 {strides = array<i32>} : memref<288x286xf32, #tpu.memory_space<vmem>>, vector<32x286xf32>,
    %c0_213 = arith.constant 0 : index
    %c36_214 = arith.constant 36 : index
    %177 = vector.load %arg6[%c0_213, %c36_214] : memref<32x324xf32, #tpu.memory_space<vmem>>, vector<32x286xf32>
    %c192_215 = arith.constant 192 : index
    %c0_216 = arith.constant 0 : index
    %178 = vector.load %arg7[%c192_215, %c0_216] : memref<288x286xf32, #tpu.memory_space<vmem>>, vector<32x286xf32>
    tpu.vector_store %arg7[%c192_215, %c0_216], %177 {strides = array<i32>} : memref<288x286xf32, #tpu.memory_space<vmem>>, vector<32x286xf32>,
    %c0_217 = arith.constant 0 : index
    %c37_218 = arith.constant 37 : index
    %179 = vector.load %arg6[%c0_217, %c37_218] : memref<32x324xf32, #tpu.memory_space<vmem>>, vector<32x286xf32>
    %c224_219 = arith.constant 224 : index
    %c0_220 = arith.constant 0 : index
    %180 = vector.load %arg7[%c224_219, %c0_220] : memref<288x286xf32, #tpu.memory_space<vmem>>, vector<32x286xf32>
    tpu.vector_store %arg7[%c224_219, %c0_220], %179 {strides = array<i32>} : memref<288x286xf32, #tpu.memory_space<vmem>>, vector<32x286xf32>,
    %c0_221 = arith.constant 0 : index
    %c38_222 = arith.constant 38 : index
    %181 = vector.load %arg6[%c0_221, %c38_222] : memref<32x324xf32, #tpu.memory_space<vmem>>, vector<32x286xf32>
    %c256_223 = arith.constant 256 : index
    %c0_224 = arith.constant 0 : index
    %182 = vector.load %arg7[%c256_223, %c0_224] : memref<288x286xf32, #tpu.memory_space<vmem>>, vector<32x286xf32>
    tpu.vector_store %arg7[%c256_223, %c0_224], %181 {strides = array<i32>} : memref<288x286xf32, #tpu.memory_space<vmem>>, vector<32x286xf32>,
    %c4 = arith.constant 4 : index
    %c0_225 = arith.constant 0 : index
    %c0_226 = arith.constant 0 : index
    %183 = vector.load %arg2[%c4, %c0_225, %c0_226] : memref<6x32x288xf32, #tpu.memory_space<vmem>>, vector<1x32x288xf32>
    %184 = vector.shape_cast %183 : vector<1x32x288xf32> to vector<32x288xf32>
    %c0_227 = arith.constant 0 : index
    %c0_228 = arith.constant 0 : index
    %185 = vector.load %arg7[%c0_227, %c0_228] : memref<288x286xf32, #tpu.memory_space<vmem>>, vector<288x286xf32>
    %cst_229 = arith.constant dense<0.000000e+00> : vector<32x286xf32>
    %186 = tpu.matmul %184, %185, %cst_229 {dimension_numbers = #tpu.dot_dimension_numbers<[1], [0], [0], [1], [0, 0, 1, 1], [], []>} : vector<32x288xf32>, vector<288x286xf32>, vector<32x286xf32> -> vector<32x286xf32>
    %c4_230 = arith.constant 4 : index
    %c0_231 = arith.constant 0 : index
    %c0_232 = arith.constant 0 : index
    %187 = vector.load %arg3[%c4_230, %c0_231, %c0_232] : memref<6x32x1xf32, #tpu.memory_space<vmem>>, vector<1x32x1xf32>
    %188 = vector.shape_cast %187 : vector<1x32x1xf32> to vector<32x1xf32>
    %189 = vector.broadcast %188 : vector<32x1xf32> to vector<32x286xf32>
    %190 = arith.addf %186, %189 : vector<32x286xf32>
    %c4_233 = arith.constant 4 : index
    %191 = memref.load %arg4[%c4_233] : memref<6xf32, #tpu.memory_space<smem>>
    %cst_234 = arith.constant 0.000000e+00 : f32
    %192 = vector.broadcast %cst_234 : f32 to vector<32x286xf32>
    %193 = arith.cmpf ogt, %190, %192 : vector<32x286xf32>
    %194 = vector.broadcast %191 : f32 to vector<32x286xf32>
    %195 = arith.mulf %194, %190 : vector<32x286xf32>
    %196 = arith.select %193, %190, %195 : vector<32x286xi1>, vector<32x286xf32>
    %cst_235 = arith.constant 0.000000e+00 : f32
    %197 = vector.broadcast %cst_235 : f32 to vector<32x286xf32>
    %198 = arith.select %22, %196, %197 : vector<32x286xi1>, vector<32x286xf32>
    %c0_236 = arith.constant 0 : index
    %c19_237 = arith.constant 19 : index
    %199 = vector.load %arg6[%c0_236, %c19_237] : memref<32x324xf32, #tpu.memory_space<vmem>>, vector<32x286xf32>
    tpu.vector_store %arg6[%c0_236, %c19_237], %198 {strides = array<i32>} : memref<32x324xf32, #tpu.memory_space<vmem>>, vector<32x286xf32>,
    %c0_238 = arith.constant 0 : index
    %c0_239 = arith.constant 0 : index
    %200 = vector.load %arg6[%c0_238, %c0_239] : memref<32x324xf32, #tpu.memory_space<vmem>>, vector<32x286xf32>
    %c0_240 = arith.constant 0 : index
    %c0_241 = arith.constant 0 : index
    %201 = vector.load %arg7[%c0_240, %c0_241] : memref<288x286xf32, #tpu.memory_space<vmem>>, vector<32x286xf32>
    tpu.vector_store %arg7[%c0_240, %c0_241], %200 {strides = array<i32>} : memref<288x286xf32, #tpu.memory_space<vmem>>, vector<32x286xf32>,
    %c0_242 = arith.constant 0 : index
    %c1_243 = arith.constant 1 : index
    %202 = vector.load %arg6[%c0_242, %c1_243] : memref<32x324xf32, #tpu.memory_space<vmem>>, vector<32x286xf32>
    %c32_244 = arith.constant 32 : index
    %c0_245 = arith.constant 0 : index
    %203 = vector.load %arg7[%c32_244, %c0_245] : memref<288x286xf32, #tpu.memory_space<vmem>>, vector<32x286xf32>
    tpu.vector_store %arg7[%c32_244, %c0_245], %202 {strides = array<i32>} : memref<288x286xf32, #tpu.memory_space<vmem>>, vector<32x286xf32>,
    %c0_246 = arith.constant 0 : index
    %c2_247 = arith.constant 2 : index
    %204 = vector.load %arg6[%c0_246, %c2_247] : memref<32x324xf32, #tpu.memory_space<vmem>>, vector<32x286xf32>
    %c64_248 = arith.constant 64 : index
    %c0_249 = arith.constant 0 : index
    %205 = vector.load %arg7[%c64_248, %c0_249] : memref<288x286xf32, #tpu.memory_space<vmem>>, vector<32x286xf32>
    tpu.vector_store %arg7[%c64_248, %c0_249], %204 {strides = array<i32>} : memref<288x286xf32, #tpu.memory_space<vmem>>, vector<32x286xf32>,
    %c0_250 = arith.constant 0 : index
    %c18_251 = arith.constant 18 : index
    %206 = vector.load %arg6[%c0_250, %c18_251] : memref<32x324xf32, #tpu.memory_space<vmem>>, vector<32x286xf32>
    %c96_252 = arith.constant 96 : index
    %c0_253 = arith.constant 0 : index
    %207 = vector.load %arg7[%c96_252, %c0_253] : memref<288x286xf32, #tpu.memory_space<vmem>>, vector<32x286xf32>
    tpu.vector_store %arg7[%c96_252, %c0_253], %206 {strides = array<i32>} : memref<288x286xf32, #tpu.memory_space<vmem>>, vector<32x286xf32>,
    %c0_254 = arith.constant 0 : index
    %c19_255 = arith.constant 19 : index
    %208 = vector.load %arg6[%c0_254, %c19_255] : memref<32x324xf32, #tpu.memory_space<vmem>>, vector<32x286xf32>
    %c128_256 = arith.constant 128 : index
    %c0_257 = arith.constant 0 : index
    %209 = vector.load %arg7[%c128_256, %c0_257] : memref<288x286xf32, #tpu.memory_space<vmem>>, vector<32x286xf32>
    tpu.vector_store %arg7[%c128_256, %c0_257], %208 {strides = array<i32>} : memref<288x286xf32, #tpu.memory_space<vmem>>, vector<32x286xf32>,
    %c0_258 = arith.constant 0 : index
    %c20_259 = arith.constant 20 : index
    %210 = vector.load %arg6[%c0_258, %c20_259] : memref<32x324xf32, #tpu.memory_space<vmem>>, vector<32x286xf32>
    %c160_260 = arith.constant 160 : index
    %c0_261 = arith.constant 0 : index
    %211 = vector.load %arg7[%c160_260, %c0_261] : memref<288x286xf32, #tpu.memory_space<vmem>>, vector<32x286xf32>
    tpu.vector_store %arg7[%c160_260, %c0_261], %210 {strides = array<i32>} : memref<288x286xf32, #tpu.memory_space<vmem>>, vector<32x286xf32>,
    %c0_262 = arith.constant 0 : index
    %c36_263 = arith.constant 36 : index
    %212 = vector.load %arg6[%c0_262, %c36_263] : memref<32x324xf32, #tpu.memory_space<vmem>>, vector<32x286xf32>
    %c192_264 = arith.constant 192 : index
    %c0_265 = arith.constant 0 : index
    %213 = vector.load %arg7[%c192_264, %c0_265] : memref<288x286xf32, #tpu.memory_space<vmem>>, vector<32x286xf32>
    tpu.vector_store %arg7[%c192_264, %c0_265], %212 {strides = array<i32>} : memref<288x286xf32, #tpu.memory_space<vmem>>, vector<32x286xf32>,
    %c0_266 = arith.constant 0 : index
    %c37_267 = arith.constant 37 : index
    %214 = vector.load %arg6[%c0_266, %c37_267] : memref<32x324xf32, #tpu.memory_space<vmem>>, vector<32x286xf32>
    %c224_268 = arith.constant 224 : index
    %c0_269 = arith.constant 0 : index
    %215 = vector.load %arg7[%c224_268, %c0_269] : memref<288x286xf32, #tpu.memory_space<vmem>>, vector<32x286xf32>
    tpu.vector_store %arg7[%c224_268, %c0_269], %214 {strides = array<i32>} : memref<288x286xf32, #tpu.memory_space<vmem>>, vector<32x286xf32>,
    %c0_270 = arith.constant 0 : index
    %c38_271 = arith.constant 38 : index
    %216 = vector.load %arg6[%c0_270, %c38_271] : memref<32x324xf32, #tpu.memory_space<vmem>>, vector<32x286xf32>
    %c256_272 = arith.constant 256 : index
    %c0_273 = arith.constant 0 : index
    %217 = vector.load %arg7[%c256_272, %c0_273] : memref<288x286xf32, #tpu.memory_space<vmem>>, vector<32x286xf32>
    tpu.vector_store %arg7[%c256_272, %c0_273], %216 {strides = array<i32>} : memref<288x286xf32, #tpu.memory_space<vmem>>, vector<32x286xf32>,
    %c5 = arith.constant 5 : index
    %c0_274 = arith.constant 0 : index
    %c0_275 = arith.constant 0 : index
    %218 = vector.load %arg2[%c5, %c0_274, %c0_275] : memref<6x32x288xf32, #tpu.memory_space<vmem>>, vector<1x32x288xf32>
    %219 = vector.shape_cast %218 : vector<1x32x288xf32> to vector<32x288xf32>
    %c0_276 = arith.constant 0 : index
    %c0_277 = arith.constant 0 : index
    %220 = vector.load %arg7[%c0_276, %c0_277] : memref<288x286xf32, #tpu.memory_space<vmem>>, vector<288x286xf32>
    %cst_278 = arith.constant dense<0.000000e+00> : vector<32x286xf32>
    %221 = tpu.matmul %219, %220, %cst_278 {dimension_numbers = #tpu.dot_dimension_numbers<[1], [0], [0], [1], [0, 0, 1, 1], [], []>} : vector<32x288xf32>, vector<288x286xf32>, vector<32x286xf32> -> vector<32x286xf32>
    %c5_279 = arith.constant 5 : index
    %c0_280 = arith.constant 0 : index
    %c0_281 = arith.constant 0 : index
    %222 = vector.load %arg3[%c5_279, %c0_280, %c0_281] : memref<6x32x1xf32, #tpu.memory_space<vmem>>, vector<1x32x1xf32>
    %223 = vector.shape_cast %222 : vector<1x32x1xf32> to vector<32x1xf32>
    %224 = vector.broadcast %223 : vector<32x1xf32> to vector<32x286xf32>
    %225 = arith.addf %221, %224 : vector<32x286xf32>
    %c5_282 = arith.constant 5 : index
    %226 = memref.load %arg4[%c5_282] : memref<6xf32, #tpu.memory_space<smem>>
    %cst_283 = arith.constant 0.000000e+00 : f32
    %227 = vector.broadcast %cst_283 : f32 to vector<32x286xf32>
    %228 = arith.cmpf ogt, %225, %227 : vector<32x286xf32>
    %229 = vector.broadcast %226 : f32 to vector<32x286xf32>
    %230 = arith.mulf %229, %225 : vector<32x286xf32>
    %231 = arith.select %228, %225, %230 : vector<32x286xi1>, vector<32x286xf32>
    %cst_284 = arith.constant 0.000000e+00 : f32
    %232 = vector.broadcast %cst_284 : f32 to vector<32x286xf32>
    %233 = arith.select %22, %231, %232 : vector<32x286xi1>, vector<32x286xf32>
    %234 = arith.addf %233, %3 : vector<32x286xf32>
    %c0_285 = arith.constant 0 : index
    %c19_286 = arith.constant 19 : index
    %235 = vector.load %arg6[%c0_285, %c19_286] : memref<32x324xf32, #tpu.memory_space<vmem>>, vector<32x286xf32>
    tpu.vector_store %arg6[%c0_285, %c19_286], %234 {strides = array<i32>} : memref<32x324xf32, #tpu.memory_space<vmem>>, vector<32x286xf32>,
    %c0_287 = arith.constant 0 : index
    %c0_288 = arith.constant 0 : index
    %236 = vector.load %arg6[%c0_287, %c0_288] : memref<32x324xf32, #tpu.memory_space<vmem>>, vector<32x324xf32>
    %c0_289 = arith.constant 0 : index
    %c0_290 = arith.constant 0 : index
    %c0_291 = arith.constant 0 : index
    %237 = vector.load %arg5[%c0_289, %c0_290, %c0_291] : memref<1x32x324xf32, #tpu.memory_space<vmem>>, vector<1x32x324xf32>
    %238 = vector.shape_cast %237 : vector<1x32x324xf32> to vector<32x324xf32>
    %239 = vector.shape_cast %236 : vector<32x324xf32> to vector<1x32x324xf32>
    tpu.vector_store %arg5[%c0_289, %c0_290, %c0_291], %239 {strides = array<i32>} : memref<1x32x324xf32, #tpu.memory_space<vmem>>, vector<1x32x324xf32>,
    return
  }
  func.func @transform_0(%arg0: i32) -> (i32, i32, i32) {
    %c0_i32 = arith.constant 0 : i32
    %c0_i32_0 = arith.constant 0 : i32
    %c0_i32_1 = arith.constant 0 : i32
    return %arg0, %c0_i32, %c0_i32_0 : i32, i32, i32
  }
  func.func @transform_1(%arg0: i32) -> (i32, i32, i32) {
    %c0_i32 = arith.constant 0 : i32
    %c0_i32_0 = arith.constant 0 : i32
    %c0_i32_1 = arith.constant 0 : i32
    %c0_i32_2 = arith.constant 0 : i32
    return %c0_i32, %c0_i32_0, %c0_i32_1 : i32, i32, i32
  }
  func.func @transform_2(%arg0: i32) -> (i32, i32, i32) {
    %c0_i32 = arith.constant 0 : i32
    %c0_i32_0 = arith.constant 0 : i32
    %c0_i32_1 = arith.constant 0 : i32
    %c0_i32_2 = arith.constant 0 : i32
    return %c0_i32, %c0_i32_0, %c0_i32_1 : i32, i32, i32
  }
  func.func @transform_3(%arg0: i32) -> i32 {
    %c0_i32 = arith.constant 0 : i32
    %c0_i32_0 = arith.constant 0 : i32
    return %c0_i32 : i32
  }
  func.func @transform_4(%arg0: i32) -> (i32, i32, i32) {
    %c0_i32 = arith.constant 0 : i32
    %c0_i32_0 = arith.constant 0 : i32
    %c0_i32_1 = arith.constant 0 : i32
    return %arg0, %c0_i32, %c0_i32_0 : i32, i32, i32
  }
}

</mosaic_0001>

<bundles_post_ra>
// kernel: advanced_residual_block.1
= control target key start
LH: loop header
LB: loop body
LE: loop exit
PB: predicated region body
PF: predicated region fallthrough
CT: control target
= control target key end

     0   :  { %9 = vsyncpa [#allocation5], 0  ;;  %s8030_s15 = smov 0   ;;  %s12947_s0 = inlined_call_operand.vmem [shape: f32[2,32,324], index: 0, kind: input, shape index: {}]   ;;  %s12948_s1 = inlined_call_operand.vmem [shape: f32[6,32,288], index: 1, kind: input, shape index: {}]   ;;  %s12949_s2 = inlined_call_operand.vmem [shape: f32[6,32,1], index: 2, kind: input, shape index: {}]   ;;  %s12950_s3 = inlined_call_operand.vmem [shape: f32[6], index: 3, kind: input, shape index: {}]   ;;  %s12951_s4 = inlined_call_operand.vmem [shape: f32[2,32,324], index: 4, kind: output, shape index: {}]  }
   0x1 LB: > { %s7746_s16 = sadd.s32 4294967295, %s7992_s15   ;;  %p7748_p0 = scmp.ge.s32.totalorder %s7992_s15, 1  ;;  %s7992_s15 = sphi %s8030_s15, %s15_s15  }
   0x2   : > { %p135_p1 = scmp.lt.s32.totalorder %s7992_s15, 3  ;;  %s153_s19 = sshll.u32 %s12950_s3, 4  ;;  %s154_s19 = int_to_ptr.vmem [resolvable:$true] %s153_s19 }
   0x3   : > { %p7939_p3 = scmp.eq.s32.totalorder %s7746_s16, 0  ;;  %s7994_s20 = smov [#allocation4]  }
   0x4   : > { %p136_p2 = pnand %p7748_p0, %p135_p1 }
   0x6   : > { %p7935_p4 = pneg %p136_p2  ;;  %174 = sbr.rel (%p136_p2) target bundleno = 3767 (0xeb7), region = 36 }
   0x8   : > { %p7936_p5 = pnand %p7939_p3, %p7935_p4 }
   0xa   : > { %7938 = dma.vmem_to_smem (!%p7936_p5), %s154_s19, 16, %s7994_s20, [#allocation5]  }
   0xb   : > { %7987 = dma.done.wait (%p7939_p3), [#allocation5], 16  }
   0xc   : > { %7989 = vsyncadd (%p7939_p3), [#allocation5], 4294967280 }
   0xd   : > { %181 = sfence }
   0xe   : > { %p202_p6 = scmp.lt.s32.totalorder %s7746_s16, 1  ;;  %vm12952_vm0 = vcmask 556032   ;;  %s7995_s25 = smov 127   ;;  %vm360_vm1 = vcmask 244736   ;;  %vm581_vm2 = vcmask 900096   ;;  %vm13029_vm3 = vcmask 1031168  }
   0xf   : > { %s7996_s26 = smov 126   ;;  %s7997_s27 = smov 110   ;;  %vm12970_vm4 = vcmask 1039360   ;;  %vm12969_vm5 = vcmask 736256   ;;  %vm905_vm6 = vcmask 744448   ;;  %vm12953_vm7 = vcmask 261120  }
  0x10   : > { %s13335_s16 = smov (!%p202_p6, %s7746_s16), 1  ;;  %s7998_s28 = smov 109   ;;  %vm824_vm8 = vcmask 752640   ;;  %vm12971_vm9 = vcmask 883712   ;;  %vm662_vm10 = vcmask 891904  }
  0x11   : > { %s7930_s21 = smul.u32 96, %s13335_s16  ;;  %s7999_s29 = smov 108  }
  0x12   : > { %s8000_s30 = smov 90   ;;  %s8001_s5 = smov 91  }
  0x13   : > { %s8049_s24 = scalar_lea.vmem %s12947_s0, %s7930_s21  ;;  %s8002_s6 = smov 92  }
  0x14   : > { %v8052_v0 = vld [vmem:[%s8049_s24 + $0x20] sm:$0xff]  ;;  %v8055_v1 = vld [vmem:[%s8049_s24 + $0x10] sm:$0xff]  ;;  %v8067_v3 = vld [vmem:[%s8049_s24 + $0x28] sm:$0xff]  ;;  %s1437_s11 = sld [smem:[#allocation4]]  ;;  %s8004_s12 = smov 19  }
  0x15   : > { %v8058_v2 = vld [vmem:[%s8049_s24] sm:$0xff]  ;;  %403 = vrot.lane.b32.xlu2 %v8052_v0, %s7995_s25  ;;  %227 = vst.msk [vmem:[#allocation2 + $0x10] sm:$0xff] %vm12952_vm0, %v8055_v1  ;;  %v8076_v5 = vld [vmem:[%s8049_s24 + $0x18] sm:$0xff]  ;;  %v8085_v7 = vld [vmem:[%s8049_s24 + $0x30] sm:$0xff]  ;;  %s7795_s19 = sld [smem:[#allocation4 + $0x1]]  ;;  %s12911_s9 = scalar_lea.vmem %s12951_s4, %s7930_s21 }
  0x16   : > { %395 = vrot.lane.b32.xlu0 %v8058_v2, %s7995_s25  ;;  %224 = vst [vmem:[#allocation2] sm:$0xff] %v8058_v2  ;;  %v8071_v4 = vld [vmem:[%s8049_s24 + $0x40] sm:$0xff]  ;;  %v8080_v6 = vld [vmem:[%s8049_s24 + $0x58] sm:$0xff]  ;;  %v8088_v8 = vld [vmem:[%s8049_s24 + $0x8] sm:$0xff]  ;;  %s7824_s7 = sld [smem:[#allocation4 + $0x2]] }
  0x17   : > { %230 = vst.msk [vmem:[#allocation2 + $0x28] sm:$0xff] %vm12952_vm0, %v8067_v3  ;;  %v8094_v9 = vld [vmem:[%s8049_s24 + $0x48] sm:$0xff]  ;;  %v8116_v13 = vld [vmem:[%s8049_s24 + $0x38] sm:$0xff]  ;;  %v8127_v15 = vld [vmem:[%s8049_s24 + $0x50] sm:$0xff]  ;;  %s7853_s13 = sld [smem:[#allocation4 + $0x3]] }
  0x18   : > { %228 = vst [vmem:[#allocation2 + $0x18] sm:$0xff] %v8076_v5  ;;  %s7882_s20 = sld [smem:[#allocation4 + $0x4]] }
  0x19   : > { %233 = vst.msk [vmem:[#allocation2 + $0x40] sm:$0xff] %vm12952_vm0, %v8071_v4 }
  0x1a   : > { %231 = vst [vmem:[#allocation2 + $0x30] sm:$0xff] %v8085_v7 }
  0x1b   : > { %236 = vst.msk [vmem:[#allocation2 + $0x58] sm:$0xff] %vm12952_vm0, %v8080_v6 }
  0x1c   : > { %v8096_v10 = vld [vmem:[#allocation2 + $0x10] sm:$0xff]  ;;  %234 = vst [vmem:[#allocation2 + $0x48] sm:$0xff] %v8094_v9 }
  0x1d   : > { %399 = vrot.lane.b32.xlu1 %v8096_v10, %s7995_s25 }
  0x1e   : > { %397 = vrot.lane.b32.xlu0 %v8088_v8, %s7995_s25  ;;  %v8103_v11 = vld [vmem:[#allocation2 + $0x28] sm:$0xff] }
  0x1f   : > { %405 = vrot.lane.b32.xlu2 %v8103_v11, %s7995_s25 }
  0x20   : > { %v8107_v12 = vld [vmem:[#allocation2 + $0x40] sm:$0xff] }
  0x22   : > { %v8118_v14 = vld [vmem:[#allocation2 + $0x58] sm:$0xff] }
  0x25   : > { %401 = vrot.lane.b32.xlu1 %v8076_v5, %s7995_s25 }
  0x26   : > { %407 = vrot.lane.b32.xlu0 %v8085_v7, %s7995_s25 }
  0x27   : > { %411 = vrot.lane.b32.xlu2 %v8107_v12, %s7995_s25 }
  0x2d   : > { %409 = vrot.lane.b32.xlu1 %v8116_v13, %s7995_s25 }
  0x2e   : > { %413 = vrot.lane.b32.xlu0 %v8094_v9, %s7995_s25 }
  0x2f   : > { %417 = vrot.lane.b32.xlu2 %v8118_v14, %s7995_s25 }
  0x35   : > { %415 = vrot.lane.b32.xlu1 %v8127_v15, %s7995_s25 }
  0x36   : > { %476 = vrot.lane.b32.xlu0 %v8058_v2, %s7996_s26 }
  0x37   : > { %480 = vrot.lane.b32.xlu2 %v8096_v10, %s7996_s26 }
  0x3d   : > { %478 = vrot.lane.b32.xlu1 %v8088_v8, %s7996_s26 }
  0x3e   : > { %482 = vrot.lane.b32.xlu0 %v8076_v5, %s7996_s26 }
  0x3f   : > { %486 = vrot.lane.b32.xlu2 %v8103_v11, %s7996_s26 }
  0x45   : > { %484 = vrot.lane.b32.xlu1 %v8052_v0, %s7996_s26 }
  0x46   : > { %488 = vrot.lane.b32.xlu0 %v8085_v7, %s7996_s26 }
  0x47   : > { %492 = vrot.lane.b32.xlu2 %v8107_v12, %s7996_s26 }
  0x4d   : > { %490 = vrot.lane.b32.xlu1 %v8116_v13, %s7996_s26 }
  0x4e   : > { %494 = vrot.lane.b32.xlu0 %v8094_v9, %s7996_s26 }
  0x4f   : > { %498 = vrot.lane.b32.xlu2 %v8118_v14, %s7996_s26 }
  0x55   : > { %496 = vrot.lane.b32.xlu1 %v8127_v15, %s7996_s26 }
  0x56   : > { %557 = vrot.lane.b32.xlu0 %v8058_v2, %s7997_s27 }
  0x57   : > { %561 = vrot.lane.b32.xlu2 %v8096_v10, %s7997_s27 }
  0x5d   : > { %559 = vrot.lane.b32.xlu1 %v8088_v8, %s7997_s27 }
  0x5e   : > { %563 = vrot.lane.b32.xlu0 %v8076_v5, %s7997_s27 }
  0x5f   : > { %567 = vrot.lane.b32.xlu2 %v8103_v11, %s7997_s27 }
  0x65   : > { %565 = vrot.lane.b32.xlu1 %v8052_v0, %s7997_s27 }
  0x66   : > { %569 = vrot.lane.b32.xlu0 %v8085_v7, %s7997_s27 }
  0x67   : > { %573 = vrot.lane.b32.xlu2 %v8107_v12, %s7997_s27 }
  0x6d   : > { %571 = vrot.lane.b32.xlu1 %v8116_v13, %s7997_s27 }
  0x6e   : > { %575 = vrot.lane.b32.xlu0 %v8094_v9, %s7997_s27 }
  0x6f   : > { %579 = vrot.lane.b32.xlu2 %v8118_v14, %s7997_s27  ;;  %v8177_v16 = vpop.permute.xlu2 %403 }
  0x75   : > { %577 = vrot.lane.b32.xlu1 %v8127_v15, %s7997_s27 }
  0x76   : > { %638 = vrot.lane.b32.xlu0 %v8058_v2, %s7998_s28 }
  0x77   : > { %642 = vrot.lane.b32.xlu2 %v8096_v10, %s7998_s28 }
  0x79   : > { %v8185_v17 = vpop.permute.xlu2 %405 }
  0x7a   : > { %445 = vst.msk [vmem:[#allocation3 + $0x88] sm:$0xff] %vm360_vm1, %v8185_v17 }
  0x7d   : > { %640 = vrot.lane.b32.xlu1 %v8088_v8, %s7998_s28 }
  0x7e   : > { %644 = vrot.lane.b32.xlu0 %v8076_v5, %s7998_s28 }
  0x7f   : > { %648 = vrot.lane.b32.xlu2 %v8103_v11, %s7998_s28 }
  0x81   : > { %v8195_v18 = vpop.permute.xlu2 %411 }
  0x82   : > { %448 = vst.msk [vmem:[#allocation3 + $0xa0] sm:$0xff] %vm360_vm1, %v8195_v18 }
  0x85   : > { %646 = vrot.lane.b32.xlu1 %v8052_v0, %s7998_s28 }
  0x86   : > { %650 = vrot.lane.b32.xlu0 %v8085_v7, %s7998_s28 }
  0x87   : > { %654 = vrot.lane.b32.xlu2 %v8107_v12, %s7998_s28 }
  0x88   : > { %v8205_v19 = vpop.permute.xlu0 %395 }
  0x89   : > { %v8207_v20 = vpop.permute.xlu2 %417 }
  0x8a   : > { %451 = vst.msk [vmem:[#allocation3 + $0xb8] sm:$0xff] %vm360_vm1, %v8207_v20 }
  0x8d   : > { %652 = vrot.lane.b32.xlu1 %v8116_v13, %s7998_s28 }
  0x8e   : > { %656 = vrot.lane.b32.xlu0 %v8094_v9, %s7998_s28 }
  0x8f   : > { %v8215_v21 = vpop.permute.xlu1 %399  ;;  %660 = vrot.lane.b32.xlu2 %v8118_v14, %s7998_s28 }
  0x90   : > { %v8219_v22 = vpop.permute.xlu0 %397  ;;  %442 = vst.msk [vmem:[#allocation3 + $0x70] sm:$0xff] %vm360_vm1, %v8215_v21 }
  0x91   : > { %v8223_v23 = vpop.permute.xlu2 %480 }
  0x92   : > { %523 = vst.msk [vmem:[#allocation3 + $0xd0] sm:$0xff] %vm360_vm1, %v8223_v23 }
  0x95   : > { %658 = vrot.lane.b32.xlu1 %v8127_v15, %s7998_s28 }
  0x96   : > { %719 = vrot.lane.b32.xlu0 %v8058_v2, %s7999_s29 }
  0x97   : > { %v8231_v24 = vpop.permute.xlu1 %401  ;;  %723 = vrot.lane.b32.xlu2 %v8096_v10, %s7999_s29 }
  0x98   : > { %v8235_v25 = vpop.permute.xlu0 %407 }
  0x99   : > { %v8237_v26 = vpop.permute.xlu2 %486 }
  0x9a   : > { %526 = vst.msk [vmem:[#allocation3 + $0xe8] sm:$0xff] %vm360_vm1, %v8237_v26 }
  0x9d   : > { %721 = vrot.lane.b32.xlu1 %v8088_v8, %s7999_s29 }
  0x9e   : > { %725 = vrot.lane.b32.xlu0 %v8076_v5, %s7999_s29 }
  0x9f   : > { %v8245_v27 = vpop.permute.xlu1 %409  ;;  %729 = vrot.lane.b32.xlu2 %v8103_v11, %s7999_s29 }
  0xa0   : > { %v8249_v28 = vpop.permute.xlu0 %413 }
  0xa1   : > { %v8251_v29 = vpop.permute.xlu2 %492 }
  0xa2   : > { %529 = vst.msk [vmem:[#allocation3 + $0x100] sm:$0xff] %vm360_vm1, %v8251_v29 }
  0xa5   : > { %727 = vrot.lane.b32.xlu1 %v8052_v0, %s7999_s29 }
  0xa6   : > { %731 = vrot.lane.b32.xlu0 %v8085_v7, %s7999_s29 }
  0xa7   : > { %v8259_v30 = vpop.permute.xlu1 %415  ;;  %980 = vrot.lane.b32.xlu2 %v8094_v9, %s8000_s30 }
  0xa8   : > { %v8263_v31 = vpop.permute.xlu0 %476 }
  0xa9   : > { %v8265_v32 = vpop.permute.xlu2 %498 }
  0xaa   : > { %532 = vst.msk [vmem:[#allocation3 + $0x118] sm:$0xff] %vm360_vm1, %v8265_v32 }
  0xad   : > { %733 = vrot.lane.b32.xlu1 %v8116_v13, %s7999_s29 }
  0xae   : > { %982 = vrot.lane.b32.xlu0 %v8127_v15, %s8000_s30 }
  0xaf   : > { %v8273_v33 = vpop.permute.xlu1 %478  ;;  %976 = vrot.lane.b32.xlu2 %v8116_v13, %s8000_s30 }
  0xb0   : > { %v8277_v34 = vpop.permute.xlu0 %482 }
  0xb1   : > { %v8279_v35 = vpop.permute.xlu2 %561 }
  0xb2   : > { %604 = vst.msk [vmem:[#allocation3 + $0x130] sm:$0xff] %vm360_vm1, %v8279_v35 }
  0xb5   : > { %974 = vrot.lane.b32.xlu1 %v8085_v7, %s8000_s30 }
  0xb6   : > { %968 = vrot.lane.b32.xlu0 %v8076_v5, %s8000_s30 }
  0xb7   : > { %v8287_v36 = vpop.permute.xlu1 %484  ;;  %962 = vrot.lane.b32.xlu2 %v8058_v2, %s8000_s30 }
  0xb8   : > { %v8291_v37 = vpop.permute.xlu0 %488 }
  0xb9   : > { %v568_v38 = vpop.permute.xlu2 %567 }
  0xba   : > { %607 = vst.msk [vmem:[#allocation3 + $0x148] sm:$0xff] %vm360_vm1, %v568_v38 }
  0xbd   : > { %970 = vrot.lane.b32.xlu1 %v8052_v0, %s8000_s30 }
  0xbe   : > { %964 = vrot.lane.b32.xlu0 %v8088_v8, %s8000_s30 }
  0xbf   : > { %v8298_v39 = vpop.permute.xlu1 %490  ;;  %903 = vrot.lane.b32.xlu2 %v8118_v14, %s8001_s5 }
  0xc0   : > { %v8302_v40 = vpop.permute.xlu0 %494 }
  0xc1   : > { %v574_v41 = vpop.permute.xlu2 %573 }
  0xc2   : > { %610 = vst.msk [vmem:[#allocation3 + $0x160] sm:$0xff] %vm360_vm1, %v574_v41 }
  0xc5   : > { %901 = vrot.lane.b32.xlu1 %v8127_v15, %s8001_s5 }
  0xc6   : > { %895 = vrot.lane.b32.xlu0 %v8116_v13, %s8001_s5 }
  0xc7   : > { %v497_v42 = vpop.permute.xlu1 %496  ;;  %889 = vrot.lane.b32.xlu2 %v8052_v0, %s8001_s5 }
  0xc8   : > { %v558_v43 = vpop.permute.xlu0 %557 }
  0xc9   : > { %v580_v44 = vpop.permute.xlu2 %579 }
  0xca   : > { %613 = vst.msk [vmem:[#allocation3 + $0x178] sm:$0xff] %vm360_vm1, %v580_v44 }
  0xcd   : > { %897 = vrot.lane.b32.xlu1 %v8107_v12, %s8001_s5 }
  0xce   : > { %891 = vrot.lane.b32.xlu0 %v8103_v11, %s8001_s5 }
  0xcf   : > { %v560_v45 = vpop.permute.xlu1 %559  ;;  %883 = vrot.lane.b32.xlu2 %v8088_v8, %s8001_s5 }
  0xd0   : > { %v564_v46 = vpop.permute.xlu0 %563  ;;  %v583_v63 = vsel %vm581_vm2, %v560_v45, %v8279_v35  ;;  %v507_v35 = vsel %vm13029_vm3, %v8302_v40, %v497_v42  ;;  %v503_v40 = vsel %vm13029_vm3, %v8277_v34, %v8287_v36 }
  0xd1   : > { %v8318_v47 = vpop.permute.xlu2 %642 }
  0xd2   : > { %685 = vst.msk [vmem:[#allocation3 + $0x190] sm:$0xff] %vm360_vm1, %v8318_v47 }
  0xd5   : > { %899 = vrot.lane.b32.xlu1 %v8094_v9, %s8001_s5 }
  0xd6   : > { %885 = vrot.lane.b32.xlu0 %v8096_v10, %s8001_s5 }
  0xd7   : > { %v566_v48 = vpop.permute.xlu1 %565  ;;  %820 = vrot.lane.b32.xlu2 %v8127_v15, %s8002_s6 }
  0xd8   : > { %v570_v49 = vpop.permute.xlu0 %569  ;;  %v585_v61 = vsel %vm581_vm2, %v566_v48, %v568_v38  ;;  %v584_v62 = vsel %vm581_vm2, %v564_v46, %v566_v48  ;;  %v508_v46 = vsel %vm13029_vm3, %v497_v42, %v8265_v32  ;;  %v504_v32 = vsel %vm13029_vm3, %v8287_v36, %v8237_v26 }
  0xd9   : > { %v8328_v50 = vpop.permute.xlu2 %648  ;;  %v501_v26 = vsel %vm13029_vm3, %v8263_v31, %v8273_v33  ;;  %v426_v36 = vsel %vm12970_vm4, %v8249_v28, %v8259_v30  ;;  %v425_v31 = vsel %vm12970_vm4, %v8245_v27, %v8195_v18  ;;  %v423_v28 = vsel %vm12970_vm4, %v8177_v16, %v8185_v17 }
  0xda   : > { %688 = vst.msk [vmem:[#allocation3 + $0x1a8] sm:$0xff] %vm360_vm1, %v8328_v50  ;;  %v421_v18 = vsel %vm12970_vm4, %v8219_v22, %v8215_v21  ;;  %v420_v17 = vsel %vm12970_vm4, %v8205_v19, %v8219_v22 }
  0xdd   : > { %893 = vrot.lane.b32.xlu1 %v8085_v7, %s8001_s5 }
  0xde   : > { %822 = vrot.lane.b32.xlu0 %v8118_v14, %s8002_s6 }
  0xdf   : > { %v572_v51 = vpop.permute.xlu1 %571  ;;  %814 = vrot.lane.b32.xlu2 %v8116_v13, %s8002_s6 }
  0xe0   : > { %v576_v52 = vpop.permute.xlu0 %575  ;;  %v587_v59 = vsel %vm581_vm2, %v572_v51, %v574_v41  ;;  %v586_v60 = vsel %vm581_vm2, %v570_v49, %v572_v51  ;;  %v582_v41 = vsel %vm581_vm2, %v558_v43, %v560_v45  ;;  %v506_v43 = vsel %vm13029_vm3, %v8298_v39, %v8251_v29 }
  0xe1   : > { %v8338_v53 = vpop.permute.xlu2 %654  ;;  %v505_v45 = vsel %vm13029_vm3, %v8291_v37, %v8298_v39  ;;  %v502_v29 = vsel %vm13029_vm3, %v8273_v33, %v8223_v23  ;;  %v427_v23 = vsel %vm12970_vm4, %v8259_v30, %v8207_v20  ;;  %v424_v20 = vsel %vm12970_vm4, %v8235_v25, %v8245_v27 }
  0xe2   : > { %691 = vst.msk [vmem:[#allocation3 + $0x1c0] sm:$0xff] %vm360_vm1, %v8338_v53  ;;  %v422_v30 = vsel %vm12970_vm4, %v8231_v24, %v8177_v16 }
  0xe5   : > { %887 = vrot.lane.b32.xlu1 %v8076_v5, %s8001_s5 }
  0xe6   : > { %816 = vrot.lane.b32.xlu0 %v8107_v12, %s8002_s6 }
  0xe7   : > { %v578_v54 = vpop.permute.xlu1 %577  ;;  %808 = vrot.lane.b32.xlu2 %v8052_v0, %s8002_s6 }
  0xe8   : > { %v8348_v55 = vpop.permute.xlu0 %638  ;;  %v589_v56 = vsel %vm581_vm2, %v578_v54, %v580_v44  ;;  %v588_v57 = vsel %vm581_vm2, %v576_v52, %v578_v54 }
  0xe9   : > { %v8352_v58 = vpop.permute.xlu2 %660  ;;  %1176 = vmatpush.msra.mxu0 %v588_v57  ;;  %1263 = vmatpush.msra.mxu3 %v589_v56 }
  0xea   : > { %694 = vst.msk [vmem:[#allocation3 + $0x1d8] sm:$0xff] %vm360_vm1, %v8352_v58 }
  0xeb   : > { %1177 = vmatpush.msra.mxu0 %v586_v60  ;;  %1264 = vmatpush.msra.mxu3 %v587_v59 }
  0xed   : > { %881 = vrot.lane.b32.xlu1 %v8058_v2, %s8001_s5  ;;  %1265 = vmatpush.msra.mxu3 %v585_v61 }
  0xee   : > { %810 = vrot.lane.b32.xlu0 %v8103_v11, %s8002_s6  ;;  %1178 = vmatpush.msra.mxu0 %v584_v62 }
  0xef   : > { %v8367_v44 = vpop.permute.xlu1 %640  ;;  %802 = vrot.lane.b32.xlu2 %v8088_v8, %s8002_s6  ;;  %1266 = vmatpush.msra.mxu3 %v583_v63 }
  0xf0   : > { %v8371_v38 = vpop.permute.xlu0 %644  ;;  %1179 = vmatpush.msra.mxu0 %v582_v41 }
  0xf1   : > { %v8377_v48 = vpop.permute.xlu2 %723  ;;  %1267 = vmatpush.msra.mxu3 %v508_v46 }
  0xf2   : > { %766 = vst.msk [vmem:[#allocation3 + $0x1f0] sm:$0xff] %vm360_vm1, %v8377_v48  ;;  %1180 = vmatpush.msra.mxu0 %v507_v35  ;;  %v355_v35 = vld [vmem:[#allocation2 + $0x48] sm:$0xff] }
  0xf3   : > { %1268 = vmatpush.msra.mxu3 %v506_v43  ;;  %v352_v43 = vld [vmem:[#allocation2 + $0x30] sm:$0xff] }
  0xf4   : > { %1181 = vmatpush.msra.mxu0 %v505_v45 }
  0xf5   : > { %818 = vrot.lane.b32.xlu1 %v8094_v9, %s8002_s6  ;;  %1269 = vmatpush.msra.mxu3 %v504_v32 }
  0xf6   : > { %804 = vrot.lane.b32.xlu0 %v8096_v10, %s8002_s6  ;;  %1182 = vmatpush.msra.mxu0 %v503_v40  ;;  %v349_v40 = vld [vmem:[#allocation2 + $0x18] sm:$0xff] }
  0xf7   : > { %v8403_v37 = vpop.permute.xlu1 %646  ;;  %739 = vrot.lane.b32.xlu2 %v8127_v15, %s7999_s29  ;;  %1270 = vmatpush.msra.mxu3 %v502_v29 }
  0xf8   : > { %v8407_v34 = vpop.permute.xlu0 %650  ;;  %1183 = vmatpush.msra.mxu0 %v501_v26 }
  0xf9   : > { %v8415_v39 = vpop.permute.xlu2 %729  ;;  %1271 = vmatpush.msra.mxu3 %v427_v23 }
  0xfa   : > { %769 = vst.msk [vmem:[#allocation3 + $0x208] sm:$0xff] %vm360_vm1, %v8415_v39  ;;  %1184 = vmatpush.msra.mxu0 %v426_v36  ;;  %v346_v36 = vld [vmem:[#allocation2] sm:$0xff] }
  0xfb   : > { %1272 = vmatpush.msra.mxu3 %v425_v31  ;;  %v8515_v31 = vld [vmem:[%s12948_s1 + $0x10] sm:$0xff] }
  0xfc   : > { %1185 = vmatpush.msra.mxu0 %v424_v20 }
  0xfd   : > { %812 = vrot.lane.b32.xlu1 %v8085_v7, %s8002_s6  ;;  %1273 = vmatpush.msra.mxu3 %v423_v28 }
  0xfe   : > { %741 = vrot.lane.b32.xlu0 %v8118_v14, %s7999_s29  ;;  %1186 = vmatpush.msra.mxu0 %v422_v30 }
  0xff   : > { %v8441_v25 = vpop.permute.xlu1 %652  ;;  %735 = vrot.lane.b32.xlu2 %v8107_v12, %s7999_s29  ;;  %1274 = vmatpush.msra.mxu3 %v421_v18 }
 0x100   : > { %v8445_v16 = vpop.permute.xlu0 %656  ;;  %1187 = vmatpush.msra.mxu0 %v420_v17 }
 0x101   : > { %v981_v24 = vpop.permute.xlu2 %980  ;;  %1275 = vmatpush.msra.mxu3 %v8127_v15 }
 0x102   : > { %1188 = vmatpush.msra.mxu0 %v355_v35 }
 0x103   : > { %1276 = vmatpush.msra.mxu3 %v8116_v13 }
 0x104   : > { %1189 = vmatpush.msra.mxu0 %v352_v43 }
 0x105   : > { %806 = vrot.lane.b32.xlu1 %v8076_v5, %s8002_s6  ;;  %1277 = vmatpush.msra.mxu3 %v8052_v0 }
 0x106   : > { %800 = vrot.lane.b32.xlu0 %v8058_v2, %s8002_s6  ;;  %1190 = vmatpush.msra.mxu0 %v349_v40 }
 0x107   : > { %v8454_v19 = vpop.permute.xlu1 %658  ;;  %984 = vrot.lane.b32.xlu2 %v8118_v14, %s8000_s30  ;;  %1278 = vmatpush.msra.mxu3 %v8088_v8 }
 0x108   : > { %v8458_v21 = vpop.permute.xlu0 %719  ;;  %1191 = vmatpush.msra.mxu0 %v346_v36 }
 0x109   : > { %v8461_v15 = vpop.permute.xlu2 %976 }
 0x10d   : > { %737 = vrot.lane.b32.xlu1 %v8094_v9, %s7999_s29 }
 0x10e   : > { %978 = vrot.lane.b32.xlu0 %v8107_v12, %s8000_s30 }
 0x10f   : > { %v8467_v0 = vpop.permute.xlu1 %721  ;;  %966 = vrot.lane.b32.xlu2 %v8096_v10, %s8000_s30 }
 0x110   : > { %v8471_v13 = vpop.permute.xlu0 %725 }
 0x111   : > { %v963_v14 = vpop.permute.xlu2 %962 }
 0x115   : > { %972 = vrot.lane.b32.xlu1 %v8103_v11, %s8000_s30 }
 0x117   : > { %v8475_v8 = vpop.permute.xlu1 %727 }
 0x118   : > { %v8477_v22 = vpop.permute.xlu0 %731 }
 0x119   : > { %v904_v27 = vpop.permute.xlu2 %903 }
 0x11a   : > { %937 = vst.msk [vmem:[#allocation3 + $0x2f8] sm:$0xff] %vm360_vm1, %v904_v27 }
 0x11f   : > { %v8480_v12 = vpop.permute.xlu1 %733 }
 0x120   : > { %v8482_v33 = vpop.permute.xlu0 %982 }
 0x121   : > { %v993_v10 = vsel %vm12969_vm5, %v981_v24, %v8482_v33  ;;  %v8486_v42 = vpop.permute.xlu2 %889  ;;  %v1126_v51 = vld [vmem:[#allocation3 + $0x2f8] sm:$0xff] }
 0x122   : > { %1246 = vmatpush.msra.mxu2 %v993_v10  ;;  %1379 = vmatpush.msrb.mxu3 %v1126_v51  ;;  %v8535_v10 = vld [vmem:[%s12948_s1] sm:$0xff] }
 0x123   : > { %1192 = vmatmul.f32.vlgmr.msra.gmra.mxu0 %v8535_v10  ;;  %1279 = vmatmul.f32.vlgmr.msra.gmra.mxu3 %v8535_v10 }
 0x127   : > { %v975_v49 = vpop.permute.xlu1 %974 }
 0x128   : > { %v969_v11 = vpop.permute.xlu0 %968  ;;  %v991_v52 = vsel %vm12969_vm5, %v975_v49, %v8461_v15 }
 0x129   : > { %v8490_v54 = vpop.permute.xlu2 %883  ;;  %1247 = vmatpush.msra.mxu2 %v991_v52 }
 0x12f   : > { %v8492_v56 = vpop.permute.xlu1 %970 }
 0x130   : > { %v8494_v57 = vpop.permute.xlu0 %964  ;;  %v989_v59 = vsel %vm12969_vm5, %v969_v11, %v8492_v56 }
 0x131   : > { %v987_v60 = vsel %vm12969_vm5, %v963_v14, %v8494_v57  ;;  %v8500_v61 = vpop.permute.xlu2 %820  ;;  %1248 = vmatpush.msra.mxu2 %v989_v59 }
 0x133   : > { %1249 = vmatpush.msra.mxu2 %v987_v60 }
 0x134   : > { %7755 = vmatmul.msk.f32.vlgmr.msra.gmra.mxu2 %vm12953_vm7, %v8515_v31 }
 0x137   : > { %v902_v62 = vpop.permute.xlu1 %901 }
 0x138   : > { %v896_v63 = vpop.permute.xlu0 %895  ;;  %v913_v41 = vsel %vm905_vm6, %v902_v62, %v904_v27  ;;  %v8528_v27 = vld [vmem:[%s12948_s1 + $0x28] sm:$0xff] }
 0x139   : > { %v8503_v46 = vpop.permute.xlu2 %814  ;;  %1292 = vmatpush.msrb.mxu2 %v913_v41 }
 0x13c   : > { %7756 = vmatmul.msk.f32.gmra.mxu2 %vm12953_vm7, %v8528_v27 }
 0x13f   : > { %v898_v45 = vpop.permute.xlu1 %897 }
 0x140   : > { %v892_v32 = vpop.permute.xlu0 %891  ;;  %934 = vst.msk [vmem:[#allocation3 + $0x2e0] sm:$0xff] %vm360_vm1, %v898_v45  ;;  %v911_v29 = vsel %vm905_vm6, %v896_v63, %v898_v45 }
 0x141   : > { %v909_v26 = vsel %vm905_vm6, %v8486_v42, %v892_v32  ;;  %v8509_v23 = vpop.permute.xlu2 %808  ;;  %931 = vst.msk [vmem:[#allocation3 + $0x2c8] sm:$0xff] %vm360_vm1, %v892_v32  ;;  %1293 = vmatpush.msrb.mxu2 %v911_v29  ;;  %v8567_v29 = vld [vmem:[%s12948_s1 + $0x58] sm:$0xff] }
 0x143   : > { %1294 = vmatpush.msrb.mxu2 %v909_v26 }
 0x147   : > { %v900_v20 = vpop.permute.xlu1 %899  ;;  %v1123_v28 = vld [vmem:[#allocation3 + $0x2e0] sm:$0xff] }
 0x148   : > { %v886_v30 = vpop.permute.xlu0 %885  ;;  %v912_v18 = vsel %vm905_vm6, %v900_v20, %v902_v62  ;;  %1380 = vmatpush.msrb.mxu3 %v1123_v28  ;;  %v1120_v24 = vld [vmem:[#allocation3 + $0x2c8] sm:$0xff]  ;;  %v8548_v62 = vld [vmem:[%s12948_s1 + $0x40] sm:$0xff] }
 0x149   : > { %v907_v17 = vsel %vm905_vm6, %v8490_v54, %v886_v30  ;;  %928 = vst.msk [vmem:[#allocation3 + $0x2b0] sm:$0xff] %vm360_vm1, %v886_v30  ;;  %v8523_v14 = vpop.permute.xlu2 %802  ;;  %1205 = vmatpush.msra.mxu1 %v912_v18  ;;  %7757 = vmatmul.msk.f32.gmra.mxu2 %vm12953_vm7, %v8548_v62 }
 0x14a   : > { %1295 = vmatpush.msrb.mxu2 %v907_v17  ;;  %1381 = vmatpush.msrb.mxu3 %v1120_v24 }
 0x14f   : > { %v894_v49 = vpop.permute.xlu1 %893 }
 0x150   : > { %v823_v11 = vpop.permute.xlu0 %822  ;;  %v1117_v51 = vld [vmem:[#allocation3 + $0x2b0] sm:$0xff]  ;;  %v910_v52 = vsel %vm905_vm6, %v894_v49, %v896_v63  ;;  %v8555_v63 = vld [vmem:[%s12948_s1 + $0x18] sm:$0xff] }
 0x151   : > { %v832_v59 = vsel %vm824_vm8, %v8500_v61, %v823_v11  ;;  %856 = vst.msk [vmem:[#allocation3 + $0x298] sm:$0xff] %vm360_vm1, %v823_v11  ;;  %1382 = vmatpush.msrb.mxu3 %v1117_v51  ;;  %v8543_v60 = vpop.permute.xlu2 %739  ;;  %1206 = vmatpush.msra.mxu1 %v910_v52 }
 0x152   : > { %1296 = vmatpush.msrb.mxu2 %v832_v59  ;;  %1195 = vmatmul.f32.gmra.mxu0 %v8555_v63  ;;  %v8003_v59 = vmov 0  }
 0x153   : > { %1282 = vmatmul.f32.gmra.mxu3 %v8555_v63  ;;  %7758 = vmatmul.msk.f32.gmra.mxu2 %vm12953_vm7, %v8567_v29 }
 0x154   : > { %7960 = vset.pattern.permute.xlu0 %v8003_v59  ;;  %7961 = vset.pattern.permute.xlu1 %v8003_v59 }
 0x155   : > { %7962 = vset.pattern.permute.xlu2 %v8003_v59 }
 0x157   : > { %v888_v41 = vpop.permute.xlu1 %887 }
 0x158   : > { %v817_v35 = vpop.permute.xlu0 %816  ;;  %v1114_v43 = vld [vmem:[#allocation3 + $0x298] sm:$0xff]  ;;  %v908_v45 = vsel %vm905_vm6, %v888_v41, %v8486_v42  ;;  %v8575_v42 = vld [vmem:[%s12948_s1 + $0x30] sm:$0xff] }
 0x159   : > { %v830_v32 = vsel %vm824_vm8, %v8503_v46, %v817_v35  ;;  %853 = vst.msk [vmem:[#allocation3 + $0x280] sm:$0xff] %vm360_vm1, %v817_v35  ;;  %1383 = vmatpush.msrb.mxu3 %v1114_v43  ;;  %v736_v40 = vpop.permute.xlu2 %735  ;;  %1207 = vmatpush.msra.mxu1 %v908_v45 }
 0x15a   : > { %1297 = vmatpush.msrb.mxu2 %v830_v32  ;;  %772 = vst.msk [vmem:[#allocation3 + $0x220] sm:$0xff] %vm360_vm1, %v736_v40  ;;  %1198 = vmatmul.f32.gmra.mxu0 %v8575_v42 }
 0x15b   : > { %1285 = vmatmul.f32.gmra.mxu3 %v8575_v42 }
 0x15f   : > { %v882_v26 = vpop.permute.xlu1 %881 }
 0x160   : > { %v1111_v36 = vld [vmem:[#allocation3 + $0x280] sm:$0xff]  ;;  %v906_v20 = vsel %vm905_vm6, %v882_v26, %v8490_v54  ;;  %v811_v28 = vpop.permute.xlu0 %810  ;;  %v8590_v54 = vld [vmem:[%s12948_s1 + $0x48] sm:$0xff]  ;;  %v749_v26 = vsel %vm12971_vm9, %v8480_v12, %v736_v40 }
 0x161   : > { %1384 = vmatpush.msrb.mxu3 %v1111_v36  ;;  %v985_v30 = vpop.permute.xlu2 %984  ;;  %v828_v18 = vsel %vm824_vm8, %v8509_v23, %v811_v28  ;;  %850 = vst.msk [vmem:[#allocation3 + $0x268] sm:$0xff] %vm360_vm1, %v811_v28  ;;  %1208 = vmatpush.msra.mxu1 %v906_v20  ;;  %v1140_v36 = vld [vmem:[%s12949_s2 + $0x8] sm:$0xff]  ;;  %v745_v20 = vsel %vm12971_vm9, %v8467_v0, %v8377_v48 }
 0x162   : > { %v994_v17 = vsel %vm12969_vm5, %v8482_v33, %v985_v30  ;;  %1018 = vst.msk [vmem:[#allocation3 + $0x358] sm:$0xff] %vm360_vm1, %v985_v30  ;;  %1298 = vmatpush.msrb.mxu2 %v828_v18  ;;  %1201 = vmatmul.f32.gmra.mxu0 %v8590_v54  ;;  %v668_v48 = vsel %vm662_vm10, %v8441_v25, %v8338_v53  ;;  %v1020_v53 = vld [vmem:[%s12948_s1 + $0x8] sm:$0xff] }
 0x163   : > { %1333 = vmatpush.msrb.mxu0 %v994_v17  ;;  %1288 = vmatmul.f32.gmra.mxu3 %v8590_v54  ;;  %v1099_v17 = vld [vmem:[#allocation3 + $0x220] sm:$0xff] }
 0x164   : > { %1150 = vperm.xlu1 %7961, %v1140_v36  }
 0x167   : > { %v819_v24 = vpop.permute.xlu1 %818 }
 0x168   : > { %v831_v49 = vsel %vm824_vm8, %v819_v24, %v8500_v61  ;;  %v805_v11 = vpop.permute.xlu0 %804  ;;  %v1108_v51 = vld [vmem:[#allocation3 + $0x268] sm:$0xff]  ;;  %v1139_v61 = vld [vmem:[%s12949_s2] sm:$0xff]  ;;  %v670_v24 = vsel %vm662_vm10, %v8454_v19, %v8352_v58  ;;  %v1093_v58 = vld [vmem:[#allocation3 + $0x1f0] sm:$0xff] }
 0x169   : > { %v8596_v33 = vpop.permute.xlu2 %966  ;;  %v826_v52 = vsel %vm824_vm8, %v8523_v14, %v805_v11  ;;  %847 = vst.msk [vmem:[#allocation3 + $0x250] sm:$0xff] %vm360_vm1, %v805_v11  ;;  %1385 = vmatpush.msrb.mxu3 %v1108_v51  ;;  %1209 = vmatpush.msra.mxu1 %v831_v49  ;;  %v666_v49 = vsel %vm662_vm10, %v8403_v37, %v8328_v50 }
 0x16a   : > { %1009 = vst.msk [vmem:[#allocation3 + $0x310] sm:$0xff] %vm360_vm1, %v8596_v33  ;;  %1299 = vmatpush.msrb.mxu2 %v826_v52  ;;  %1145 = vperm.xlu0 %7960, %v1139_v61   ;;  %v1090_v61 = vld [vmem:[#allocation3 + $0x1d8] sm:$0xff] }
 0x16f   : > { %v813_v41 = vpop.permute.xlu1 %812 }
 0x170   : > { %v829_v35 = vsel %vm824_vm8, %v813_v41, %v8503_v46  ;;  %v742_v43 = vpop.permute.xlu0 %741  ;;  %v1105_v45 = vld [vmem:[#allocation3 + $0x250] sm:$0xff]  ;;  %v747_v46 = vsel %vm12971_vm9, %v8475_v8, %v8415_v39  ;;  %v1142_v41 = vld [vmem:[%s12949_s2 + $0x18] sm:$0xff] }
 0x171   : > { %v751_v32 = vsel %vm12971_vm9, %v8543_v60, %v742_v43  ;;  %775 = vst.msk [vmem:[#allocation3 + $0x238] sm:$0xff] %vm360_vm1, %v742_v43  ;;  %1386 = vmatpush.msrb.mxu3 %v1105_v45  ;;  %1210 = vmatpush.msra.mxu1 %v829_v35  ;;  %v748_v35 = vsel %vm12971_vm9, %v8477_v22, %v8480_v12  ;;  %v357_v43 = vld [vmem:[#allocation2 + $0x58] sm:$0xff]  ;;  %v1084_v45 = vld [vmem:[#allocation3 + $0x1a8] sm:$0xff]  ;;  %v1081_v12 = vld [vmem:[#allocation3 + $0x190] sm:$0xff] }
 0x172   : > { %1300 = vmatpush.msrb.mxu2 %v751_v32  ;;  %370 = vst.msk [vmem:[#allocation3 + $0x58] sm:$0xff] %vm360_vm1, %v357_v43  ;;  %1160 = vperm.xlu1 %7961, %v1142_v41   ;;  %v354_v32 = vld [vmem:[#allocation2 + $0x40] sm:$0xff]  ;;  %v744_v22 = vsel %vm12971_vm9, %v8458_v21, %v8467_v0  ;;  %v348_v21 = vld [vmem:[#allocation2 + $0x10] sm:$0xff] }
 0x173   : > { %367 = vst.msk [vmem:[#allocation3 + $0x40] sm:$0xff] %vm360_vm1, %v354_v32 }
 0x174   : > { %1301 = vmatpush.msrb.mxu2 %v749_v26  ;;  %v351_v26 = vld [vmem:[#allocation2 + $0x28] sm:$0xff]  ;;  %361 = vst.msk [vmem:[#allocation3 + $0x10] sm:$0xff] %vm360_vm1, %v348_v21 }
 0x175   : > { %364 = vst.msk [vmem:[#allocation3 + $0x28] sm:$0xff] %vm360_vm1, %v351_v26 }
 0x176   : > { %1302 = vmatpush.msrb.mxu2 %v747_v46 }
 0x177   : > { %v807_v28 = vpop.permute.xlu1 %806 }
 0x178   : > { %v827_v40 = vsel %vm824_vm8, %v807_v28, %v8509_v23  ;;  %v801_v30 = vpop.permute.xlu0 %800  ;;  %v1102_v18 = vld [vmem:[#allocation3 + $0x238] sm:$0xff]  ;;  %1303 = vmatpush.msrb.mxu2 %v745_v20  ;;  %v1096_v23 = vld [vmem:[#allocation3 + $0x208] sm:$0xff]  ;;  %v667_v20 = vsel %vm662_vm10, %v8407_v34, %v8441_v25  ;;  %v663_v34 = vsel %vm662_vm10, %v8348_v55, %v8367_v44  ;;  %v1029_v28 = vld [vmem:[%s12948_s1 + $0x50] sm:$0xff] }
 0x179   : > { %1387 = vmatpush.msrb.mxu3 %v1102_v18  ;;  %1211 = vmatpush.msra.mxu1 %v827_v40  ;;  %v825_v39 = vsel %vm824_vm8, %v801_v30, %v8523_v14  ;;  %v664_v14 = vsel %vm662_vm10, %v8367_v44, %v8318_v47  ;;  %v1138_v47 = vld [vmem:[#allocation3 + $0x358] sm:$0xff]  ;;  %v1072_v55 = vld [vmem:[#allocation3 + $0x148] sm:$0xff]  ;;  %v1069_v44 = vld [vmem:[#allocation3 + $0x130] sm:$0xff] }
 0x17a   : > { %1304 = vmatpush.msrb.mxu2 %v670_v24  ;;  %v1026_v25 = vld [vmem:[%s12948_s1 + $0x38] sm:$0xff]  ;;  %v1063_v30 = vld [vmem:[#allocation3 + $0x100] sm:$0xff]  ;;  %v1060_v18 = vld [vmem:[#allocation3 + $0xe8] sm:$0xff] }
 0x17b   : > { %1388 = vmatpush.msrb.mxu3 %v1099_v17  ;;  %1212 = vmatpush.msra.mxu1 %v825_v39  ;;  %v1066_v40 = vld [vmem:[#allocation3 + $0x118] sm:$0xff]  ;;  %v1057_v17 = vld [vmem:[#allocation3 + $0xd0] sm:$0xff]  ;;  %v1051_v39 = vld [vmem:[#allocation3 + $0xa0] sm:$0xff] }
 0x17c   : > { %1305 = vmatpush.msrb.mxu2 %v668_v48  ;;  %v1054_v24 = vld [vmem:[#allocation3 + $0xb8] sm:$0xff]  ;;  %v1048_v48 = vld [vmem:[#allocation3 + $0x88] sm:$0xff] }
 0x17d   : > { %1389 = vmatpush.msrb.mxu3 %v1096_v23  ;;  %v1045_v23 = vld [vmem:[#allocation3 + $0x70] sm:$0xff] }
 0x17e   : > { %1306 = vmatpush.msrb.mxu2 %v666_v49  ;;  %v1042_v49 = vld [vmem:[#allocation3 + $0x58] sm:$0xff] }
 0x17f   : > { %v738_v11 = vpop.permute.xlu1 %737  ;;  %1390 = vmatpush.msrb.mxu3 %v1093_v58  ;;  %v1039_v58 = vld [vmem:[#allocation3 + $0x40] sm:$0xff] }
 0x180   : > { %v750_v51 = vsel %vm12971_vm9, %v738_v11, %v8543_v60  ;;  %v979_v52 = vpop.permute.xlu0 %978  ;;  %1307 = vmatpush.msrb.mxu2 %v664_v14  ;;  %v1087_v60 = vld [vmem:[#allocation3 + $0x1c0] sm:$0xff]  ;;  %v1036_v14 = vld [vmem:[#allocation3 + $0x28] sm:$0xff]  ;;  %v1033_v11 = vld [vmem:[#allocation3 + $0x10] sm:$0xff] }
 0x181   : > { %v992_v50 = vsel %vm12969_vm5, %v8461_v15, %v979_v52  ;;  %1015 = vst.msk [vmem:[#allocation3 + $0x340] sm:$0xff] %vm360_vm1, %v979_v52  ;;  %1391 = vmatpush.msrb.mxu3 %v1090_v61  ;;  %1213 = vmatpush.msra.mxu1 %v750_v51  ;;  %v746_v15 = vsel %vm12971_vm9, %v8471_v13, %v8475_v8  ;;  %v1023_v13 = vld [vmem:[%s12948_s1 + $0x20] sm:$0xff] }
 0x182   : > { %1308 = vmatmul.f32.vlgmr.msrb.gmra.mxu2 %v1020_v53  ;;  %1334 = vmatpush.msrb.mxu0 %v992_v50  ;;  %v669_v8 = vsel %vm662_vm10, %v8445_v16, %v8454_v19  ;;  %v988_v16 = vsel %vm12969_vm5, %v8494_v57, %v8596_v33  ;;  %v665_v19 = vsel %vm662_vm10, %v8371_v38, %v8403_v37  ;;  %v1078_v57 = vld [vmem:[#allocation3 + $0x178] sm:$0xff]  ;;  %v1129_v33 = vld [vmem:[#allocation3 + $0x310] sm:$0xff]  ;;  %v1075_v37 = vld [vmem:[#allocation3 + $0x160] sm:$0xff] }
 0x183   : > { %1392 = vmatpush.msrb.mxu3 %v1087_v60  ;;  %1214 = vmatpush.msra.mxu1 %v748_v35  ;;  %v1141_v38 = vld [vmem:[%s12949_s2 + $0x10] sm:$0xff] }
 0x184   : > { %1420 = vmatpush.msra.mxu2 %v1138_v47  ;;  %1155 = vperm.xlu2 %7962, %v1141_v38  }
 0x185   : > { %1393 = vmatpush.msrb.mxu3 %v1084_v45  ;;  %1215 = vmatpush.msra.mxu1 %v746_v15 }
 0x187   : > { %v973_v36 = vpop.permute.xlu1 %972  ;;  %1394 = vmatpush.msrb.mxu3 %v1081_v12  ;;  %1216 = vmatpush.msra.mxu1 %v744_v22 }
 0x188   : > { %v990_v46 = vsel %vm12969_vm5, %v8492_v56, %v973_v36  ;;  %1012 = vst.msk [vmem:[#allocation3 + $0x328] sm:$0xff] %vm360_vm1, %v973_v36  ;;  %1395 = vmatmul.f32.vlgmr.msrb.gmra.mxu3 %v1020_v53  ;;  %v1135_v0 = vld [vmem:[#allocation3 + $0x340] sm:$0xff] }
 0x189   : > { %1217 = vmatpush.msra.mxu1 %v669_v8  ;;  %1335 = vmatpush.msrb.mxu0 %v990_v46 }
 0x18a   : > { %1311 = vmatmul.f32.gmra.mxu2 %v1023_v13 }
 0x18b   : > { %1218 = vmatpush.msra.mxu1 %v667_v20  ;;  %1336 = vmatpush.msrb.mxu0 %v988_v16 }
 0x18c   : > { %7759 = vmatmul.msk.f32.vlgmr.msrb.gmra.mxu0 %vm12953_vm7, %v8515_v31  ;;  %1421 = vmatpush.msra.mxu2 %v1135_v0 }
 0x18d   : > { %1219 = vmatpush.msra.mxu1 %v665_v19 }
 0x18f   : > { %1220 = vmatpush.msra.mxu1 %v663_v34  ;;  %v1132_v56 = vld [vmem:[#allocation3 + $0x328] sm:$0xff] }
 0x190   : > { %1221 = vmatmul.f32.vlgmr.msra.gmra.mxu1 %v1020_v53  ;;  %1422 = vmatpush.msra.mxu2 %v1132_v56 }
 0x191   : > { %1350 = vmatpush.msrb.mxu1 %v1078_v57  ;;  %1398 = vmatmul.f32.gmra.mxu3 %v1023_v13 }
 0x192   : > { %1314 = vmatmul.f32.gmra.mxu2 %v1026_v25 }
 0x193   : > { %1351 = vmatpush.msrb.mxu1 %v1075_v37  ;;  %1423 = vmatpush.msra.mxu2 %v1129_v33 }
 0x194   : > { %7760 = vmatmul.msk.f32.gmra.mxu0 %vm12953_vm7, %v8528_v27 }
 0x195   : > { %1352 = vmatpush.msrb.mxu1 %v1072_v55 }
 0x197   : > { %1353 = vmatpush.msrb.mxu1 %v1069_v44 }
 0x198   : > { %1224 = vmatmul.f32.gmra.mxu1 %v1023_v13 }
 0x199   : > { %1354 = vmatpush.msrb.mxu1 %v1066_v40  ;;  %1401 = vmatmul.f32.gmra.mxu3 %v1026_v25 }
 0x19a   : > { %1317 = vmatmul.f32.gmra.mxu2 %v1029_v28 }
 0x19b   : > { %1355 = vmatpush.msrb.mxu1 %v1063_v30 }
 0x19c   : > { %7761 = vmatmul.msk.f32.gmra.mxu0 %vm12953_vm7, %v8548_v62 }
 0x19d   : > { %1356 = vmatpush.msrb.mxu1 %v1060_v18 }
 0x19f   : > { %1357 = vmatpush.msrb.mxu1 %v1057_v17 }
 0x1a0   : > { %1227 = vmatmul.f32.gmra.mxu1 %v1026_v25  ;;  %v8722_v35 = vpop.f32.mrf.mxu0 }
 0x1a1   : > { %1358 = vmatpush.msrb.mxu1 %v1054_v24  ;;  %1404 = vmatmul.f32.gmra.mxu3 %v1029_v28 }
 0x1a2   : > { %7763 = vmatmul.msk.f32.vlgmr.msra.gmra.mxu2 %vm12953_vm7, %v8515_v31  ;;  %v237_v31 = vlaneseq }
 0x1a3   : > { %1359 = vmatpush.msrb.mxu1 %v1051_v39 }
 0x1a4   : > { %7762 = vmatmul.msk.f32.gmra.mxu0 %vm12953_vm7, %v8567_v29 }
 0x1a5   : > { %1360 = vmatpush.msrb.mxu1 %v1048_v48 }
 0x1a6   : > { %v1280_v48 = vpop.f32.mrf.mxu3 }
 0x1a7   : > { %1361 = vmatpush.msrb.mxu1 %v1045_v23 }
 0x1a8   : > { %1230 = vmatmul.f32.gmra.mxu1 %v1029_v28 }
 0x1a9   : > { %1362 = vmatpush.msrb.mxu1 %v1042_v49 }
 0x1aa   : > { %7764 = vmatmul.msk.f32.gmra.mxu2 %vm12953_vm7, %v8528_v27  ;;  %v8715_v27 = vand.u32 127, %v237_v31 }
 0x1ab   : > { %1363 = vmatpush.msrb.mxu1 %v1039_v58 }
 0x1ac   : > { %v239_v53 = vadd.s32 128, %v8715_v27  ;;  %v244_v61 = vand.u32 65535, %v8715_v27  ;;  %v8737_v40 = vadd.s32 256, %v8715_v27 }
 0x1ad   : > { %1364 = vmatpush.msrb.mxu1 %v1036_v14 }
 0x1ae   : > { %v273_v51 = vand.u32 65535, %v239_v53  ;;  %v274_v52 = vshrl.u32 %v239_v53, 16  ;;  %v247_v60 = vmul.u32 14564, %v244_v61  ;;  %v302_v39 = vand.u32 65535, %v8737_v40 }
 0x1af   : > { %1365 = vmatpush.msrb.mxu1 %v1033_v11  ;;  %v303_v31 = vshrl.u32 %v8737_v40, 16 }
 0x1b0   : > { %1366 = vmatmul.f32.vlgmr.msrb.gmra.mxu1 %v8535_v10  ;;  %v277_v10 = vmul.u32 58254, %v273_v51  ;;  %v278_v50 = vmul.u32 14564, %v274_v52  ;;  %v279_v45 = vmul.u32 58254, %v274_v52  ;;  %v8746_v11 = vmul.u32 58254, %v302_v39 }
 0x1b2   : > { %7765 = vmatmul.msk.f32.gmra.mxu2 %vm12953_vm7, %v8548_v62  ;;  %v276_v62 = vmul.u32 14564, %v273_v51  ;;  %v282_v41 = vshll.u32 %v278_v50, 16  ;;  %v281_v21 = vshrl.u32 %v277_v10, 16  ;;  %v283_v34 = vshrl.u32 %v278_v50, 16 }
 0x1b7   : > { %v8719_v47 = vpop.f32.mrf.mxu2 }
 0x1b8   : > { %1369 = vmatmul.f32.gmra.mxu1 %v8555_v63  ;;  %v280_v63 = vshll.u32 %v277_v10, 16  ;;  %v305_v10 = vmul.u32 14564, %v302_v39 }
 0x1ba   : > { %7766 = vmatmul.msk.f32.gmra.mxu2 %vm12953_vm7, %v8567_v29  ;;  %v245_v29 = vshrl.u32 %v8715_v27, 16  ;;  %vm284_vm11 = vc.u32 %v276_v62, %v280_v63 }
 0x1bb   : > { %v285_v32 = vsel %vm284_vm11, 1, %v8003_v59 }
 0x1bc   : > { %v249_v43 = vmul.u32 14564, %v245_v29  ;;  %v287_v26 = vadd.s32 %v285_v32, %v279_v45  ;;  %v250_v13 = vmul.u32 58254, %v245_v29 }
 0x1be   : > { %v253_v22 = vshll.u32 %v249_v43, 16  ;;  %v254_v37 = vshrl.u32 %v249_v43, 16 }
 0x1bf   : > { %v8725_v36 = vpop.f32.mrf.mxu2 }
 0x1c0   : > { %1372 = vmatmul.f32.gmra.mxu1 %v8575_v42  ;;  %v248_v42 = vmul.u32 58254, %v244_v61  ;;  %v309_v61 = vshll.u32 %v8746_v11, 16 }
 0x1c2   : > { %v251_v15 = vshll.u32 %v248_v42, 16  ;;  %v252_v56 = vshrl.u32 %v248_v42, 16 }
 0x1c4   : > { %vm255_vm13 = vc.u32 %v247_v60, %v251_v15  ;;  %v257_v12 = vadd.s32 %v251_v15, %v247_v60  ;;  %v8763_v15 = vstv %s1437_s11 }
 0x1c5   : > { %v256_v46 = vsel %vm255_vm13, 1, %v8003_v59  ;;  %vm313_vm13 = vc.u32 %v305_v10, %v309_v61 }
 0x1c6   : > { %vm259_vm14 = vc.u32 %v257_v12, %v253_v22  ;;  %v258_v16 = vadd.s32 %v256_v46, %v250_v13  ;;  %v308_v12 = vmul.u32 58254, %v303_v31 }
 0x1c7   : > { %v260_v19 = vsel %vm259_vm14, 1, %v8003_v59 }
 0x1c8   : > { %1375 = vmatmul.f32.gmra.mxu1 %v8590_v54  ;;  %v286_v54 = vadd.s32 %v280_v63, %v276_v62  ;;  %v262_v57 = vadd.s32 %v260_v19, %v258_v16 }
 0x1ca   : > { %vm288_vm12 = vc.u32 %v286_v54, %v282_v41  ;;  %v263_v55 = vadd.s32 %v262_v57, %v252_v56  ;;  %v315_v54 = vadd.s32 %v309_v61, %v305_v10 }
 0x1cb   : > { %v289_v8 = vsel %vm288_vm12, 1, %v8003_v59 }
 0x1cc   : > { %v291_v0 = vadd.s32 %v289_v8, %v287_v26  ;;  %v8732_v33 = vpop.f32.mrf.mxu2  ;;  %v264_v30 = vadd.s32 %v263_v55, %v254_v37  ;;  %v314_v26 = vsel %vm313_vm13, 1, %v8003_v59  ;;  %v13041_v8 = vmov 0 }
 0x1cd   : > { %v316_v57 = vadd.s32 %v314_v26, %v308_v12 }
 0x1ce   : > { %v292_v25 = vadd.s32 %v291_v0, %v281_v21  ;;  %v265_v24 = vshrl.u32 %v264_v30, 4 }
 0x1cf   : > { %v8729_v20 = vpop.f32.mrf.mxu0 }
 0x1d0   : > { %v293_v38 = vadd.s32 %v292_v25, %v283_v34  ;;  %v266_v14 = vmul.u32 18, %v265_v24 }
 0x1d2   : > { %v294_v28 = vshrl.u32 %v293_v38, 4  ;;  %v267_v52 = vsub.s32 %v8715_v27, %v266_v14 }
 0x1d4   : > { %v295_v18 = vmul.u32 18, %v294_v28  ;;  %vm328_vm14 = vcmp.ne.s32.totalorder %v267_v52, 0  ;;  %vm331_vm0 = vcmp.lt.s32.totalorder %v267_v52, 0  ;;  %v337_v45 = vadd.s32 18, %v267_v52 }
 0x1d5   : > { %v13044_v28 = vmov 0 }
 0x1d6   : > { %v8739_v17 = vpop.f32.mrf.mxu2  ;;  %v296_v23 = vsub.s32 %v239_v53, %v295_v18  ;;  %v8752_v53 = vmul.u32 14564, %v303_v31  ;;  %v1283_v42 = vpop.f32.mrf.mxu3 }
 0x1d7   : > { %v8734_v44 = vpop.f32.mrf.mxu0  ;;  %v8761_v60 = vpop.permute.xlu1 %1150 }
 0x1d8   : > { %vm329_vm15 = vcmp.ne.s32.totalorder %v296_v23, 0  ;;  %vm332_vm11 = vcmp.lt.s32.totalorder %v296_v23, 0  ;;  %v338_v62 = vadd.s32 18, %v296_v23  ;;  %v311_v41 = vshll.u32 %v8752_v53, 16 }
 0x1d9   : > { %vm8754_vm12 = vmand %vm332_vm11, %vm329_vm15  ;;  %v1284_v22 = vadd.f32 %v1283_v42, %v8761_v60  ;;  %v1197_v14 = vadd.f32 %v8729_v20, %v8761_v60 }
 0x1da   : > { %v341_v27 = vsel %vm8754_vm12, %v338_v62, %v296_v23  ;;  %vm8767_vm15 = vmand %vm331_vm0, %vm328_vm14  ;;  %vm317_vm7 = vc.u32 %v315_v54, %v311_v41  ;;  %v310_v23 = vshrl.u32 %v8746_v11, 16  ;;  %v312_v11 = vshrl.u32 %v8752_v53, 16 }
 0x1db   : > { %vm8771_vm11 = vcmp.lt.s32.totalorder %v341_v27, 16  ;;  %v340_v19 = vsel %vm8767_vm15, %v337_v45, %v267_v52  ;;  %v318_v55 = vsel %vm317_vm7, 1, %v8003_v59 }
 0x1dc   : > { %v8742_v49 = vpop.permute.xlu0 %1145  ;;  %v13042_v8 = vsel %vm8771_vm11, 4294967295, %v13041_v8  ;;  %vm8787_vm0 = vcmp.lt.s32.totalorder %v340_v19, 16  ;;  %v320_v59 = vadd.s32 %v318_v55, %v316_v57 }
 0x1dd   : > { %v1281_v51 = vadd.f32 %v1280_v48, %v8742_v49  ;;  %13043 = vst [vmem:[#allocation7_spill] sm:$0xff] %v13042_v8  ;;  %v1194_v21 = vadd.f32 %v8722_v35, %v8742_v49  ;;  %v13045_v28 = vsel %vm8787_vm0, 4294967295, %v13044_v28 }
 0x1de   : > { %v8780_v38 = vpop.permute.xlu2 %1155  ;;  %13046 = vst [vmem:[#allocation8_spill] sm:$0xff] %v13045_v28  ;;  %v1286_v30 = vpop.f32.mrf.mxu3  ;;  %v321_v63 = vadd.s32 %v320_v59, %v310_v23 }
 0x1df   : > { %v8744_v58 = vpop.f32.mrf.mxu0  ;;  %v1287_v48 = vadd.f32 %v1286_v30, %v8780_v38  ;;  %v1200_v53 = vadd.f32 %v8734_v44, %v8780_v38 }
 0x1e0   : > { %v322_v27 = vadd.s32 %v321_v63, %v312_v11  ;;  %v13047_v11 = vmov 0 }
 0x1e6   : > { %v1289_v45 = vpop.f32.mrf.mxu3 }
 0x205   : > { %v1309_v50 = vpop.f32.mrf.mxu2 }
 0x206   : > { %v1310_v29 = vadd.f32 %v1309_v50, %v1281_v51 }
 0x209   : > { %v1338_v43 = vpop.f32.mrf.mxu0 }
 0x20a   : > { %v1339_v32 = vadd.f32 %v1338_v43, %v1310_v29  ;;  %v8806_v43 = vpop.permute.xlu1 %1160 }
 0x20b   : > { %v1290_v13 = vadd.f32 %v1289_v45, %v8806_v43  ;;  %v1203_v55 = vadd.f32 %v8744_v58, %v8806_v43  ;;  %v1396_v23 = vpop.f32.mrf.mxu3 }
 0x20c   : > { %v1452_v46 = vmul.f32 %v8763_v15, %v1339_v32  ;;  %vm1439_vm12 = vcmp.gt.f32.partialorder %v1339_v32, 0.0 }
 0x20d   : > { %v1222_v0 = vpop.f32.mrf.mxu1  ;;  %v1312_v16 = vpop.f32.mrf.mxu2 }
 0x20e   : > { %v1223_v34 = vadd.f32 %v1222_v0, %v1194_v21  ;;  %v1313_v25 = vadd.f32 %v1312_v16, %v1284_v22  ;;  %v1464_v56 = vsel %vm1439_vm12, %v1339_v32, %v1452_v46  ;;  %v323_v0 = vshrl.u32 %v322_v27, 4 }
 0x20f   : > { %v1476_v37 = vsel %vm8771_vm11, %v1464_v56, 0.0 }
 0x210   : > { %v1252_v35 = vadd.f32 %v8719_v47, %v1223_v34  ;;  %1501 = vrot.lane.b32.xlu0 %v1476_v37, %s8004_s12  ;;  %v324_v57 = vmul.u32 18, %v323_v0 }
 0x211   : > { %v1341_v18 = vpop.f32.mrf.mxu0 }
 0x212   : > { %v1342_v24 = vadd.f32 %v1341_v18, %v1313_v25  ;;  %vm1438_vm13 = vcmp.gt.f32.partialorder %v1252_v35, 0.0  ;;  %v1451_v39 = vmul.f32 %v8763_v15, %v1252_v35 }
 0x214   : > { %v1455_v47 = vmul.f32 %v8763_v15, %v1342_v24  ;;  %v1463_v31 = vsel %vm1438_vm13, %v1252_v35, %v1451_v39  ;;  %vm1442_vm7 = vcmp.gt.f32.partialorder %v1342_v24, 0.0  ;;  %v325_v39 = vsub.s32 %v8737_v40, %v324_v57 }
 0x215   : > { %v1225_v51 = vpop.f32.mrf.mxu1  ;;  %v1475_v52 = vsel %vm8787_vm0, %v1463_v31, 0.0  ;;  %v1315_v10 = vpop.f32.mrf.mxu2 }
 0x216   : > { %v1226_v61 = vadd.f32 %v1225_v51, %v1197_v14  ;;  %1499 = vrot.lane.b32.xlu2 %v1475_v52, %s8004_s12  ;;  %v1316_v62 = vadd.f32 %v1315_v10, %v1287_v48  ;;  %v1467_v50 = vsel %vm1442_vm7, %v1342_v24, %v1455_v47  ;;  %v339_v31 = vadd.s32 18, %v325_v39 }
 0x217   : > { %v1479_v29 = vsel %vm8771_vm11, %v1467_v50, 0.0 }
 0x218   : > { %v1255_v20 = vadd.f32 %v8725_v36, %v1226_v61  ;;  %1507 = vrot.lane.b32.xlu0 %v1479_v29, %s8004_s12  ;;  %v1399_v61 = vpop.f32.mrf.mxu3 }
 0x219   : > { %v1344_v42 = vpop.f32.mrf.mxu0 }
 0x21a   : > { %v1345_v41 = vadd.f32 %v1344_v42, %v1316_v62  ;;  %vm1441_vm14 = vcmp.gt.f32.partialorder %v1255_v20, 0.0  ;;  %v1454_v54 = vmul.f32 %v8763_v15, %v1255_v20 }
 0x21c   : > { %v1458_v32 = vmul.f32 %v8763_v15, %v1345_v41  ;;  %v1466_v22 = vsel %vm1441_vm14, %v1255_v20, %v1454_v54  ;;  %vm1445_vm15 = vcmp.gt.f32.partialorder %v1345_v41, 0.0  ;;  %vm330_vm14 = vcmp.ne.s32.totalorder %v325_v39, 0 }
 0x21d   : > { %v1228_v12 = vpop.f32.mrf.mxu1  ;;  %v1478_v36 = vsel %vm8787_vm0, %v1466_v22, 0.0  ;;  %v1318_v26 = vpop.f32.mrf.mxu2 }
 0x21e   : > { %v1229_v46 = vadd.f32 %v1228_v12, %v1200_v53  ;;  %1505 = vrot.lane.b32.xlu2 %v1478_v36, %s8004_s12  ;;  %v1470_v21 = vsel %vm1445_vm15, %v1345_v41, %v1458_v32  ;;  %v1319_v44 = vadd.f32 %v1318_v26, %v1290_v13  ;;  %vm333_vm15 = vcmp.lt.s32.totalorder %v325_v39, 0 }
 0x21f   : > { %v1482_v16 = vsel %vm8771_vm11, %v1470_v21, 0.0 }
 0x220   : > { %v1258_v19 = vadd.f32 %v8732_v33, %v1229_v46  ;;  %1513 = vrot.lane.b32.xlu0 %v1482_v16, %s8004_s12  ;;  %v1402_v27 = vpop.f32.mrf.mxu3 }
 0x221   : > { %v1347_v34 = vpop.f32.mrf.mxu0 }
 0x222   : > { %v1348_v25 = vadd.f32 %v1347_v34, %v1319_v44  ;;  %vm1444_vm12 = vcmp.gt.f32.partialorder %v1258_v19, 0.0  ;;  %v1457_v56 = vmul.f32 %v8763_v15, %v1258_v19 }
 0x224   : > { %v1461_v37 = vmul.f32 %v8763_v15, %v1348_v25  ;;  %v1469_v35 = vsel %vm1444_vm12, %v1258_v19, %v1457_v56  ;;  %vm1448_vm13 = vcmp.gt.f32.partialorder %v1348_v25, 0.0  ;;  %vm336_vm12 = vmand %vm333_vm15, %vm330_vm14 }
 0x225   : > { %v1231_v30 = vpop.f32.mrf.mxu1  ;;  %v1481_v33 = vsel %vm8787_vm0, %v1469_v35, 0.0  ;;  %v1425_v58 = vpop.f32.mrf.mxu2  ;;  %v342_v10 = vsel %vm336_vm12, %v339_v31, %v325_v39 }
 0x226   : > { %v1232_v18 = vadd.f32 %v1231_v30, %v1203_v55  ;;  %1511 = vrot.lane.b32.xlu2 %v1481_v33, %s8004_s12  ;;  %v1473_v24 = vsel %vm1448_vm13, %v1348_v25, %v1461_v37  ;;  %vm8836_vm13 = vcmp.lt.s32.totalorder %v342_v10, 16 }
 0x227   : > { %v1485_v48 = vsel %vm8771_vm11, %v1473_v24, 0.0  ;;  %v13048_v11 = vsel %vm8836_vm13, 4294967295, %v13047_v11 }
 0x228   : > { %v1261_v59 = vadd.f32 %v8739_v17, %v1232_v18  ;;  %1519 = vrot.lane.b32.xlu0 %v1485_v48, %s8004_s12  ;;  %13049 = vst [vmem:[#allocation9_spill] sm:$0xff] %v13048_v11  ;;  %v1405_v21 = vpop.f32.mrf.mxu3 }
 0x22a   : > { %vm1447_vm7 = vcmp.gt.f32.partialorder %v1261_v59, 0.0  ;;  %v1460_v47 = vmul.f32 %v8763_v15, %v1261_v59 }
 0x22c   : > { %v1472_v14 = vsel %vm1447_vm7, %v1261_v59, %v1460_v47 }
 0x22d   : > { %v1367_v51 = vpop.f32.mrf.mxu1  ;;  %v1484_v40 = vsel %vm8787_vm0, %v1472_v14, 0.0  ;;  %v1428_v50 = vpop.f32.mrf.mxu2 }
 0x22e   : > { %v1368_v52 = vadd.f32 %v1367_v51, %v8742_v49  ;;  %1517 = vrot.lane.b32.xlu2 %v1484_v40, %s8004_s12 }
 0x230   : > { %v1397_v17 = vadd.f32 %v1396_v23, %v1368_v52 }
 0x232   : > { %v1426_v62 = vadd.f32 %v1425_v58, %v1397_v17 }
 0x234   : > { %v1453_v63 = vmul.f32 %v8763_v15, %v1426_v62  ;;  %vm1440_vm7 = vcmp.gt.f32.partialorder %v1426_v62, 0.0 }
 0x235   : > { %v1370_v29 = vpop.f32.mrf.mxu1  ;;  %v1431_v53 = vpop.f32.mrf.mxu2 }
 0x236   : > { %v1371_v20 = vadd.f32 %v1370_v29, %v8761_v60  ;;  %v1465_v42 = vsel %vm1440_vm7, %v1426_v62, %v1453_v63  ;;  %vm1544_vm7 = vcmask 1047704  }
 0x237   : > { %v1477_v49 = vsel %vm8836_vm13, %v1465_v42, 0.0 }
 0x238   : > { %v1400_v41 = vadd.f32 %v1399_v61, %v1371_v20  ;;  %1503 = vrot.lane.b32.xlu1 %v1477_v49, %s8004_s12 }
 0x23a   : > { %v1429_v54 = vadd.f32 %v1428_v50, %v1400_v41 }
 0x23c   : > { %v1456_v45 = vmul.f32 %v8763_v15, %v1429_v54  ;;  %vm1443_vm14 = vcmp.gt.f32.partialorder %v1429_v54, 0.0 }
 0x23d   : > { %v1373_v32 = vpop.f32.mrf.mxu1 }
 0x23e   : > { %v1374_v22 = vadd.f32 %v1373_v32, %v8780_v38  ;;  %v1468_v12 = vsel %vm1443_vm14, %v1429_v54, %v1456_v45  ;;  %v1434_v38 = vpop.f32.mrf.mxu2  ;;  %vm1523_vm14 = vcmask 154624  }
 0x23f   : > { %v1480_v60 = vsel %vm8836_vm13, %v1468_v12, 0.0 }
 0x240   : > { %v1403_v36 = vadd.f32 %v1402_v27, %v1374_v22  ;;  %1509 = vrot.lane.b32.xlu1 %v1480_v60, %s8004_s12 }
 0x242   : > { %v1432_v26 = vadd.f32 %v1431_v53, %v1403_v36 }
 0x244   : > { %v1459_v13 = vmul.f32 %v8763_v15, %v1432_v26  ;;  %vm1446_vm15 = vcmp.gt.f32.partialorder %v1432_v26, 0.0 }
 0x245   : > { %v1376_v46 = vpop.f32.mrf.mxu1 }
 0x246   : > { %v1377_v0 = vadd.f32 %v1376_v46, %v8806_v43  ;;  %v1471_v16 = vsel %vm1446_vm15, %v1432_v26, %v1459_v13  ;;  %vm1547_vm15 = vcmask 400384  }
 0x247   : > { %v1483_v19 = vsel %vm8836_vm13, %v1471_v16, 0.0 }
 0x248   : > { %v1406_v44 = vadd.f32 %v1405_v21, %v1377_v0  ;;  %1515 = vrot.lane.b32.xlu1 %v1483_v19, %s8004_s12 }
 0x24a   : > { %v1435_v34 = vadd.f32 %v1434_v38, %v1406_v44 }
 0x24c   : > { %v1462_v25 = vmul.f32 %v8763_v15, %v1435_v34  ;;  %vm1449_vm12 = vcmp.gt.f32.partialorder %v1435_v34, 0.0 }
 0x24e   : > { %v1474_v56 = vsel %vm1449_vm12, %v1435_v34, %v1462_v25  ;;  %vm13070_vm12 = vcmask 261120  }
 0x24f   : > { %v1486_v57 = vsel %vm8836_vm13, %v1474_v56, 0.0 }
 0x250   : > { %1521 = vrot.lane.b32.xlu1 %v1486_v57, %s8004_s12 }
 0x270   : > { %v1500_v43 = vpop.permute.xlu2 %1499 }
 0x271   : > { %1545 = vst.msk [vmem:[#allocation2] sm:$0xff] %vm1544_vm7, %v1500_v43 }
 0x278   : > { %v1506_v37 = vpop.permute.xlu2 %1505  ;;  %v8860_v55 = vld [vmem:[#allocation2] sm:$0xff] }
 0x279   : > { %2086 = vrot.lane.b32.xlu0 %v8860_v55, %s8001_s5  ;;  %1549 = vst.msk [vmem:[#allocation2 + $0x18] sm:$0xff] %vm1544_vm7, %v1506_v37  ;;  %1926 = vrot.lane.b32.xlu1 %v8860_v55, %s7999_s29 }
 0x27a   : > { %1606 = vrot.lane.b32.xlu2 %v8860_v55, %s7995_s25 }
 0x280   : > { %v1512_v15 = vpop.permute.xlu2 %1511  ;;  %v8869_v35 = vld [vmem:[#allocation2 + $0x18] sm:$0xff] }
 0x281   : > { %1552 = vst.msk [vmem:[#allocation2 + $0x30] sm:$0xff] %vm1544_vm7, %v1512_v15  ;;  %2092 = vrot.lane.b32.xlu1 %v8869_v35, %s8001_s5  ;;  %2012 = vrot.lane.b32.xlu0 %v8869_v35, %s8002_s6 }
 0x282   : > { %1686 = vrot.lane.b32.xlu2 %v8860_v55, %s7996_s26  ;;  %v1502_v30 = vpop.permute.xlu0 %1501 }
 0x283   : > { %v8879_v33 = vsel %vm1523_vm14, %v1500_v43, %v1502_v30 }
 0x284   : > { %1546 = vst [vmem:[#allocation2 + $0x8] sm:$0xff] %v8879_v33 }
 0x288   : > { %v1518_v18 = vpop.permute.xlu2 %1517  ;;  %v8882_v24 = vld [vmem:[#allocation2 + $0x30] sm:$0xff] }
 0x289   : > { %1555 = vst.msk [vmem:[#allocation2 + $0x48] sm:$0xff] %vm1544_vm7, %v1518_v18  ;;  %2018 = vrot.lane.b32.xlu1 %v8882_v24, %s8002_s6  ;;  %1938 = vrot.lane.b32.xlu0 %v8882_v24, %s7999_s29 }
 0x28a   : > { %1766 = vrot.lane.b32.xlu2 %v8860_v55, %s7997_s27  ;;  %v1508_v39 = vpop.permute.xlu0 %1507 }
 0x28b   : > { %v8892_v48 = vsel %vm1523_vm14, %v1506_v37, %v1508_v39 }
 0x28c   : > { %1550 = vst [vmem:[#allocation2 + $0x20] sm:$0xff] %v8892_v48 }
 0x290   : > { %v8895_v23 = vld [vmem:[#allocation2 + $0x48] sm:$0xff] }
 0x291   : > { %2104 = vrot.lane.b32.xlu0 %v8895_v23, %s8001_s5  ;;  %1944 = vrot.lane.b32.xlu1 %v8895_v23, %s7999_s29 }
 0x292   : > { %1846 = vrot.lane.b32.xlu2 %v8860_v55, %s7998_s28  ;;  %v1514_v59 = vpop.permute.xlu0 %1513 }
 0x293   : > { %v8904_v58 = vsel %vm1523_vm14, %v1512_v15, %v1514_v59 }
 0x294   : > { %1553 = vst [vmem:[#allocation2 + $0x38] sm:$0xff] %v8904_v58 }
 0x299   : > { %2088 = vrot.lane.b32.xlu1 %v8879_v33, %s8001_s5  ;;  %1864 = vrot.lane.b32.xlu0 %v8895_v23, %s7998_s28 }
 0x29a   : > { %2006 = vrot.lane.b32.xlu2 %v8860_v55, %s8002_s6  ;;  %v1520_v47 = vpop.permute.xlu0 %1519 }
 0x29b   : > { %v8914_v14 = vsel %vm1523_vm14, %v1518_v18, %v1520_v47 }
 0x29c   : > { %1556 = vst [vmem:[#allocation2 + $0x50] sm:$0xff] %v8914_v14 }
 0x2a1   : > { %2014 = vrot.lane.b32.xlu1 %v8892_v48, %s8002_s6  ;;  %1608 = vrot.lane.b32.xlu0 %v8879_v33, %s7995_s25 }
 0x2a2   : > { %1612 = vrot.lane.b32.xlu2 %v8869_v35, %s7995_s25 }
 0x2a9   : > { %1854 = vrot.lane.b32.xlu1 %v8892_v48, %s7998_s28  ;;  %1688 = vrot.lane.b32.xlu0 %v8879_v33, %s7996_s26 }
 0x2aa   : > { %1692 = vrot.lane.b32.xlu2 %v8869_v35, %s7996_s26  ;;  %v1504_v31 = vpop.permute.xlu1 %1503 }
 0x2ab   : > { %v1525_v51 = vsel %vm1523_vm14, %v1502_v30, %v1504_v31 }
 0x2ac   : > { %1548 = vst.msk [vmem:[#allocation2 + $0x10] sm:$0xff] %vm1547_vm15, %v1525_v51 }
 0x2b1   : > { %1768 = vrot.lane.b32.xlu0 %v8879_v33, %s7997_s27 }
 0x2b2   : > { %1772 = vrot.lane.b32.xlu2 %v8869_v35, %s7997_s27  ;;  %v1510_v40 = vpop.permute.xlu1 %1509 }
 0x2b3   : > { %v1527_v52 = vsel %vm1523_vm14, %v1508_v39, %v1510_v40  ;;  %v8936_v17 = vld [vmem:[#allocation2 + $0x10] sm:$0xff] }
 0x2b4   : > { %v1560_v10 = vld [vmem:[#allocation2 + $0x10] sm:$0xff]  ;;  %1610 = vrot.lane.b32.xlu1 %v8936_v17, %s7995_s25  ;;  %1551 = vst.msk [vmem:[#allocation2 + $0x28] sm:$0xff] %vm1547_vm15, %v1527_v52 }
 0x2b5   : > { %1572 = vst.msk [vmem:[#allocation3 + $0x10] sm:$0xff] %vm360_vm1, %v1560_v10 }
 0x2b9   : > { %1848 = vrot.lane.b32.xlu0 %v8879_v33, %s7998_s28 }
 0x2ba   : > { %1852 = vrot.lane.b32.xlu2 %v8869_v35, %s7998_s28  ;;  %v1516_v61 = vpop.permute.xlu1 %1515 }
 0x2bb   : > { %v1529_v62 = vsel %vm1523_vm14, %v1514_v59, %v1516_v61  ;;  %v1563_v50 = vld [vmem:[#allocation2 + $0x28] sm:$0xff] }
 0x2bc   : > { %1554 = vst.msk [vmem:[#allocation2 + $0x40] sm:$0xff] %vm1547_vm15, %v1529_v62  ;;  %1690 = vrot.lane.b32.xlu1 %v8936_v17, %s7996_s26  ;;  %v8979_v41 = vld [vmem:[#allocation2 + $0x28] sm:$0xff] }
 0x2bd   : > { %1575 = vst.msk [vmem:[#allocation3 + $0x28] sm:$0xff] %vm360_vm1, %v1563_v50 }
 0x2c1   : > { %2008 = vrot.lane.b32.xlu0 %v8879_v33, %s8002_s6 }
 0x2c2   : > { %1932 = vrot.lane.b32.xlu2 %v8869_v35, %s7999_s29  ;;  %v1522_v63 = vpop.permute.xlu1 %1521 }
 0x2c3   : > { %v1531_v29 = vsel %vm1523_vm14, %v1520_v47, %v1522_v63  ;;  %v1566_v20 = vld [vmem:[#allocation2 + $0x40] sm:$0xff] }
 0x2c4   : > { %1557 = vst.msk [vmem:[#allocation2 + $0x58] sm:$0xff] %vm1547_vm15, %v1531_v29  ;;  %1770 = vrot.lane.b32.xlu1 %v8936_v17, %s7997_s27  ;;  %v9049_v38 = vld [vmem:[#allocation2 + $0x40] sm:$0xff] }
 0x2c5   : > { %1578 = vst.msk [vmem:[#allocation3 + $0x40] sm:$0xff] %vm360_vm1, %v1566_v20 }
 0x2c9   : > { %1614 = vrot.lane.b32.xlu0 %v8892_v48, %s7995_s25 }
 0x2ca   : > { %1618 = vrot.lane.b32.xlu2 %v8882_v24, %s7995_s25 }
 0x2cb   : > { %v1569_v42 = vld [vmem:[#allocation2 + $0x58] sm:$0xff] }
 0x2cc   : > { %1850 = vrot.lane.b32.xlu1 %v8936_v17, %s7998_s28  ;;  %1581 = vst.msk [vmem:[#allocation3 + $0x58] sm:$0xff] %vm360_vm1, %v1569_v42  ;;  %v1593_v59 = vld [vmem:[#allocation2 + $0x58] sm:$0xff] }
 0x2d1   : > { %1694 = vrot.lane.b32.xlu0 %v8892_v48, %s7996_s26 }
 0x2d2   : > { %1698 = vrot.lane.b32.xlu2 %v8882_v24, %s7996_s26 }
 0x2d4   : > { %v8971_v49 = vpop.permute.xlu2 %1606  ;;  %1940 = vrot.lane.b32.xlu1 %v8904_v58, %s7999_s29 }
 0x2d9   : > { %1774 = vrot.lane.b32.xlu0 %v8892_v48, %s7997_s27 }
 0x2da   : > { %1778 = vrot.lane.b32.xlu2 %v8882_v24, %s7997_s27 }
 0x2dc   : > { %v8981_v54 = vpop.permute.xlu2 %1686  ;;  %1616 = vrot.lane.b32.xlu1 %v8979_v41, %s7995_s25 }
 0x2e1   : > { %1934 = vrot.lane.b32.xlu0 %v8892_v48, %s7999_s29 }
 0x2e2   : > { %2098 = vrot.lane.b32.xlu2 %v8882_v24, %s8001_s5 }
 0x2e4   : > { %v8989_v27 = vpop.permute.xlu2 %1766  ;;  %1696 = vrot.lane.b32.xlu1 %v8979_v41, %s7996_s26 }
 0x2e9   : > { %1620 = vrot.lane.b32.xlu0 %v8904_v58, %s7995_s25 }
 0x2ea   : > { %1858 = vrot.lane.b32.xlu2 %v8882_v24, %s7998_s28 }
 0x2eb   : > { %v8997_v45 = vpop.permute.xlu0 %2086  ;;  %v8999_v32 = vpop.permute.xlu1 %1926 }
 0x2ec   : > { %v9001_v53 = vpop.permute.xlu2 %1846  ;;  %1776 = vrot.lane.b32.xlu1 %v8979_v41, %s7997_s27 }
 0x2ed   : > { %13050 = vst [vmem:[#allocation10_spill] sm:$0xff] %v9001_v53 }
 0x2f1   : > { %1700 = vrot.lane.b32.xlu0 %v8904_v58, %s7996_s26 }
 0x2f2   : > { %1624 = vrot.lane.b32.xlu2 %v8895_v23, %s7995_s25 }
 0x2f3   : > { %v9009_v22 = vpop.permute.xlu1 %2092  ;;  %v9011_v12 = vpop.permute.xlu0 %2012 }
 0x2f4   : > { %v9013_v60 = vpop.permute.xlu2 %2006  ;;  %2096 = vrot.lane.b32.xlu1 %v8979_v41, %s8001_s5 }
 0x2f9   : > { %1780 = vrot.lane.b32.xlu0 %v8904_v58, %s7997_s27 }
 0x2fa   : > { %1704 = vrot.lane.b32.xlu2 %v8895_v23, %s7996_s26 }
 0x2fb   : > { %v9021_v36 = vpop.permute.xlu1 %2018  ;;  %v9023_v26 = vpop.permute.xlu0 %1938 }
 0x2fc   : > { %v9025_v13 = vpop.permute.xlu2 %1612  ;;  %2106 = vrot.lane.b32.xlu1 %v8914_v14, %s8001_s5 }
 0x301   : > { %2100 = vrot.lane.b32.xlu0 %v8904_v58, %s8001_s5 }
 0x302   : > { %1784 = vrot.lane.b32.xlu2 %v8895_v23, %s7997_s27 }
 0x303   : > { %v9033_v46 = vpop.permute.xlu0 %2104  ;;  %v9035_v21 = vpop.permute.xlu1 %1944 }
 0x304   : > { %v9037_v0 = vpop.permute.xlu2 %1692  ;;  %1866 = vrot.lane.b32.xlu1 %v8914_v14, %s7998_s28 }
 0x309   : > { %1860 = vrot.lane.b32.xlu0 %v8904_v58, %s7998_s28 }
 0x30a   : > { %2024 = vrot.lane.b32.xlu2 %v8895_v23, %s8002_s6 }
 0x30b   : > { %v9045_v16 = vpop.permute.xlu1 %2088  ;;  %v9047_v19 = vpop.permute.xlu0 %1864 }
 0x30c   : > { %v9051_v44 = vpop.permute.xlu2 %1772  ;;  %1622 = vrot.lane.b32.xlu1 %v9049_v38, %s7995_s25 }
 0x311   : > { %1626 = vrot.lane.b32.xlu0 %v8914_v14, %s7995_s25 }
 0x312   : > { %1928 = vrot.lane.b32.xlu2 %v8879_v33, %s7999_s29 }
 0x313   : > { %v9059_v34 = vpop.permute.xlu0 %1608  ;;  %v9061_v25 = vpop.permute.xlu1 %2014 }
 0x314   : > { %v9063_v56 = vpop.permute.xlu2 %1852  ;;  %1702 = vrot.lane.b32.xlu1 %v9049_v38, %s7996_s26 }
 0x319   : > { %1706 = vrot.lane.b32.xlu0 %v8914_v14, %s7996_s26 }
 0x31a   : > { %2094 = vrot.lane.b32.xlu2 %v8892_v48, %s8001_s5 }
 0x31b   : > { %v9071_v57 = vpop.permute.xlu0 %1688  ;;  %v9077_v37 = vpop.permute.xlu1 %1854 }
 0x31c   : > { %v9073_v43 = vpop.permute.xlu2 %1932  ;;  %1782 = vrot.lane.b32.xlu1 %v9049_v38, %s7997_s27 }
 0x321   : > { %1786 = vrot.lane.b32.xlu0 %v8914_v14, %s7997_s27 }
 0x322   : > { %2090 = vrot.lane.b32.xlu2 %v8936_v17, %s8001_s5 }
 0x323   : > { %v9083_v15 = vpop.permute.xlu0 %1768 }
 0x324   : > { %v9085_v30 = vpop.permute.xlu2 %1618  ;;  %2022 = vrot.lane.b32.xlu1 %v9049_v38, %s8002_s6 }
 0x326   : > { %v9089_v18 = vpop.permute.xlu1 %1610 }
 0x327   : > { %13051 = vst [vmem:[#allocation11_spill] sm:$0xff] %v9089_v18 }
 0x328   : > { %1652 = vst.msk [vmem:[#allocation3 + $0x70] sm:$0xff] %vm360_vm1, %v9089_v18 }
 0x329   : > { %2026 = vrot.lane.b32.xlu0 %v8914_v14, %s8002_s6 }
 0x32a   : > { %2020 = vrot.lane.b32.xlu2 %v8904_v58, %s8002_s6 }
 0x32b   : > { %v9097_v39 = vpop.permute.xlu0 %1848 }
 0x32c   : > { %v9099_v47 = vpop.permute.xlu2 %1698  ;;  %1628 = vrot.lane.b32.xlu1 %v1593_v59, %s7995_s25 }
 0x32e   : > { %v9102_v31 = vpop.permute.xlu1 %1690 }
 0x32f   : > { %13052 = vst [vmem:[#allocation12_spill] sm:$0xff] %v9102_v31 }
 0x330   : > { %1732 = vst.msk [vmem:[#allocation3 + $0xd0] sm:$0xff] %vm360_vm1, %v9102_v31 }
 0x331   : > { %2102 = vrot.lane.b32.xlu0 %v9049_v38, %s8001_s5 }
 0x332   : > { %1946 = vrot.lane.b32.xlu2 %v8914_v14, %s7999_s29 }
 0x333   : > { %v9110_v51 = vpop.permute.xlu0 %2008 }
 0x334   : > { %v9112_v40 = vpop.permute.xlu2 %1778  ;;  %1708 = vrot.lane.b32.xlu1 %v1593_v59, %s7996_s26 }
 0x336   : > { %v9115_v52 = vpop.permute.xlu1 %1770 }
 0x337   : > { %13053 = vst [vmem:[#allocation13_spill] sm:$0xff] %v9115_v52 }
 0x338   : > { %1812 = vst.msk [vmem:[#allocation3 + $0x130] sm:$0xff] %vm360_vm1, %v9115_v52 }
 0x339   : > { %2028 = vrot.lane.b32.xlu0 %v1593_v59, %s8002_s6 }
 0x33a   : > { %2016 = vrot.lane.b32.xlu2 %v8979_v41, %s8002_s6 }
 0x33b   : > { %v9122_v10 = vpop.permute.xlu0 %1614 }
 0x33c   : > { %v2099_v61 = vpop.permute.xlu2 %2098  ;;  %1788 = vrot.lane.b32.xlu1 %v1593_v59, %s7997_s27 }
 0x33e   : > { %v9125_v62 = vpop.permute.xlu1 %1850 }
 0x33f   : > { %13054 = vst [vmem:[#allocation14_spill] sm:$0xff] %v9125_v62 }
 0x340   : > { %1892 = vst.msk [vmem:[#allocation3 + $0x190] sm:$0xff] %vm360_vm1, %v9125_v62 }
 0x341   : > { %2010 = vrot.lane.b32.xlu0 %v8936_v17, %s8002_s6 }
 0x342   : > { %2108 = vrot.lane.b32.xlu2 %v1593_v59, %s8001_s5 }
 0x343   : > { %v9132_v50 = vpop.permute.xlu0 %1694 }
 0x344   : > { %v9134_v63 = vpop.permute.xlu2 %1858  ;;  %1948 = vrot.lane.b32.xlu1 %v1593_v59, %s7999_s29 }
 0x346   : > { %v9137_v29 = vpop.permute.xlu1 %1940 }
 0x349   : > { %1936 = vrot.lane.b32.xlu0 %v8979_v41, %s7999_s29 }
 0x34a   : > { %1942 = vrot.lane.b32.xlu2 %v9049_v38, %s7999_s29 }
 0x34b   : > { %v9143_v20 = vpop.permute.xlu0 %1774 }
 0x34c   : > { %v9145_v42 = vpop.permute.xlu2 %1624  ;;  %1930 = vrot.lane.b32.xlu1 %v8936_v17, %s7999_s29 }
 0x34e   : > { %v9149_v11 = vpop.permute.xlu1 %1616 }
 0x34f   : > { %13055 = vst [vmem:[#allocation15_spill] sm:$0xff] %v9149_v11 }
 0x350   : > { %1655 = vst.msk [vmem:[#allocation3 + $0x88] sm:$0xff] %vm360_vm1, %v9149_v11 }
 0x351   : > { %1862 = vrot.lane.b32.xlu0 %v9049_v38, %s7998_s28 }
 0x352   : > { %1868 = vrot.lane.b32.xlu2 %v1593_v59, %s7998_s28 }
 0x353   : > { %v9156_v8 = vpop.permute.xlu0 %1934 }
 0x354   : > { %v9158_v28 = vpop.permute.xlu2 %1704  ;;  %1856 = vrot.lane.b32.xlu1 %v8979_v41, %s7998_s28 }
 0x356   : > { %v9162_v62 = vpop.permute.xlu1 %1696 }
 0x357   : > { %13056 = vst [vmem:[#allocation16_spill] sm:$0xff] %v9162_v62 }
 0x358   : > { %1735 = vst.msk [vmem:[#allocation3 + $0xe8] sm:$0xff] %vm360_vm1, %v9162_v62 }
 0x359   : > { %2186 = vrot.lane.b32.xlu0 %v8914_v14, %s8000_s30 }
 0x35a   : > { %2184 = vrot.lane.b32.xlu2 %v8895_v23, %s8000_s30 }
 0x35b   : > { %v9170_v18 = vpop.permute.xlu0 %1620 }
 0x35c   : > { %v9172_v11 = vpop.permute.xlu2 %1784  ;;  %2178 = vrot.lane.b32.xlu1 %v8882_v24, %s8000_s30 }
 0x35e   : > { %v9176_v31 = vpop.permute.xlu1 %1776 }
 0x35f   : > { %13057 = vst [vmem:[#allocation17_spill] sm:$0xff] %v9176_v31 }
 0x360   : > { %1815 = vst.msk [vmem:[#allocation3 + $0x148] sm:$0xff] %vm360_vm1, %v9176_v31 }
 0x361   : > { %2172 = vrot.lane.b32.xlu0 %v8869_v35, %s8000_s30 }
 0x362   : > { %2180 = vrot.lane.b32.xlu2 %v8904_v58, %s8000_s30 }
 0x363   : > { %v9184_v14 = vpop.permute.xlu0 %1700 }
 0x364   : > { %v9186_v62 = vpop.permute.xlu2 %2024  ;;  %2174 = vrot.lane.b32.xlu1 %v8892_v48, %s8000_s30 }
 0x366   : > { %v9190_v52 = vpop.permute.xlu1 %2096 }
 0x367   : > { %13058 = vst [vmem:[#allocation18_spill] sm:$0xff] %v9190_v52 }
 0x368   : > { %2135 = vst.msk [vmem:[#allocation3 + $0x2c8] sm:$0xff] %vm360_vm1, %v9190_v52 }
 0x369   : > { %2168 = vrot.lane.b32.xlu0 %v8879_v33, %s8000_s30 }
 0x36a   : > { %2166 = vrot.lane.b32.xlu2 %v8860_v55, %s8000_s30 }
 0x36b   : > { %v9198_v31 = vpop.permute.xlu0 %1780 }
 0x36c   : > { %v9200_v58 = vpop.permute.xlu2 %1928  ;;  %2188 = vrot.lane.b32.xlu1 %v1593_v59, %s8000_s30 }
 0x36e   : > { %v9203_v53 = vpop.permute.xlu1 %2106 }
 0x36f   : > { %v2116_v48 = vsel %vm905_vm6, %v9033_v46, %v9203_v53 }
 0x370   : > { %2409 = vmatpush.msra.mxu1 %v2116_v48 }
 0x371   : > { %2176 = vrot.lane.b32.xlu0 %v8979_v41, %s8000_s30  ;;  %v7780_v41 = vld [vmem:[%s12949_s2 + $0x28] sm:$0xff] }
 0x372   : > { %2182 = vrot.lane.b32.xlu2 %v9049_v38, %s8000_s30  ;;  %v7779_v38 = vld [vmem:[%s12949_s2 + $0x20] sm:$0xff] }
 0x373   : > { %v9212_v55 = vpop.permute.xlu0 %2100 }
 0x374   : > { %v2114_v33 = vsel %vm905_vm6, %v2099_v61, %v9212_v55  ;;  %v9216_v52 = vpop.permute.xlu2 %2094  ;;  %2170 = vrot.lane.b32.xlu1 %v8936_v17, %s8000_s30  ;;  %v2110_v17 = vsel %vm905_vm6, %v8997_v45, %v9045_v16  ;;  %v7782_v45 = vld [vmem:[%s12949_s2 + $0x38] sm:$0xff] }
 0x375   : > { %2410 = vmatpush.msra.mxu1 %v2114_v33  ;;  %v2112_v46 = vsel %vm905_vm6, %v9009_v22, %v9216_v52  ;;  %v7781_v22 = vld [vmem:[%s12949_s2 + $0x30] sm:$0xff] }
 0x376   : > { %v9223_v59 = vpop.permute.xlu1 %1866 }
 0x377   : > { %2411 = vmatpush.msra.mxu1 %v2112_v46 }
 0x379   : > { %2355 = vperm.xlu0 %7960, %v7780_v41   ;;  %2412 = vmatpush.msra.mxu1 %v2110_v17 }
 0x37a   : > { %2350 = vperm.xlu2 %7962, %v7779_v38   ;;  %v7963_v38 = vld [vmem:[%s8049_s24 + $0x8] sm:$0xff] }
 0x37b   : > { %v9237_v61 = vpop.permute.xlu0 %1860 }
 0x37c   : > { %v9239_v48 = vpop.permute.xlu2 %2090  ;;  %2360 = vperm.xlu1 %7961, %v7781_v22  }
 0x37d   : > { %2132 = vst.msk [vmem:[#allocation3 + $0x2b0] sm:$0xff] %vm360_vm1, %v9239_v48 }
 0x37e   : > { %v9243_v33 = vpop.permute.xlu1 %1622 }
 0x37f   : > { %13059 = vst [vmem:[#allocation19_spill] sm:$0xff] %v9243_v33 }
 0x380   : > { %1658 = vst.msk [vmem:[#allocation3 + $0xa0] sm:$0xff] %vm360_vm1, %v9243_v33 }
 0x381   : > { %2703 = vrot.lane.b32.xlu0 %v8058_v2, %s7998_s28 }
 0x382   : > { %2365 = vperm.xlu2 %7962, %v7782_v45   ;;  %v7964_v45 = vld [vmem:[%s8049_s24 + $0x20] sm:$0xff] }
 0x383   : > { %v9252_v46 = vpop.permute.xlu0 %1626 }
 0x384   : > { %v9254_v41 = vpop.permute.xlu2 %2020  ;;  %2705 = vrot.lane.b32.xlu1 %v7963_v38, %s7998_s28 }
 0x386   : > { %v9258_v17 = vpop.permute.xlu1 %1702 }
 0x387   : > { %1738 = vst.msk [vmem:[#allocation3 + $0x100] sm:$0xff] %vm360_vm1, %v9258_v17 }
 0x389   : > { %2709 = vrot.lane.b32.xlu0 %v8076_v5, %s7998_s28 }
 0x38a   : > { %2707 = vrot.lane.b32.xlu2 %v8055_v1, %s7998_s28 }
 0x38b   : > { %v9266_v2 = vpop.permute.xlu0 %1706 }
 0x38c   : > { %v9268_v22 = vpop.permute.xlu2 %1946  ;;  %2711 = vrot.lane.b32.xlu1 %v7964_v45, %s7998_s28  ;;  %v7965_v45 = vld [vmem:[%s8049_s24 + $0x38] sm:$0xff] }
 0x38e   : > { %v9272_v38 = vpop.permute.xlu1 %1782 }
 0x38f   : > { %1818 = vst.msk [vmem:[#allocation3 + $0x160] sm:$0xff] %vm360_vm1, %v9272_v38 }
 0x391   : > { %2715 = vrot.lane.b32.xlu0 %v8085_v7, %s7998_s28 }
 0x392   : > { %2713 = vrot.lane.b32.xlu2 %v8067_v3, %s7998_s28  ;;  %v1794_v3 = vsel %vm581_vm2, %v9112_v40, %v9198_v31 }
 0x393   : > { %v9280_v5 = vpop.permute.xlu0 %1786 }
 0x394   : > { %v1796_v1 = vsel %vm581_vm2, %v9172_v11, %v9280_v5  ;;  %v9285_v33 = vpop.permute.xlu2 %2016  ;;  %2717 = vrot.lane.b32.xlu1 %v7965_v45, %s7998_s28  ;;  %v1792_v11 = vsel %vm581_vm2, %v9051_v44, %v9143_v20  ;;  %v1716_v45 = vsel %vm13029_vm3, %v9158_v28, %v9266_v2  ;;  %v2034_v28 = vsel %vm824_vm8, %v9021_v36, %v9254_v41 }
 0x395   : > { %2055 = vst.msk [vmem:[#allocation3 + $0x268] sm:$0xff] %vm360_vm1, %v9285_v33  ;;  %2380 = vmatpush.msra.mxu0 %v1796_v1  ;;  %v1790_v1 = vsel %vm581_vm2, %v8989_v27, %v9083_v15  ;;  %v1710_v36 = vsel %vm13029_vm3, %v8981_v54, %v9071_v57 }
 0x396   : > { %v9294_v7 = vpop.permute.xlu1 %2022 }
 0x397   : > { %2058 = vst.msk [vmem:[#allocation3 + $0x280] sm:$0xff] %vm360_vm1, %v9294_v7  ;;  %2381 = vmatpush.msra.mxu0 %v1794_v3 }
 0x399   : > { %2382 = vmatpush.msra.mxu0 %v1792_v11  ;;  %2721 = vrot.lane.b32.xlu0 %v8094_v9, %s7998_s28  ;;  %v7966_v9 = vld [vmem:[%s8049_s24 + $0x50] sm:$0xff]  ;;  %v1712_v11 = vsel %vm13029_vm3, %v9037_v0, %v9132_v50  ;;  %v1956_v0 = vsel %vm12971_vm9, %v9035_v21, %v9268_v22  ;;  %v1632_v21 = vsel %vm12970_vm4, %v9025_v13, %v9122_v10  ;;  %s7911_s24 = sld [smem:[#allocation4 + $0x5]] }
 0x39a   : > { %2719 = vrot.lane.b32.xlu2 %v8071_v4, %s7998_s28  ;;  %v1714_v4 = vsel %vm13029_vm3, %v9099_v47, %v9184_v14  ;;  %v2030_v47 = vsel %vm824_vm8, %v9013_v60, %v9110_v51  ;;  %v1634_v60 = vsel %vm12970_vm4, %v9085_v30, %v9170_v18  ;;  %v1950_v30 = vsel %vm12971_vm9, %v8999_v32, %v9200_v58 }
 0x39b   : > { %v9308_v40 = vpop.permute.xlu0 %2026  ;;  %2383 = vmatpush.msra.mxu0 %v1790_v1  ;;  %v1876_v13 = vsel %vm662_vm10, %v9047_v19, %v9223_v59  ;;  %v1872_v19 = vsel %vm662_vm10, %v9063_v56, %v9077_v37  ;;  %v13061_v56 = vld [vmem:[#allocation17_spill] sm:$0xff] }
 0x39c   : > { %v2036_v44 = vsel %vm824_vm8, %v9186_v62, %v9308_v40  ;;  %v9316_v3 = vpop.permute.xlu2 %2108  ;;  %2723 = vrot.lane.b32.xlu1 %v7966_v9, %s7998_s28  ;;  %v2032_v62 = vsel %vm824_vm8, %v9011_v12, %v9061_v25  ;;  %v1636_v12 = vsel %vm12970_vm4, %v9145_v42, %v9252_v46 }
 0x39d   : > { %2141 = vst.msk [vmem:[#allocation3 + $0x2f8] sm:$0xff] %vm360_vm1, %v9316_v3  ;;  %2384 = vmatpush.msra.mxu0 %v1716_v45  ;;  %2413 = vmatpush.msra.mxu1 %v2036_v44  ;;  %v1952_v45 = vsel %vm12971_vm9, %v9073_v43, %v9156_v8 }
 0x39e   : > { %v9328_v27 = vpop.permute.xlu1 %1628 }
 0x39f   : > { %1661 = vst.msk [vmem:[#allocation3 + $0xb8] sm:$0xff] %vm360_vm1, %v9328_v27  ;;  %2385 = vmatpush.msra.mxu0 %v1714_v4  ;;  %2414 = vmatpush.msra.mxu1 %v2034_v28  ;;  %v1558_v4 = vld [vmem:[#allocation2] sm:$0xff]  ;;  %v1793_v28 = vsel %vm581_vm2, %v9143_v20, %v13061_v56  ;;  %v13062_v20 = vld [vmem:[#allocation13_spill] sm:$0xff] }
 0x3a1   : > { %2386 = vmatpush.msra.mxu0 %v1712_v11  ;;  %2415 = vmatpush.msra.mxu1 %v2032_v62  ;;  %v1791_v11 = vsel %vm581_vm2, %v9083_v15, %v13062_v20 }
 0x3a2   : > { %2725 = vrot.lane.b32.xlu2 %v8080_v6, %s7998_s28  ;;  %v1954_v6 = vsel %vm12971_vm9, %v9023_v26, %v9137_v29  ;;  %v1630_v26 = vsel %vm12970_vm4, %v8971_v49, %v9059_v34  ;;  %v1874_v49 = vsel %vm662_vm10, %v9134_v63, %v9237_v61  ;;  %v9402_v63 = vld [vmem:[%s12948_s1 + $0x60] sm:$0xff] }
 0x3a3   : > { %v2103_v1 = vpop.permute.xlu0 %2102  ;;  %2387 = vmatpush.msra.mxu0 %v1710_v36  ;;  %2416 = vmatpush.msra.mxu1 %v2030_v47 }
 0x3a4   : > { %2138 = vst.msk [vmem:[#allocation3 + $0x2e0] sm:$0xff] %vm360_vm1, %v2103_v1  ;;  %v9353_v54 = vpop.permute.xlu2 %1942  ;;  %v2115_v36 = vsel %vm905_vm6, %v9212_v55, %v2103_v1  ;;  %v1715_v55 = vsel %vm13029_vm3, %v9184_v14, %v9258_v17  ;;  %v9440_v1 = vld [vmem:[%s12948_s1 + $0x78] sm:$0xff]  ;;  %v9451_v14 = vld [vmem:[%s12948_s1 + $0x80] sm:$0xff] }
 0x3a5   : > { %1978 = vst.msk [vmem:[#allocation3 + $0x220] sm:$0xff] %vm360_vm1, %v9353_v54  ;;  %2388 = vmatpush.msra.mxu0 %v1636_v12  ;;  %2417 = vmatpush.msra.mxu1 %v1956_v0  ;;  %v13064_v12 = vld [vmem:[#allocation16_spill] sm:$0xff] }
 0x3a6   : > { %v1709_v42 = vpop.permute.xlu1 %1708 }
 0x3a7   : > { %1741 = vst.msk [vmem:[#allocation3 + $0x118] sm:$0xff] %vm360_vm1, %v1709_v42  ;;  %2389 = vmatpush.msra.mxu0 %v1634_v60  ;;  %2418 = vmatpush.msra.mxu1 %v1954_v6 }
 0x3a9   : > { %2390 = vmatpush.msra.mxu0 %v1632_v21  ;;  %2419 = vmatpush.msra.mxu1 %v1952_v45 }
 0x3ab   : > { %v2029_v44 = vpop.permute.xlu0 %2028  ;;  %2391 = vmatpush.msra.mxu0 %v1630_v26  ;;  %2420 = vmatpush.msra.mxu1 %v1950_v30  ;;  %v1955_v26 = vsel %vm12971_vm9, %v9137_v29, %v9353_v54  ;;  %v9510_v29 = vld [vmem:[%s12948_s1 + $0xa8] sm:$0xff] }
 0x3ac   : > { %2061 = vst.msk [vmem:[#allocation3 + $0x298] sm:$0xff] %vm360_vm1, %v2029_v44  ;;  %v9380_v43 = vpop.permute.xlu2 %1868  ;;  %v2037_v17 = vsel %vm824_vm8, %v9308_v40, %v2029_v44  ;;  %v1637_v40 = vsel %vm12970_vm4, %v9252_v46, %v9328_v27  ;;  %v13067_v27 = vld [vmem:[#allocation15_spill] sm:$0xff] }
 0x3ad   : > { %1901 = vst.msk [vmem:[#allocation3 + $0x1d8] sm:$0xff] %vm360_vm1, %v9380_v43  ;;  %2392 = vmatpush.msra.mxu0 %v8895_v23  ;;  %2421 = vmatpush.msra.mxu1 %v1876_v13  ;;  %v1795_v23 = vsel %vm581_vm2, %v9198_v31, %v9272_v38  ;;  %v2117_v31 = vsel %vm905_vm6, %v9203_v53, %v9316_v3  ;;  %v13063_v3 = vld [vmem:[#allocation18_spill] sm:$0xff] }
 0x3ae   : > { %v1789_v32 = vpop.permute.xlu1 %1788  ;;  %v1717_v53 = vsel %vm13029_vm3, %v9266_v2, %v1709_v42  ;;  %v2113_v15 = vsel %vm905_vm6, %v9216_v52, %v13063_v3  ;;  %v2111_v2 = vsel %vm905_vm6, %v9045_v16, %v9239_v48  ;;  %v1713_v52 = vsel %vm13029_vm3, %v9132_v50, %v13064_v12  ;;  %v13065_v16 = vld [vmem:[#allocation12_spill] sm:$0xff]  ;;  %v13066_v42 = vld [vmem:[#allocation19_spill] sm:$0xff] }
 0x3af   : > { %v1797_v9 = vsel %vm581_vm2, %v9280_v5, %v1789_v32  ;;  %1821 = vst.msk [vmem:[#allocation3 + $0x178] sm:$0xff] %vm360_vm1, %v1789_v32  ;;  %2393 = vmatpush.msra.mxu0 %v8882_v24  ;;  %2422 = vmatpush.msra.mxu1 %v1874_v49  ;;  %v13060_v24 = vld [vmem:[#allocation10_spill] sm:$0xff]  ;;  %v1711_v50 = vsel %vm13029_vm3, %v9071_v57, %v13065_v16  ;;  %v1562_v49 = vld [vmem:[#allocation2 + $0x20] sm:$0xff] }
 0x3b0   : > { %2467 = vmatpush.msrb.mxu2 %v1797_v9  ;;  %v1870_v5 = vsel %vm662_vm10, %v13060_v24, %v9097_v39  ;;  %v2035_v48 = vsel %vm824_vm8, %v9254_v41, %v9294_v7  ;;  %v2033_v57 = vsel %vm824_vm8, %v9061_v25, %v9285_v33  ;;  %v1635_v41 = vsel %vm12970_vm4, %v9170_v18, %v13066_v42  ;;  %v9479_v7 = vld [vmem:[%s12948_s1 + $0x90] sm:$0xff]  ;;  %v9489_v18 = vld [vmem:[%s12948_s1 + $0x98] sm:$0xff] }
 0x3b1   : > { %2394 = vmatpush.msra.mxu0 %v8869_v35  ;;  %2423 = vmatpush.msra.mxu1 %v1872_v19  ;;  %v9413_v35 = vld [vmem:[%s12948_s1 + $0x68] sm:$0xff]  ;;  %v1633_v25 = vsel %vm12970_vm4, %v9122_v10, %v13067_v27  ;;  %v1877_v32 = vsel %vm662_vm10, %v9223_v59, %v9380_v43  ;;  %v2330_v24 = vld [vmem:[#allocation3 + $0x2f8] sm:$0xff] }
 0x3b2   : > { %2468 = vmatpush.msrb.mxu2 %v1795_v23  ;;  %v1559_v59 = vld [vmem:[#allocation2 + $0x8] sm:$0xff] }
 0x3b3   : > { %v2011_v62 = vpop.permute.xlu0 %2010  ;;  %2395 = vmatpush.msra.mxu0 %v1558_v4  ;;  %2424 = vmatpush.msra.mxu1 %v1870_v5  ;;  %v13069_v4 = vld [vmem:[#allocation14_spill] sm:$0xff] }
 0x3b4   : > { %2052 = vst.msk [vmem:[#allocation3 + $0x250] sm:$0xff] %vm360_vm1, %v2011_v62  ;;  %v9419_v38 = vpop.permute.xlu2 %2184  ;;  %2396 = vmatmul.f32.vlgmr.msra.gmra.mxu0 %v9402_v63  ;;  %2469 = vmatpush.msrb.mxu2 %v1793_v28  ;;  %v2031_v46 = vsel %vm824_vm8, %v9110_v51, %v2011_v62  ;;  %v13068_v51 = vld [vmem:[#allocation11_spill] sm:$0xff]  ;;  %v1871_v56 = vsel %vm662_vm10, %v9097_v39, %v13069_v4  ;;  %v2324_v62 = vld [vmem:[#allocation3 + $0x2c8] sm:$0xff]  ;;  %v2318_v20 = vld [vmem:[#allocation3 + $0x298] sm:$0xff] }
 0x3b5   : > { %2496 = vmatpush.msrb.mxu0 %v2117_v31  ;;  %7914 = vmatpush.msrb.mxu1 %v2117_v31  ;;  %v1631_v10 = vsel %vm12970_vm4, %v9059_v34, %v13068_v51  ;;  %v1565_v34 = vld [vmem:[#allocation2 + $0x38] sm:$0xff]  ;;  %v2315_v39 = vld [vmem:[#allocation3 + $0x280] sm:$0xff] }
 0x3b6   : > { %v1949_v47 = vpop.permute.xlu1 %1948  ;;  %2425 = vmatmul.f32.vlgmr.msra.gmra.mxu1 %v9413_v35  ;;  %2470 = vmatpush.msrb.mxu2 %v1791_v11 }
 0x3b7   : > { %1981 = vst.msk [vmem:[#allocation3 + $0x238] sm:$0xff] %vm360_vm1, %v1949_v47  ;;  %2497 = vmatpush.msrb.mxu0 %v2115_v36  ;;  %7915 = vmatpush.msrb.mxu1 %v2115_v36  ;;  %v1957_v21 = vsel %vm12971_vm9, %v9268_v22, %v1949_v47  ;;  %v1568_v22 = vld [vmem:[#allocation2 + $0x50] sm:$0xff] }
 0x3b8   : > { %2471 = vmatpush.msrb.mxu2 %v1717_v53  ;;  %v9547_v36 = vld [vmem:[%s12948_s1 + $0x70] sm:$0xff]  ;;  %v2312_v53 = vld [vmem:[#allocation3 + $0x268] sm:$0xff] }
 0x3b9   : > { %2498 = vmatpush.msrb.mxu0 %v2113_v15  ;;  %7916 = vmatpush.msrb.mxu1 %v2113_v15 }
 0x3ba   : > { %2472 = vmatpush.msrb.mxu2 %v1715_v55  ;;  %v2282_v55 = vld [vmem:[#allocation3 + $0x178] sm:$0xff] }
 0x3bb   : > { %v1937_v0 = vpop.permute.xlu0 %1936  ;;  %2499 = vmatpush.msrb.mxu0 %v2111_v2  ;;  %7917 = vmatpush.msrb.mxu1 %v2111_v2  ;;  %v2309_v15 = vld [vmem:[#allocation3 + $0x250] sm:$0xff] }
 0x3bc   : > { %1975 = vst.msk [vmem:[#allocation3 + $0x208] sm:$0xff] %vm360_vm1, %v1937_v0  ;;  %v9456_v6 = vpop.permute.xlu2 %2180  ;;  %2399 = vmatmul.f32.gmra.mxu0 %v9440_v1  ;;  %2473 = vmatpush.msrb.mxu2 %v1713_v52  ;;  %v1953_v44 = vsel %vm12971_vm9, %v9156_v8, %v1937_v0  ;;  %v9517_v8 = vld [vmem:[%s12948_s1 + $0xb0] sm:$0xff]  ;;  %v2279_v52 = vld [vmem:[#allocation3 + $0x160] sm:$0xff] }
 0x3bd   : > { %2500 = vmatpush.msrb.mxu0 %v2037_v17  ;;  %7918 = vmatpush.msrb.mxu1 %v2037_v17  ;;  %v2303_v17 = vld [vmem:[#allocation3 + $0x220] sm:$0xff] }
 0x3be   : > { %v1931_v60 = vpop.permute.xlu1 %1930  ;;  %2428 = vmatmul.f32.gmra.mxu1 %v9451_v14  ;;  %2474 = vmatpush.msrb.mxu2 %v1711_v50  ;;  %v2306_v12 = vld [vmem:[#allocation3 + $0x238] sm:$0xff]  ;;  %v2276_v50 = vld [vmem:[#allocation3 + $0x148] sm:$0xff] }
 0x3bf   : > { %1972 = vst.msk [vmem:[#allocation3 + $0x1f0] sm:$0xff] %vm360_vm1, %v1931_v60  ;;  %2501 = vmatpush.msrb.mxu0 %v2035_v48  ;;  %7919 = vmatpush.msrb.mxu1 %v2035_v48  ;;  %v1951_v54 = vsel %vm12971_vm9, %v9200_v58, %v1931_v60 }
 0x3c0   : > { %2475 = vmatpush.msrb.mxu2 %v1637_v40  ;;  %v2273_v40 = vld [vmem:[#allocation3 + $0x130] sm:$0xff] }
 0x3c1   : > { %2502 = vmatpush.msrb.mxu0 %v2033_v57  ;;  %7920 = vmatpush.msrb.mxu1 %v2033_v57 }
 0x3c2   : > { %2476 = vmatpush.msrb.mxu2 %v1635_v41 }
 0x3c3   : > { %v1863_v33 = vpop.permute.xlu0 %1862  ;;  %2503 = vmatpush.msrb.mxu0 %v2031_v46  ;;  %7921 = vmatpush.msrb.mxu1 %v2031_v46  ;;  %v2300_v60 = vld [vmem:[#allocation3 + $0x208] sm:$0xff] }
 0x3c4   : > { %1898 = vst.msk [vmem:[#allocation3 + $0x1c0] sm:$0xff] %vm360_vm1, %v1863_v33  ;;  %v9494_v45 = vpop.permute.xlu2 %2166  ;;  %2402 = vmatmul.f32.gmra.mxu0 %v9479_v7  ;;  %2477 = vmatpush.msrb.mxu2 %v1633_v25  ;;  %v1875_v58 = vsel %vm662_vm10, %v9237_v61, %v1863_v33  ;;  %v2327_v61 = vld [vmem:[#allocation3 + $0x2e0] sm:$0xff]  ;;  %v2270_v25 = vld [vmem:[#allocation3 + $0x118] sm:$0xff] }
 0x3c5   : > { %2504 = vmatpush.msrb.mxu0 %v1957_v21  ;;  %7922 = vmatpush.msrb.mxu1 %v1957_v21  ;;  %v2294_v33 = vld [vmem:[#allocation3 + $0x1d8] sm:$0xff]  ;;  %v2267_v21 = vld [vmem:[#allocation3 + $0x100] sm:$0xff] }
 0x3c6   : > { %v1857_v30 = vpop.permute.xlu1 %1856  ;;  %2431 = vmatmul.f32.gmra.mxu1 %v9489_v18  ;;  %2478 = vmatpush.msrb.mxu2 %v1631_v10  ;;  %v2297_v41 = vld [vmem:[#allocation3 + $0x1f0] sm:$0xff]  ;;  %v2264_v10 = vld [vmem:[#allocation3 + $0xe8] sm:$0xff] }
 0x3c7   : > { %1895 = vst.msk [vmem:[#allocation3 + $0x1a8] sm:$0xff] %vm360_vm1, %v1857_v30  ;;  %2505 = vmatpush.msrb.mxu0 %v1955_v26  ;;  %7923 = vmatpush.msrb.mxu1 %v1955_v26  ;;  %v1873_v5 = vsel %vm662_vm10, %v9077_v37, %v1857_v30  ;;  %v7775_v30 = vld [vmem:[%s12948_s1 + $0xa0] sm:$0xff] }
 0x3c8   : > { %2479 = vmatpush.msrb.mxu2 %v1568_v22 }
 0x3c9   : > { %2506 = vmatpush.msrb.mxu0 %v1953_v44  ;;  %7924 = vmatpush.msrb.mxu1 %v1953_v44  ;;  %v2261_v44 = vld [vmem:[#allocation3 + $0xd0] sm:$0xff] }
 0x3ca   : > { %2480 = vmatpush.msrb.mxu2 %v1565_v34  ;;  %v2285_v34 = vld [vmem:[#allocation3 + $0x190] sm:$0xff] }
 0x3cb   : > { %v2187_v13 = vpop.permute.xlu0 %2186  ;;  %2507 = vmatpush.msrb.mxu0 %v1951_v54  ;;  %7925 = vmatpush.msrb.mxu1 %v1951_v54  ;;  %v2291_v51 = vld [vmem:[#allocation3 + $0x1c0] sm:$0xff]  ;;  %v2258_v54 = vld [vmem:[#allocation3 + $0xb8] sm:$0xff] }
 0x3cc   : > { %v2196_v9 = vsel %vm12969_vm5, %v9419_v38, %v2187_v13  ;;  %v9524_v19 = vpop.permute.xlu2 %2182  ;;  %2405 = vmatmul.f32.gmra.mxu0 %v9510_v29  ;;  %2481 = vmatpush.msrb.mxu2 %v1562_v49  ;;  %v2321_v38 = vld [vmem:[#allocation3 + $0x2b0] sm:$0xff]  ;;  %v2252_v49 = vld [vmem:[#allocation3 + $0x88] sm:$0xff] }
 0x3cd   : > { %2218 = vst.msk [vmem:[#allocation3 + $0x340] sm:$0xff] %vm360_vm1, %v9524_v19  ;;  %2508 = vmatpush.msrb.mxu0 %v1877_v32  ;;  %7926 = vmatpush.msrb.mxu1 %v1877_v32  ;;  %v2195_v0 = vsel %vm12969_vm5, %v9456_v6, %v9524_v19  ;;  %v7778_v32 = vld [vmem:[%s12948_s1 + $0xb8] sm:$0xff] }
 0x3ce   : > { %v2179_v23 = vpop.permute.xlu1 %2178  ;;  %2450 = vmatpush.msra.mxu3 %v2196_v9  ;;  %2434 = vmatmul.f32.gmra.mxu1 %v9517_v8  ;;  %v2288_v26 = vld [vmem:[#allocation3 + $0x1a8] sm:$0xff]  ;;  %v2249_v9 = vld [vmem:[#allocation3 + $0x70] sm:$0xff]  ;;  %v2246_v19 = vld [vmem:[#allocation3 + $0x58] sm:$0xff] }
 0x3cf   : > { %v2194_v43 = vsel %vm12969_vm5, %v2179_v23, %v9456_v6  ;;  %2482 = vmatpush.msrb.mxu2 %v1559_v59  ;;  %2509 = vmatpush.msrb.mxu0 %v1875_v58  ;;  %v7772_v6 = vld [vmem:[%s12948_s1 + $0x88] sm:$0xff]  ;;  %v2237_v23 = vld [vmem:[#allocation3 + $0x10] sm:$0xff] }
 0x3d0   : > { %7927 = vmatpush.msrb.mxu1 %v1875_v58  ;;  %2483 = vmatmul.f32.vlgmr.msrb.gmra.mxu2 %v9402_v63  ;;  %v2240_v58 = vld [vmem:[#allocation3 + $0x28] sm:$0xff] }
 0x3d1   : > { %2583 = vmatpush.msra.mxu2 %v2330_v24  ;;  %2451 = vmatpush.msra.mxu3 %v2194_v43 }
 0x3d2   : > { %2510 = vmatpush.msrb.mxu0 %v1873_v5  ;;  %7928 = vmatpush.msrb.mxu1 %v1873_v5 }
 0x3d3   : > { %v2173_v28 = vpop.permute.xlu0 %2172  ;;  %2584 = vmatpush.msra.mxu2 %v2327_v61 }
 0x3d4   : > { %2511 = vmatpush.msrb.mxu0 %v1871_v56  ;;  %7929 = vmatpush.msrb.mxu1 %v1871_v56  ;;  %v2339_v27 = vld [vmem:[#allocation3 + $0x340] sm:$0xff]  ;;  %v9598_v61 = vpop.permute.xlu2 %2350 }
 0x3d5   : > { %2585 = vmatpush.msra.mxu2 %v2324_v62  ;;  %2512 = vmatmul.f32.vlgmr.msrb.gmra.mxu0 %v9413_v35 }
 0x3d6   : > { %v2175_v31 = vpop.permute.xlu1 %2174  ;;  %2518 = vmatmul.f32.vlgmr.msrb.gmra.mxu1 %v9489_v18 }
 0x3d7   : > { %v2192_v37 = vsel %vm12969_vm5, %v2173_v28, %v2175_v31  ;;  %2586 = vmatpush.msra.mxu2 %v2321_v38 }
 0x3d8   : > { %2486 = vmatmul.f32.gmra.mxu2 %v9440_v1  ;;  %2452 = vmatpush.msra.mxu3 %v2192_v37 }
 0x3d9   : > { %2587 = vmatpush.msra.mxu2 %v2318_v20 }
 0x3db   : > { %v2169_v11 = vpop.permute.xlu0 %2168  ;;  %2588 = vmatpush.msra.mxu2 %v2315_v39 }
 0x3dc   : > { %v2190_v47 = vsel %vm12969_vm5, %v9494_v45, %v2169_v11  ;;  %v9609_v28 = vpop.permute.xlu2 %2365 }
 0x3dd   : > { %2589 = vmatpush.msra.mxu2 %v2312_v53  ;;  %2453 = vmatpush.msra.mxu3 %v2190_v47 }
 0x3de   : > { %v2189_v3 = vpop.permute.xlu1 %2188  ;;  %7783 = vmatmul.msk.f32.vlgmr.msra.gmra.mxu3 %vm13070_vm12, %v9547_v36  ;;  %2515 = vmatmul.f32.gmra.mxu0 %v9451_v14 }
 0x3df   : > { %v2197_v2 = vsel %vm12969_vm5, %v2187_v13, %v2189_v3  ;;  %2221 = vst.msk [vmem:[#allocation3 + $0x358] sm:$0xff] %vm360_vm1, %v2189_v3  ;;  %2590 = vmatpush.msra.mxu2 %v2309_v15  ;;  %2554 = vmatpush.msrb.mxu3 %v2282_v55  ;;  %v2255_v13 = vld [vmem:[#allocation3 + $0xa0] sm:$0xff] }
 0x3e0   : > { %2489 = vmatmul.f32.gmra.mxu2 %v9479_v7  ;;  %2537 = vmatpush.msra.mxu1 %v2197_v2 }
 0x3e1   : > { %2591 = vmatpush.msra.mxu2 %v2306_v12  ;;  %2555 = vmatpush.msrb.mxu3 %v2279_v52 }
 0x3e2   : > { %2521 = vmatmul.f32.gmra.mxu1 %v9517_v8 }
 0x3e3   : > { %v2177_v16 = vpop.permute.xlu0 %2176  ;;  %2592 = vmatpush.msra.mxu2 %v2303_v17  ;;  %2538 = vmatpush.msra.mxu1 %v2195_v0 }
 0x3e4   : > { %v2193_v48 = vsel %vm12969_vm5, %v2175_v31, %v2177_v16  ;;  %2215 = vst.msk [vmem:[#allocation3 + $0x328] sm:$0xff] %vm360_vm1, %v2177_v16  ;;  %2556 = vmatpush.msrb.mxu3 %v2276_v50  ;;  %v9620_v55 = vpop.permute.xlu2 %2707 }
 0x3e5   : > { %2593 = vmatpush.msra.mxu2 %v2300_v60  ;;  %2539 = vmatpush.msra.mxu1 %v2193_v48  ;;  %13080 = vst [vmem:[#allocation17_spill] sm:$0xff] %v9620_v55 }
 0x3e6   : > { %v2171_v57 = vpop.permute.xlu1 %2170  ;;  %v2342_v42 = vld [vmem:[#allocation3 + $0x358] sm:$0xff]  ;;  %2557 = vmatpush.msrb.mxu3 %v2273_v40 }
 0x3e7   : > { %v2191_v46 = vsel %vm12969_vm5, %v2169_v11, %v2171_v57  ;;  %2212 = vst.msk [vmem:[#allocation3 + $0x310] sm:$0xff] %vm360_vm1, %v2171_v57  ;;  %2624 = vmatpush.msra.mxu0 %v2342_v42  ;;  %2594 = vmatpush.msra.mxu2 %v2297_v41  ;;  %vm13071_vm5 = vmmov %vm13070_vm12  ;;  %v9613_v11 = vstv %s7795_s19 }
 0x3e8   : > { %7784 = vmatmul.msk.f32.gmra.mxu3 %vm13070_vm12, %v7772_v6  ;;  %2492 = vmatmul.f32.gmra.mxu2 %v9510_v29  ;;  %vm13072_vm12 = vmmov %vm13071_vm5 }
 0x3e9   : > { %2625 = vmatpush.msra.mxu0 %v2339_v27  ;;  %2558 = vmatpush.msrb.mxu3 %v2270_v25  ;;  %vm13073_vm4 = vmmov %vm13071_vm5 }
 0x3ea   : > { %2595 = vmatpush.msra.mxu2 %v2294_v33  ;;  %2540 = vmatpush.msra.mxu1 %v2191_v46  ;;  %vm13075_vm9 = vmmov %vm13073_vm4 }
 0x3eb   : > { %v2336_v45 = vld [vmem:[#allocation3 + $0x328] sm:$0xff]  ;;  %2559 = vmatpush.msrb.mxu3 %v2267_v21  ;;  %7787 = vmatmul.msk.f32.vlgmr.msra.gmra.mxu1 %vm13071_vm5, %v9547_v36 }
 0x3ec   : > { %2626 = vmatpush.msra.mxu0 %v2336_v45  ;;  %2596 = vmatpush.msra.mxu2 %v2291_v51  ;;  %v9630_v45 = vpop.permute.xlu2 %2713  ;;  %v7808_v51 = vld [vmem:[%s12949_s2 + $0x40] sm:$0xff] }
 0x3ed   : > { %2560 = vmatpush.msrb.mxu3 %v2264_v10  ;;  %13082 = vst [vmem:[#allocation13_spill] sm:$0xff] %v9630_v45 }
 0x3ee   : > { %v2333_v22 = vld [vmem:[#allocation3 + $0x310] sm:$0xff]  ;;  %2597 = vmatpush.msra.mxu2 %v2288_v26  ;;  %v9600_v4 = vpop.permute.xlu1 %2360 }
 0x3ef   : > { %2627 = vmatpush.msra.mxu0 %v2333_v22  ;;  %2561 = vmatpush.msrb.mxu3 %v2261_v44 }
 0x3f0   : > { %2598 = vmatpush.msra.mxu2 %v2285_v34  ;;  %7785 = vmatmul.msk.f32.gmra.mxu3 %vm13072_vm12, %v7775_v30  ;;  %vm13074_vm12 = vmmov %vm13073_vm4 }
 0x3f1   : > { %2562 = vmatpush.msrb.mxu3 %v2258_v54  ;;  %2599 = vmatmul.f32.vlgmr.msra.gmra.mxu2 %v9413_v35  ;;  %v2243_v35 = vld [vmem:[#allocation3 + $0x40] sm:$0xff] }
 0x3f2   : > { %7791 = vmatmul.msk.f32.vlgmr.msra.gmra.mxu0 %vm13071_vm5, %v9547_v36  ;;  %vm13076_vm5 = vmmov %vm13073_vm4 }
 0x3f3   : > { %2563 = vmatpush.msrb.mxu3 %v2255_v13  ;;  %7788 = vmatmul.msk.f32.gmra.mxu1 %vm13073_vm4, %v7772_v6 }
 0x3f5   : > { %2564 = vmatpush.msrb.mxu3 %v2252_v49 }
 0x3f6   : > { %v2706_v62 = vpop.permute.xlu1 %2705 }
 0x3f7   : > { %2565 = vmatpush.msrb.mxu3 %v2249_v9 }
 0x3f8   : > { %7786 = vmatmul.msk.f32.gmra.mxu3 %vm13074_vm12, %v7778_v32  ;;  %vm13077_vm12 = vmmov %vm13073_vm4 }
 0x3f9   : > { %2566 = vmatpush.msrb.mxu3 %v2246_v19  ;;  %2602 = vmatmul.f32.gmra.mxu2 %v9451_v14 }
 0x3fa   : > { %7792 = vmatmul.msk.f32.gmra.mxu0 %vm13075_vm9, %v7772_v6  ;;  %vm13078_vm9 = vmmov %vm13073_vm4 }
 0x3fb   : > { %2567 = vmatpush.msrb.mxu3 %v2243_v35  ;;  %7789 = vmatmul.msk.f32.gmra.mxu1 %vm13076_vm5, %v7775_v30 }
 0x3fd   : > { %2568 = vmatpush.msrb.mxu3 %v2240_v58 }
 0x3fe   : > { %v2712_v16 = vpop.permute.xlu1 %2711 }
 0x3ff   : > { %2569 = vmatpush.msrb.mxu3 %v2237_v23 }
 0x400   : > { %2570 = vmatmul.f32.vlgmr.msrb.gmra.mxu3 %v9402_v63 }
 0x401   : > { %2605 = vmatmul.f32.gmra.mxu2 %v9489_v18 }
 0x402   : > { %7793 = vmatmul.msk.f32.gmra.mxu0 %vm13073_vm4, %v7775_v30  ;;  %v9637_v30 = vsel %vm662_vm10, %v2706_v62, %v9620_v55 }
 0x403   : > { %7790 = vmatmul.msk.f32.gmra.mxu1 %vm13077_vm12, %v7778_v32  ;;  %13084 = vst [vmem:[#allocation18_spill] sm:$0xff] %v9637_v30 }
 0x406   : > { %v2718_v35 = vpop.permute.xlu1 %2717 }
 0x408   : > { %2573 = vmatmul.f32.gmra.mxu3 %v9440_v1 }
 0x409   : > { %2608 = vmatmul.f32.gmra.mxu2 %v9517_v8  ;;  %v9604_v8 = vpop.permute.xlu0 %2355 }
 0x40a   : > { %7794 = vmatmul.msk.f32.gmra.mxu0 %vm13078_vm9, %v7778_v32 }
 0x410   : > { %2576 = vmatmul.f32.gmra.mxu3 %v9479_v7 }
 0x411   : > { %v2704_v31 = vpop.permute.xlu0 %2703 }
 0x412   : > { %v9618_v15 = vsel %vm662_vm10, %v2704_v31, %v2706_v62 }
 0x413   : > { %13079 = vst [vmem:[#allocation10_spill] sm:$0xff] %v9618_v15 }
 0x418   : > { %2579 = vmatmul.f32.gmra.mxu3 %v9510_v29 }
 0x419   : > { %v2710_v60 = vpop.permute.xlu0 %2709 }
 0x41a   : > { %v9640_v44 = vsel %vm662_vm10, %v2710_v60, %v2712_v16 }
 0x41b   : > { %13085 = vst [vmem:[#allocation16_spill] sm:$0xff] %v9640_v44 }
 0x421   : > { %v2716_v58 = vpop.permute.xlu0 %2715 }
 0x422   : > { %v9660_v31 = vsel %vm662_vm10, %v2716_v58, %v2718_v35 }
 0x423   : > { %13087 = vst [vmem:[#allocation19_spill] sm:$0xff] %v9660_v31 }
 0x431   : > { %v2397_v43 = vpop.f32.mrf.mxu0 }
 0x432   : > { %v2398_v29 = vadd.f32 %v2397_v43, %v9598_v61 }
 0x433   : > { %v2426_v14 = vpop.f32.mrf.mxu1 }
 0x434   : > { %v2427_v37 = vadd.f32 %v2426_v14, %v2398_v29 }
 0x439   : > { %v2400_v24 = vpop.f32.mrf.mxu0 }
 0x43a   : > { %v2401_v2 = vadd.f32 %v2400_v24, %v9604_v8  ;;  %v9652_v24 = vsel %vm662_vm10, %v2712_v16, %v9630_v45 }
 0x43b   : > { %v2429_v59 = vpop.f32.mrf.mxu1  ;;  %13086 = vst [vmem:[#allocation12_spill] sm:$0xff] %v9652_v24 }
 0x43c   : > { %v2430_v6 = vadd.f32 %v2429_v59, %v2401_v2 }
 0x441   : > { %v2403_v5 = vpop.f32.mrf.mxu0 }
 0x442   : > { %v2404_v33 = vadd.f32 %v2403_v5, %v9600_v4 }
 0x443   : > { %v2432_v63 = vpop.f32.mrf.mxu1 }
 0x444   : > { %v2433_v9 = vadd.f32 %v2432_v63, %v2404_v33 }
 0x449   : > { %v9606_v7 = vpop.f32.mrf.mxu0 }
 0x44a   : > { %v2407_v63 = vadd.f32 %v9606_v7, %v9609_v28 }
 0x44b   : > { %v9596_v18 = vpop.f32.mrf.mxu1 }
 0x452   : > { %v2513_v36 = vpop.f32.mrf.mxu0 }
 0x453   : > { %v9602_v1 = vpop.f32.mrf.mxu1  ;;  %v2484_v56 = vpop.f32.mrf.mxu2 }
 0x454   : > { %v2485_v53 = vadd.f32 %v2484_v56, %v9598_v61 }
 0x456   : > { %v2514_v52 = vadd.f32 %v2513_v36, %v2485_v53 }
 0x45b   : > { %v2487_v20 = vpop.f32.mrf.mxu2  ;;  %v2516_v27 = vpop.f32.mrf.mxu0 }
 0x45c   : > { %v2488_v57 = vadd.f32 %v2487_v20, %v9604_v8 }
 0x45e   : > { %v2517_v22 = vadd.f32 %v2516_v27, %v2488_v57 }
 0x45f   : > { %v9611_v38 = vpop.f32.mrf.mxu1 }
 0x461   : > { %v2455_v39 = vpop.f32.mrf.mxu3 }
 0x462   : > { %v2456_v47 = vadd.f32 %v2455_v39, %v2427_v37  ;;  %v9664_v39 = vpop.permute.xlu2 %2719 }
 0x463   : > { %v2490_v42 = vpop.f32.mrf.mxu2  ;;  %13088 = vst [vmem:[#allocation15_spill] sm:$0xff] %v9664_v39  ;;  %v9676_v16 = vsel %vm662_vm10, %v2718_v35, %v9664_v39 }
 0x464   : > { %vm2642_vm5 = vcmp.gt.f32.partialorder %v2456_v47, 0.0  ;;  %v2655_v3 = vmul.f32 %v9613_v11, %v2456_v47  ;;  %v2491_v23 = vadd.f32 %v2490_v42, %v9600_v4  ;;  %13089 = vst [vmem:[#allocation11_spill] sm:$0xff] %v9676_v16 }
 0x466   : > { %v2667_v12 = vsel %vm2642_vm5, %v2456_v47, %v2655_v3  ;;  %v2520_v37 = vadd.f32 %v9602_v1, %v2491_v23  ;;  %v2436_v3 = vadd.f32 %v9596_v18, %v2407_v63 }
 0x467   : > { %v2679_v17 = vsel %vm8787_vm0, %v2667_v12, 0.0 }
 0x468   : > { %v2747_v50 = vadd.f32 %v9618_v15, %v2679_v17  ;;  %v2542_v48 = vpop.f32.mrf.mxu1 }
 0x469   : > { %v2543_v40 = vadd.f32 %v2542_v48, %v2514_v52  ;;  %v2722_v48 = vpop.permute.xlu0 %2721 }
 0x46a   : > { %2771 = vrot.lane.b32.xlu0 %v2747_v50, %s8004_s12  ;;  %v2724_v50 = vpop.permute.xlu1 %2723 }
 0x46b   : > { %vm2643_vm4 = vcmp.gt.f32.partialorder %v2543_v40, 0.0  ;;  %v2656_v41 = vmul.f32 %v9613_v11, %v2543_v40  ;;  %v2458_v46 = vpop.f32.mrf.mxu3  ;;  %v2493_v5 = vpop.f32.mrf.mxu2  ;;  %v9682_v57 = vsel %vm662_vm10, %v2722_v48, %v2724_v50 }
 0x46c   : > { %v2459_v25 = vadd.f32 %v2458_v46, %v2430_v6  ;;  %v2494_v12 = vadd.f32 %v2493_v5, %v9609_v28  ;;  %13090 = vst [vmem:[#allocation14_spill] sm:$0xff] %v9682_v57 }
 0x46d   : > { %v2668_v21 = vsel %vm2643_vm4, %v2543_v40, %v2656_v41 }
 0x46e   : > { %v2680_v10 = vsel %vm8771_vm11, %v2668_v21, 0.0  ;;  %vm2645_vm12 = vcmp.gt.f32.partialorder %v2459_v25, 0.0  ;;  %v2658_v26 = vmul.f32 %v9613_v11, %v2459_v25  ;;  %v2523_v42 = vadd.f32 %v9611_v38, %v2494_v12 }
 0x46f   : > { %v2748_v34 = vadd.f32 %v9637_v30, %v2680_v10  ;;  %v2629_v46 = vpop.f32.mrf.mxu0  ;;  %v9689_v10 = vpop.permute.xlu2 %2725 }
 0x470   : > { %v2670_v54 = vsel %vm2645_vm12, %v2459_v25, %v2658_v26  ;;  %v2545_v13 = vpop.f32.mrf.mxu1  ;;  %13091 = vst [vmem:[#allocation20_spill] sm:$0xff] %v9689_v10 }
 0x471   : > { %v2682_v49 = vsel %vm8787_vm0, %v2670_v54, 0.0  ;;  %v2546_v32 = vadd.f32 %v2545_v13, %v2517_v22  ;;  %2773 = vrot.lane.b32.xlu1 %v2748_v34, %s8004_s12  ;;  %v9697_v54 = vsel %vm662_vm10, %v2724_v50, %v9689_v10 }
 0x472   : > { %v2750_v19 = vadd.f32 %v9640_v44, %v2682_v49  ;;  %13092 = vst [vmem:[#allocation21_spill] sm:$0xff] %v9697_v54 }
 0x473   : > { %vm2646_vm9 = vcmp.gt.f32.partialorder %v2546_v32, 0.0  ;;  %v2659_v14 = vmul.f32 %v9613_v11, %v2546_v32  ;;  %v2461_v59 = vpop.f32.mrf.mxu3 }
 0x474   : > { %v2462_v43 = vadd.f32 %v2461_v59, %v2433_v9  ;;  %2777 = vrot.lane.b32.xlu0 %v2750_v19, %s8004_s12  ;;  %v2600_v40 = vpop.f32.mrf.mxu2 }
 0x475   : > { %v2671_v56 = vsel %vm2646_vm9, %v2546_v32, %v2659_v14 }
 0x476   : > { %v2683_v29 = vsel %vm8771_vm11, %v2671_v56, 0.0  ;;  %vm2648_vm5 = vcmp.gt.f32.partialorder %v2462_v43, 0.0  ;;  %v2661_v62 = vmul.f32 %v9613_v11, %v2462_v43 }
 0x477   : > { %v2751_v20 = vadd.f32 %v9652_v24, %v2683_v29  ;;  %v2632_v58 = vpop.f32.mrf.mxu0 }
 0x478   : > { %v2673_v36 = vsel %vm2648_vm5, %v2462_v43, %v2661_v62  ;;  %v2548_v47 = vpop.f32.mrf.mxu1 }
 0x479   : > { %v2685_v7 = vsel %vm8787_vm0, %v2673_v36, 0.0  ;;  %v2549_v53 = vadd.f32 %v2548_v47, %v2520_v37  ;;  %2779 = vrot.lane.b32.xlu1 %v2751_v20, %s8004_s12 }
 0x47a   : > { %v2753_v2 = vadd.f32 %v9660_v31, %v2685_v7 }
 0x47b   : > { %vm2649_vm4 = vcmp.gt.f32.partialorder %v2549_v53, 0.0  ;;  %v2662_v1 = vmul.f32 %v9613_v11, %v2549_v53  ;;  %v2464_v52 = vpop.f32.mrf.mxu3 }
 0x47c   : > { %v2465_v17 = vadd.f32 %v2464_v52, %v2436_v3  ;;  %2783 = vrot.lane.b32.xlu0 %v2753_v2, %s8004_s12  ;;  %v2603_v19 = vpop.f32.mrf.mxu2 }
 0x47d   : > { %v2674_v60 = vsel %vm2649_vm4, %v2549_v53, %v2662_v1 }
 0x47e   : > { %v2686_v18 = vsel %vm8771_vm11, %v2674_v60, 0.0  ;;  %vm2651_vm12 = vcmp.gt.f32.partialorder %v2465_v17, 0.0  ;;  %v2664_v6 = vmul.f32 %v9613_v11, %v2465_v17 }
 0x47f   : > { %v2754_v41 = vadd.f32 %v9676_v16, %v2686_v18  ;;  %v2635_v36 = vpop.f32.mrf.mxu0 }
 0x480   : > { %v2676_v27 = vsel %vm2651_vm12, %v2465_v17, %v2664_v6  ;;  %v2551_v25 = vpop.f32.mrf.mxu1 }
 0x481   : > { %v2688_v33 = vsel %vm8787_vm0, %v2676_v27, 0.0  ;;  %v2552_v21 = vadd.f32 %v2551_v25, %v2523_v42  ;;  %2785 = vrot.lane.b32.xlu1 %v2754_v41, %s8004_s12 }
 0x482   : > { %v2756_v26 = vadd.f32 %v9682_v57, %v2688_v33 }
 0x483   : > { %vm2652_vm9 = vcmp.gt.f32.partialorder %v2552_v21, 0.0  ;;  %v2665_v22 = vmul.f32 %v9613_v11, %v2552_v21  ;;  %v2571_v34 = vpop.f32.mrf.mxu3 }
 0x484   : > { %v2572_v38 = vadd.f32 %v2571_v34, %v9598_v61  ;;  %2789 = vrot.lane.b32.xlu0 %v2756_v26, %s8004_s12  ;;  %v2606_v62 = vpop.f32.mrf.mxu2 }
 0x485   : > { %v2677_v13 = vsel %vm2652_vm9, %v2552_v21, %v2665_v22 }
 0x486   : > { %v2689_v49 = vsel %vm8771_vm11, %v2677_v13, 0.0  ;;  %v2601_v32 = vadd.f32 %v2600_v40, %v2572_v38 }
 0x487   : > { %v2757_v9 = vadd.f32 %v9697_v54, %v2689_v49  ;;  %v2638_v48 = vpop.f32.mrf.mxu0 }
 0x488   : > { %v2630_v35 = vadd.f32 %v2629_v46, %v2601_v32 }
 0x489   : > { %2791 = vrot.lane.b32.xlu1 %v2757_v9, %s8004_s12 }
 0x48a   : > { %vm2644_vm5 = vcmp.gt.f32.partialorder %v2630_v35, 0.0  ;;  %v2657_v61 = vmul.f32 %v9613_v11, %v2630_v35 }
 0x48b   : > { %v2574_v23 = vpop.f32.mrf.mxu3 }
 0x48c   : > { %v2669_v14 = vsel %vm2644_vm5, %v2630_v35, %v2657_v61  ;;  %v2575_v59 = vadd.f32 %v2574_v23, %v9604_v8  ;;  %v2609_v52 = vpop.f32.mrf.mxu2  ;;  %vm13110_vm5 = vcmask 883712  }
 0x48d   : > { %v2681_v5 = vsel %vm8836_vm13, %v2669_v14, 0.0 }
 0x48e   : > { %v2604_v56 = vadd.f32 %v2603_v19, %v2575_v59  ;;  %v2749_v63 = vadd.f32 %v9620_v55, %v2681_v5 }
 0x490   : > { %v2633_v29 = vadd.f32 %v2632_v58, %v2604_v56  ;;  %2775 = vrot.lane.b32.xlu2 %v2749_v63, %s8004_s12 }
 0x492   : > { %vm2647_vm4 = vcmp.gt.f32.partialorder %v2633_v29, 0.0  ;;  %v2660_v37 = vmul.f32 %v9613_v11, %v2633_v29 }
 0x493   : > { %v2577_v20 = vpop.f32.mrf.mxu3 }
 0x494   : > { %v2672_v47 = vsel %vm2647_vm4, %v2633_v29, %v2660_v37  ;;  %v2578_v7 = vadd.f32 %v2577_v20, %v9600_v4  ;;  %vm13111_vm4 = vmmov %vm13110_vm5 }
 0x495   : > { %v2684_v8 = vsel %vm8836_vm13, %v2672_v47, 0.0 }
 0x496   : > { %v2607_v53 = vadd.f32 %v2606_v62, %v2578_v7  ;;  %v2752_v3 = vadd.f32 %v9630_v45, %v2684_v8 }
 0x498   : > { %v2636_v2 = vadd.f32 %v2635_v36, %v2607_v53  ;;  %2781 = vrot.lane.b32.xlu2 %v2752_v3, %s8004_s12 }
 0x49a   : > { %vm2650_vm12 = vcmp.gt.f32.partialorder %v2636_v2, 0.0  ;;  %v2663_v12 = vmul.f32 %v9613_v11, %v2636_v2 }
 0x49b   : > { %v2580_v1 = vpop.f32.mrf.mxu3 }
 0x49c   : > { %v2675_v17 = vsel %vm2650_vm12, %v2636_v2, %v2663_v12  ;;  %v2581_v50 = vadd.f32 %v2580_v1, %v9609_v28  ;;  %vm13112_vm12 = vcmask 1039360  }
 0x49d   : > { %v2687_v4 = vsel %vm8836_vm13, %v2675_v17, 0.0 }
 0x49e   : > { %v2610_v60 = vadd.f32 %v2609_v52, %v2581_v50  ;;  %v2755_v40 = vadd.f32 %v9664_v39, %v2687_v4 }
 0x4a0   : > { %v2639_v18 = vadd.f32 %v2638_v48, %v2610_v60  ;;  %2787 = vrot.lane.b32.xlu2 %v2755_v40, %s8004_s12 }
 0x4a2   : > { %vm2653_vm9 = vcmp.gt.f32.partialorder %v2639_v18, 0.0  ;;  %v2666_v6 = vmul.f32 %v9613_v11, %v2639_v18 }
 0x4a4   : > { %v2678_v42 = vsel %vm2653_vm9, %v2639_v18, %v2666_v6  ;;  %vm13113_vm9 = vmmov %vm13111_vm4 }
 0x4a5   : > { %v2690_v41 = vsel %vm8836_vm13, %v2678_v42, 0.0 }
 0x4a6   : > { %v2758_v46 = vadd.f32 %v9689_v10, %v2690_v41 }
 0x4a8   : > { %2793 = vrot.lane.b32.xlu2 %v2758_v46, %s8004_s12 }
 0x4dc   : > { %v2772_v28 = vpop.permute.xlu0 %2771 }
 0x4dd   : > { %2815 = vst.msk [vmem:[#allocation2] sm:$0xff] %vm1544_vm7, %v2772_v28 }
 0x4e3   : > { %v2774_v27 = vpop.permute.xlu1 %2773 }
 0x4e4   : > { %v9728_v25 = vsel %vm1523_vm14, %v2772_v28, %v2774_v27  ;;  %v9730_v33 = vld [vmem:[#allocation2] sm:$0xff] }
 0x4e5   : > { %2816 = vst [vmem:[#allocation2 + $0x8] sm:$0xff] %v9728_v25  ;;  %2875 = vrot.lane.b32.xlu0 %v9730_v33, %s7995_s25  ;;  %3195 = vrot.lane.b32.xlu2 %v9730_v33, %s7999_s29 }
 0x4e6   : > { %v2778_v11 = vpop.permute.xlu0 %2777  ;;  %3115 = vrot.lane.b32.xlu1 %v9730_v33, %s7998_s28 }
 0x4e7   : > { %2818 = vst.msk [vmem:[#allocation2 + $0x18] sm:$0xff] %vm1544_vm7, %v2778_v11 }
 0x4ea   : > { %v2776_v21 = vpop.permute.xlu2 %2775 }
 0x4eb   : > { %v2796_v26 = vsel %vm1523_vm14, %v2774_v27, %v2776_v21  ;;  %v2780_v22 = vpop.permute.xlu1 %2779 }
 0x4ec   : > { %2817 = vst.msk [vmem:[#allocation2 + $0x10] sm:$0xff] %vm1547_vm15, %v2796_v26  ;;  %v9743_v34 = vsel %vm1523_vm14, %v2778_v11, %v2780_v22 }
 0x4ed   : > { %2819 = vst [vmem:[#allocation2 + $0x20] sm:$0xff] %v9743_v34  ;;  %2955 = vrot.lane.b32.xlu0 %v9730_v33, %s7996_s26 }
 0x4ee   : > { %v2784_v38 = vpop.permute.xlu0 %2783  ;;  %v9748_v13 = vld [vmem:[#allocation2 + $0x18] sm:$0xff] }
 0x4ef   : > { %2821 = vst.msk [vmem:[#allocation2 + $0x30] sm:$0xff] %vm1544_vm7, %v2784_v38  ;;  %3361 = vrot.lane.b32.xlu2 %v9748_v13, %s8001_s5  ;;  %3281 = vrot.lane.b32.xlu1 %v9748_v13, %s8002_s6 }
 0x4f2   : > { %v2782_v49 = vpop.permute.xlu2 %2781 }
 0x4f3   : > { %v2798_v32 = vsel %vm1523_vm14, %v2780_v22, %v2782_v49  ;;  %v2786_v9 = vpop.permute.xlu1 %2785  ;;  %v2829_v19 = vld [vmem:[#allocation2 + $0x10] sm:$0xff] }
 0x4f4   : > { %2820 = vst.msk [vmem:[#allocation2 + $0x28] sm:$0xff] %vm1547_vm15, %v2798_v32  ;;  %v9758_v35 = vsel %vm1523_vm14, %v2784_v38, %v2786_v9  ;;  %v9825_v36 = vld [vmem:[#allocation2 + $0x10] sm:$0xff] }
 0x4f5   : > { %2822 = vst [vmem:[#allocation2 + $0x38] sm:$0xff] %v9758_v35  ;;  %3355 = vrot.lane.b32.xlu0 %v9730_v33, %s8001_s5 }
 0x4f6   : > { %v2790_v58 = vpop.permute.xlu0 %2789  ;;  %v9763_v61 = vld [vmem:[#allocation2 + $0x30] sm:$0xff]  ;;  %2841 = vst.msk [vmem:[#allocation3 + $0x10] sm:$0xff] %vm360_vm1, %v2829_v19 }
 0x4f7   : > { %2824 = vst.msk [vmem:[#allocation2 + $0x48] sm:$0xff] %vm1544_vm7, %v2790_v58  ;;  %3041 = vrot.lane.b32.xlu2 %v9748_v13, %s7997_s27  ;;  %3367 = vrot.lane.b32.xlu1 %v9763_v61, %s8001_s5 }
 0x4fa   : > { %v2788_v23 = vpop.permute.xlu2 %2787 }
 0x4fb   : > { %v2800_v14 = vsel %vm1523_vm14, %v2786_v9, %v2788_v23  ;;  %v2792_v59 = vpop.permute.xlu1 %2791  ;;  %v2832_v5 = vld [vmem:[#allocation2 + $0x28] sm:$0xff] }
 0x4fc   : > { %2823 = vst.msk [vmem:[#allocation2 + $0x40] sm:$0xff] %vm1547_vm15, %v2800_v14  ;;  %v9774_v56 = vsel %vm1523_vm14, %v2790_v58, %v2792_v59  ;;  %v9863_v53 = vld [vmem:[#allocation2 + $0x28] sm:$0xff] }
 0x4fd   : > { %2825 = vst [vmem:[#allocation2 + $0x50] sm:$0xff] %v9774_v56  ;;  %3035 = vrot.lane.b32.xlu0 %v9730_v33, %s7997_s27 }
 0x4fe   : > { %2844 = vst.msk [vmem:[#allocation3 + $0x28] sm:$0xff] %vm360_vm1, %v2832_v5  ;;  %v9799_v20 = vld [vmem:[#allocation2 + $0x48] sm:$0xff] }
 0x4ff   : > { %3121 = vrot.lane.b32.xlu2 %v9748_v13, %s7998_s28  ;;  %3047 = vrot.lane.b32.xlu1 %v9763_v61, %s7997_s27 }
 0x502   : > { %v2794_v63 = vpop.permute.xlu2 %2793 }
 0x503   : > { %v2802_v29 = vsel %vm1523_vm14, %v2792_v59, %v2794_v63  ;;  %v2835_v62 = vld [vmem:[#allocation2 + $0x40] sm:$0xff] }
 0x504   : > { %2826 = vst.msk [vmem:[#allocation2 + $0x58] sm:$0xff] %vm1547_vm15, %v2802_v29  ;;  %v9913_v6 = vld [vmem:[#allocation2 + $0x40] sm:$0xff] }
 0x505   : > { %3275 = vrot.lane.b32.xlu0 %v9730_v33, %s8002_s6  ;;  %2847 = vst.msk [vmem:[#allocation3 + $0x40] sm:$0xff] %vm360_vm1, %v2835_v62 }
 0x507   : > { %3287 = vrot.lane.b32.xlu2 %v9763_v61, %s8002_s6  ;;  %3207 = vrot.lane.b32.xlu1 %v9763_v61, %s7999_s29 }
 0x50b   : > { %v9793_v37 = vld [vmem:[#allocation2 + $0x58] sm:$0xff] }
 0x50c   : > { %2850 = vst.msk [vmem:[#allocation3 + $0x58] sm:$0xff] %vm360_vm1, %v9793_v37 }
 0x50d   : > { %2881 = vrot.lane.b32.xlu0 %v9748_v13, %s7995_s25 }
 0x50f   : > { %3373 = vrot.lane.b32.xlu2 %v9799_v20, %s8001_s5  ;;  %3293 = vrot.lane.b32.xlu1 %v9799_v20, %s8002_s6 }
 0x515   : > { %2961 = vrot.lane.b32.xlu0 %v9748_v13, %s7996_s26 }
 0x517   : > { %3213 = vrot.lane.b32.xlu2 %v9799_v20, %s7999_s29  ;;  %3133 = vrot.lane.b32.xlu1 %v9799_v20, %s7998_s28 }
 0x51d   : > { %3201 = vrot.lane.b32.xlu0 %v9748_v13, %s7999_s29 }
 0x51f   : > { %3453 = vrot.lane.b32.xlu2 %v9799_v20, %s8000_s30  ;;  %2877 = vrot.lane.b32.xlu1 %v9728_v25, %s7995_s25 }
 0x525   : > { %2887 = vrot.lane.b32.xlu0 %v9763_v61, %s7995_s25 }
 0x527   : > { %3117 = vrot.lane.b32.xlu2 %v9728_v25, %s7998_s28  ;;  %2957 = vrot.lane.b32.xlu1 %v9728_v25, %s7996_s26 }
 0x52d   : > { %2967 = vrot.lane.b32.xlu0 %v9763_v61, %s7996_s26 }
 0x52f   : > { %3357 = vrot.lane.b32.xlu1 %v9728_v25, %s8001_s5  ;;  %2879 = vrot.lane.b32.xlu2 %v9825_v36, %s7995_s25 }
 0x535   : > { %3127 = vrot.lane.b32.xlu0 %v9763_v61, %s7998_s28 }
 0x537   : > { %3037 = vrot.lane.b32.xlu1 %v9728_v25, %s7997_s27  ;;  %2959 = vrot.lane.b32.xlu2 %v9825_v36, %s7996_s26 }
 0x53d   : > { %2893 = vrot.lane.b32.xlu0 %v9799_v20, %s7995_s25 }
 0x53f   : > { %3277 = vrot.lane.b32.xlu1 %v9728_v25, %s8002_s6  ;;  %3039 = vrot.lane.b32.xlu2 %v9825_v36, %s7997_s27  ;;  %v9843_v47 = vpop.permute.xlu2 %3195 }
 0x545   : > { %2973 = vrot.lane.b32.xlu0 %v9799_v20, %s7996_s26 }
 0x547   : > { %2883 = vrot.lane.b32.xlu1 %v9743_v34, %s7995_s25  ;;  %3359 = vrot.lane.b32.xlu2 %v9825_v36, %s8001_s5 }
 0x549   : > { %v9851_v7 = vpop.permute.xlu2 %3361 }
 0x54d   : > { %3053 = vrot.lane.b32.xlu0 %v9799_v20, %s7997_s27 }
 0x54f   : > { %2963 = vrot.lane.b32.xlu1 %v9743_v34, %s7996_s26  ;;  %3283 = vrot.lane.b32.xlu2 %v9743_v34, %s8002_s6 }
 0x551   : > { %v9859_v8 = vpop.permute.xlu2 %3041 }
 0x555   : > { %3197 = vrot.lane.b32.xlu0 %v9728_v25, %s7999_s29 }
 0x557   : > { %3203 = vrot.lane.b32.xlu1 %v9743_v34, %s7999_s29  ;;  %2885 = vrot.lane.b32.xlu2 %v9863_v53, %s7995_s25  ;;  %v9869_v3 = vpop.permute.xlu0 %2875 }
 0x558   : > { %v9871_v2 = vpop.permute.xlu1 %3115 }
 0x559   : > { %v9873_v12 = vpop.permute.xlu2 %3121 }
 0x55d   : > { %3279 = vrot.lane.b32.xlu0 %v9825_v36, %s8002_s6 }
 0x55f   : > { %2889 = vrot.lane.b32.xlu1 %v9758_v35, %s7995_s25  ;;  %2965 = vrot.lane.b32.xlu2 %v9863_v53, %s7996_s26  ;;  %v9881_v1 = vpop.permute.xlu0 %2955 }
 0x561   : > { %v9883_v52 = vpop.permute.xlu1 %3281  ;;  %v9885_v17 = vpop.permute.xlu2 %3287 }
 0x565   : > { %3363 = vrot.lane.b32.xlu0 %v9743_v34, %s8001_s5 }
 0x567   : > { %2969 = vrot.lane.b32.xlu1 %v9758_v35, %s7996_s26  ;;  %3285 = vrot.lane.b32.xlu2 %v9863_v53, %s8002_s6  ;;  %v9893_v50 = vpop.permute.xlu0 %3355 }
 0x569   : > { %v9895_v4 = vpop.permute.xlu1 %3367  ;;  %v9897_v48 = vpop.permute.xlu2 %3373 }
 0x56d   : > { %3043 = vrot.lane.b32.xlu0 %v9743_v34, %s7997_s27 }
 0x56f   : > { %3129 = vrot.lane.b32.xlu1 %v9758_v35, %s7998_s28  ;;  %3369 = vrot.lane.b32.xlu2 %v9758_v35, %s8001_s5  ;;  %v9905_v60 = vpop.permute.xlu0 %3035 }
 0x571   : > { %v9907_v40 = vpop.permute.xlu1 %3047  ;;  %v9909_v18 = vpop.permute.xlu2 %3213 }
 0x575   : > { %3123 = vrot.lane.b32.xlu0 %v9743_v34, %s7998_s28 }
 0x577   : > { %3049 = vrot.lane.b32.xlu2 %v9758_v35, %s7997_s27  ;;  %3051 = vrot.lane.b32.xlu1 %v9913_v6, %s7997_s27  ;;  %v9919_v42 = vpop.permute.xlu0 %3275 }
 0x579   : > { %v9921_v41 = vpop.permute.xlu1 %3207  ;;  %v9923_v46 = vpop.permute.xlu2 %3453 }
 0x57d   : > { %3045 = vrot.lane.b32.xlu0 %v9863_v53, %s7997_s27 }
 0x57f   : > { %3209 = vrot.lane.b32.xlu2 %v9758_v35, %s7999_s29  ;;  %3371 = vrot.lane.b32.xlu1 %v9913_v6, %s8001_s5  ;;  %v9931_v28 = vpop.permute.xlu0 %2881 }
 0x581   : > { %v9933_v27 = vpop.permute.xlu1 %3293  ;;  %v9935_v11 = vpop.permute.xlu2 %3117 }
 0x585   : > { %3365 = vrot.lane.b32.xlu0 %v9863_v53, %s8001_s5 }
 0x587   : > { %3291 = vrot.lane.b32.xlu1 %v9913_v6, %s8002_s6  ;;  %2891 = vrot.lane.b32.xlu2 %v9913_v6, %s7995_s25  ;;  %v9943_v21 = vpop.permute.xlu0 %2961 }
 0x589   : > { %v9945_v26 = vpop.permute.xlu1 %3133  ;;  %v9947_v22 = vpop.permute.xlu2 %2879 }
 0x58a   : > { %13094 = vst [vmem:[#allocation22_spill] sm:$0xff] %v9947_v22 }
 0x58b   : > { %2921 = vst.msk [vmem:[#allocation3 + $0x70] sm:$0xff] %vm360_vm1, %v9947_v22 }
 0x58d   : > { %3289 = vrot.lane.b32.xlu0 %v9758_v35, %s8002_s6 }
 0x58f   : > { %2895 = vrot.lane.b32.xlu1 %v9774_v56, %s7995_s25  ;;  %2971 = vrot.lane.b32.xlu2 %v9913_v6, %s7996_s26  ;;  %v9957_v38 = vpop.permute.xlu0 %3201 }
 0x591   : > { %v9959_v49 = vpop.permute.xlu1 %2877  ;;  %v9961_v32 = vpop.permute.xlu2 %2959 }
 0x592   : > { %13095 = vst [vmem:[#allocation23_spill] sm:$0xff] %v9961_v32 }
 0x593   : > { %3001 = vst.msk [vmem:[#allocation3 + $0xd0] sm:$0xff] %vm360_vm1, %v9961_v32 }
 0x595   : > { %3375 = vrot.lane.b32.xlu0 %v9774_v56, %s8001_s5 }
 0x597   : > { %2975 = vrot.lane.b32.xlu1 %v9774_v56, %s7996_s26  ;;  %3447 = vrot.lane.b32.xlu2 %v9763_v61, %s8000_s30  ;;  %v9971_v9 = vpop.permute.xlu0 %2887 }
 0x599   : > { %v9973_v19 = vpop.permute.xlu1 %2957  ;;  %v9975_v58 = vpop.permute.xlu2 %3039 }
 0x59a   : > { %13096 = vst [vmem:[#allocation24_spill] sm:$0xff] %v9975_v58 }
 0x59b   : > { %3081 = vst.msk [vmem:[#allocation3 + $0x130] sm:$0xff] %vm360_vm1, %v9975_v58 }
 0x59d   : > { %3449 = vrot.lane.b32.xlu0 %v9758_v35, %s8000_s30 }
 0x59f   : > { %3055 = vrot.lane.b32.xlu1 %v9774_v56, %s7997_s27  ;;  %3295 = vrot.lane.b32.xlu2 %v9774_v56, %s8002_s6  ;;  %v9985_v23 = vpop.permute.xlu0 %2967 }
 0x5a1   : > { %v9987_v14 = vpop.permute.xlu1 %3357  ;;  %v9989_v59 = vpop.permute.xlu2 %3359 }
 0x5a2   : > { %13097 = vst [vmem:[#allocation25_spill] sm:$0xff] %v9989_v59 }
 0x5a3   : > { %3401 = vst.msk [vmem:[#allocation3 + $0x2b0] sm:$0xff] %vm360_vm1, %v9989_v59 }
 0x5a5   : > { %3443 = vrot.lane.b32.xlu0 %v9743_v34, %s8000_s30 }
 0x5a7   : > { %3211 = vrot.lane.b32.xlu1 %v9913_v6, %s7999_s29  ;;  %3441 = vrot.lane.b32.xlu2 %v9748_v13, %s8000_s30  ;;  %v9999_v35 = vpop.permute.xlu0 %3127 }
 0x5a9   : > { %v10001_v5 = vpop.permute.xlu1 %3037  ;;  %v10003_v63 = vpop.permute.xlu2 %3283 }
 0x5ad   : > { %3215 = vrot.lane.b32.xlu0 %v9774_v56, %s7999_s29 }
 0x5af   : > { %3205 = vrot.lane.b32.xlu1 %v9863_v53, %s7999_s29  ;;  %3135 = vrot.lane.b32.xlu2 %v9774_v56, %s7998_s28  ;;  %v10011_v34 = vpop.permute.xlu0 %2893 }
 0x5b1   : > { %v10013_v29 = vpop.permute.xlu1 %3277  ;;  %v10015_v62 = vpop.permute.xlu2 %2885 }
 0x5b2   : > { %13098 = vst [vmem:[#allocation26_spill] sm:$0xff] %v10015_v62 }
 0x5b3   : > { %2924 = vst.msk [vmem:[#allocation3 + $0x88] sm:$0xff] %vm360_vm1, %v10015_v62 }
 0x5b5   : > { %3455 = vrot.lane.b32.xlu0 %v9774_v56, %s8000_s30 }
 0x5b7   : > { %2977 = vrot.lane.b32.xlu1 %v9793_v37, %s7996_s26  ;;  %2897 = vrot.lane.b32.xlu2 %v9793_v37, %s7995_s25  ;;  %v10025_v10 = vpop.permute.xlu0 %2973 }
 0x5b9   : > { %v10027_v39 = vpop.permute.xlu1 %2883  ;;  %v10029_v45 = vpop.permute.xlu2 %2965 }
 0x5ba   : > { %13099 = vst [vmem:[#allocation27_spill] sm:$0xff] %v10029_v45 }
 0x5bb   : > { %3004 = vst.msk [vmem:[#allocation3 + $0xe8] sm:$0xff] %vm360_vm1, %v10029_v45 }
 0x5bd   : > { %3057 = vrot.lane.b32.xlu0 %v9793_v37, %s7997_s27 }
 0x5bf   : > { %3437 = vrot.lane.b32.xlu1 %v9728_v25, %s8000_s30  ;;  %3377 = vrot.lane.b32.xlu2 %v9793_v37, %s8001_s5  ;;  %v10039_v56 = vpop.permute.xlu0 %3053 }
 0x5c1   : > { %v10041_v55 = vpop.permute.xlu1 %2963  ;;  %v10043_v16 = vpop.permute.xlu2 %3285 }
 0x5c2   : > { %13100 = vst [vmem:[#allocation28_spill] sm:$0xff] %v10043_v16 }
 0x5c3   : > { %3324 = vst.msk [vmem:[#allocation3 + $0x268] sm:$0xff] %vm360_vm1, %v10043_v16 }
 0x5c5   : > { %3297 = vrot.lane.b32.xlu0 %v9793_v37, %s8002_s6 }
 0x5c7   : > { %3445 = vrot.lane.b32.xlu1 %v9863_v53, %s8000_s30  ;;  %3199 = vrot.lane.b32.xlu2 %v9825_v36, %s7999_s29  ;;  %v10053_v25 = vpop.permute.xlu0 %3197 }
 0x5c9   : > { %v10055_v24 = vpop.permute.xlu1 %3203  ;;  %v10057_v54 = vpop.permute.xlu2 %3369 }
 0x5cd   : > { %3435 = vrot.lane.b32.xlu0 %v9730_v33, %s8000_s30 }
 0x5cf   : > { %3217 = vrot.lane.b32.xlu1 %v9793_v37, %s7999_s29  ;;  %3451 = vrot.lane.b32.xlu2 %v9913_v6, %s8000_s30  ;;  %v10065_v57 = vpop.permute.xlu0 %3279 }
 0x5d0   : > { %13101 = vst [vmem:[#allocation29_spill] sm:$0xff] %v10065_v57 }
 0x5d1   : > { %3321 = vst.msk [vmem:[#allocation3 + $0x250] sm:$0xff] %vm360_vm1, %v10065_v57  ;;  %v10069_v30 = vpop.permute.xlu1 %2889  ;;  %v10071_v31 = vpop.permute.xlu2 %3049 }
 0x5d5   : > { %3137 = vrot.lane.b32.xlu0 %v9793_v37, %s7998_s28 }
 0x5d7   : > { %3457 = vrot.lane.b32.xlu1 %v9793_v37, %s8000_s30  ;;  %3131 = vrot.lane.b32.xlu2 %v9913_v6, %s7998_s28  ;;  %v10079_v33 = vpop.permute.xlu0 %3363 }
 0x5d9   : > { %v10081_v44 = vpop.permute.xlu1 %2969  ;;  %v10083_v15 = vpop.permute.xlu2 %3209 }
 0x5dd   : > { %3439 = vrot.lane.b32.xlu0 %v9825_v36, %s8000_s30 }
 0x5df   : > { %3125 = vrot.lane.b32.xlu1 %v9863_v53, %s7998_s28  ;;  %3119 = vrot.lane.b32.xlu2 %v9825_v36, %s7998_s28  ;;  %v10091_v43 = vpop.permute.xlu0 %3043  ;;  %v7811_v53 = vld [vmem:[%s12949_s2 + $0x58] sm:$0xff]  ;;  %v7810_v36 = vld [vmem:[%s12949_s2 + $0x50] sm:$0xff] }
 0x5e1   : > { %v10093_v37 = vpop.permute.xlu1 %3129  ;;  %v10095_v6 = vpop.permute.xlu2 %2891 }
 0x5e2   : > { %13102 = vst [vmem:[#allocation30_spill] sm:$0xff] %v10095_v6 }
 0x5e3   : > { %2927 = vst.msk [vmem:[#allocation3 + $0xa0] sm:$0xff] %vm360_vm1, %v10095_v6  ;;  %v7809_v6 = vld [vmem:[%s12949_s2 + $0x48] sm:$0xff] }
 0x5e5   : > { %3619 = vperm.xlu0 %7960, %v7808_v51  }
 0x5e7   : > { %3634 = vperm.xlu1 %7961, %v7811_v53   ;;  %3629 = vperm.xlu2 %7962, %v7810_v36   ;;  %v10108_v0 = vpop.permute.xlu0 %3123 }
 0x5e9   : > { %v10110_v22 = vpop.permute.xlu1 %3051  ;;  %v10112_v62 = vpop.permute.xlu2 %2971 }
 0x5ea   : > { %13103 = vst [vmem:[#allocation31_spill] sm:$0xff] %v10110_v22 }
 0x5eb   : > { %13104 = vst [vmem:[#allocation32_spill] sm:$0xff] %v10112_v62 }
 0x5ec   : > { %3087 = vst.msk [vmem:[#allocation3 + $0x160] sm:$0xff] %vm360_vm1, %v10110_v22  ;;  %v3379_v22 = vsel %vm905_vm6, %v9893_v50, %v9987_v14  ;;  %v3301_v50 = vsel %vm824_vm8, %v9883_v52, %v10003_v63  ;;  %v3059_v52 = vsel %vm581_vm2, %v9905_v60, %v10001_v5  ;;  %v2981_v60 = vsel %vm13029_vm3, %v9943_v21, %v10041_v55 }
 0x5ed   : > { %3007 = vst.msk [vmem:[#allocation3 + $0x100] sm:$0xff] %vm360_vm1, %v10112_v62  ;;  %3624 = vperm.xlu0 %7960, %v7809_v6   ;;  %v3223_v21 = vsel %vm13111_vm4, %v9921_v41, %v10083_v15 }
 0x5ef   : > { %v10121_v51 = vpop.permute.xlu0 %3045 }
 0x5f0   : > { %13105 = vst [vmem:[#allocation33_spill] sm:$0xff] %v10121_v51 }
 0x5f1   : > { %3084 = vst.msk [vmem:[#allocation3 + $0x148] sm:$0xff] %vm360_vm1, %v10121_v51  ;;  %v10125_v53 = vpop.permute.xlu1 %3371  ;;  %v10127_v36 = vpop.permute.xlu2 %3447  ;;  %v3381_v51 = vsel %vm905_vm6, %v9851_v7, %v10079_v33 }
 0x5f2   : > { %13106 = vst [vmem:[#allocation34_spill] sm:$0xff] %v10125_v53 }
 0x5f3   : > { %3407 = vst.msk [vmem:[#allocation3 + $0x2e0] sm:$0xff] %vm360_vm1, %v10125_v53 }
 0x5f7   : > { %v10131_v57 = vpop.permute.xlu0 %3365 }
 0x5f8   : > { %13107 = vst [vmem:[#allocation35_spill] sm:$0xff] %v10131_v57 }
 0x5f9   : > { %3404 = vst.msk [vmem:[#allocation3 + $0x2c8] sm:$0xff] %vm360_vm1, %v10131_v57  ;;  %v10135_v16 = vpop.permute.xlu1 %3291  ;;  %v10137_v6 = vpop.permute.xlu2 %3295 }
 0x5fa   : > { %13108 = vst [vmem:[#allocation36_spill] sm:$0xff] %v10135_v16 }
 0x5fb   : > { %3327 = vst.msk [vmem:[#allocation3 + $0x280] sm:$0xff] %vm360_vm1, %v10135_v16  ;;  %v3383_v16 = vsel %vm905_vm6, %v9895_v4, %v10057_v54 }
 0x5ff   : > { %v10141_v32 = vpop.permute.xlu0 %3289 }
 0x601   : > { %v10143_v45 = vpop.permute.xlu1 %2895  ;;  %v10145_v62 = vpop.permute.xlu2 %3441 }
 0x607   : > { %v10147_v59 = vpop.permute.xlu0 %3375 }
 0x608   : > { %13109 = vst [vmem:[#allocation37_spill] sm:$0xff] %v10147_v59  ;;  %v3385_v58 = vsel %vm905_vm6, %v9897_v48, %v10147_v59 }
 0x609   : > { %v10152_v57 = vpop.permute.xlu1 %2975  ;;  %v10154_v53 = vpop.permute.xlu2 %3135  ;;  %3678 = vmatpush.msra.mxu3 %v3385_v58  ;;  %v3305_v58 = vsel %vm824_vm8, %v9933_v27, %v10137_v6  ;;  %v3063_v27 = vsel %vm581_vm2, %v9907_v40, %v10071_v31 }
 0x60b   : > { %3679 = vmatpush.msra.mxu3 %v3383_v16  ;;  %v3303_v16 = vsel %vm824_vm8, %v9885_v17, %v10141_v32  ;;  %v3299_v17 = vsel %vm824_vm8, %v9919_v42, %v10013_v29  ;;  %v2985_v42 = vsel %vm13029_vm3, %v10025_v10, %v10152_v57  ;;  %v2979_v10 = vsel %vm13029_vm3, %v9881_v1, %v9973_v19 }
 0x60c   : > { %v3221_v1 = vsel %vm13113_vm9, %v9957_v38, %v10055_v24 }
 0x60d   : > { %3680 = vmatpush.msra.mxu3 %v3381_v51 }
 0x60f   : > { %v10165_v48 = vpop.permute.xlu0 %3449  ;;  %3681 = vmatpush.msra.mxu3 %v3379_v22  ;;  %v3061_v22 = vsel %vm581_vm2, %v9859_v8, %v10091_v43  ;;  %v2983_v8 = vsel %vm13029_vm3, %v9985_v23, %v10081_v44  ;;  %v2905_v23 = vsel %vm13112_vm12, %v10011_v34, %v10143_v45 }
 0x611   : > { %v10170_v59 = vpop.permute.xlu1 %3055  ;;  %v10172_v4 = vpop.permute.xlu2 %2897  ;;  %3682 = vmatpush.msra.mxu3 %v3305_v58 }
 0x612   : > { %v3065_v7 = vsel %vm581_vm2, %v10039_v56, %v10170_v59  ;;  %2930 = vst.msk [vmem:[#allocation3 + $0xb8] sm:$0xff] %vm360_vm1, %v10172_v4 }
 0x613   : > { %3649 = vmatpush.msrb.mxu1 %v3065_v7  ;;  %3683 = vmatpush.msra.mxu3 %v3303_v16 }
 0x615   : > { %3650 = vmatpush.msrb.mxu1 %v3063_v27  ;;  %3684 = vmatpush.msra.mxu3 %v3301_v50 }
 0x617   : > { %v10194_v56 = vpop.permute.xlu0 %3443  ;;  %3651 = vmatpush.msrb.mxu1 %v3061_v22  ;;  %3685 = vmatpush.msra.mxu3 %v3299_v17 }
 0x619   : > { %v10199_v51 = vpop.permute.xlu1 %3211  ;;  %v10201_v40 = vpop.permute.xlu2 %3377  ;;  %3652 = vmatpush.msrb.mxu1 %v3059_v52 }
 0x61a   : > { %3247 = vst.msk [vmem:[#allocation3 + $0x220] sm:$0xff] %vm360_vm1, %v10199_v51 }
 0x61b   : > { %3410 = vst.msk [vmem:[#allocation3 + $0x2f8] sm:$0xff] %vm360_vm1, %v10201_v40  ;;  %3653 = vmatpush.msrb.mxu1 %v2985_v42 }
 0x61d   : > { %3654 = vmatpush.msrb.mxu1 %v2983_v8  ;;  %v13122_v8 = vld [vmem:[#allocation37_spill] sm:$0xff] }
 0x61f   : > { %v10216_v58 = vpop.permute.xlu0 %3215  ;;  %3655 = vmatpush.msrb.mxu1 %v2981_v60  ;;  %v3386_v60 = vsel %vm905_vm6, %v13122_v8, %v10201_v40  ;;  %v13125_v40 = vld [vmem:[#allocation24_spill] sm:$0xff] }
 0x620   : > { %v3225_v16 = vsel %vm13110_vm5, %v9909_v18, %v10216_v58  ;;  %vm13114_vm5 = vmmov %vm13112_vm12 }
 0x621   : > { %v10224_v7 = vpop.permute.xlu1 %3205  ;;  %v10226_v50 = vpop.permute.xlu2 %3199  ;;  %3656 = vmatpush.msrb.mxu1 %v2979_v10  ;;  %3686 = vmatpush.msra.mxu3 %v3225_v16  ;;  %v2903_v18 = vsel %vm13114_vm5, %v9971_v9, %v10069_v30  ;;  %vm13115_vm4 = vmmov %vm13114_vm5  ;;  %v3145_v9 = vsel %vm662_vm10, %v9945_v26, %v10154_v53  ;;  %vm13118_vm5 = vcmask 736256   ;;  %v13124_v16 = vld [vmem:[#allocation34_spill] sm:$0xff] }
 0x622   : > { %3244 = vst.msk [vmem:[#allocation3 + $0x208] sm:$0xff] %vm360_vm1, %v10224_v7  ;;  %v2901_v41 = vsel %vm13115_vm4, %v9931_v28, %v10027_v39  ;;  %vm13116_vm12 = vmmov %vm13113_vm9 }
 0x623   : > { %3241 = vst.msk [vmem:[#allocation3 + $0x1f0] sm:$0xff] %vm360_vm1, %v10226_v50  ;;  %3657 = vmatpush.msrb.mxu1 %v2905_v23  ;;  %3687 = vmatpush.msra.mxu3 %v3223_v21  ;;  %v3219_v34 = vsel %vm13116_vm12, %v9843_v47, %v10053_v25  ;;  %vm13117_vm9 = vmmov %vm13115_vm4  ;;  %v3143_v47 = vsel %vm662_vm10, %v9999_v35, %v10093_v37  ;;  %v10283_v35 = vld [vmem:[%s12948_s1 + $0xc8] sm:$0xff] }
 0x624   : > { %v2899_v38 = vsel %vm13117_vm9, %v9869_v3, %v9959_v49  ;;  %vm13119_vm4 = vmmov %vm13118_vm5  ;;  %v3384_v21 = vsel %vm905_vm6, %v10057_v54, %v13124_v16  ;;  %v3060_v23 = vsel %vm581_vm2, %v10001_v5, %v13125_v40  ;;  %v10331_v54 = vld [vmem:[%s12948_s1 + $0xd8] sm:$0xff]  ;;  %v3542_v40 = vld [vmem:[#allocation3 + $0x130] sm:$0xff] }
 0x625   : > { %3658 = vmatpush.msrb.mxu1 %v2903_v18  ;;  %3688 = vmatpush.msra.mxu3 %v3221_v1  ;;  %v3463_v3 = vsel %vm13119_vm4, %v10127_v36, %v10165_v48  ;;  %vm13120_vm12 = vmmov %vm13119_vm4  ;;  %v13126_v1 = vld [vmem:[#allocation35_spill] sm:$0xff] }
 0x626   : > { %v3461_v26 = vsel %vm13120_vm12, %v10145_v62, %v10194_v56  ;;  %v2827_v62 = vld [vmem:[#allocation2] sm:$0xff]  ;;  %v3382_v18 = vsel %vm905_vm6, %v10079_v33, %v13126_v1  ;;  %vm13134_vm9 = vmmov %vm13119_vm4  ;;  %vm13136_vm4 = vcmask 883712   ;;  %v2834_v1 = vld [vmem:[#allocation2 + $0x38] sm:$0xff] }
 0x627   : > { %v10250_v27 = vpop.permute.xlu0 %3455  ;;  %3659 = vmatpush.msrb.mxu1 %v2901_v41  ;;  %3689 = vmatpush.msra.mxu3 %v3219_v34  ;;  %v13127_v41 = vld [vmem:[#allocation25_spill] sm:$0xff] }
 0x628   : > { %v3465_v28 = vsel %vm13118_vm5, %v9923_v46, %v10250_v27  ;;  %v3141_v46 = vsel %vm662_vm10, %v9873_v12, %v10108_v0  ;;  %v10292_v12 = vld [vmem:[%s12948_s1 + $0xc0] sm:$0xff]  ;;  %v3380_v34 = vsel %vm905_vm6, %v9987_v14, %v13127_v41  ;;  %vm13135_vm5 = vcmask 1039360  }
 0x629   : > { %v2978_v17 = vpop.permute.xlu1 %2977  ;;  %v10261_v22 = vpop.permute.xlu2 %3451  ;;  %3660 = vmatpush.msrb.mxu1 %v2899_v38  ;;  %3690 = vmatpush.msra.mxu3 %v3145_v9  ;;  %vm13138_vm12 = vmmov %vm13135_vm5  ;;  %v2831_v41 = vld [vmem:[#allocation2 + $0x20] sm:$0xff] }
 0x62a   : > { %3010 = vst.msk [vmem:[#allocation3 + $0x118] sm:$0xff] %vm360_vm1, %v2978_v17  ;;  %3719 = vmatpush.msrb.mxu2 %v3465_v28  ;;  %v2986_v38 = vsel %vm13029_vm3, %v10152_v57, %v2978_v17  ;;  %v13128_v28 = vld [vmem:[#allocation32_spill] sm:$0xff]  ;;  %v13129_v57 = vld [vmem:[#allocation27_spill] sm:$0xff] }
 0x62b   : > { %3487 = vst.msk [vmem:[#allocation3 + $0x340] sm:$0xff] %vm360_vm1, %v10261_v22  ;;  %3661 = vmatpush.msrb.mxu1 %v9799_v20  ;;  %3691 = vmatpush.msra.mxu3 %v3143_v47  ;;  %v3139_v20 = vsel %vm662_vm10, %v9871_v2, %v9935_v11  ;;  %v2984_v14 = vsel %vm13029_vm3, %v10081_v44, %v13128_v28  ;;  %v13130_v17 = vld [vmem:[#allocation36_spill] sm:$0xff]  ;;  %v10363_v44 = vld [vmem:[%s12948_s1 + $0xf8] sm:$0xff] }
 0x62c   : > { %3720 = vmatpush.msrb.mxu2 %v3463_v3  ;;  %v3304_v47 = vsel %vm824_vm8, %v10141_v32, %v13130_v17  ;;  %v13131_v3 = vld [vmem:[#allocation23_spill] sm:$0xff]  ;;  %v10374_v32 = vld [vmem:[%s12948_s1 + $0xf0] sm:$0xff]  ;;  %v3527_v28 = vld [vmem:[#allocation3 + $0xb8] sm:$0xff] }
 0x62d   : > { %3662 = vmatpush.msrb.mxu1 %v9763_v61  ;;  %3692 = vmatpush.msra.mxu3 %v3141_v46  ;;  %v2980_v46 = vsel %vm13029_vm3, %v9973_v19, %v13131_v3  ;;  %v10385_v19 = vld [vmem:[%s12948_s1 + $0xd0] sm:$0xff] }
 0x62e   : > { %3721 = vmatpush.msrb.mxu2 %v3461_v26  ;;  %v13132_v26 = vld [vmem:[#allocation28_spill] sm:$0xff]  ;;  %v3590_v3 = vld [vmem:[#allocation3 + $0x2b0] sm:$0xff] }
 0x62f   : > { %v3058_v36 = vpop.permute.xlu0 %3057  ;;  %3663 = vmatpush.msrb.mxu1 %v9748_v13  ;;  %3693 = vmatpush.msra.mxu3 %v3139_v20  ;;  %v13121_v13 = vld [vmem:[#allocation31_spill] sm:$0xff]  ;;  %v3302_v20 = vsel %vm824_vm8, %v10003_v63, %v13132_v26  ;;  %v2906_v63 = vsel %vm13135_vm5, %v10143_v45, %v10172_v4  ;;  %vm13140_vm5 = vmmov %vm13136_vm4 }
 0x630   : > { %v3066_v61 = vsel %vm581_vm2, %v10170_v59, %v3058_v36  ;;  %3090 = vst.msk [vmem:[#allocation3 + $0x178] sm:$0xff] %vm360_vm1, %v3058_v36  ;;  %3694 = vmatmul.f32.vlgmr.msra.gmra.mxu3 %v10283_v35  ;;  %v3064_v42 = vsel %vm581_vm2, %v10071_v31, %v13121_v13  ;;  %v13123_v59 = vld [vmem:[#allocation33_spill] sm:$0xff]  ;;  %v10320_v31 = vld [vmem:[%s12948_s1 + $0xe0] sm:$0xff]  ;;  %v3224_v4 = vsel %vm13140_vm5, %v10083_v15, %v10199_v51  ;;  %v13144_v15 = vld [vmem:[#allocation22_spill] sm:$0xff] }
 0x631   : > { %v10298_v52 = vpop.permute.xlu1 %3437  ;;  %v10300_v2 = vpop.permute.xlu2 %3131  ;;  %3664 = vmatpush.msrb.mxu1 %v2827_v62  ;;  %3736 = vmatpush.msrb.mxu0 %v3066_v61  ;;  %v3062_v10 = vsel %vm581_vm2, %v10091_v43, %v13123_v59  ;;  %v13133_v36 = vld [vmem:[#allocation29_spill] sm:$0xff]  ;;  %v3548_v59 = vld [vmem:[#allocation3 + $0x160] sm:$0xff] }
 0x632   : > { %3167 = vst.msk [vmem:[#allocation3 + $0x1c0] sm:$0xff] %vm360_vm1, %v10300_v2  ;;  %3665 = vmatmul.f32.vlgmr.msrb.gmra.mxu1 %v10292_v12  ;;  %v3300_v61 = vsel %vm824_vm8, %v10013_v29, %v13133_v36  ;;  %v3584_v36 = vld [vmem:[#allocation3 + $0x280] sm:$0xff] }
 0x633   : > { %3765 = vmatpush.msra.mxu1 %v3386_v60  ;;  %3737 = vmatpush.msrb.mxu0 %v3064_v42  ;;  %v13137_v42 = vld [vmem:[#allocation30_spill] sm:$0xff] }
 0x634   : > { %v2904_v8 = vsel %vm13138_vm12, %v10069_v30, %v13137_v42  ;;  %v3506_v42 = vld [vmem:[#allocation3 + $0x10] sm:$0xff] }
 0x635   : > { %3766 = vmatpush.msra.mxu1 %v3384_v21  ;;  %3738 = vmatpush.msrb.mxu0 %v3062_v10  ;;  %v10411_v10 = vld [vmem:[%s12948_s1 + $0x110] sm:$0xff]  ;;  %v10419_v21 = vld [vmem:[%s12948_s1 + $0x108] sm:$0xff] }
 0x637   : > { %v3298_v43 = vpop.permute.xlu0 %3297  ;;  %3767 = vmatpush.msra.mxu1 %v3382_v18  ;;  %3739 = vmatpush.msrb.mxu0 %v3060_v23  ;;  %v3551_v45 = vld [vmem:[#allocation3 + $0x178] sm:$0xff]  ;;  %v10431_v23 = vld [vmem:[%s12948_s1 + $0xe8] sm:$0xff] }
 0x638   : > { %v3306_v5 = vsel %vm824_vm8, %v10137_v6, %v3298_v43  ;;  %3330 = vst.msk [vmem:[#allocation3 + $0x298] sm:$0xff] %vm360_vm1, %v3298_v43  ;;  %3697 = vmatmul.f32.gmra.mxu3 %v10320_v31  ;;  %v2982_v6 = vsel %vm13029_vm3, %v10041_v55, %v13129_v57  ;;  %v3536_v43 = vld [vmem:[#allocation3 + $0x100] sm:$0xff] }
 0x639   : > { %v10342_v33 = vpop.permute.xlu1 %3445  ;;  %v10344_v9 = vpop.permute.xlu2 %3119  ;;  %3768 = vmatpush.msra.mxu1 %v3380_v34  ;;  %3740 = vmatpush.msrb.mxu0 %v2986_v38  ;;  %v3524_v57 = vld [vmem:[#allocation3 + $0xa0] sm:$0xff] }
 0x63a   : > { %3484 = vst.msk [vmem:[#allocation3 + $0x328] sm:$0xff] %vm360_vm1, %v10342_v33  ;;  %3668 = vmatmul.f32.gmra.mxu1 %v10331_v54 }
 0x63b   : > { %3161 = vst.msk [vmem:[#allocation3 + $0x190] sm:$0xff] %vm360_vm1, %v10344_v9  ;;  %3769 = vmatpush.msra.mxu1 %v3306_v5  ;;  %3741 = vmatpush.msrb.mxu0 %v2984_v14  ;;  %v10454_v5 = vld [vmem:[%s12948_s1 + $0x100] sm:$0xff]  ;;  %v3140_v14 = vsel %vm662_vm10, %v9935_v11, %v10344_v9  ;;  %v3518_v11 = vld [vmem:[#allocation3 + $0x70] sm:$0xff]  ;;  %v7807_v9 = vld [vmem:[%s12948_s1 + $0x118] sm:$0xff] }
 0x63d   : > { %3770 = vmatpush.msra.mxu1 %v3304_v47  ;;  %3742 = vmatpush.msrb.mxu0 %v2982_v6  ;;  %v3593_v6 = vld [vmem:[#allocation3 + $0x2c8] sm:$0xff] }
 0x63e   : > { %v3521_v47 = vld [vmem:[#allocation3 + $0x88] sm:$0xff] }
 0x63f   : > { %v3436_v55 = vpop.permute.xlu0 %3435  ;;  %3771 = vmatpush.msra.mxu1 %v3302_v20  ;;  %3743 = vmatpush.msrb.mxu0 %v2980_v46  ;;  %v3608_v46 = vld [vmem:[#allocation3 + $0x340] sm:$0xff]  ;;  %v3587_v26 = vld [vmem:[#allocation3 + $0x298] sm:$0xff] }
 0x640   : > { %v3459_v62 = vsel %vm13134_vm9, %v3436_v55, %v10298_v52  ;;  %3700 = vmatmul.f32.gmra.mxu3 %v10363_v44  ;;  %vm13139_vm9 = vcmask 261120   ;;  %v3515_v55 = vld [vmem:[#allocation3 + $0x58] sm:$0xff] }
 0x641   : > { %v3218_v13 = vpop.permute.xlu1 %3217  ;;  %3772 = vmatpush.msra.mxu1 %v3300_v61  ;;  %3722 = vmatpush.msrb.mxu2 %v3459_v62  ;;  %v3605_v20 = vld [vmem:[#allocation3 + $0x328] sm:$0xff]  ;;  %v3512_v62 = vld [vmem:[#allocation3 + $0x40] sm:$0xff] }
 0x642   : > { %v3226_v29 = vsel %vm13136_vm4, %v10216_v58, %v3218_v13  ;;  %3250 = vst.msk [vmem:[#allocation3 + $0x238] sm:$0xff] %vm360_vm1, %v3218_v13  ;;  %3671 = vmatmul.f32.gmra.mxu1 %v10374_v32  ;;  %3744 = vmatpush.msrb.mxu0 %v2906_v63  ;;  %v13141_v58 = vld [vmem:[#allocation26_spill] sm:$0xff]  ;;  %vm13142_vm4 = vmmov %vm13138_vm12  ;;  %v3581_v63 = vld [vmem:[#allocation3 + $0x268] sm:$0xff] }
 0x643   : > { %3773 = vmatpush.msra.mxu1 %v3226_v29  ;;  %7812 = vmatmul.msk.f32.vlgmr.msrb.gmra.mxu2 %vm13139_vm9, %v10385_v19  ;;  %v2902_v60 = vsel %vm13142_vm4, %v10027_v39, %v13141_v58  ;;  %vm13143_vm12 = vmmov %vm13140_vm5  ;;  %v3545_v39 = vld [vmem:[#allocation3 + $0x148] sm:$0xff]  ;;  %v3578_v29 = vld [vmem:[#allocation3 + $0x250] sm:$0xff] }
 0x644   : > { %3823 = vmatpush.msra.mxu2 %v3551_v45  ;;  %3745 = vmatpush.msrb.mxu0 %v2904_v8  ;;  %v3222_v30 = vsel %vm13143_vm12, %v10055_v24, %v10224_v7  ;;  %vm13145_vm9 = vmmov %vm13142_vm4  ;;  %v3220_v24 = vsel %vm13140_vm5, %v10053_v25, %v10226_v50  ;;  %vm13146_vm4 = vcmask 736256   ;;  %vm13147_vm12 = vcmask 261120   ;;  %v3539_v50 = vld [vmem:[#allocation3 + $0x118] sm:$0xff]  ;;  %v3509_v13 = vld [vmem:[#allocation3 + $0x28] sm:$0xff] }
 0x645   : > { %3774 = vmatpush.msra.mxu1 %v3224_v4  ;;  %v2900_v51 = vsel %vm13145_vm9, %v9959_v49, %v13144_v15  ;;  %vm13148_vm9 = vmmov %vm13146_vm4  ;;  %v3572_v45 = vld [vmem:[#allocation3 + $0x220] sm:$0xff]  ;;  %v3569_v4 = vld [vmem:[#allocation3 + $0x208] sm:$0xff] }
 0x646   : > { %3824 = vmatpush.msra.mxu2 %v3548_v59  ;;  %3746 = vmatpush.msrb.mxu0 %v2902_v60  ;;  %v3464_v18 = vsel %vm13148_vm9, %v10165_v48, %v10261_v22  ;;  %vm13149_vm5 = vmmov %vm13146_vm4  ;;  %v2828_v22 = vld [vmem:[#allocation2 + $0x8] sm:$0xff]  ;;  %v3566_v58 = vld [vmem:[#allocation3 + $0x1f0] sm:$0xff] }
 0x647   : > { %v3138_v16 = vpop.permute.xlu0 %3137  ;;  %3775 = vmatpush.msra.mxu1 %v3222_v30  ;;  %v3462_v34 = vsel %vm13149_vm5, %v10194_v56, %v10342_v33  ;;  %v3599_v33 = vld [vmem:[#allocation3 + $0x2f8] sm:$0xff]  ;;  %vm13150_vm9 = vmmov %vm13147_vm12  ;;  %v3560_v59 = vld [vmem:[#allocation3 + $0x1c0] sm:$0xff] }
 0x648   : > { %v3146_v7 = vsel %vm662_vm10, %v10154_v53, %v3138_v16  ;;  %3170 = vst.msk [vmem:[#allocation3 + $0x1d8] sm:$0xff] %vm360_vm1, %v3138_v16  ;;  %3825 = vmatpush.msra.mxu2 %v3545_v39  ;;  %3747 = vmatpush.msrb.mxu0 %v2900_v51  ;;  %v2837_v53 = vld [vmem:[#allocation2 + $0x50] sm:$0xff]  ;;  %vm13151_vm5 = vmmov %vm13150_vm9 }
 0x649   : > { %v3458_v49 = vpop.permute.xlu1 %3457  ;;  %3776 = vmatpush.msra.mxu1 %v3220_v24  ;;  %3703 = vmatmul.f32.gmra.mxu3 %v10411_v10  ;;  %v3575_v8 = vld [vmem:[#allocation3 + $0x238] sm:$0xff]  ;;  %v3554_v30 = vld [vmem:[#allocation3 + $0x190] sm:$0xff] }
 0x64a   : > { %v3466_v25 = vsel %vm13146_vm4, %v10250_v27, %v3458_v49  ;;  %3490 = vst.msk [vmem:[#allocation3 + $0x358] sm:$0xff] %vm360_vm1, %v3458_v49  ;;  %3674 = vmatmul.f32.gmra.mxu1 %v10419_v21  ;;  %3826 = vmatpush.msra.mxu2 %v3542_v40  ;;  %v3144_v27 = vsel %vm662_vm10, %v10093_v37, %v10300_v2  ;;  %v3533_v37 = vld [vmem:[#allocation3 + $0xe8] sm:$0xff] }
 0x64b   : > { %3748 = vmatpush.msrb.mxu0 %v2837_v53  ;;  %3777 = vmatpush.msra.mxu1 %v3146_v7 }
 0x64c   : > { %3806 = vmatpush.msrb.mxu3 %v3466_v25  ;;  %7813 = vmatmul.msk.f32.gmra.mxu2 %vm13147_vm12, %v10431_v23 }
 0x64d   : > { %3827 = vmatpush.msra.mxu2 %v3539_v50  ;;  %3749 = vmatpush.msrb.mxu0 %v2834_v1 }
 0x64e   : > { %3778 = vmatpush.msra.mxu1 %v3144_v27  ;;  %3807 = vmatpush.msrb.mxu3 %v3464_v18 }
 0x64f   : > { %v3440_v38 = vpop.permute.xlu0 %3439  ;;  %3828 = vmatpush.msra.mxu2 %v3536_v43  ;;  %3750 = vmatpush.msrb.mxu0 %v2831_v41  ;;  %v3563_v60 = vld [vmem:[#allocation3 + $0x1d8] sm:$0xff] }
 0x650   : > { %v3460_v48 = vsel %vm13146_vm4, %v10298_v52, %v3440_v38  ;;  %3481 = vst.msk [vmem:[#allocation3 + $0x310] sm:$0xff] %vm360_vm1, %v3440_v38  ;;  %3808 = vmatpush.msrb.mxu3 %v3462_v34  ;;  %v3530_v52 = vld [vmem:[#allocation3 + $0xd0] sm:$0xff]  ;;  %vm13152_vm4 = vmmov %vm13151_vm5  ;;  %v10511_v34 = vpop.permute.xlu2 %3629 }
 0x651   : > { %v3126_v2 = vpop.permute.xlu1 %3125  ;;  %3829 = vmatpush.msra.mxu2 %v3533_v37  ;;  %3751 = vmatpush.msrb.mxu0 %v2828_v22  ;;  %v3611_v17 = vld [vmem:[#allocation3 + $0x358] sm:$0xff] }
 0x652   : > { %v3142_v56 = vsel %vm662_vm10, %v10108_v0, %v3126_v2  ;;  %3164 = vst.msk [vmem:[#allocation3 + $0x1a8] sm:$0xff] %vm360_vm1, %v3126_v2  ;;  %3752 = vmatmul.f32.vlgmr.msrb.gmra.mxu0 %v10292_v12  ;;  %3809 = vmatpush.msrb.mxu3 %v3460_v48  ;;  %v3596_v0 = vld [vmem:[#allocation3 + $0x2e0] sm:$0xff] }
 0x653   : > { %3830 = vmatpush.msra.mxu2 %v3530_v52  ;;  %3852 = vmatpush.msra.mxu0 %v3599_v33 }
 0x654   : > { %3779 = vmatpush.msra.mxu1 %v3142_v56  ;;  %7814 = vmatmul.msk.f32.gmra.mxu2 %vm13147_vm12, %v10454_v5  ;;  %vm13153_vm12 = vmmov %vm13152_vm4 }
 0x655   : > { %7816 = vmatmul.msk.f32.vlgmr.msrb.gmra.mxu3 %vm13150_vm9, %v10385_v19  ;;  %3831 = vmatpush.msra.mxu2 %v3527_v28  ;;  %vm13154_vm9 = vmmov %vm13152_vm4 }
 0x656   : > { %3853 = vmatpush.msra.mxu0 %v3596_v0  ;;  %3780 = vmatpush.msra.mxu1 %v3140_v14 }
 0x657   : > { %3781 = vmatmul.f32.vlgmr.msra.gmra.mxu1 %v10283_v35  ;;  %3832 = vmatpush.msra.mxu2 %v3524_v57  ;;  %v3602_v61 = vld [vmem:[#allocation3 + $0x310] sm:$0xff] }
 0x658   : > { %3854 = vmatpush.msra.mxu0 %v3593_v6  ;;  %3893 = vmatpush.msrb.mxu1 %v3611_v17 }
 0x659   : > { %3833 = vmatpush.msra.mxu2 %v3521_v47  ;;  %v10520_v17 = vpop.permute.xlu1 %3634 }
 0x65a   : > { %3855 = vmatpush.msra.mxu0 %v3590_v3  ;;  %3894 = vmatpush.msrb.mxu1 %v3608_v46 }
 0x65b   : > { %3755 = vmatmul.f32.gmra.mxu0 %v10331_v54  ;;  %3834 = vmatpush.msra.mxu2 %v3518_v11 }
 0x65c   : > { %3856 = vmatpush.msra.mxu0 %v3587_v26  ;;  %3895 = vmatpush.msrb.mxu1 %v3605_v20 }
 0x65d   : > { %7815 = vmatmul.msk.f32.gmra.mxu2 %vm13151_vm5, %v7807_v9  ;;  %7817 = vmatmul.msk.f32.gmra.mxu3 %vm13152_vm4, %v10431_v23  ;;  %vm13155_vm5 = vmmov %vm13152_vm4 }
 0x65e   : > { %3835 = vmatpush.msra.mxu2 %v3515_v55  ;;  %3857 = vmatpush.msra.mxu0 %v3584_v36 }
 0x65f   : > { %3896 = vmatpush.msrb.mxu1 %v3602_v61 }
 0x660   : > { %3784 = vmatmul.f32.gmra.mxu1 %v10320_v31  ;;  %3836 = vmatpush.msra.mxu2 %v3512_v62 }
 0x661   : > { %3858 = vmatpush.msra.mxu0 %v3581_v63 }
 0x662   : > { %3837 = vmatpush.msra.mxu2 %v3509_v13 }
 0x663   : > { %3859 = vmatpush.msra.mxu0 %v3578_v29 }
 0x664   : > { %3758 = vmatmul.f32.gmra.mxu0 %v10374_v32  ;;  %3838 = vmatpush.msra.mxu2 %v3506_v42 }
 0x665   : > { %3860 = vmatpush.msra.mxu0 %v3575_v8  ;;  %7818 = vmatmul.msk.f32.gmra.mxu3 %vm13153_vm12, %v10454_v5  ;;  %vm13156_vm12 = vmmov %vm13152_vm4 }
 0x666   : > { %3839 = vmatmul.f32.vlgmr.msra.gmra.mxu2 %v10292_v12  ;;  %v3557_v12 = vld [vmem:[#allocation3 + $0x1a8] sm:$0xff] }
 0x667   : > { %3861 = vmatpush.msra.mxu0 %v3572_v45 }
 0x668   : > { %3787 = vmatmul.f32.gmra.mxu1 %v10363_v44 }
 0x669   : > { %3862 = vmatpush.msra.mxu0 %v3569_v4 }
 0x66b   : > { %3863 = vmatpush.msra.mxu0 %v3566_v58 }
 0x66c   : > { %3761 = vmatmul.f32.gmra.mxu0 %v10419_v21 }
 0x66d   : > { %3864 = vmatpush.msra.mxu0 %v3563_v60  ;;  %7819 = vmatmul.msk.f32.gmra.mxu3 %vm13154_vm9, %v7807_v9  ;;  %vm13157_vm9 = vmmov %vm13152_vm4 }
 0x66e   : > { %3842 = vmatmul.f32.gmra.mxu2 %v10331_v54 }
 0x66f   : > { %3865 = vmatpush.msra.mxu0 %v3560_v59 }
 0x670   : > { %3790 = vmatmul.f32.gmra.mxu1 %v10411_v10 }
 0x671   : > { %3866 = vmatpush.msra.mxu0 %v3557_v12 }
 0x673   : > { %3867 = vmatpush.msra.mxu0 %v3554_v30 }
 0x674   : > { %3868 = vmatmul.f32.vlgmr.msra.gmra.mxu0 %v10283_v35 }
 0x676   : > { %3845 = vmatmul.f32.gmra.mxu2 %v10374_v32 }
 0x678   : > { %7820 = vmatmul.msk.f32.vlgmr.msrb.gmra.mxu1 %vm13155_vm5, %v10385_v19 }
 0x67c   : > { %3871 = vmatmul.f32.gmra.mxu0 %v10320_v31  ;;  %v10498_v31 = vpop.permute.xlu0 %3619 }
 0x67e   : > { %3848 = vmatmul.f32.gmra.mxu2 %v10419_v21  ;;  %v10501_v21 = vstv %s7824_s7 }
 0x680   : > { %7821 = vmatmul.msk.f32.gmra.mxu1 %vm13152_vm4, %v10431_v23 }
 0x684   : > { %3874 = vmatmul.f32.gmra.mxu0 %v10363_v44  ;;  %v10504_v7 = vpop.permute.xlu0 %3624 }
 0x688   : > { %7822 = vmatmul.msk.f32.gmra.mxu1 %vm13156_vm12, %v10454_v5 }
 0x68c   : > { %3877 = vmatmul.f32.gmra.mxu0 %v10411_v10 }
 0x690   : > { %7823 = vmatmul.msk.f32.gmra.mxu1 %vm13157_vm9, %v7807_v9 }
 0x6af   : > { %v3666_v35 = vpop.f32.mrf.mxu1 }
 0x6b0   : > { %v3667_v51 = vadd.f32 %v3666_v35, %v10498_v31 }
 0x6b3   : > { %v3695_v54 = vpop.f32.mrf.mxu3 }
 0x6b4   : > { %v3696_v16 = vadd.f32 %v3695_v54, %v3667_v51 }
 0x6b7   : > { %v3669_v32 = vpop.f32.mrf.mxu1 }
 0x6b8   : > { %v3670_v40 = vadd.f32 %v3669_v32, %v10504_v7 }
 0x6bb   : > { %v3698_v19 = vpop.f32.mrf.mxu3 }
 0x6bc   : > { %v3699_v50 = vadd.f32 %v3698_v19, %v3670_v40 }
 0x6bf   : > { %v3672_v15 = vpop.f32.mrf.mxu1 }
 0x6c0   : > { %v3673_v38 = vadd.f32 %v3672_v15, %v10511_v34 }
 0x6c3   : > { %v3701_v39 = vpop.f32.mrf.mxu3 }
 0x6c4   : > { %v3702_v5 = vadd.f32 %v3701_v39, %v3673_v38 }
 0x6c6   : > { %v3724_v44 = vpop.f32.mrf.mxu2 }
 0x6c7   : > { %v3725_v24 = vadd.f32 %v3724_v44, %v3696_v16  ;;  %v3675_v23 = vpop.f32.mrf.mxu1 }
 0x6c8   : > { %v3676_v3 = vadd.f32 %v3675_v23, %v10520_v17 }
 0x6c9   : > { %vm3911_vm5 = vcmp.gt.f32.partialorder %v3725_v24, 0.0  ;;  %v3924_v10 = vmul.f32 %v10501_v21, %v3725_v24 }
 0x6cb   : > { %v3936_v49 = vsel %vm3911_vm5, %v3725_v24, %v3924_v10 }
 0x6cc   : > { %v3948_v53 = vsel %vm8787_vm0, %v3936_v49, 0.0  ;;  %v3704_v27 = vpop.f32.mrf.mxu3 }
 0x6cd   : > { %3972 = vrot.lane.b32.xlu1 %v3948_v53, %s8004_s12  ;;  %v3705_v36 = vadd.f32 %v3704_v27, %v3676_v3 }
 0x6cf   : > { %v3727_v1 = vpop.f32.mrf.mxu2  ;;  %v3753_v18 = vpop.f32.mrf.mxu0 }
 0x6d0   : > { %v3728_v43 = vadd.f32 %v3727_v1, %v3699_v50  ;;  %v3754_v22 = vadd.f32 %v3753_v18, %v10498_v31 }
 0x6d2   : > { %vm3914_vm4 = vcmp.gt.f32.partialorder %v3728_v43, 0.0  ;;  %v3927_v41 = vmul.f32 %v10501_v21, %v3728_v43 }
 0x6d4   : > { %v3782_v48 = vpop.f32.mrf.mxu1  ;;  %v3939_v37 = vsel %vm3914_vm4, %v3728_v43, %v3927_v41 }
 0x6d5   : > { %v3951_v2 = vsel %vm8787_vm0, %v3939_v37, 0.0  ;;  %v3783_v56 = vadd.f32 %v3782_v48, %v3754_v22 }
 0x6d6   : > { %3978 = vrot.lane.b32.xlu1 %v3951_v2, %s8004_s12 }
 0x6d7   : > { %v3730_v52 = vpop.f32.mrf.mxu2 }
 0x6d8   : > { %v3731_v33 = vadd.f32 %v3730_v52, %v3702_v5  ;;  %v3756_v28 = vpop.f32.mrf.mxu0  ;;  %v3811_v14 = vpop.f32.mrf.mxu3 }
 0x6d9   : > { %v3812_v0 = vadd.f32 %v3811_v14, %v3783_v56  ;;  %v3757_v46 = vadd.f32 %v3756_v28, %v10504_v7 }
 0x6da   : > { %vm3917_vm12 = vcmp.gt.f32.partialorder %v3731_v33, 0.0  ;;  %v3930_v57 = vmul.f32 %v10501_v21, %v3731_v33 }
 0x6db   : > { %vm3912_vm9 = vcmp.gt.f32.partialorder %v3812_v0, 0.0  ;;  %v3925_v6 = vmul.f32 %v10501_v21, %v3812_v0 }
 0x6dc   : > { %v3942_v47 = vsel %vm3917_vm12, %v3731_v33, %v3930_v57 }
 0x6dd   : > { %v3785_v11 = vpop.f32.mrf.mxu1  ;;  %v3937_v9 = vsel %vm3912_vm9, %v3812_v0, %v3925_v6  ;;  %v3954_v26 = vsel %vm8787_vm0, %v3942_v47, 0.0 }
 0x6de   : > { %v3949_v55 = vsel %vm8771_vm11, %v3937_v9, 0.0  ;;  %3984 = vrot.lane.b32.xlu1 %v3954_v26, %s8004_s12  ;;  %v3786_v61 = vadd.f32 %v3785_v11, %v3757_v46 }
 0x6df   : > { %3974 = vrot.lane.b32.xlu2 %v3949_v55, %s8004_s12 }
 0x6e0   : > { %v3733_v62 = vpop.f32.mrf.mxu2  ;;  %v3814_v63 = vpop.f32.mrf.mxu3 }
 0x6e1   : > { %v3734_v13 = vadd.f32 %v3733_v62, %v3705_v36  ;;  %v3759_v29 = vpop.f32.mrf.mxu0  ;;  %v3815_v42 = vadd.f32 %v3814_v63, %v3786_v61 }
 0x6e2   : > { %v3760_v4 = vadd.f32 %v3759_v29, %v10511_v34 }
 0x6e3   : > { %vm3920_vm5 = vcmp.gt.f32.partialorder %v3734_v13, 0.0  ;;  %v3933_v8 = vmul.f32 %v10501_v21, %v3734_v13  ;;  %vm3915_vm4 = vcmp.gt.f32.partialorder %v3815_v42, 0.0  ;;  %v3928_v45 = vmul.f32 %v10501_v21, %v3815_v42 }
 0x6e5   : > { %v3788_v58 = vpop.f32.mrf.mxu1  ;;  %v3940_v60 = vsel %vm3915_vm4, %v3815_v42, %v3928_v45  ;;  %v3945_v59 = vsel %vm3920_vm5, %v3734_v13, %v3933_v8 }
 0x6e6   : > { %v3952_v12 = vsel %vm8771_vm11, %v3940_v60, 0.0  ;;  %v3957_v30 = vsel %vm8787_vm0, %v3945_v59, 0.0  ;;  %v3789_v35 = vadd.f32 %v3788_v58, %v3760_v4 }
 0x6e7   : > { %3980 = vrot.lane.b32.xlu2 %v3952_v12, %s8004_s12  ;;  %3990 = vrot.lane.b32.xlu1 %v3957_v30, %s8004_s12 }
 0x6e8   : > { %v3817_v54 = vpop.f32.mrf.mxu3 }
 0x6e9   : > { %v3762_v32 = vpop.f32.mrf.mxu0  ;;  %v3818_v19 = vadd.f32 %v3817_v54, %v3789_v35  ;;  %v3840_v15 = vpop.f32.mrf.mxu2 }
 0x6ea   : > { %v3763_v16 = vadd.f32 %v3762_v32, %v10520_v17  ;;  %v3841_v53 = vadd.f32 %v3840_v15, %v10498_v31 }
 0x6eb   : > { %vm3918_vm12 = vcmp.gt.f32.partialorder %v3818_v19, 0.0  ;;  %v3931_v51 = vmul.f32 %v10501_v21, %v3818_v19 }
 0x6ed   : > { %v3791_v39 = vpop.f32.mrf.mxu1  ;;  %v3943_v44 = vsel %vm3918_vm12, %v3818_v19, %v3931_v51 }
 0x6ee   : > { %v3955_v24 = vsel %vm8771_vm11, %v3943_v44, 0.0  ;;  %v3792_v10 = vadd.f32 %v3791_v39, %v3763_v16 }
 0x6ef   : > { %3986 = vrot.lane.b32.xlu2 %v3955_v24, %s8004_s12 }
 0x6f0   : > { %v3820_v49 = vpop.f32.mrf.mxu3 }
 0x6f1   : > { %v3821_v40 = vadd.f32 %v3820_v49, %v3792_v10  ;;  %v3869_v23 = vpop.f32.mrf.mxu0  ;;  %v3843_v1 = vpop.f32.mrf.mxu2 }
 0x6f2   : > { %v3870_v18 = vadd.f32 %v3869_v23, %v3841_v53  ;;  %v3844_v22 = vadd.f32 %v3843_v1, %v10504_v7 }
 0x6f3   : > { %vm3921_vm9 = vcmp.gt.f32.partialorder %v3821_v40, 0.0  ;;  %v3934_v50 = vmul.f32 %v10501_v21, %v3821_v40 }
 0x6f5   : > { %v3898_v27 = vpop.f32.mrf.mxu1  ;;  %v3946_v43 = vsel %vm3921_vm9, %v3821_v40, %v3934_v50 }
 0x6f6   : > { %v3899_v41 = vadd.f32 %v3898_v27, %v3870_v18  ;;  %v3958_v38 = vsel %vm8771_vm11, %v3946_v43, 0.0 }
 0x6f7   : > { %3992 = vrot.lane.b32.xlu2 %v3958_v38, %s8004_s12 }
 0x6f8   : > { %vm3913_vm5 = vcmp.gt.f32.partialorder %v3899_v41, 0.0  ;;  %v3926_v48 = vmul.f32 %v10501_v21, %v3899_v41 }
 0x6f9   : > { %v3872_v37 = vpop.f32.mrf.mxu0  ;;  %v3846_v52 = vpop.f32.mrf.mxu2 }
 0x6fa   : > { %v3938_v31 = vsel %vm3913_vm5, %v3899_v41, %v3926_v48  ;;  %v3873_v56 = vadd.f32 %v3872_v37, %v3844_v22  ;;  %v3847_v57 = vadd.f32 %v3846_v52, %v10511_v34  ;;  %vm13164_vm5 = vcmask 736256  }
 0x6fb   : > { %v3950_v5 = vsel %vm8836_vm13, %v3938_v31, 0.0 }
 0x6fc   : > { %3976 = vrot.lane.b32.xlu0 %v3950_v5, %s8004_s12 }
 0x6fd   : > { %v3901_v33 = vpop.f32.mrf.mxu1 }
 0x6fe   : > { %v3902_v28 = vadd.f32 %v3901_v33, %v3873_v56 }
 0x700   : > { %vm3916_vm4 = vcmp.gt.f32.partialorder %v3902_v28, 0.0  ;;  %v3929_v14 = vmul.f32 %v10501_v21, %v3902_v28 }
 0x701   : > { %v3875_v0 = vpop.f32.mrf.mxu0  ;;  %v3849_v11 = vpop.f32.mrf.mxu2 }
 0x702   : > { %v3941_v6 = vsel %vm3916_vm4, %v3902_v28, %v3929_v14  ;;  %v3876_v47 = vadd.f32 %v3875_v0, %v3847_v57  ;;  %v3850_v55 = vadd.f32 %v3849_v11, %v10520_v17  ;;  %vm13165_vm4 = vmmov %vm13164_vm5 }
 0x703   : > { %v3953_v7 = vsel %vm8836_vm13, %v3941_v6, 0.0 }
 0x704   : > { %3982 = vrot.lane.b32.xlu0 %v3953_v7, %s8004_s12 }
 0x705   : > { %v3904_v3 = vpop.f32.mrf.mxu1 }
 0x706   : > { %v3905_v46 = vadd.f32 %v3904_v3, %v3876_v47 }
 0x708   : > { %vm3919_vm12 = vcmp.gt.f32.partialorder %v3905_v46, 0.0  ;;  %v3932_v9 = vmul.f32 %v10501_v21, %v3905_v46 }
 0x709   : > { %v3878_v26 = vpop.f32.mrf.mxu0 }
 0x70a   : > { %v3944_v36 = vsel %vm3919_vm12, %v3905_v46, %v3932_v9  ;;  %v3879_v61 = vadd.f32 %v3878_v26, %v3850_v55  ;;  %vm13166_vm12 = vcmask 883712  }
 0x70b   : > { %v3956_v34 = vsel %vm8836_vm13, %v3944_v36, 0.0 }
 0x70c   : > { %3988 = vrot.lane.b32.xlu0 %v3956_v34, %s8004_s12 }
 0x70d   : > { %v3907_v62 = vpop.f32.mrf.mxu1 }
 0x70e   : > { %v3908_v63 = vadd.f32 %v3907_v62, %v3879_v61 }
 0x710   : > { %vm3922_vm9 = vcmp.gt.f32.partialorder %v3908_v63, 0.0  ;;  %v3935_v13 = vmul.f32 %v10501_v21, %v3908_v63 }
 0x712   : > { %v3947_v29 = vsel %vm3922_vm9, %v3908_v63, %v3935_v13  ;;  %vm13167_vm9 = vmmov %vm13166_vm12 }
 0x713   : > { %v3959_v42 = vsel %vm8836_vm13, %v3947_v29, 0.0 }
 0x714   : > { %3994 = vrot.lane.b32.xlu0 %v3959_v42, %s8004_s12 }
 0x739   : > { %v3975_v8 = vpop.permute.xlu2 %3974 }
 0x73f   : > { %v3973_v17 = vpop.permute.xlu1 %3972 }
 0x740   : > { %v10569_v45 = vsel %vm1523_vm14, %v3973_v17, %v3975_v8  ;;  %4016 = vst.msk [vmem:[#allocation2] sm:$0xff] %vm1544_vm7, %v3973_v17 }
 0x741   : > { %4017 = vst [vmem:[#allocation2 + $0x8] sm:$0xff] %v10569_v45  ;;  %v3981_v4 = vpop.permute.xlu2 %3980 }
 0x747   : > { %v10573_v58 = vld [vmem:[#allocation2] sm:$0xff] }
 0x748   : > { %13161 = vst [vmem:[#allocation31_spill] sm:$0xff] %v10573_v58  ;;  %v3979_v60 = vpop.permute.xlu1 %3978  ;;  %4396 = vrot.lane.b32.xlu0 %v10573_v58, %s7999_s29  ;;  %4316 = vrot.lane.b32.xlu2 %v10573_v58, %s7998_s28 }
 0x749   : > { %v10580_v21 = vsel %vm1523_vm14, %v3979_v60, %v3981_v4  ;;  %4019 = vst.msk [vmem:[#allocation2 + $0x18] sm:$0xff] %vm1544_vm7, %v3979_v60  ;;  %4076 = vrot.lane.b32.xlu1 %v10573_v58, %s7995_s25  ;;  %v3987_v59 = vpop.permute.xlu2 %3986 }
 0x74a   : > { %4020 = vst [vmem:[#allocation2 + $0x20] sm:$0xff] %v10580_v21 }
 0x750   : > { %v3985_v12 = vpop.permute.xlu1 %3984  ;;  %v10586_v30 = vld [vmem:[#allocation2 + $0x18] sm:$0xff] }
 0x751   : > { %13162 = vst [vmem:[#allocation37_spill] sm:$0xff] %v10586_v30  ;;  %v10589_v35 = vsel %vm1523_vm14, %v3985_v12, %v3987_v59  ;;  %4242 = vrot.lane.b32.xlu0 %v10586_v30, %s7997_s27  ;;  %4482 = vrot.lane.b32.xlu2 %v10586_v30, %s8002_s6  ;;  %v3993_v32 = vpop.permute.xlu2 %3992 }
 0x752   : > { %4022 = vst.msk [vmem:[#allocation2 + $0x30] sm:$0xff] %vm1544_vm7, %v3985_v12  ;;  %4156 = vrot.lane.b32.xlu1 %v10573_v58, %s7996_s26 }
 0x753   : > { %4023 = vst [vmem:[#allocation2 + $0x38] sm:$0xff] %v10589_v35 }
 0x759   : > { %v10599_v54 = vld [vmem:[#allocation2 + $0x30] sm:$0xff]  ;;  %v3991_v19 = vpop.permute.xlu1 %3990  ;;  %4562 = vrot.lane.b32.xlu0 %v10586_v30, %s8001_s5 }
 0x75a   : > { %4248 = vrot.lane.b32.xlu2 %v10599_v54, %s7997_s27  ;;  %v10606_v15 = vsel %vm1523_vm14, %v3991_v19, %v3993_v32  ;;  %4025 = vst.msk [vmem:[#allocation2 + $0x48] sm:$0xff] %vm1544_vm7, %v3991_v19  ;;  %4236 = vrot.lane.b32.xlu1 %v10573_v58, %s7997_s27 }
 0x75b   : > { %4026 = vst [vmem:[#allocation2 + $0x50] sm:$0xff] %v10606_v15 }
 0x761   : > { %4322 = vrot.lane.b32.xlu0 %v10586_v30, %s7998_s28  ;;  %v10626_v39 = vld [vmem:[#allocation2 + $0x48] sm:$0xff] }
 0x762   : > { %4568 = vrot.lane.b32.xlu2 %v10599_v54, %s8001_s5  ;;  %4556 = vrot.lane.b32.xlu1 %v10573_v58, %s8001_s5 }
 0x769   : > { %4168 = vrot.lane.b32.xlu0 %v10599_v54, %s7996_s26 }
 0x76a   : > { %4408 = vrot.lane.b32.xlu2 %v10599_v54, %s7999_s29  ;;  %4476 = vrot.lane.b32.xlu1 %v10573_v58, %s8002_s6 }
 0x76e   : > { %v3977_v51 = vpop.permute.xlu0 %3976 }
 0x76f   : > { %v3997_v16 = vsel %vm1523_vm14, %v3975_v8, %v3977_v51 }
 0x770   : > { %4018 = vst.msk [vmem:[#allocation2 + $0x10] sm:$0xff] %vm1547_vm15, %v3997_v16 }
 0x771   : > { %4488 = vrot.lane.b32.xlu0 %v10599_v54, %s8002_s6 }
 0x772   : > { %4174 = vrot.lane.b32.xlu2 %v10626_v39, %s7996_s26  ;;  %4082 = vrot.lane.b32.xlu1 %v10586_v30, %s7995_s25 }
 0x776   : > { %v3983_v44 = vpop.permute.xlu0 %3982 }
 0x777   : > { %v3999_v24 = vsel %vm1523_vm14, %v3981_v4, %v3983_v44  ;;  %v4030_v10 = vld [vmem:[#allocation2 + $0x10] sm:$0xff] }
 0x778   : > { %4021 = vst.msk [vmem:[#allocation2 + $0x28] sm:$0xff] %vm1547_vm15, %v3999_v24  ;;  %v10749_v57 = vld [vmem:[#allocation2 + $0x10] sm:$0xff] }
 0x779   : > { %4648 = vrot.lane.b32.xlu0 %v10599_v54, %s8000_s30  ;;  %4042 = vst.msk [vmem:[#allocation3 + $0x10] sm:$0xff] %vm360_vm1, %v4030_v10 }
 0x77a   : > { %4494 = vrot.lane.b32.xlu2 %v10626_v39, %s8002_s6  ;;  %4162 = vrot.lane.b32.xlu1 %v10586_v30, %s7996_s26 }
 0x77e   : > { %v3989_v49 = vpop.permute.xlu0 %3988 }
 0x77f   : > { %v4001_v40 = vsel %vm1523_vm14, %v3987_v59, %v3989_v49  ;;  %v4033_v23 = vld [vmem:[#allocation2 + $0x28] sm:$0xff] }
 0x780   : > { %4024 = vst.msk [vmem:[#allocation2 + $0x40] sm:$0xff] %vm1547_vm15, %v4001_v40  ;;  %v4537_v36 = vld [vmem:[#allocation2 + $0x28] sm:$0xff] }
 0x781   : > { %4254 = vrot.lane.b32.xlu0 %v10626_v39, %s7997_s27  ;;  %4045 = vst.msk [vmem:[#allocation3 + $0x28] sm:$0xff] %vm360_vm1, %v4033_v23 }
 0x782   : > { %4334 = vrot.lane.b32.xlu2 %v10626_v39, %s7998_s28  ;;  %4402 = vrot.lane.b32.xlu1 %v10586_v30, %s7999_s29 }
 0x786   : > { %v3995_v53 = vpop.permute.xlu0 %3994 }
 0x787   : > { %v4003_v50 = vsel %vm1523_vm14, %v3993_v32, %v3995_v53  ;;  %v4036_v1 = vld [vmem:[#allocation2 + $0x40] sm:$0xff] }
 0x788   : > { %4027 = vst.msk [vmem:[#allocation2 + $0x58] sm:$0xff] %vm1547_vm15, %v4003_v50  ;;  %v4460_v4 = vld [vmem:[#allocation2 + $0x40] sm:$0xff] }
 0x789   : > { %4414 = vrot.lane.b32.xlu0 %v10626_v39, %s7999_s29  ;;  %4048 = vst.msk [vmem:[#allocation3 + $0x40] sm:$0xff] %vm360_vm1, %v4036_v1 }
 0x78a   : > { %4654 = vrot.lane.b32.xlu2 %v10626_v39, %s8000_s30  ;;  %4088 = vrot.lane.b32.xlu1 %v10599_v54, %s7995_s25 }
 0x78f   : > { %v10661_v18 = vld [vmem:[#allocation2 + $0x58] sm:$0xff] }
 0x790   : > { %4051 = vst.msk [vmem:[#allocation3 + $0x58] sm:$0xff] %vm360_vm1, %v10661_v18 }
 0x791   : > { %4318 = vrot.lane.b32.xlu0 %v10569_v45, %s7998_s28 }
 0x792   : > { %4078 = vrot.lane.b32.xlu2 %v10569_v45, %s7995_s25  ;;  %4328 = vrot.lane.b32.xlu1 %v10599_v54, %s7998_s28 }
 0x799   : > { %4484 = vrot.lane.b32.xlu0 %v10580_v21, %s8002_s6 }
 0x79a   : > { %4158 = vrot.lane.b32.xlu2 %v10569_v45, %s7996_s26  ;;  %4094 = vrot.lane.b32.xlu1 %v10626_v39, %s7995_s25 }
 0x7a1   : > { %4250 = vrot.lane.b32.xlu0 %v10589_v35, %s7997_s27 }
 0x7a2   : > { %4238 = vrot.lane.b32.xlu2 %v10569_v45, %s7997_s27  ;;  %4574 = vrot.lane.b32.xlu1 %v10626_v39, %s8001_s5  ;;  %v10683_v27 = vpop.permute.xlu2 %4316 }
 0x7a9   : > { %4570 = vrot.lane.b32.xlu0 %v10589_v35, %s8001_s5 }
 0x7aa   : > { %4558 = vrot.lane.b32.xlu2 %v10569_v45, %s8001_s5  ;;  %4398 = vrot.lane.b32.xlu1 %v10569_v45, %s7999_s29 }
 0x7ab   : > { %v10691_v43 = vpop.permute.xlu2 %4482 }
 0x7b1   : > { %4410 = vrot.lane.b32.xlu0 %v10589_v35, %s7999_s29 }
 0x7b2   : > { %4478 = vrot.lane.b32.xlu2 %v10569_v45, %s8002_s6  ;;  %4244 = vrot.lane.b32.xlu1 %v10580_v21, %s7997_s27 }
 0x7b4   : > { %v10699_v41 = vpop.permute.xlu2 %4248 }
 0x7b9   : > { %4176 = vrot.lane.b32.xlu0 %v10606_v15, %s7996_s26 }
 0x7ba   : > { %4084 = vrot.lane.b32.xlu2 %v10580_v21, %s7995_s25  ;;  %4564 = vrot.lane.b32.xlu1 %v10580_v21, %s8001_s5  ;;  %v10707_v38 = vpop.permute.xlu0 %4396 }
 0x7bb   : > { %v10709_v48 = vpop.permute.xlu1 %4076 }
 0x7bc   : > { %v10711_v37 = vpop.permute.xlu2 %4568 }
 0x7c1   : > { %4496 = vrot.lane.b32.xlu0 %v10606_v15, %s8002_s6 }
 0x7c2   : > { %4164 = vrot.lane.b32.xlu2 %v10580_v21, %s7996_s26  ;;  %4324 = vrot.lane.b32.xlu1 %v10580_v21, %s7998_s28 }
 0x7c3   : > { %v10719_v22 = vpop.permute.xlu0 %4242 }
 0x7c4   : > { %v10721_v31 = vpop.permute.xlu2 %4408  ;;  %v10723_v5 = vpop.permute.xlu1 %4156 }
 0x7c9   : > { %4336 = vrot.lane.b32.xlu0 %v10606_v15, %s7998_s28 }
 0x7ca   : > { %4404 = vrot.lane.b32.xlu2 %v10580_v21, %s7999_s29  ;;  %4170 = vrot.lane.b32.xlu1 %v10589_v35, %s7996_s26 }
 0x7cb   : > { %v10731_v56 = vpop.permute.xlu0 %4562 }
 0x7cc   : > { %v10733_v52 = vpop.permute.xlu2 %4174  ;;  %v10735_v33 = vpop.permute.xlu1 %4236 }
 0x7d1   : > { %4656 = vrot.lane.b32.xlu0 %v10606_v15, %s8000_s30 }
 0x7d2   : > { %4090 = vrot.lane.b32.xlu2 %v10589_v35, %s7995_s25  ;;  %4490 = vrot.lane.b32.xlu1 %v10589_v35, %s8002_s6 }
 0x7d3   : > { %v10743_v28 = vpop.permute.xlu0 %4322 }
 0x7d4   : > { %v10745_v14 = vpop.permute.xlu2 %4494  ;;  %v10747_v0 = vpop.permute.xlu1 %4556 }
 0x7d9   : > { %4080 = vrot.lane.b32.xlu0 %v10749_v57, %s7995_s25 }
 0x7da   : > { %4330 = vrot.lane.b32.xlu2 %v10589_v35, %s7998_s28  ;;  %4650 = vrot.lane.b32.xlu1 %v10589_v35, %s8000_s30 }
 0x7db   : > { %v10757_v6 = vpop.permute.xlu0 %4168 }
 0x7dc   : > { %v10759_v7 = vpop.permute.xlu2 %4334  ;;  %v10761_v47 = vpop.permute.xlu1 %4476 }
 0x7e1   : > { %4560 = vrot.lane.b32.xlu0 %v10749_v57, %s8001_s5 }
 0x7e2   : > { %4096 = vrot.lane.b32.xlu2 %v10606_v15, %s7995_s25  ;;  %4256 = vrot.lane.b32.xlu1 %v10606_v15, %s7997_s27 }
 0x7e3   : > { %v10769_v3 = vpop.permute.xlu0 %4488 }
 0x7e4   : > { %v10771_v46 = vpop.permute.xlu2 %4654  ;;  %v10773_v11 = vpop.permute.xlu1 %4082 }
 0x7e9   : > { %4240 = vrot.lane.b32.xlu0 %v10749_v57, %s7997_s27 }
 0x7ea   : > { %4576 = vrot.lane.b32.xlu2 %v10606_v15, %s8001_s5  ;;  %4416 = vrot.lane.b32.xlu1 %v10606_v15, %s7999_s29 }
 0x7eb   : > { %v10781_v9 = vpop.permute.xlu0 %4648 }
 0x7ec   : > { %v10783_v26 = vpop.permute.xlu2 %4078  ;;  %v10785_v55 = vpop.permute.xlu1 %4162 }
 0x7f1   : > { %4086 = vrot.lane.b32.xlu0 %v4537_v36, %s7995_s25 }
 0x7f2   : > { %4480 = vrot.lane.b32.xlu2 %v10749_v57, %s8002_s6  ;;  %4566 = vrot.lane.b32.xlu1 %v4537_v36, %s8001_s5 }
 0x7f3   : > { %v10791_v34 = vpop.permute.xlu0 %4254 }
 0x7f4   : > { %v10793_v61 = vpop.permute.xlu2 %4158  ;;  %v10795_v62 = vpop.permute.xlu1 %4402 }
 0x7f9   : > { %4486 = vrot.lane.b32.xlu0 %v4537_v36, %s8002_s6 }
 0x7fa   : > { %4160 = vrot.lane.b32.xlu2 %v10749_v57, %s7996_s26  ;;  %4246 = vrot.lane.b32.xlu1 %v4537_v36, %s7997_s27 }
 0x7fb   : > { %v10801_v63 = vpop.permute.xlu0 %4414 }
 0x7fc   : > { %v10803_v13 = vpop.permute.xlu2 %4238  ;;  %v10805_v29 = vpop.permute.xlu1 %4088 }
 0x801   : > { %4166 = vrot.lane.b32.xlu0 %v4537_v36, %s7996_s26 }
 0x802   : > { %4400 = vrot.lane.b32.xlu2 %v10749_v57, %s7999_s29  ;;  %4406 = vrot.lane.b32.xlu1 %v4537_v36, %s7999_s29 }
 0x803   : > { %v10811_v42 = vpop.permute.xlu0 %4318 }
 0x804   : > { %v10813_v8 = vpop.permute.xlu2 %4558  ;;  %v10815_v17 = vpop.permute.xlu1 %4328 }
 0x809   : > { %4092 = vrot.lane.b32.xlu0 %v4460_v4, %s7995_s25 }
 0x80a   : > { %4326 = vrot.lane.b32.xlu2 %v4537_v36, %s7998_s28  ;;  %4492 = vrot.lane.b32.xlu1 %v4460_v4, %s8002_s6 }
 0x80b   : > { %v10820_v60 = vpop.permute.xlu0 %4484 }
 0x80c   : > { %v10822_v59 = vpop.permute.xlu2 %4478  ;;  %v10824_v12 = vpop.permute.xlu1 %4094 }
 0x811   : > { %4412 = vrot.lane.b32.xlu0 %v4460_v4, %s7999_s29 }
 0x812   : > { %4572 = vrot.lane.b32.xlu2 %v4460_v4, %s8001_s5  ;;  %4172 = vrot.lane.b32.xlu1 %v4460_v4, %s7996_s26 }
 0x813   : > { %v10829_v35 = vpop.permute.xlu0 %4250 }
 0x814   : > { %v10831_v32 = vpop.permute.xlu2 %4084  ;;  %v4575_v19 = vpop.permute.xlu1 %4574 }
 0x819   : > { %4098 = vrot.lane.b32.xlu0 %v10661_v18, %s7995_s25 }
 0x81a   : > { %4252 = vrot.lane.b32.xlu2 %v4460_v4, %s7997_s27  ;;  %4332 = vrot.lane.b32.xlu1 %v4460_v4, %s7998_s28 }
 0x81b   : > { %v10837_v15 = vpop.permute.xlu0 %4570 }
 0x81c   : > { %v10839_v51 = vpop.permute.xlu2 %4164  ;;  %v10841_v16 = vpop.permute.xlu1 %4398 }
 0x821   : > { %4258 = vrot.lane.b32.xlu0 %v10661_v18, %s7997_s27 }
 0x822   : > { %4498 = vrot.lane.b32.xlu2 %v10661_v18, %s8002_s6  ;;  %4578 = vrot.lane.b32.xlu1 %v10661_v18, %s8001_s5 }
 0x823   : > { %v10849_v44 = vpop.permute.xlu0 %4410 }
 0x824   : > { %v10851_v24 = vpop.permute.xlu2 %4404  ;;  %v10853_v10 = vpop.permute.xlu1 %4244 }
 0x829   : > { %4320 = vrot.lane.b32.xlu0 %v10749_v57, %s7998_s28 }
 0x82a   : > { %4178 = vrot.lane.b32.xlu2 %v10661_v18, %s7996_s26  ;;  %4642 = vrot.lane.b32.xlu1 %v10586_v30, %s8000_s30 }
 0x82b   : > { %v10861_v49 = vpop.permute.xlu0 %4176 }
 0x82c   : > { %v10863_v40 = vpop.permute.xlu2 %4090  ;;  %v10865_v23 = vpop.permute.xlu1 %4564 }
 0x831   : > { %4646 = vrot.lane.b32.xlu0 %v4537_v36, %s8000_s30 }
 0x832   : > { %4652 = vrot.lane.b32.xlu2 %v4460_v4, %s8000_s30  ;;  %4418 = vrot.lane.b32.xlu1 %v10661_v18, %s7999_s29 }
 0x833   : > { %v10871_v53 = vpop.permute.xlu0 %4496 }
 0x834   : > { %v10873_v50 = vpop.permute.xlu2 %4330  ;;  %v10875_v1 = vpop.permute.xlu1 %4324 }
 0x839   : > { %4338 = vrot.lane.b32.xlu0 %v10661_v18, %s7998_s28 }
 0x83a   : > { %4644 = vrot.lane.b32.xlu2 %v10580_v21, %s8000_s30  ;;  %4658 = vrot.lane.b32.xlu1 %v10661_v18, %s8000_s30 }
 0x83b   : > { %v10883_v36 = vpop.permute.xlu0 %4336 }
 0x83c   : > { %v10885_v4 = vpop.permute.xlu2 %4096  ;;  %v10887_v2 = vpop.permute.xlu1 %4170 }
 0x841   : > { %4640 = vrot.lane.b32.xlu0 %v10749_v57, %s8000_s30  ;;  %v7838_v57 = vld [vmem:[%s12949_s2 + $0x68] sm:$0xff] }
 0x842   : > { %4638 = vrot.lane.b32.xlu2 %v10569_v45, %s8000_s30  ;;  %4636 = vrot.lane.b32.xlu1 %v10573_v58, %s8000_s30  ;;  %v4584_v45 = vsel %vm905_vm6, %v10711_v37, %v10837_v15  ;;  %v7839_v58 = vld [vmem:[%s12949_s2 + $0x70] sm:$0xff] }
 0x843   : > { %v10895_v20 = vpop.permute.xlu0 %4656 }
 0x844   : > { %13163 = vst [vmem:[#allocation33_spill] sm:$0xff] %v10895_v20  ;;  %v10897_v21 = vpop.permute.xlu2 %4576  ;;  %v10899_v18 = vpop.permute.xlu1 %4490  ;;  %v4666_v25 = vsel %vm13164_vm5, %v10771_v46, %v10895_v20  ;;  %v7840_v46 = vld [vmem:[%s12949_s2 + $0x78] sm:$0xff]  ;;  %vm13168_vm5 = vmmov %vm13167_vm9 }
 0x845   : > { %v4586_v30 = vsel %vm905_vm6, %v4575_v19, %v10897_v21  ;;  %4920 = vmatpush.msrb.mxu0 %v4666_v25  ;;  %v4582_v25 = vsel %vm905_vm6, %v10731_v56, %v10865_v23 }
 0x846   : > { %4879 = vmatpush.msrb.mxu2 %v4586_v30  ;;  %v4580_v30 = vsel %vm905_vm6, %v10747_v0, %v10813_v8  ;;  %v4504_v0 = vsel %vm824_vm8, %v10769_v3, %v10899_v18 }
 0x848   : > { %4880 = vmatpush.msrb.mxu2 %v4584_v45  ;;  %v7837_v45 = vld [vmem:[%s12949_s2 + $0x60] sm:$0xff] }
 0x849   : > { %4825 = vperm.xlu0 %7960, %v7838_v57  }
 0x84a   : > { %4830 = vperm.xlu2 %7962, %v7839_v58   ;;  %4835 = vperm.xlu1 %7961, %v7840_v46   ;;  %v4506_v58 = vsel %vm824_vm8, %v10745_v14, %v10871_v53  ;;  %v4502_v14 = vsel %vm824_vm8, %v10691_v43, %v10820_v60 }
 0x84b   : > { %4881 = vmatpush.msrb.mxu2 %v4582_v25  ;;  %v10924_v37 = vpop.permute.xlu0 %4080  ;;  %v4262_v25 = vsel %vm581_vm2, %v10719_v22, %v10853_v10 }
 0x84c   : > { %v10926_v19 = vpop.permute.xlu2 %4480  ;;  %v10928_v20 = vpop.permute.xlu1 %4650  ;;  %4122 = vst.msk [vmem:[#allocation3 + $0x70] sm:$0xff] %vm360_vm1, %v10924_v37 }
 0x84d   : > { %4882 = vmatpush.msrb.mxu2 %v4580_v30  ;;  %v4664_v56 = vsel %vm13165_vm4, %v10781_v9, %v10928_v20  ;;  %4522 = vst.msk [vmem:[#allocation3 + $0x250] sm:$0xff] %vm360_vm1, %v10926_v19  ;;  %v4500_v9 = vsel %vm824_vm8, %v10761_v47, %v10822_v59  ;;  %v4264_v47 = vsel %vm581_vm2, %v10699_v41, %v10829_v35  ;;  %vm13169_vm4 = vmmov %vm13168_vm5 }
 0x84e   : > { %4921 = vmatpush.msrb.mxu0 %v4664_v56  ;;  %v4260_v30 = vsel %vm581_vm2, %v10735_v33, %v10803_v13  ;;  %v4186_v41 = vsel %vm13029_vm3, %v10733_v52, %v10861_v49  ;;  %v4424_v33 = vsel %vm13167_vm9, %v10721_v31, %v10849_v44  ;;  %v4182_v52 = vsel %vm13029_vm3, %v10785_v55, %v10839_v51 }
 0x84f   : > { %4883 = vmatpush.msrb.mxu2 %v4506_v58  ;;  %v4180_v31 = vsel %vm13029_vm3, %v10723_v5, %v10793_v61  ;;  %v4346_v55 = vsel %vm662_vm10, %v10759_v7, %v10883_v36  ;;  %v4344_v7 = vsel %vm662_vm10, %v10815_v17, %v10873_v50 }
 0x851   : > { %4884 = vmatpush.msrb.mxu2 %v4504_v0  ;;  %v4184_v0 = vsel %vm13029_vm3, %v10757_v6, %v10887_v2  ;;  %v4420_v6 = vsel %vm13169_vm4, %v10707_v38, %v10841_v16 }
 0x852   : > { %4820 = vperm.xlu1 %7961, %v7837_v45  }
 0x853   : > { %4885 = vmatpush.msrb.mxu2 %v4502_v14  ;;  %v10952_v57 = vpop.permute.xlu0 %4560 }
 0x854   : > { %v10954_v46 = vpop.permute.xlu2 %4160  ;;  %v10956_v3 = vpop.permute.xlu1 %4256  ;;  %4602 = vst.msk [vmem:[#allocation3 + $0x2b0] sm:$0xff] %vm360_vm1, %v10952_v57 }
 0x855   : > { %4886 = vmatpush.msrb.mxu2 %v4500_v9  ;;  %v4266_v43 = vsel %vm581_vm2, %v10791_v34, %v10956_v3  ;;  %4202 = vst.msk [vmem:[#allocation3 + $0xd0] sm:$0xff] %vm360_vm1, %v10954_v46 }
 0x856   : > { %4850 = vmatpush.msra.mxu3 %v4266_v43  ;;  %v4340_v43 = vsel %vm662_vm10, %v10683_v27, %v10811_v42  ;;  %v13174_v27 = vld [vmem:[#allocation37_spill] sm:$0xff] }
 0x858   : > { %4851 = vmatpush.msra.mxu3 %v4264_v47 }
 0x85a   : > { %4852 = vmatpush.msra.mxu3 %v4262_v25 }
 0x85b   : > { %v10974_v58 = vpop.permute.xlu0 %4240 }
 0x85c   : > { %v10976_v34 = vpop.permute.xlu2 %4400  ;;  %v10978_v56 = vpop.permute.xlu1 %4416  ;;  %4282 = vst.msk [vmem:[#allocation3 + $0x130] sm:$0xff] %vm360_vm1, %v10974_v58  ;;  %4853 = vmatpush.msra.mxu3 %v4260_v30 }
 0x85d   : > { %v4426_v22 = vsel %vm13166_vm12, %v10801_v63, %v10978_v56  ;;  %4442 = vst.msk [vmem:[#allocation3 + $0x1f0] sm:$0xff] %vm360_vm1, %v10976_v34  ;;  %v4422_v63 = vsel %vm13168_vm5, %v10795_v62, %v10851_v24  ;;  %vm13170_vm12 = vcmask 1039360  }
 0x85e   : > { %4854 = vmatpush.msra.mxu3 %v4186_v41  ;;  %4887 = vmatpush.msrb.mxu2 %v4426_v22  ;;  %v4106_v5 = vsel %vm13170_vm12, %v10824_v12, %v10885_v4  ;;  %vm13171_vm9 = vmmov %vm13170_vm12  ;;  %v4342_v12 = vsel %vm662_vm10, %v10743_v28, %v10875_v1  ;;  %v11067_v28 = vld [vmem:[%s12948_s1 + $0x140] sm:$0xff]  ;;  %vm13180_vm12 = vcmask 736256  }
 0x85f   : > { %v4104_v38 = vsel %vm13171_vm9, %v10805_v29, %v10863_v40  ;;  %vm13172_vm5 = vmmov %vm13171_vm9  ;;  %v11041_v29 = vld [vmem:[%s12948_s1 + $0x128] sm:$0xff] }
 0x860   : > { %4855 = vmatpush.msra.mxu3 %v4184_v0  ;;  %4888 = vmatpush.msrb.mxu2 %v4424_v33  ;;  %v4102_v62 = vsel %vm13172_vm5, %v10773_v11, %v10831_v32  ;;  %vm13173_vm4 = vmmov %vm13172_vm5  ;;  %v11089_v33 = vld [vmem:[%s12948_s1 + $0x158] sm:$0xff]  ;;  %vm13182_vm5 = vcmask 883712  }
 0x861   : > { %v4100_v17 = vsel %vm13173_vm4, %v10709_v48, %v10783_v26  ;;  %v11062_v48 = vld [vmem:[%s12948_s1 + $0x120] sm:$0xff]  ;;  %13176 = vst [vmem:[#allocation34_spill] sm:$0xff] %v11089_v33  ;;  %vm13181_vm9 = vmmov %vm13173_vm4 }
 0x862   : > { %4856 = vmatpush.msra.mxu3 %v4182_v52  ;;  %4889 = vmatpush.msrb.mxu2 %v4422_v63 }
 0x863   : > { %v11008_v45 = vpop.permute.xlu0 %4086 }
 0x864   : > { %v11010_v14 = vpop.permute.xlu2 %4326  ;;  %v11012_v9 = vpop.permute.xlu1 %4566  ;;  %4125 = vst.msk [vmem:[#allocation3 + $0x88] sm:$0xff] %vm360_vm1, %v11008_v45  ;;  %4857 = vmatpush.msra.mxu3 %v4180_v31  ;;  %4890 = vmatpush.msrb.mxu2 %v4420_v6  ;;  %v11102_v31 = vld [vmem:[%s12948_s1 + $0x150] sm:$0xff] }
 0x865   : > { %4605 = vst.msk [vmem:[#allocation3 + $0x2c8] sm:$0xff] %vm360_vm1, %v11012_v9  ;;  %v11107_v6 = vld [vmem:[%s12948_s1 + $0x170] sm:$0xff] }
 0x866   : > { %4365 = vst.msk [vmem:[#allocation3 + $0x1a8] sm:$0xff] %vm360_vm1, %v11010_v14  ;;  %4858 = vmatpush.msra.mxu3 %v4106_v5  ;;  %4891 = vmatpush.msrb.mxu2 %v4346_v55 }
 0x867   : > { %13177 = vst [vmem:[#allocation24_spill] sm:$0xff] %v11102_v31 }
 0x868   : > { %4859 = vmatpush.msra.mxu3 %v4104_v38  ;;  %4892 = vmatpush.msrb.mxu2 %v4344_v7  ;;  %13178 = vst [vmem:[#allocation35_spill] sm:$0xff] %v11107_v6  ;;  %v11120_v7 = vld [vmem:[%s12948_s1 + $0x168] sm:$0xff] }
 0x869   : > { %13179 = vst [vmem:[#allocation25_spill] sm:$0xff] %v11120_v7 }
 0x86a   : > { %4860 = vmatpush.msra.mxu3 %v4102_v62  ;;  %4893 = vmatpush.msrb.mxu2 %v4342_v12 }
 0x86b   : > { %v11049_v11 = vpop.permute.xlu0 %4486 }
 0x86c   : > { %v4573_v47 = vpop.permute.xlu2 %4572  ;;  %v4247_v25 = vpop.permute.xlu1 %4246  ;;  %4525 = vst.msk [vmem:[#allocation3 + $0x268] sm:$0xff] %vm360_vm1, %v11049_v11  ;;  %4861 = vmatpush.msra.mxu3 %v4100_v17  ;;  %4894 = vmatpush.msrb.mxu2 %v4340_v43 }
 0x86d   : > { %4285 = vst.msk [vmem:[#allocation3 + $0x148] sm:$0xff] %vm360_vm1, %v4247_v25  ;;  %4895 = vmatmul.f32.vlgmr.msrb.gmra.mxu2 %v11041_v29 }
 0x86e   : > { %4608 = vst.msk [vmem:[#allocation3 + $0x2e0] sm:$0xff] %vm360_vm1, %v4573_v47  ;;  %4862 = vmatpush.msra.mxu3 %v10626_v39  ;;  %v11084_v39 = vld [vmem:[%s12948_s1 + $0x138] sm:$0xff] }
 0x870   : > { %4863 = vmatpush.msra.mxu3 %v10599_v54  ;;  %v13175_v54 = vld [vmem:[#allocation31_spill] sm:$0xff] }
 0x872   : > { %4864 = vmatpush.msra.mxu3 %v13174_v27 }
 0x873   : > { %v11069_v30 = vpop.permute.xlu0 %4166 }
 0x874   : > { %v4253_v41 = vpop.permute.xlu2 %4252  ;;  %v11071_v22 = vpop.permute.xlu1 %4406  ;;  %4205 = vst.msk [vmem:[#allocation3 + $0xe8] sm:$0xff] %vm360_vm1, %v11069_v30  ;;  %4865 = vmatpush.msra.mxu3 %v13175_v54 }
 0x875   : > { %4445 = vst.msk [vmem:[#allocation3 + $0x208] sm:$0xff] %vm360_vm1, %v11071_v22  ;;  %4866 = vmatmul.f32.vlgmr.msra.gmra.mxu3 %v11062_v48  ;;  %4898 = vmatmul.f32.gmra.mxu2 %v11067_v28 }
 0x876   : > { %4288 = vst.msk [vmem:[#allocation3 + $0x160] sm:$0xff] %vm360_vm1, %v4253_v41 }
 0x87b   : > { %v11091_v0 = vpop.permute.xlu0 %4092 }
 0x87c   : > { %v4499_v52 = vpop.permute.xlu2 %4498  ;;  %v4493_v63 = vpop.permute.xlu1 %4492  ;;  %4128 = vst.msk [vmem:[#allocation3 + $0xa0] sm:$0xff] %vm360_vm1, %v11091_v0 }
 0x87d   : > { %4528 = vst.msk [vmem:[#allocation3 + $0x280] sm:$0xff] %vm360_vm1, %v4493_v63  ;;  %4869 = vmatmul.f32.gmra.mxu3 %v11084_v39  ;;  %4901 = vmatmul.f32.gmra.mxu2 %v11089_v33  ;;  %v4265_v33 = vsel %vm581_vm2, %v10829_v35, %v4253_v41  ;;  %v4581_v35 = vsel %vm905_vm6, %v10813_v8, %v10952_v57  ;;  %v4029_v41 = vld [vmem:[#allocation2 + $0x8] sm:$0xff] }
 0x87e   : > { %4531 = vst.msk [vmem:[#allocation3 + $0x298] sm:$0xff] %vm360_vm1, %v4499_v52  ;;  %v4183_v57 = vsel %vm13029_vm3, %v10839_v51, %v11069_v30 }
 0x883   : > { %v11109_v55 = vpop.permute.xlu0 %4412 }
 0x884   : > { %v4179_v5 = vpop.permute.xlu2 %4178  ;;  %v4173_v38 = vpop.permute.xlu1 %4172  ;;  %4448 = vst.msk [vmem:[#allocation3 + $0x220] sm:$0xff] %vm360_vm1, %v11109_v55 }
 0x885   : > { %4208 = vst.msk [vmem:[#allocation3 + $0x100] sm:$0xff] %vm360_vm1, %v4173_v38  ;;  %4872 = vmatmul.f32.gmra.mxu3 %v11102_v31  ;;  %4904 = vmatmul.f32.gmra.mxu2 %v11107_v6  ;;  %v4263_v31 = vsel %vm581_vm2, %v10853_v10, %v4247_v25  ;;  %v4187_v10 = vsel %vm13029_vm3, %v10861_v49, %v4179_v5 }
 0x886   : > { %4211 = vst.msk [vmem:[#allocation3 + $0x118] sm:$0xff] %vm360_vm1, %v4179_v5  ;;  %v4185_v8 = vsel %vm13029_vm3, %v10887_v2, %v4173_v38  ;;  %v4505_v49 = vsel %vm824_vm8, %v10899_v18, %v4493_v63  ;;  %v4181_v2 = vsel %vm13029_vm3, %v10793_v61, %v10954_v46  ;;  %v4501_v18 = vsel %vm824_vm8, %v10822_v59, %v10926_v19  ;;  %vm13185_vm3 = vmmov %vm13173_vm4  ;;  %v4794_v5 = vld [vmem:[#allocation3 + $0x2c8] sm:$0xff] }
 0x887   : > { %v4105_v61 = vsel %vm13173_vm4, %v10863_v40, %v11091_v0  ;;  %v4423_v19 = vsel %vm13182_vm5, %v10851_v24, %v11071_v22  ;;  %v4101_v40 = vsel %vm13185_vm3, %v10783_v26, %v10924_v37  ;;  %v4038_v24 = vld [vmem:[#allocation2 + $0x50] sm:$0xff]  ;;  %v4035_v26 = vld [vmem:[#allocation2 + $0x38] sm:$0xff]  ;;  %v4032_v37 = vld [vmem:[#allocation2 + $0x20] sm:$0xff] }
 0x88b   : > { %v4099_v62 = vpop.permute.xlu0 %4098 }
 0x88c   : > { %v11122_v12 = vpop.permute.xlu2 %4652  ;;  %v11124_v17 = vpop.permute.xlu1 %4332  ;;  %4131 = vst.msk [vmem:[#allocation3 + $0xb8] sm:$0xff] %vm360_vm1, %v4099_v62  ;;  %v4107_v51 = vsel %vm13181_vm9, %v10885_v4, %v4099_v62  ;;  %vm13184_vm9 = vmmov %vm13173_vm4 }
 0x88d   : > { %4368 = vst.msk [vmem:[#allocation3 + $0x1c0] sm:$0xff] %vm360_vm1, %v11124_v17  ;;  %4875 = vmatmul.f32.gmra.mxu3 %v11120_v7  ;;  %v4585_v7 = vsel %vm905_vm6, %v10837_v15, %v4573_v47  ;;  %v4103_v4 = vsel %vm13184_vm9, %v10831_v32, %v11008_v45  ;;  %vm13186_vm4 = vmmov %vm13182_vm5  ;;  %v13187_v45 = vld [vmem:[#allocation33_spill] sm:$0xff] }
 0x88e   : > { %4688 = vst.msk [vmem:[#allocation3 + $0x340] sm:$0xff] %vm360_vm1, %v11122_v12 }
 0x893   : > { %v4259_v43 = vpop.permute.xlu0 %4258 }
 0x894   : > { %v4579_v27 = vpop.permute.xlu1 %4578  ;;  %v4267_v54 = vsel %vm581_vm2, %v10956_v3, %v4259_v43  ;;  %4291 = vst.msk [vmem:[#allocation3 + $0x178] sm:$0xff] %vm360_vm1, %v4259_v43  ;;  %v4583_v3 = vsel %vm905_vm6, %v10865_v23, %v11012_v9  ;;  %v4645_v47 = vpop.permute.xlu2 %4644  ;;  %v4743_v43 = vld [vmem:[#allocation3 + $0x130] sm:$0xff] }
 0x895   : > { %v4587_v6 = vsel %vm905_vm6, %v10897_v21, %v4579_v27  ;;  %4611 = vst.msk [vmem:[#allocation3 + $0x2f8] sm:$0xff] %vm360_vm1, %v4579_v27  ;;  %4937 = vmatpush.msra.mxu1 %v4267_v54  ;;  %v4261_v21 = vsel %vm581_vm2, %v10803_v13, %v10974_v58  ;;  %v4507_v13 = vsel %vm824_vm8, %v10871_v53, %v4499_v52  ;;  %v11227_v52 = vld [vmem:[%s12948_s1 + $0x130] sm:$0xff]  ;;  %v4788_v27 = vld [vmem:[#allocation3 + $0x298] sm:$0xff] }
 0x896   : > { %4966 = vmatpush.msrb.mxu3 %v4587_v6  ;;  %v4503_v53 = vsel %vm824_vm8, %v10820_v60, %v11049_v11  ;;  %v4809_v6 = vld [vmem:[#allocation3 + $0x340] sm:$0xff]  ;;  %v4740_v54 = vld [vmem:[#allocation3 + $0x118] sm:$0xff] }
 0x897   : > { %4938 = vmatpush.msra.mxu1 %v4265_v33 }
 0x898   : > { %4967 = vmatpush.msrb.mxu3 %v4585_v7  ;;  %v4746_v7 = vld [vmem:[#allocation3 + $0x148] sm:$0xff] }
 0x899   : > { %4939 = vmatpush.msra.mxu1 %v4263_v31  ;;  %v4797_v31 = vld [vmem:[#allocation3 + $0x2e0] sm:$0xff] }
 0x89a   : > { %4968 = vmatpush.msrb.mxu3 %v4583_v3  ;;  %v4785_v3 = vld [vmem:[#allocation3 + $0x280] sm:$0xff] }
 0x89b   : > { %v11153_v15 = vpop.permute.xlu0 %4320  ;;  %4940 = vmatpush.msra.mxu1 %v4261_v21  ;;  %v4752_v63 = vld [vmem:[#allocation3 + $0x178] sm:$0xff]  ;;  %v4737_v21 = vld [vmem:[#allocation3 + $0x100] sm:$0xff] }
 0x89c   : > { %v4643_v25 = vpop.permute.xlu1 %4642  ;;  %4362 = vst.msk [vmem:[#allocation3 + $0x190] sm:$0xff] %vm360_vm1, %v11153_v15  ;;  %4969 = vmatpush.msrb.mxu3 %v4581_v35  ;;  %v4639_v22 = vpop.permute.xlu2 %4638  ;;  %v4782_v35 = vld [vmem:[#allocation3 + $0x268] sm:$0xff] }
 0x89d   : > { %v4662_v23 = vsel %vm13180_vm12, %v4643_v25, %v4645_v47  ;;  %4941 = vmatpush.msra.mxu1 %v4187_v10  ;;  %vm13183_vm12 = vmmov %vm13182_vm5  ;;  %v4779_v10 = vld [vmem:[#allocation3 + $0x250] sm:$0xff]  ;;  %v7833_v25 = vld [vmem:[%s12948_s1 + $0x160] sm:$0xff] }
 0x89e   : > { %4922 = vmatpush.msrb.mxu0 %v4662_v23  ;;  %4970 = vmatpush.msrb.mxu3 %v4507_v13  ;;  %v4425_v59 = vsel %vm13183_vm12, %v10849_v44, %v11109_v55  ;;  %v4421_v44 = vsel %vm13186_vm4, %v10841_v16, %v10976_v34  ;;  %vm13188_vm12 = vcmask 736256   ;;  %v4345_v16 = vsel %vm662_vm10, %v10873_v50, %v11124_v17  ;;  %v4749_v55 = vld [vmem:[#allocation3 + $0x160] sm:$0xff]  ;;  %v11239_v17 = vld [vmem:[%s12948_s1 + $0x148] sm:$0xff]  ;;  %v4731_v13 = vld [vmem:[#allocation3 + $0xd0] sm:$0xff] }
 0x89f   : > { %4942 = vmatpush.msra.mxu1 %v4185_v8  ;;  %vm13189_vm3 = vmmov %vm13188_vm12  ;;  %v4343_v34 = vsel %vm662_vm10, %v10875_v1, %v11010_v14  ;;  %v4341_v50 = vsel %vm662_vm10, %v10811_v42, %v11153_v15  ;;  %v4800_v1 = vld [vmem:[#allocation3 + $0x2f8] sm:$0xff]  ;;  %v4734_v15 = vld [vmem:[#allocation3 + $0xe8] sm:$0xff] }
 0x8a0   : > { %4971 = vmatpush.msrb.mxu3 %v4505_v49  ;;  %vm13190_vm9 = vmmov %vm13189_vm3  ;;  %v13198_v23 = vld [vmem:[#allocation34_spill] sm:$0xff] }
 0x8a1   : > { %4943 = vmatpush.msra.mxu1 %v4183_v57  ;;  %vm13192_vm4 = vmmov %vm13189_vm3  ;;  %v4728_v49 = vld [vmem:[#allocation3 + $0xb8] sm:$0xff]  ;;  %v4773_v57 = vld [vmem:[#allocation3 + $0x220] sm:$0xff] }
 0x8a2   : > { %4972 = vmatpush.msrb.mxu3 %v4503_v53  ;;  %v4725_v53 = vld [vmem:[#allocation3 + $0xa0] sm:$0xff] }
 0x8a3   : > { %v4647_v58 = vpop.permute.xlu0 %4646  ;;  %4944 = vmatpush.msra.mxu1 %v4181_v2  ;;  %v4770_v2 = vld [vmem:[#allocation3 + $0x208] sm:$0xff] }
 0x8a4   : > { %v4419_v9 = vpop.permute.xlu1 %4418  ;;  %4685 = vst.msk [vmem:[#allocation3 + $0x328] sm:$0xff] %vm360_vm1, %v4647_v58  ;;  %4973 = vmatpush.msrb.mxu3 %v4501_v18  ;;  %v4663_v30 = vsel %vm13190_vm9, %v4645_v47, %v4647_v58  ;;  %v13197_v47 = vld [vmem:[#allocation24_spill] sm:$0xff]  ;;  %v4767_v58 = vld [vmem:[#allocation3 + $0x1f0] sm:$0xff] }
 0x8a5   : > { %v4427_v60 = vsel %vm13182_vm5, %v10978_v56, %v4419_v9  ;;  %4451 = vst.msk [vmem:[#allocation3 + $0x238] sm:$0xff] %vm360_vm1, %v4419_v9  ;;  %4945 = vmatpush.msra.mxu1 %v4107_v51  ;;  %vm13191_vm5 = vmmov %vm13189_vm3  ;;  %v4722_v18 = vld [vmem:[#allocation3 + $0x88] sm:$0xff]  ;;  %v13201_v51 = vld [vmem:[#allocation25_spill] sm:$0xff] }
 0x8a6   : > { %4974 = vmatpush.msrb.mxu3 %v4427_v60  ;;  %v7836_v9 = vld [vmem:[%s12948_s1 + $0x178] sm:$0xff]  ;;  %v4719_v60 = vld [vmem:[#allocation3 + $0x70] sm:$0xff] }
 0x8a7   : > { %4946 = vmatpush.msra.mxu1 %v4105_v61  ;;  %v13202_v61 = vld [vmem:[#allocation35_spill] sm:$0xff] }
 0x8a8   : > { %4975 = vmatpush.msrb.mxu3 %v4425_v59 }
 0x8a9   : > { %4947 = vmatpush.msra.mxu1 %v4103_v4  ;;  %v4716_v4 = vld [vmem:[#allocation3 + $0x58] sm:$0xff] }
 0x8aa   : > { %4976 = vmatpush.msrb.mxu3 %v4423_v19  ;;  %v4761_v19 = vld [vmem:[#allocation3 + $0x1c0] sm:$0xff] }
 0x8ab   : > { %v4339_v46 = vpop.permute.xlu0 %4338  ;;  %4948 = vmatpush.msra.mxu1 %v4101_v40  ;;  %v4806_v38 = vld [vmem:[#allocation3 + $0x328] sm:$0xff]  ;;  %v4713_v40 = vld [vmem:[#allocation3 + $0x40] sm:$0xff] }
 0x8ac   : > { %v4659_v56 = vpop.permute.xlu1 %4658  ;;  %v4347_v32 = vsel %vm662_vm10, %v10883_v36, %v4339_v46  ;;  %4371 = vst.msk [vmem:[#allocation3 + $0x1d8] sm:$0xff] %vm360_vm1, %v4339_v46  ;;  %4977 = vmatpush.msrb.mxu3 %v4421_v44  ;;  %v4665_v36 = vsel %vm13189_vm3, %v10928_v20, %v11122_v12  ;;  %v4791_v12 = vld [vmem:[#allocation3 + $0x2b0] sm:$0xff]  ;;  %v4776_v8 = vld [vmem:[#allocation3 + $0x238] sm:$0xff]  ;;  %v4758_v44 = vld [vmem:[#allocation3 + $0x1a8] sm:$0xff] }
 0x8ad   : > { %v4667_v11 = vsel %vm13188_vm12, %v13187_v45, %v4659_v56  ;;  %4691 = vst.msk [vmem:[#allocation3 + $0x358] sm:$0xff] %vm360_vm1, %v4659_v56  ;;  %4949 = vmatpush.msra.mxu1 %v4038_v24  ;;  %vm13193_vm12 = vcmask 261120   ;;  %v4710_v46 = vld [vmem:[#allocation3 + $0x28] sm:$0xff]  ;;  %v4755_v56 = vld [vmem:[#allocation3 + $0x190] sm:$0xff] }
 0x8ae   : > { %4978 = vmatpush.msrb.mxu3 %v4347_v32  ;;  %5007 = vmatpush.msra.mxu2 %v4667_v11  ;;  %vm13194_vm3 = vmmov %vm13193_vm12  ;;  %v4707_v32 = vld [vmem:[#allocation3 + $0x10] sm:$0xff] }
 0x8af   : > { %4950 = vmatpush.msra.mxu1 %v4035_v26  ;;  %vm13195_vm9 = vmmov %vm13194_vm3 }
 0x8b0   : > { %4979 = vmatpush.msrb.mxu3 %v4345_v16  ;;  %5008 = vmatpush.msra.mxu2 %v4665_v36 }
 0x8b1   : > { %4951 = vmatpush.msra.mxu1 %v4032_v37 }
 0x8b2   : > { %4980 = vmatpush.msrb.mxu3 %v4343_v34  ;;  %5009 = vmatpush.msra.mxu2 %v4663_v30 }
 0x8b3   : > { %v4641_v20 = vpop.permute.xlu0 %4640  ;;  %4952 = vmatpush.msra.mxu1 %v4029_v41  ;;  %v4764_v59 = vld [vmem:[#allocation3 + $0x1d8] sm:$0xff] }
 0x8b4   : > { %v4637_v33 = vpop.permute.xlu1 %4636  ;;  %v4661_v0 = vsel %vm13191_vm5, %v4639_v22, %v4641_v20  ;;  %4682 = vst.msk [vmem:[#allocation3 + $0x310] sm:$0xff] %vm360_vm1, %v4641_v20  ;;  %4981 = vmatpush.msrb.mxu3 %v4341_v50  ;;  %4953 = vmatmul.f32.vlgmr.msra.gmra.mxu1 %v11062_v48  ;;  %v4812_v14 = vld [vmem:[#allocation3 + $0x358] sm:$0xff]  ;;  %vm13196_vm5 = vmmov %vm13194_vm3  ;;  %v11279_v50 = vstv %s7853_s13 }
 0x8b5   : > { %v4660_v42 = vsel %vm13192_vm4, %v4637_v33, %v4639_v22  ;;  %4982 = vmatmul.f32.vlgmr.msrb.gmra.mxu3 %v11041_v29  ;;  %5053 = vmatpush.msrb.mxu1 %v4800_v1  ;;  %vm13199_vm4 = vmmov %vm13194_vm3 }
 0x8b6   : > { %5094 = vmatpush.msra.mxu3 %v4812_v14  ;;  %4923 = vmatpush.msrb.mxu0 %v4660_v42 }
 0x8b7   : > { %5010 = vmatpush.msra.mxu2 %v4661_v0  ;;  %7841 = vmatmul.msk.f32.vlgmr.msrb.gmra.mxu0 %vm13193_vm12, %v11227_v52  ;;  %vm13200_vm12 = vmmov %vm13194_vm3 }
 0x8b8   : > { %7845 = vmatmul.msk.f32.vlgmr.msra.gmra.mxu2 %vm13194_vm3, %v11227_v52  ;;  %5024 = vmatpush.msra.mxu0 %v4752_v63 }
 0x8b9   : > { %5054 = vmatpush.msrb.mxu1 %v4797_v31  ;;  %5095 = vmatpush.msra.mxu3 %v4809_v6 }
 0x8ba   : > { %5025 = vmatpush.msra.mxu0 %v4749_v55  ;;  %v13208_v55 = vld [vmem:[#allocation10_spill] sm:$0xff] }
 0x8bb   : > { %5055 = vmatpush.msrb.mxu1 %v4794_v5  ;;  %5096 = vmatpush.msra.mxu3 %v4806_v38  ;;  %v4803_v62 = vld [vmem:[#allocation3 + $0x310] sm:$0xff]  ;;  %v11281_v20 = vpop.permute.xlu0 %4825 }
 0x8bc   : > { %5026 = vmatpush.msra.mxu0 %v4746_v7  ;;  %4956 = vmatmul.f32.gmra.mxu1 %v11084_v39  ;;  %v11274_v11 = vpop.permute.xlu1 %4835 }
 0x8bd   : > { %5056 = vmatpush.msrb.mxu1 %v4791_v12  ;;  %5097 = vmatpush.msra.mxu3 %v4803_v62  ;;  %v11289_v62 = vpop.permute.xlu2 %4830 }
 0x8be   : > { %4985 = vmatmul.f32.gmra.mxu3 %v11067_v28  ;;  %5027 = vmatpush.msra.mxu0 %v4743_v43 }
 0x8bf   : > { %5057 = vmatpush.msrb.mxu1 %v4788_v27  ;;  %7842 = vmatmul.msk.f32.gmra.mxu0 %vm13195_vm9, %v11239_v17  ;;  %vm13203_vm9 = vmmov %vm13194_vm3 }
 0x8c0   : > { %7846 = vmatmul.msk.f32.gmra.mxu2 %vm13196_vm5, %v11239_v17  ;;  %5028 = vmatpush.msra.mxu0 %v4740_v54  ;;  %vm13204_vm5 = vmmov %vm13194_vm3 }
 0x8c1   : > { %5058 = vmatpush.msrb.mxu1 %v4785_v3 }
 0x8c2   : > { %5029 = vmatpush.msra.mxu0 %v4737_v21 }
 0x8c3   : > { %5059 = vmatpush.msrb.mxu1 %v4782_v35 }
 0x8c4   : > { %5030 = vmatpush.msra.mxu0 %v4734_v15  ;;  %4959 = vmatmul.f32.gmra.mxu1 %v13197_v47  ;;  %v11276_v26 = vpop.permute.xlu1 %4820 }
 0x8c5   : > { %5060 = vmatpush.msrb.mxu1 %v4779_v10 }
 0x8c6   : > { %4988 = vmatmul.f32.gmra.mxu3 %v13198_v23  ;;  %5031 = vmatpush.msra.mxu0 %v4731_v13 }
 0x8c7   : > { %5061 = vmatpush.msrb.mxu1 %v4776_v8  ;;  %7843 = vmatmul.msk.f32.gmra.mxu0 %vm13199_vm4, %v7833_v25  ;;  %vm13205_vm4 = vmmov %vm13194_vm3 }
 0x8c8   : > { %7847 = vmatmul.msk.f32.gmra.mxu2 %vm13200_vm12, %v7833_v25  ;;  %5032 = vmatpush.msra.mxu0 %v4728_v49  ;;  %vm13206_vm12 = vmmov %vm13194_vm3 }
 0x8c9   : > { %5062 = vmatpush.msrb.mxu1 %v4773_v57 }
 0x8ca   : > { %5033 = vmatpush.msra.mxu0 %v4725_v53 }
 0x8cb   : > { %5063 = vmatpush.msrb.mxu1 %v4770_v2 }
 0x8cc   : > { %5034 = vmatpush.msra.mxu0 %v4722_v18  ;;  %4962 = vmatmul.f32.gmra.mxu1 %v13201_v51 }
 0x8cd   : > { %5064 = vmatpush.msrb.mxu1 %v4767_v58 }
 0x8ce   : > { %4991 = vmatmul.f32.gmra.mxu3 %v13202_v61  ;;  %5035 = vmatpush.msra.mxu0 %v4719_v60 }
 0x8cf   : > { %5065 = vmatpush.msrb.mxu1 %v4764_v59  ;;  %7844 = vmatmul.msk.f32.gmra.mxu0 %vm13194_vm3, %v7836_v9 }
 0x8d0   : > { %7848 = vmatmul.msk.f32.gmra.mxu2 %vm13203_vm9, %v7836_v9  ;;  %5036 = vmatpush.msra.mxu0 %v4716_v4 }
 0x8d1   : > { %5066 = vmatpush.msrb.mxu1 %v4761_v19  ;;  %v13210_v19 = vld [vmem:[#allocation19_spill] sm:$0xff] }
 0x8d2   : > { %5037 = vmatpush.msra.mxu0 %v4713_v40 }
 0x8d3   : > { %5067 = vmatpush.msrb.mxu1 %v4758_v44 }
 0x8d4   : > { %5038 = vmatpush.msra.mxu0 %v4710_v46 }
 0x8d5   : > { %5068 = vmatpush.msrb.mxu1 %v4755_v56 }
 0x8d6   : > { %5039 = vmatpush.msra.mxu0 %v4707_v32  ;;  %7849 = vmatmul.msk.f32.vlgmr.msra.gmra.mxu3 %vm13204_vm5, %v11227_v52 }
 0x8d7   : > { %5040 = vmatmul.f32.vlgmr.msra.gmra.mxu0 %v11062_v48  ;;  %5069 = vmatmul.f32.vlgmr.msrb.gmra.mxu1 %v11041_v29 }
 0x8de   : > { %7850 = vmatmul.msk.f32.gmra.mxu3 %vm13205_vm4, %v11239_v17 }
 0x8df   : > { %5043 = vmatmul.f32.gmra.mxu0 %v11084_v39  ;;  %5072 = vmatmul.f32.gmra.mxu1 %v11067_v28 }
 0x8e6   : > { %7851 = vmatmul.msk.f32.gmra.mxu3 %vm13206_vm12, %v7833_v25 }
 0x8e7   : > { %5046 = vmatmul.f32.gmra.mxu0 %v13197_v47  ;;  %5075 = vmatmul.f32.gmra.mxu1 %v13198_v23  ;;  %v13209_v47 = vld [vmem:[#allocation16_spill] sm:$0xff] }
 0x8ee   : > { %7852 = vmatmul.msk.f32.gmra.mxu3 %vm13194_vm3, %v7836_v9 }
 0x8ef   : > { %5049 = vmatmul.f32.gmra.mxu0 %v13201_v51  ;;  %5078 = vmatmul.f32.gmra.mxu1 %v13202_v61 }
 0x8f0   : > { %v4896_v48 = vpop.f32.mrf.mxu2 }
 0x8f8   : > { %v4867_v29 = vpop.f32.mrf.mxu3  ;;  %v4899_v45 = vpop.f32.mrf.mxu2 }
 0x8f9   : > { %v4868_v16 = vadd.f32 %v4867_v29, %v11276_v26 }
 0x8fb   : > { %v4897_v34 = vadd.f32 %v4896_v48, %v4868_v16 }
 0x900   : > { %v4870_v24 = vpop.f32.mrf.mxu3  ;;  %v4902_v28 = vpop.f32.mrf.mxu2 }
 0x901   : > { %v4871_v33 = vadd.f32 %v4870_v24, %v11281_v20 }
 0x903   : > { %v4900_v31 = vadd.f32 %v4899_v45, %v4871_v33 }
 0x908   : > { %v4873_v39 = vpop.f32.mrf.mxu3  ;;  %v4905_v30 = vpop.f32.mrf.mxu2 }
 0x909   : > { %v4874_v12 = vadd.f32 %v4873_v39, %v11289_v62 }
 0x90b   : > { %v4903_v15 = vadd.f32 %v4902_v28, %v4874_v12 }
 0x910   : > { %v4876_v36 = vpop.f32.mrf.mxu3 }
 0x911   : > { %v4877_v49 = vadd.f32 %v4876_v36, %v11274_v11 }
 0x913   : > { %v4906_v59 = vadd.f32 %v4905_v30, %v4877_v49 }
 0x931   : > { %v4954_v37 = vpop.f32.mrf.mxu1 }
 0x932   : > { %v4955_v17 = vadd.f32 %v4954_v37, %v11276_v26 }
 0x934   : > { %v4925_v41 = vpop.f32.mrf.mxu0 }
 0x935   : > { %v4926_v22 = vadd.f32 %v4925_v41, %v4897_v34 }
 0x937   : > { %vm5112_vm9 = vcmp.gt.f32.partialorder %v4926_v22, 0.0  ;;  %v5125_v0 = vmul.f32 %v11279_v50, %v4926_v22 }
 0x938   : > { %v4983_v1 = vpop.f32.mrf.mxu3 }
 0x939   : > { %v5137_v14 = vsel %vm5112_vm9, %v4926_v22, %v5125_v0  ;;  %v4957_v52 = vpop.f32.mrf.mxu1  ;;  %v4984_v27 = vadd.f32 %v4983_v1, %v4955_v17  ;;  %v13212_v22 = vld [vmem:[#allocation18_spill] sm:$0xff] }
 0x93a   : > { %v5149_v63 = vsel %vm8787_vm0, %v5137_v14, 0.0  ;;  %v4958_v57 = vadd.f32 %v4957_v52, %v11281_v20  ;;  %v13213_v1 = vld [vmem:[#allocation14_spill] sm:$0xff] }
 0x93b   : > { %v5012_v6 = vpop.f32.mrf.mxu2  ;;  %v5161_v5 = vadd.f32 %v5149_v63, %v13208_v55 }
 0x93c   : > { %v4928_v38 = vpop.f32.mrf.mxu0  ;;  %v5013_v23 = vadd.f32 %v5012_v6, %v4984_v27 }
 0x93d   : > { %v4929_v7 = vadd.f32 %v4928_v38, %v4900_v31  ;;  %5185 = vrot.lane.b32.xlu2 %v5161_v5, %s8004_s12 }
 0x93e   : > { %v5126_v18 = vmul.f32 %v11279_v50, %v5013_v23  ;;  %vm5113_vm12 = vcmp.gt.f32.partialorder %v5013_v23, 0.0 }
 0x93f   : > { %vm5115_vm5 = vcmp.gt.f32.partialorder %v4929_v7, 0.0  ;;  %v5128_v43 = vmul.f32 %v11279_v50, %v4929_v7 }
 0x940   : > { %v5138_v56 = vsel %vm5113_vm12, %v5013_v23, %v5126_v18 }
 0x941   : > { %v5140_v54 = vsel %vm5115_vm5, %v4929_v7, %v5128_v43  ;;  %v4986_v3 = vpop.f32.mrf.mxu3  ;;  %v4960_v35 = vpop.f32.mrf.mxu1  ;;  %v5150_v39 = vsel %vm8771_vm11, %v5138_v56, 0.0 }
 0x942   : > { %v5152_v21 = vsel %vm8787_vm0, %v5140_v54, 0.0  ;;  %v4961_v2 = vadd.f32 %v4960_v35, %v11289_v62  ;;  %v4987_v58 = vadd.f32 %v4986_v3, %v4958_v57  ;;  %v5162_v33 = vadd.f32 %v5150_v39, %v13212_v22 }
 0x943   : > { %v5015_v10 = vpop.f32.mrf.mxu2  ;;  %v5164_v25 = vadd.f32 %v5152_v21, %v13209_v47 }
 0x944   : > { %v4931_v13 = vpop.f32.mrf.mxu0  ;;  %v5016_v32 = vadd.f32 %v5015_v10, %v4987_v58 }
 0x945   : > { %v4932_v8 = vadd.f32 %v4931_v13, %v4903_v15  ;;  %5191 = vrot.lane.b32.xlu2 %v5164_v25, %s8004_s12  ;;  %v13215_v15 = vld [vmem:[#allocation12_spill] sm:$0xff]  ;;  %v13216_v25 = vld [vmem:[#allocation11_spill] sm:$0xff] }
 0x946   : > { %v5129_v16 = vmul.f32 %v11279_v50, %v5016_v32  ;;  %vm5116_vm9 = vcmp.gt.f32.partialorder %v5016_v32, 0.0 }
 0x947   : > { %vm5118_vm4 = vcmp.gt.f32.partialorder %v4932_v8, 0.0  ;;  %v5131_v53 = vmul.f32 %v11279_v50, %v4932_v8 }
 0x948   : > { %v5141_v6 = vsel %vm5116_vm9, %v5016_v32, %v5129_v16  ;;  %v13219_v32 = vld [vmem:[#allocation13_spill] sm:$0xff] }
 0x949   : > { %v5143_v51 = vsel %vm5118_vm4, %v4932_v8, %v5131_v53  ;;  %v4989_v9 = vpop.f32.mrf.mxu3  ;;  %v4963_v44 = vpop.f32.mrf.mxu1  ;;  %v5153_v17 = vsel %vm8771_vm11, %v5141_v6, 0.0 }
 0x94a   : > { %v5155_v60 = vsel %vm8787_vm0, %v5143_v51, 0.0  ;;  %v4990_v61 = vadd.f32 %v4989_v9, %v4961_v2  ;;  %v4964_v28 = vadd.f32 %v4963_v44, %v11274_v11  ;;  %v5165_v10 = vadd.f32 %v5153_v17, %v13215_v15 }
 0x94b   : > { %v5018_v4 = vpop.f32.mrf.mxu2  ;;  %v5167_v40 = vadd.f32 %v5155_v60, %v13210_v19  ;;  %v13218_v60 = vld [vmem:[#allocation17_spill] sm:$0xff] }
 0x94c   : > { %v4934_v46 = vpop.f32.mrf.mxu0  ;;  %v5019_v29 = vadd.f32 %v5018_v4, %v4990_v61 }
 0x94d   : > { %v4935_v48 = vadd.f32 %v4934_v46, %v4906_v59  ;;  %5197 = vrot.lane.b32.xlu0 %v5167_v40, %s8004_s12 }
 0x94e   : > { %v5132_v36 = vmul.f32 %v11279_v50, %v5019_v29  ;;  %vm5119_vm5 = vcmp.gt.f32.partialorder %v5019_v29, 0.0 }
 0x94f   : > { %vm5121_vm3 = vcmp.gt.f32.partialorder %v4935_v48, 0.0  ;;  %v5134_v24 = vmul.f32 %v11279_v50, %v4935_v48 }
 0x950   : > { %v5144_v5 = vsel %vm5119_vm5, %v5019_v29, %v5132_v36 }
 0x951   : > { %v5146_v37 = vsel %vm5121_vm3, %v4935_v48, %v5134_v24  ;;  %v4992_v34 = vpop.f32.mrf.mxu3  ;;  %v5156_v43 = vsel %vm8771_vm11, %v5144_v5, 0.0 }
 0x952   : > { %v5158_v30 = vsel %vm8787_vm0, %v5146_v37, 0.0  ;;  %v4993_v41 = vadd.f32 %v4992_v34, %v4964_v28  ;;  %v5168_v13 = vadd.f32 %v5156_v43, %v13216_v25 }
 0x953   : > { %v5021_v0 = vpop.f32.mrf.mxu2  ;;  %v5170_v14 = vadd.f32 %v5158_v30, %v13213_v1  ;;  %v13220_v30 = vld [vmem:[#allocation15_spill] sm:$0xff] }
 0x954   : > { %v5022_v52 = vadd.f32 %v5021_v0, %v4993_v41  ;;  %v5041_v63 = vpop.f32.mrf.mxu0  ;;  %v5070_v31 = vpop.f32.mrf.mxu1 }
 0x955   : > { %v5042_v38 = vadd.f32 %v5041_v63, %v11276_v26  ;;  %5203 = vrot.lane.b32.xlu1 %v5170_v14, %s8004_s12  ;;  %5187 = vrot.lane.b32.xlu0 %v5162_v33, %s8004_s12  ;;  %v13214_v26 = vld [vmem:[#allocation21_spill] sm:$0xff] }
 0x956   : > { %vm5122_vm4 = vcmp.gt.f32.partialorder %v5022_v52, 0.0  ;;  %v5135_v7 = vmul.f32 %v11279_v50, %v5022_v52 }
 0x957   : > { %v5071_v12 = vadd.f32 %v5070_v31, %v5042_v38  ;;  %v13221_v31 = vld [vmem:[#allocation20_spill] sm:$0xff] }
 0x958   : > { %v5147_v27 = vsel %vm5122_vm4, %v5022_v52, %v5135_v7  ;;  %vm13222_vm4 = vcmask 883712  }
 0x959   : > { %v5159_v54 = vsel %vm8771_vm11, %v5147_v27, 0.0  ;;  %v5099_v3 = vpop.f32.mrf.mxu3 }
 0x95a   : > { %v5171_v21 = vadd.f32 %v5159_v54, %v13214_v26  ;;  %v5100_v35 = vadd.f32 %v5099_v3, %v5071_v12 }
 0x95c   : > { %vm5114_vm12 = vcmp.gt.f32.partialorder %v5100_v35, 0.0  ;;  %v5127_v23 = vmul.f32 %v11279_v50, %v5100_v35  ;;  %5205 = vrot.lane.b32.xlu2 %v5171_v21, %s8004_s12  ;;  %v5044_v8 = vpop.f32.mrf.mxu0  ;;  %v5073_v49 = vpop.f32.mrf.mxu1 }
 0x95d   : > { %v5045_v57 = vadd.f32 %v5044_v8, %v11281_v20  ;;  %5199 = vrot.lane.b32.xlu1 %v5168_v13, %s8004_s12  ;;  %5193 = vrot.lane.b32.xlu0 %v5165_v10, %s8004_s12 }
 0x95e   : > { %v5139_v53 = vsel %vm5114_vm12, %v5100_v35, %v5127_v23  ;;  %vm13223_vm12 = vmmov %vm13222_vm4 }
 0x95f   : > { %v5074_v2 = vadd.f32 %v5073_v49, %v5045_v57  ;;  %v5151_v58 = vsel %vm8836_vm13, %v5139_v53, 0.0 }
 0x960   : > { %v5163_v61 = vadd.f32 %v5151_v58, %v13218_v60 }
 0x961   : > { %v5102_v51 = vpop.f32.mrf.mxu3 }
 0x962   : > { %v5103_v9 = vadd.f32 %v5102_v51, %v5074_v2 }
 0x964   : > { %vm5117_vm3 = vcmp.gt.f32.partialorder %v5103_v9, 0.0  ;;  %v5130_v59 = vmul.f32 %v11279_v50, %v5103_v9  ;;  %v5047_v4 = vpop.f32.mrf.mxu0  ;;  %v5076_v40 = vpop.f32.mrf.mxu1 }
 0x965   : > { %v5048_v20 = vadd.f32 %v5047_v4, %v11289_v62  ;;  %5189 = vrot.lane.b32.xlu1 %v5163_v61, %s8004_s12 }
 0x966   : > { %v5142_v44 = vsel %vm5117_vm3, %v5103_v9, %v5130_v59  ;;  %vm13224_vm3 = vmmov %vm13222_vm4 }
 0x967   : > { %v5154_v46 = vsel %vm8836_vm13, %v5142_v44, 0.0  ;;  %v5077_v56 = vadd.f32 %v5076_v40, %v5048_v20 }
 0x968   : > { %v5166_v29 = vadd.f32 %v5154_v46, %v13219_v32 }
 0x969   : > { %v5105_v48 = vpop.f32.mrf.mxu3 }
 0x96a   : > { %v5106_v24 = vadd.f32 %v5105_v48, %v5077_v56  ;;  %5195 = vrot.lane.b32.xlu2 %v5166_v29, %s8004_s12 }
 0x96c   : > { %vm5120_vm9 = vcmp.gt.f32.partialorder %v5106_v24, 0.0  ;;  %v5133_v39 = vmul.f32 %v11279_v50, %v5106_v24  ;;  %v5050_v28 = vpop.f32.mrf.mxu0  ;;  %v5079_v16 = vpop.f32.mrf.mxu1 }
 0x96d   : > { %v5051_v62 = vadd.f32 %v5050_v28, %v11274_v11 }
 0x96e   : > { %v5145_v36 = vsel %vm5120_vm9, %v5106_v24, %v5133_v39  ;;  %vm13225_vm9 = vmmov %vm13224_vm3 }
 0x96f   : > { %v5157_v37 = vsel %vm8836_vm13, %v5145_v36, 0.0  ;;  %v5080_v34 = vadd.f32 %v5079_v16, %v5051_v62 }
 0x970   : > { %v5169_v41 = vadd.f32 %v5157_v37, %v13220_v30 }
 0x971   : > { %v5108_v33 = vpop.f32.mrf.mxu3 }
 0x972   : > { %v5109_v0 = vadd.f32 %v5108_v33, %v5080_v34  ;;  %5201 = vrot.lane.b32.xlu0 %v5169_v41, %s8004_s12 }
 0x974   : > { %vm5123_vm5 = vcmp.gt.f32.partialorder %v5109_v0, 0.0  ;;  %v5136_v14 = vmul.f32 %v11279_v50, %v5109_v0 }
 0x976   : > { %v5148_v52 = vsel %vm5123_vm5, %v5109_v0, %v5136_v14  ;;  %vm13226_vm5 = vcmask 1031168  }
 0x977   : > { %v5160_v63 = vsel %vm8836_vm13, %v5148_v52, 0.0 }
 0x978   : > { %v5172_v11 = vadd.f32 %v5160_v63, %v13221_v31 }
 0x97a   : > { %5207 = vrot.lane.b32.xlu1 %v5172_v11, %s8004_s12 }
 0x997   : > { %v5186_v6 = vpop.permute.xlu2 %5185 }
 0x998   : > { %5229 = vst.msk [vmem:[#allocation2] sm:$0xff] %vm1544_vm7, %v5186_v6 }
 0x99f   : > { %v5192_v5 = vpop.permute.xlu2 %5191  ;;  %v11357_v38 = vld [vmem:[#allocation2] sm:$0xff] }
 0x9a0   : > { %5232 = vst.msk [vmem:[#allocation2 + $0x18] sm:$0xff] %vm1544_vm7, %v5192_v5  ;;  %5689 = vrot.lane.b32.xlu0 %v11357_v38, %s8002_s6  ;;  %5369 = vrot.lane.b32.xlu1 %v11357_v38, %s7996_s26 }
 0x9a1   : > { %5289 = vrot.lane.b32.xlu2 %v11357_v38, %s7995_s25 }
 0x9a7   : > { %v11372_v50 = vld [vmem:[#allocation2 + $0x18] sm:$0xff] }
 0x9a8   : > { %5529 = vrot.lane.b32.xlu0 %v11357_v38, %s7998_s28  ;;  %5769 = vrot.lane.b32.xlu1 %v11357_v38, %s8001_s5 }
 0x9a9   : > { %5449 = vrot.lane.b32.xlu2 %v11357_v38, %s7997_s27 }
 0x9b0   : > { %5695 = vrot.lane.b32.xlu1 %v11372_v50, %s8002_s6  ;;  %5455 = vrot.lane.b32.xlu0 %v11372_v50, %s7997_s27 }
 0x9b1   : > { %5609 = vrot.lane.b32.xlu2 %v11357_v38, %s7999_s29 }
 0x9b6   : > { %v5206_v12 = vpop.permute.xlu2 %5205 }
 0x9b8   : > { %5615 = vrot.lane.b32.xlu1 %v11372_v50, %s7999_s29 }
 0x9b9   : > { %5295 = vrot.lane.b32.xlu2 %v11372_v50, %s7995_s25 }
 0x9bf   : > { %v5198_v7 = vpop.permute.xlu0 %5197 }
 0x9c0   : > { %5235 = vst.msk [vmem:[#allocation2 + $0x30] sm:$0xff] %vm1544_vm7, %v5198_v7 }
 0x9c1   : > { %5375 = vrot.lane.b32.xlu2 %v11372_v50, %s7996_s26 }
 0x9c4   : > { %v5196_v21 = vpop.permute.xlu2 %5195 }
 0x9c7   : > { %v5204_v17 = vpop.permute.xlu1 %5203  ;;  %v5188_v43 = vpop.permute.xlu0 %5187  ;;  %v11387_v27 = vld [vmem:[#allocation2 + $0x30] sm:$0xff] }
 0x9c8   : > { %v11390_v54 = vsel %vm1523_vm14, %v5204_v17, %v5206_v12  ;;  %5238 = vst.msk [vmem:[#allocation2 + $0x48] sm:$0xff] %vm1544_vm7, %v5204_v17  ;;  %v11394_v3 = vsel %vm1523_vm14, %v5186_v6, %v5188_v43  ;;  %5461 = vrot.lane.b32.xlu1 %v11387_v27, %s7997_s27  ;;  %5381 = vrot.lane.b32.xlu0 %v11387_v27, %s7996_s26 }
 0x9c9   : > { %5239 = vst [vmem:[#allocation2 + $0x50] sm:$0xff] %v11390_v54  ;;  %5775 = vrot.lane.b32.xlu2 %v11372_v50, %s8001_s5 }
 0x9ca   : > { %5230 = vst [vmem:[#allocation2 + $0x8] sm:$0xff] %v11394_v3 }
 0x9cf   : > { %v5200_v35 = vpop.permute.xlu1 %5199  ;;  %v5194_v10 = vpop.permute.xlu0 %5193  ;;  %v11429_v2 = vld [vmem:[#allocation2 + $0x48] sm:$0xff] }
 0x9d0   : > { %v11405_v13 = vsel %vm1523_vm14, %v5198_v7, %v5200_v35  ;;  %v11408_v23 = vsel %vm1523_vm14, %v5192_v5, %v5194_v10  ;;  %v5212_v8 = vsel %vm1523_vm14, %v5194_v10, %v5196_v21  ;;  %5781 = vrot.lane.b32.xlu1 %v11387_v27, %s8001_s5  ;;  %5301 = vrot.lane.b32.xlu0 %v11387_v27, %s7995_s25 }
 0x9d1   : > { %5236 = vst [vmem:[#allocation2 + $0x38] sm:$0xff] %v11405_v13  ;;  %5535 = vrot.lane.b32.xlu2 %v11372_v50, %s7998_s28 }
 0x9d2   : > { %5233 = vst [vmem:[#allocation2 + $0x20] sm:$0xff] %v11408_v23 }
 0x9d3   : > { %5234 = vst.msk [vmem:[#allocation2 + $0x28] sm:$0xff] %vm1547_vm15, %v5212_v8 }
 0x9d7   : > { %v5190_v49 = vpop.permute.xlu1 %5189 }
 0x9d8   : > { %v5210_v57 = vsel %vm1523_vm14, %v5188_v43, %v5190_v49  ;;  %5541 = vrot.lane.b32.xlu1 %v11387_v27, %s7998_s28  ;;  %5621 = vrot.lane.b32.xlu0 %v11387_v27, %s7999_s29 }
 0x9d9   : > { %5231 = vst.msk [vmem:[#allocation2 + $0x10] sm:$0xff] %vm1547_vm15, %v5210_v57  ;;  %5701 = vrot.lane.b32.xlu2 %v11387_v27, %s8002_s6 }
 0x9da   : > { %v5246_v53 = vld [vmem:[#allocation2 + $0x28] sm:$0xff] }
 0x9db   : > { %5258 = vst.msk [vmem:[#allocation3 + $0x28] sm:$0xff] %vm360_vm1, %v5246_v53  ;;  %v11552_v63 = vld [vmem:[#allocation2 + $0x28] sm:$0xff] }
 0x9e0   : > { %5387 = vrot.lane.b32.xlu1 %v11429_v2, %s7996_s26  ;;  %5787 = vrot.lane.b32.xlu0 %v11429_v2, %s8001_s5  ;;  %v5243_v58 = vld [vmem:[#allocation2 + $0x10] sm:$0xff] }
 0x9e1   : > { %5467 = vrot.lane.b32.xlu2 %v11429_v2, %s7997_s27  ;;  %5255 = vst.msk [vmem:[#allocation3 + $0x10] sm:$0xff] %vm360_vm1, %v5243_v58  ;;  %v11526_v37 = vld [vmem:[#allocation2 + $0x10] sm:$0xff] }
 0x9e4   : > { %v5202_v51 = vpop.permute.xlu0 %5201 }
 0x9e5   : > { %v5214_v9 = vsel %vm1523_vm14, %v5200_v35, %v5202_v51 }
 0x9e6   : > { %5237 = vst.msk [vmem:[#allocation2 + $0x40] sm:$0xff] %vm1547_vm15, %v5214_v9 }
 0x9e8   : > { %5691 = vrot.lane.b32.xlu1 %v11394_v3, %s8002_s6  ;;  %5707 = vrot.lane.b32.xlu0 %v11429_v2, %s8002_s6 }
 0x9e9   : > { %5307 = vrot.lane.b32.xlu2 %v11429_v2, %s7995_s25 }
 0x9ec   : > { %v5208_v61 = vpop.permute.xlu1 %5207 }
 0x9ed   : > { %v5216_v59 = vsel %vm1523_vm14, %v5206_v12, %v5208_v61  ;;  %v5249_v4 = vld [vmem:[#allocation2 + $0x40] sm:$0xff] }
 0x9ee   : > { %5240 = vst.msk [vmem:[#allocation2 + $0x58] sm:$0xff] %vm1547_vm15, %v5216_v59  ;;  %v5433_v43 = vld [vmem:[#allocation2 + $0x40] sm:$0xff] }
 0x9ef   : > { %5261 = vst.msk [vmem:[#allocation3 + $0x40] sm:$0xff] %vm360_vm1, %v5249_v4 }
 0x9f0   : > { %5531 = vrot.lane.b32.xlu1 %v11394_v3, %s7998_s28  ;;  %5627 = vrot.lane.b32.xlu0 %v11429_v2, %s7999_s29 }
 0x9f1   : > { %5371 = vrot.lane.b32.xlu2 %v11394_v3, %s7996_s26 }
 0x9f5   : > { %v5252_v40 = vld [vmem:[#allocation2 + $0x58] sm:$0xff] }
 0x9f6   : > { %5264 = vst.msk [vmem:[#allocation3 + $0x58] sm:$0xff] %vm360_vm1, %v5252_v40  ;;  %v5436_v53 = vld [vmem:[#allocation2 + $0x58] sm:$0xff] }
 0x9f8   : > { %5547 = vrot.lane.b32.xlu0 %v11429_v2, %s7998_s28  ;;  %5457 = vrot.lane.b32.xlu1 %v11408_v23, %s7997_s27 }
 0x9f9   : > { %5771 = vrot.lane.b32.xlu2 %v11394_v3, %s8001_s5 }
 0x9fb   : > { %v11462_v20 = vpop.permute.xlu2 %5289 }
 0xa00   : > { %5291 = vrot.lane.b32.xlu0 %v11394_v3, %s7995_s25  ;;  %5383 = vrot.lane.b32.xlu1 %v11405_v13, %s7996_s26 }
 0xa01   : > { %5697 = vrot.lane.b32.xlu2 %v11408_v23, %s8002_s6 }
 0xa03   : > { %v11470_v44 = vpop.permute.xlu2 %5449 }
 0xa08   : > { %5451 = vrot.lane.b32.xlu0 %v11394_v3, %s7997_s27  ;;  %5303 = vrot.lane.b32.xlu1 %v11405_v13, %s7995_s25 }
 0xa09   : > { %5617 = vrot.lane.b32.xlu2 %v11408_v23, %s7999_s29 }
 0xa0b   : > { %v11478_v46 = vpop.permute.xlu2 %5609 }
 0xa10   : > { %5611 = vrot.lane.b32.xlu0 %v11394_v3, %s7999_s29  ;;  %5623 = vrot.lane.b32.xlu1 %v11405_v13, %s7999_s29 }
 0xa11   : > { %5463 = vrot.lane.b32.xlu2 %v11405_v13, %s7997_s27 }
 0xa12   : > { %v11488_v29 = vpop.permute.xlu1 %5369  ;;  %v11498_v24 = vpop.permute.xlu0 %5689 }
 0xa13   : > { %v11486_v56 = vpop.permute.xlu2 %5295 }
 0xa18   : > { %5297 = vrot.lane.b32.xlu0 %v11408_v23, %s7995_s25  ;;  %5789 = vrot.lane.b32.xlu1 %v11390_v54, %s8001_s5 }
 0xa19   : > { %5783 = vrot.lane.b32.xlu2 %v11405_v13, %s8001_s5 }
 0xa1a   : > { %v11500_v39 = vpop.permute.xlu1 %5769  ;;  %v11510_v16 = vpop.permute.xlu0 %5529 }
 0xa1b   : > { %v11496_v48 = vpop.permute.xlu2 %5375 }
 0xa20   : > { %5377 = vrot.lane.b32.xlu0 %v11408_v23, %s7996_s26  ;;  %5709 = vrot.lane.b32.xlu1 %v11390_v54, %s8002_s6 }
 0xa21   : > { %5543 = vrot.lane.b32.xlu2 %v11405_v13, %s7998_s28 }
 0xa22   : > { %v11512_v62 = vpop.permute.xlu1 %5695  ;;  %v11530_v34 = vpop.permute.xlu0 %5455 }
 0xa23   : > { %v11508_v28 = vpop.permute.xlu2 %5775 }
 0xa28   : > { %5777 = vrot.lane.b32.xlu0 %v11408_v23, %s8001_s5  ;;  %5629 = vrot.lane.b32.xlu1 %v11390_v54, %s7999_s29 }
 0xa29   : > { %5389 = vrot.lane.b32.xlu2 %v11390_v54, %s7996_s26 }
 0xa2a   : > { %v11532_v41 = vpop.permute.xlu1 %5615 }
 0xa2b   : > { %v11520_v36 = vpop.permute.xlu2 %5535 }
 0xa30   : > { %5537 = vrot.lane.b32.xlu0 %v11408_v23, %s7998_s28  ;;  %5549 = vrot.lane.b32.xlu1 %v11390_v54, %s7998_s28 }
 0xa31   : > { %5773 = vrot.lane.b32.xlu2 %v11526_v37, %s8001_s5 }
 0xa33   : > { %v11534_v33 = vpop.permute.xlu2 %5701 }
 0xa38   : > { %5703 = vrot.lane.b32.xlu0 %v11405_v13, %s8002_s6  ;;  %5293 = vrot.lane.b32.xlu1 %v11526_v37, %s7995_s25 }
 0xa39   : > { %5373 = vrot.lane.b32.xlu2 %v11526_v37, %s7996_s26 }
 0xa3a   : > { %v11542_v0 = vpop.permute.xlu1 %5461  ;;  %v11544_v14 = vpop.permute.xlu0 %5381 }
 0xa3b   : > { %v11546_v52 = vpop.permute.xlu2 %5467 }
 0xa40   : > { %5453 = vrot.lane.b32.xlu1 %v11526_v37, %s7997_s27  ;;  %5469 = vrot.lane.b32.xlu0 %v11390_v54, %s7997_s27 }
 0xa41   : > { %5699 = vrot.lane.b32.xlu2 %v11552_v63, %s8002_s6 }
 0xa42   : > { %v11556_v11 = vpop.permute.xlu1 %5781  ;;  %v11558_v6 = vpop.permute.xlu0 %5301 }
 0xa43   : > { %v11560_v5 = vpop.permute.xlu2 %5307 }
 0xa48   : > { %5693 = vrot.lane.b32.xlu1 %v11526_v37, %s8002_s6  ;;  %5309 = vrot.lane.b32.xlu0 %v11390_v54, %s7995_s25 }
 0xa49   : > { %5619 = vrot.lane.b32.xlu2 %v11552_v63, %s7999_s29 }
 0xa4a   : > { %v11568_v7 = vpop.permute.xlu1 %5541  ;;  %v11570_v12 = vpop.permute.xlu0 %5621 }
 0xa4b   : > { %v11572_v17 = vpop.permute.xlu2 %5371 }
 0xa50   : > { %5613 = vrot.lane.b32.xlu0 %v11526_v37, %s7999_s29  ;;  %5299 = vrot.lane.b32.xlu1 %v11552_v63, %s7995_s25 }
 0xa51   : > { %5465 = vrot.lane.b32.xlu2 %v5433_v43, %s7997_s27 }
 0xa52   : > { %v11579_v21 = vpop.permute.xlu1 %5387  ;;  %v5788_v35 = vpop.permute.xlu0 %5787 }
 0xa53   : > { %v11581_v10 = vpop.permute.xlu2 %5771 }
 0xa58   : > { %5459 = vrot.lane.b32.xlu0 %v11552_v63, %s7997_s27  ;;  %5779 = vrot.lane.b32.xlu1 %v11552_v63, %s8001_s5 }
 0xa59   : > { %5305 = vrot.lane.b32.xlu2 %v5433_v43, %s7995_s25 }
 0xa5a   : > { %v11588_v8 = vpop.permute.xlu1 %5691  ;;  %v11590_v49 = vpop.permute.xlu0 %5707 }
 0xa5b   : > { %v11592_v57 = vpop.permute.xlu2 %5697 }
 0xa60   : > { %5785 = vrot.lane.b32.xlu0 %v5433_v43, %s8001_s5  ;;  %5379 = vrot.lane.b32.xlu1 %v11552_v63, %s7996_s26 }
 0xa61   : > { %5471 = vrot.lane.b32.xlu2 %v5436_v53, %s7997_s27 }
 0xa62   : > { %v11598_v58 = vpop.permute.xlu1 %5531  ;;  %v11600_v51 = vpop.permute.xlu0 %5627 }
 0xa63   : > { %v11602_v9 = vpop.permute.xlu2 %5617 }
 0xa68   : > { %5385 = vrot.lane.b32.xlu0 %v5433_v43, %s7996_s26  ;;  %5705 = vrot.lane.b32.xlu1 %v5433_v43, %s8002_s6 }
 0xa69   : > { %5791 = vrot.lane.b32.xlu2 %v5436_v53, %s8001_s5 }
 0xa6a   : > { %v11607_v61 = vpop.permute.xlu0 %5547  ;;  %v11609_v59 = vpop.permute.xlu1 %5457 }
 0xa6b   : > { %v11611_v4 = vpop.permute.xlu2 %5463 }
 0xa70   : > { %5867 = vrot.lane.b32.xlu0 %v11429_v2, %s8000_s30  ;;  %5625 = vrot.lane.b32.xlu1 %v5433_v43, %s7999_s29 }
 0xa71   : > { %5391 = vrot.lane.b32.xlu2 %v5436_v53, %s7996_s26 }
 0xa72   : > { %v11617_v40 = vpop.permute.xlu0 %5291  ;;  %v11619_v31 = vpop.permute.xlu1 %5383 }
 0xa73   : > { %v11621_v26 = vpop.permute.xlu2 %5783 }
 0xa74   : > { %v5797_v47 = vsel %vm905_vm6, %v11556_v11, %v11621_v26 }
 0xa78   : > { %5861 = vrot.lane.b32.xlu0 %v11387_v27, %s8000_s30  ;;  %5869 = vrot.lane.b32.xlu1 %v11390_v54, %s8000_s30 }
 0xa79   : > { %5545 = vrot.lane.b32.xlu2 %v5433_v43, %s7998_s28 }
 0xa7a   : > { %v11628_v30 = vpop.permute.xlu0 %5451  ;;  %v11630_v25 = vpop.permute.xlu1 %5303 }
 0xa7b   : > { %v11632_v32 = vpop.permute.xlu2 %5543 }
 0xa80   : > { %5711 = vrot.lane.b32.xlu0 %v5436_v53, %s8002_s6  ;;  %5863 = vrot.lane.b32.xlu1 %v11405_v13, %s8000_s30 }
 0xa81   : > { %5539 = vrot.lane.b32.xlu2 %v11552_v63, %s7998_s28 }
 0xa82   : > { %v11639_v15 = vpop.permute.xlu0 %5611  ;;  %v11641_v60 = vpop.permute.xlu1 %5623 }
 0xa83   : > { %v11643_v54 = vpop.permute.xlu2 %5389 }
 0xa88   : > { %5311 = vrot.lane.b32.xlu0 %v5436_v53, %s7995_s25  ;;  %5551 = vrot.lane.b32.xlu1 %v5436_v53, %s7998_s28 }
 0xa89   : > { %5533 = vrot.lane.b32.xlu2 %v11526_v37, %s7998_s28 }
 0xa8a   : > { %v11649_v22 = vpop.permute.xlu0 %5297  ;;  %v11651_v1 = vpop.permute.xlu1 %5789 }
 0xa8b   : > { %v5799_v13 = vsel %vm905_vm6, %v5788_v35, %v11651_v1  ;;  %v11655_v19 = vpop.permute.xlu2 %5773 }
 0xa8c   : > { %5815 = vst.msk [vmem:[#allocation3 + $0x2b0] sm:$0xff] %vm360_vm1, %v11655_v19  ;;  %6092 = vmatpush.msrb.mxu0 %v5799_v13 }
 0xa8e   : > { %6093 = vmatpush.msrb.mxu0 %v5797_v47 }
 0xa90   : > { %5631 = vrot.lane.b32.xlu0 %v5436_v53, %s7999_s29  ;;  %5857 = vrot.lane.b32.xlu1 %v11408_v23, %s8000_s30 }
 0xa91   : > { %5849 = vrot.lane.b32.xlu2 %v11357_v38, %s8000_s30 }
 0xa92   : > { %v11667_v35 = vpop.permute.xlu0 %5377  ;;  %v11669_v55 = vpop.permute.xlu1 %5709 }
 0xa93   : > { %v11671_v18 = vpop.permute.xlu2 %5373  ;;  %v5719_v45 = vsel %vm824_vm8, %v11590_v49, %v11669_v55  ;;  %v7867_v49 = vld [vmem:[%s12949_s2 + $0x88] sm:$0xff] }
 0xa94   : > { %5415 = vst.msk [vmem:[#allocation3 + $0xd0] sm:$0xff] %vm360_vm1, %v11671_v18 }
 0xa98   : > { %5855 = vrot.lane.b32.xlu0 %v11372_v50, %s8000_s30  ;;  %5871 = vrot.lane.b32.xlu1 %v5436_v53, %s8000_s30  ;;  %v5793_v53 = vsel %vm905_vm6, %v11500_v39, %v11581_v10 }
 0xa99   : > { %5865 = vrot.lane.b32.xlu2 %v5433_v43, %s8000_s30  ;;  %v7869_v43 = vld [vmem:[%s12949_s2 + $0x98] sm:$0xff] }
 0xa9a   : > { %v11679_v47 = vpop.permute.xlu0 %5777  ;;  %v11681_v23 = vpop.permute.xlu1 %5629 }
 0xa9b   : > { %v5795_v11 = vsel %vm905_vm6, %v11508_v28, %v11679_v47  ;;  %v11686_v13 = vpop.permute.xlu2 %5699 }
 0xa9c   : > { %5738 = vst.msk [vmem:[#allocation3 + $0x268] sm:$0xff] %vm360_vm1, %v11686_v13  ;;  %6094 = vmatpush.msrb.mxu0 %v5795_v11 }
 0xa9e   : > { %6095 = vmatpush.msrb.mxu0 %v5793_v53 }
 0xaa0   : > { %5851 = vrot.lane.b32.xlu0 %v11394_v3, %s8000_s30  ;;  %5853 = vrot.lane.b32.xlu1 %v11526_v37, %s8000_s30  ;;  %v7866_v3 = vld [vmem:[%s12949_s2 + $0x80] sm:$0xff] }
 0xaa1   : > { %6048 = vperm.xlu2 %7962, %v7869_v43   ;;  %6096 = vmatpush.msrb.mxu0 %v5719_v45 }
 0xaa2   : > { %v11703_v28 = vpop.permute.xlu0 %5537  ;;  %v11705_v39 = vpop.permute.xlu1 %5549 }
 0xaa3   : > { %v11707_v11 = vpop.permute.xlu2 %5619 }
 0xaa4   : > { %5658 = vst.msk [vmem:[#allocation3 + $0x208] sm:$0xff] %vm360_vm1, %v11707_v11 }
 0xaa8   : > { %5859 = vrot.lane.b32.xlu0 %v11552_v63, %s8000_s30  ;;  %6038 = vperm.xlu1 %7961, %v7867_v49   ;;  %v5715_v63 = vsel %vm824_vm8, %v11512_v62, %v11592_v57  ;;  %v7868_v49 = vld [vmem:[%s12949_s2 + $0x90] sm:$0xff]  ;;  %v5637_v62 = vsel %vm13223_vm12, %v11570_v12, %v11641_v60  ;;  %v5477_v12 = vsel %vm581_vm2, %v11542_v0, %v11611_v4 }
 0xaa9   : > { %6033 = vperm.xlu2 %7962, %v7866_v3   ;;  %v5639_v3 = vsel %vm13222_vm4, %v11600_v51, %v11681_v23  ;;  %v5635_v51 = vsel %vm13224_vm3, %v11532_v41, %v11602_v9  ;;  %v5473_v41 = vsel %vm581_vm2, %v11470_v44, %v11628_v30  ;;  %v5559_v0 = vsel %vm662_vm10, %v11607_v61, %v11705_v39  ;;  %vm13227_vm4 = vmmov %vm13226_vm5 }
 0xaaa   : > { %v11719_v45 = vpop.permute.xlu0 %5703  ;;  %v11721_v37 = vpop.permute.xlu1 %5293  ;;  %vm13228_vm12 = vmmov %vm13227_vm4 }
 0xaab   : > { %v5717_v53 = vsel %vm824_vm8, %v11534_v33, %v11719_v45  ;;  %5335 = vst.msk [vmem:[#allocation3 + $0x70] sm:$0xff] %vm360_vm1, %v11721_v37  ;;  %v5466_v43 = vpop.permute.xlu2 %5465  ;;  %v5713_v33 = vsel %vm824_vm8, %v11498_v24, %v11588_v8  ;;  %vm13229_vm3 = vmmov %vm13227_vm4 }
 0xaac   : > { %5501 = vst.msk [vmem:[#allocation3 + $0x160] sm:$0xff] %vm360_vm1, %v5466_v43  ;;  %6097 = vmatpush.msrb.mxu0 %v5717_v53 }
 0xaae   : > { %6098 = vmatpush.msrb.mxu0 %v5715_v63 }
 0xab0   : > { %6043 = vperm.xlu0 %7960, %v7868_v49   ;;  %6099 = vmatpush.msrb.mxu0 %v5713_v33  ;;  %v5633_v49 = vsel %vm13225_vm9, %v11478_v46, %v11639_v15  ;;  %v5557_v46 = vsel %vm662_vm10, %v11568_v7, %v11632_v32  ;;  %v5555_v7 = vsel %vm662_vm10, %v11520_v36, %v11703_v28  ;;  %vm13230_vm9 = vcmask 1039360  }
 0xab1   : > { %v5393_v36 = vsel %vm13229_vm3, %v11488_v29, %v11572_v17 }
 0xab2   : > { %v11741_v53 = vpop.permute.xlu1 %5453  ;;  %v5470_v42 = vpop.permute.xlu0 %5469  ;;  %6100 = vmatpush.msrb.mxu0 %v5639_v3 }
 0xab3   : > { %5495 = vst.msk [vmem:[#allocation3 + $0x130] sm:$0xff] %vm360_vm1, %v11741_v53  ;;  %v5479_v24 = vsel %vm581_vm2, %v11546_v52, %v5470_v42  ;;  %v11750_v63 = vpop.permute.xlu2 %5305  ;;  %v5475_v52 = vsel %vm581_vm2, %v11530_v34, %v11609_v59  ;;  %v5399_v34 = vsel %vm13226_vm5, %v11579_v21, %v11643_v54  ;;  %v5478_v21 = vsel %vm581_vm2, %v11611_v4, %v5466_v43  ;;  %vm13231_vm5 = vmmov %vm13230_vm9 }
 0xab4   : > { %5341 = vst.msk [vmem:[#allocation3 + $0xa0] sm:$0xff] %vm360_vm1, %v11750_v63  ;;  %6063 = vmatpush.msrb.mxu2 %v5479_v24  ;;  %6101 = vmatpush.msrb.mxu0 %v5637_v62  ;;  %v5397_v62 = vsel %vm13227_vm4, %v11544_v14, %v11619_v31  ;;  %v5553_v24 = vsel %vm662_vm10, %v11510_v16, %v11598_v58  ;;  %vm13232_vm4 = vmmov %vm13231_vm5 }
 0xab5   : > { %v5395_v14 = vsel %vm13228_vm12, %v11496_v48, %v11667_v35  ;;  %v5317_v29 = vsel %vm13231_vm5, %v11558_v6, %v11630_v25  ;;  %vm13233_vm12 = vmmov %vm13232_vm4 }
 0xab6   : > { %6064 = vmatpush.msrb.mxu2 %v5477_v12  ;;  %6102 = vmatpush.msrb.mxu0 %v5635_v51  ;;  %v11827_v51 = vld [vmem:[%s12948_s1 + $0x1a0] sm:$0xff]  ;;  %v5313_v12 = vsel %vm13233_vm12, %v11462_v20, %v11617_v40  ;;  %v5474_v20 = vsel %vm581_vm2, %v11628_v30, %v11741_v53  ;;  %vm13235_vm5 = vmmov %vm13229_vm3  ;;  %vm13237_vm12 = vcmask 736256  }
 0xab7   : > { %v11857_v30 = vld [vmem:[%s12948_s1 + $0x180] sm:$0xff] }
 0xab8   : > { %6065 = vmatpush.msrb.mxu2 %v5475_v52  ;;  %6103 = vmatpush.msrb.mxu0 %v5633_v49 }
 0xaba   : > { %v11772_v33 = vpop.permute.xlu1 %5693  ;;  %v11774_v3 = vpop.permute.xlu0 %5309  ;;  %6066 = vmatpush.msrb.mxu2 %v5473_v41  ;;  %6104 = vmatpush.msrb.mxu0 %v5559_v0  ;;  %v5794_v0 = vsel %vm905_vm6, %v11581_v10, %v11655_v19  ;;  %v11905_v10 = vld [vmem:[%s12948_s1 + $0x1b0] sm:$0xff] }
 0xabb   : > { %5735 = vst.msk [vmem:[#allocation3 + $0x250] sm:$0xff] %vm360_vm1, %v11772_v33  ;;  %v5472_v44 = vpop.permute.xlu2 %5471  ;;  %v5319_v16 = vsel %vm13230_vm9, %v11560_v5, %v11774_v3  ;;  %v5315_v5 = vsel %vm13232_vm4, %v11486_v56, %v11649_v22  ;;  %v11849_v56 = vld [vmem:[%s12948_s1 + $0x1b8] sm:$0xff]  ;;  %vm13234_vm9 = vmmov %vm13229_vm3 }
 0xabc   : > { %v5480_v61 = vsel %vm581_vm2, %v5470_v42, %v5472_v44  ;;  %5504 = vst.msk [vmem:[#allocation3 + $0x178] sm:$0xff] %vm360_vm1, %v5472_v44  ;;  %6067 = vmatpush.msrb.mxu2 %v5399_v34  ;;  %6105 = vmatpush.msrb.mxu0 %v5557_v46  ;;  %v11797_v42 = vld [vmem:[%s12948_s1 + $0x188] sm:$0xff]  ;;  %vm13236_vm4 = vmmov %vm13229_vm3 }
 0xabd   : > { %6150 = vmatpush.msrb.mxu3 %v5480_v61 }
 0xabe   : > { %6068 = vmatpush.msrb.mxu2 %v5397_v62  ;;  %6106 = vmatpush.msrb.mxu0 %v5555_v7 }
 0xabf   : > { %6151 = vmatpush.msrb.mxu3 %v5478_v21 }
 0xac0   : > { %6069 = vmatpush.msrb.mxu2 %v5395_v14  ;;  %6107 = vmatpush.msrb.mxu0 %v5553_v24 }
 0xac1   : > { %6108 = vmatmul.f32.vlgmr.msrb.gmra.mxu0 %v11797_v42 }
 0xac2   : > { %v11809_v4 = vpop.permute.xlu0 %5613  ;;  %v11811_v43 = vpop.permute.xlu1 %5299  ;;  %6070 = vmatpush.msrb.mxu2 %v5393_v36 }
 0xac3   : > { %5655 = vst.msk [vmem:[#allocation3 + $0x1f0] sm:$0xff] %vm360_vm1, %v11809_v4  ;;  %v5792_v48 = vpop.permute.xlu2 %5791 }
 0xac4   : > { %5338 = vst.msk [vmem:[#allocation3 + $0x88] sm:$0xff] %vm360_vm1, %v11811_v43  ;;  %6071 = vmatpush.msrb.mxu2 %v5319_v16  ;;  %v5800_v53 = vsel %vm905_vm6, %v11651_v1, %v5792_v48  ;;  %v11875_v1 = vld [vmem:[%s12948_s1 + $0x1d0] sm:$0xff] }
 0xac5   : > { %5824 = vst.msk [vmem:[#allocation3 + $0x2f8] sm:$0xff] %vm360_vm1, %v5792_v48 }
 0xac6   : > { %6072 = vmatpush.msrb.mxu2 %v5317_v29 }
 0xac8   : > { %6073 = vmatpush.msrb.mxu2 %v5315_v5 }
 0xac9   : > { %6111 = vmatmul.f32.gmra.mxu0 %v11827_v51 }
 0xaca   : > { %v5460_v6 = vpop.permute.xlu0 %5459  ;;  %v5780_v52 = vpop.permute.xlu1 %5779  ;;  %6074 = vmatpush.msrb.mxu2 %v5313_v12  ;;  %v5716_v12 = vsel %vm824_vm8, %v11592_v57, %v11686_v13 }
 0xacb   : > { %v5476_v49 = vsel %vm581_vm2, %v11609_v59, %v5460_v6  ;;  %5498 = vst.msk [vmem:[#allocation3 + $0x148] sm:$0xff] %vm360_vm1, %v5460_v6  ;;  %v5392_v41 = vpop.permute.xlu2 %5391 }
 0xacc   : > { %5818 = vst.msk [vmem:[#allocation3 + $0x2c8] sm:$0xff] %vm360_vm1, %v5780_v52  ;;  %6075 = vmatpush.msrb.mxu2 %v11429_v2  ;;  %6152 = vmatpush.msrb.mxu3 %v5476_v49  ;;  %v5400_v59 = vsel %vm13229_vm3, %v11643_v54, %v5392_v41  ;;  %vm13238_vm3 = vmmov %vm13237_vm12 }
 0xacd   : > { %5424 = vst.msk [vmem:[#allocation3 + $0x118] sm:$0xff] %vm360_vm1, %v5392_v41 }
 0xace   : > { %6076 = vmatpush.msrb.mxu2 %v11387_v27  ;;  %6153 = vmatpush.msrb.mxu3 %v5474_v20 }
 0xad0   : > { %6077 = vmatpush.msrb.mxu2 %v11372_v50  ;;  %6154 = vmatpush.msrb.mxu3 %v5400_v59 }
 0xad1   : > { %6114 = vmatmul.f32.gmra.mxu0 %v11849_v56 }
 0xad2   : > { %v5786_v27 = vpop.permute.xlu0 %5785  ;;  %v5380_v2 = vpop.permute.xlu1 %5379  ;;  %6078 = vmatpush.msrb.mxu2 %v11357_v38  ;;  %v11882_v38 = vld [vmem:[%s12948_s1 + $0x198] sm:$0xff] }
 0xad3   : > { %v5798_v54 = vsel %vm905_vm6, %v11621_v26, %v5786_v27  ;;  %5821 = vst.msk [vmem:[#allocation3 + $0x2e0] sm:$0xff] %vm360_vm1, %v5786_v27  ;;  %v11866_v50 = vpop.permute.xlu2 %5545  ;;  %6079 = vmatmul.f32.vlgmr.msrb.gmra.mxu2 %v11857_v30  ;;  %v5796_v26 = vsel %vm905_vm6, %v11679_v47, %v5780_v52  ;;  %v5396_v19 = vsel %vm13235_vm5, %v11667_v35, %v5380_v2 }
 0xad4   : > { %5418 = vst.msk [vmem:[#allocation3 + $0xe8] sm:$0xff] %vm360_vm1, %v5380_v2  ;;  %6179 = vmatpush.msra.mxu2 %v5800_v53  ;;  %v6007_v2 = vld [vmem:[#allocation3 + $0x2c8] sm:$0xff] }
 0xad5   : > { %5581 = vst.msk [vmem:[#allocation3 + $0x1c0] sm:$0xff] %vm360_vm1, %v11866_v50 }
 0xad6   : > { %6180 = vmatpush.msra.mxu2 %v5798_v54 }
 0xad8   : > { %6181 = vmatpush.msra.mxu2 %v5796_v26 }
 0xad9   : > { %6117 = vmatmul.f32.gmra.mxu0 %v11875_v1 }
 0xada   : > { %v5386_v46 = vpop.permute.xlu0 %5385  ;;  %v5706_v34 = vpop.permute.xlu1 %5705  ;;  %6182 = vmatpush.msra.mxu2 %v5794_v0 }
 0xadb   : > { %v5398_v44 = vsel %vm13234_vm9, %v11619_v31, %v5386_v46  ;;  %5421 = vst.msk [vmem:[#allocation3 + $0x100] sm:$0xff] %vm360_vm1, %v5386_v46  ;;  %v11891_v47 = vpop.permute.xlu2 %5539  ;;  %6082 = vmatmul.f32.gmra.mxu2 %v11882_v38  ;;  %v5394_v31 = vsel %vm13236_vm4, %v11572_v17, %v11671_v18  ;;  %v11916_v18 = vld [vmem:[%s12948_s1 + $0x1c8] sm:$0xff]  ;;  %v5718_v5 = vsel %vm824_vm8, %v11719_v45, %v5706_v34  ;;  %vm13239_vm9 = vcmask 1039360   ;;  %v11985_v46 = vld [vmem:[%s12948_s1 + $0x190] sm:$0xff] }
 0xadc   : > { %5741 = vst.msk [vmem:[#allocation3 + $0x280] sm:$0xff] %vm360_vm1, %v5706_v34  ;;  %6155 = vmatpush.msrb.mxu3 %v5398_v44  ;;  %vm13240_vm5 = vmmov %vm13239_vm9  ;;  %v5556_v53 = vsel %vm662_vm10, %v11703_v28, %v11891_v47  ;;  %v5965_v34 = vld [vmem:[#allocation3 + $0x178] sm:$0xff] }
 0xadd   : > { %5578 = vst.msk [vmem:[#allocation3 + $0x1a8] sm:$0xff] %vm360_vm1, %v11891_v47  ;;  %v5318_v57 = vsel %vm13240_vm5, %v11630_v25, %v11750_v63  ;;  %vm13241_vm4 = vmmov %vm13240_vm5  ;;  %v5251_v25 = vld [vmem:[#allocation2 + $0x50] sm:$0xff]  ;;  %v5248_v63 = vld [vmem:[#allocation2 + $0x38] sm:$0xff] }
 0xade   : > { %6156 = vmatpush.msrb.mxu3 %v5396_v19  ;;  %v5995_v47 = vld [vmem:[#allocation3 + $0x268] sm:$0xff]  ;;  %v5962_v19 = vld [vmem:[#allocation3 + $0x160] sm:$0xff] }
 0xae0   : > { %6157 = vmatpush.msrb.mxu3 %v5394_v31  ;;  %v5992_v31 = vld [vmem:[#allocation3 + $0x250] sm:$0xff] }
 0xae2   : > { %v5868_v61 = vpop.permute.xlu0 %5867  ;;  %v5626_v62 = vpop.permute.xlu1 %5625 }
 0xae3   : > { %5661 = vst.msk [vmem:[#allocation3 + $0x220] sm:$0xff] %vm360_vm1, %v5626_v62  ;;  %v11908_v7 = vpop.permute.xlu2 %5533  ;;  %6085 = vmatmul.f32.gmra.mxu2 %v11905_v10 }
 0xae4   : > { %5575 = vst.msk [vmem:[#allocation3 + $0x190] sm:$0xff] %vm360_vm1, %v11908_v7  ;;  %v5554_v54 = vsel %vm662_vm10, %v11598_v58, %v11908_v7  ;;  %v5998_v58 = vld [vmem:[#allocation3 + $0x280] sm:$0xff] }
 0xaea   : > { %v5862_v17 = vpop.permute.xlu0 %5861  ;;  %v5870_v35 = vpop.permute.xlu1 %5869 }
 0xaeb   : > { %v5879_v21 = vsel %vm13237_vm12, %v5868_v61, %v5870_v35  ;;  %v11919_v24 = vpop.permute.xlu2 %5849  ;;  %6088 = vmatmul.f32.gmra.mxu2 %v11916_v18  ;;  %vm13242_vm12 = vmmov %vm13241_vm4 }
 0xaec   : > { %6133 = vmatpush.msra.mxu1 %v5879_v21  ;;  %v5314_v13 = vsel %vm13242_vm12, %v11617_v40, %v11721_v37  ;;  %v5245_v37 = vld [vmem:[#allocation2 + $0x20] sm:$0xff]  ;;  %vm13247_vm12 = vcmask 736256   ;;  %v5956_v21 = vld [vmem:[#allocation3 + $0x130] sm:$0xff] }
 0xaf2   : > { %v5712_v14 = vpop.permute.xlu0 %5711  ;;  %v5864_v36 = vpop.permute.xlu1 %5863 }
 0xaf3   : > { %v5720_v16 = vsel %vm824_vm8, %v11669_v55, %v5712_v14  ;;  %5744 = vst.msk [vmem:[#allocation3 + $0x298] sm:$0xff] %vm360_vm1, %v5712_v14  ;;  %v5877_v48 = vsel %vm13238_vm3, %v5862_v17, %v5864_v36  ;;  %v5866_v29 = vpop.permute.xlu2 %5865  ;;  %v5714_v55 = vsel %vm824_vm8, %v11588_v8, %v11772_v33  ;;  %v5316_v8 = vsel %vm13241_vm4, %v11649_v22, %v11811_v43  ;;  %v5242_v43 = vld [vmem:[#allocation2 + $0x8] sm:$0xff] }
 0xaf4   : > { %5901 = vst.msk [vmem:[#allocation3 + $0x340] sm:$0xff] %vm360_vm1, %v5866_v29  ;;  %6134 = vmatpush.msra.mxu1 %v5877_v48  ;;  %6183 = vmatpush.msra.mxu2 %v5720_v16  ;;  %vm13243_vm3 = vcmask 883712   ;;  %v5983_v16 = vld [vmem:[#allocation3 + $0x208] sm:$0xff]  ;;  %v5950_v48 = vld [vmem:[#allocation3 + $0x100] sm:$0xff] }
 0xaf5   : > { %vm13245_vm5 = vmmov %vm13243_vm3 }
 0xaf6   : > { %6184 = vmatpush.msra.mxu2 %v5718_v5  ;;  %v5636_v40 = vsel %vm13245_vm5, %v11602_v9, %v11707_v11  ;;  %vm13246_vm4 = vmmov %vm13243_vm3  ;;  %v6013_v9 = vld [vmem:[#allocation3 + $0x2f8] sm:$0xff] }
 0xaf8   : > { %6185 = vmatpush.msra.mxu2 %v5716_v12  ;;  %v5947_v12 = vld [vmem:[#allocation3 + $0xe8] sm:$0xff] }
 0xafa   : > { %v5312_v6 = vpop.permute.xlu0 %5311  ;;  %v5552_v52 = vpop.permute.xlu1 %5551  ;;  %6186 = vmatpush.msra.mxu2 %v5714_v55  ;;  %v6001_v28 = vld [vmem:[#allocation3 + $0x298] sm:$0xff]  ;;  %v7862_v55 = vld [vmem:[%s12948_s1 + $0x1c0] sm:$0xff] }
 0xafb   : > { %v5320_v49 = vsel %vm13239_vm9, %v11774_v3, %v5312_v6  ;;  %5344 = vst.msk [vmem:[#allocation3 + $0xb8] sm:$0xff] %vm360_vm1, %v5312_v6  ;;  %vm13244_vm9 = vmmov %vm13243_vm3  ;;  %v5560_v11 = vsel %vm662_vm10, %v11705_v39, %v5552_v52  ;;  %v6004_v39 = vld [vmem:[#allocation3 + $0x2b0] sm:$0xff]  ;;  %v6022_v44 = vld [vmem:[#allocation3 + $0x340] sm:$0xff] }
 0xafc   : > { %5584 = vst.msk [vmem:[#allocation3 + $0x1d8] sm:$0xff] %vm360_vm1, %v5552_v52  ;;  %6158 = vmatpush.msrb.mxu3 %v5320_v49  ;;  %v5638_v22 = vsel %vm13244_vm9, %v11641_v60, %v5626_v62  ;;  %v5959_v62 = vld [vmem:[#allocation3 + $0x148] sm:$0xff]  ;;  %v5944_v52 = vld [vmem:[#allocation3 + $0xd0] sm:$0xff] }
 0xafe   : > { %6159 = vmatpush.msrb.mxu3 %v5318_v57 }
 0xb00   : > { %6160 = vmatpush.msrb.mxu3 %v5316_v8  ;;  %v5974_v8 = vld [vmem:[#allocation3 + $0x1c0] sm:$0xff] }
 0xb02   : > { %v5632_v45 = vpop.permute.xlu0 %5631  ;;  %v11948_v33 = vpop.permute.xlu1 %5857  ;;  %6161 = vmatpush.msrb.mxu3 %v5314_v13  ;;  %v5941_v57 = vld [vmem:[#allocation3 + $0xb8] sm:$0xff]  ;;  %v5938_v13 = vld [vmem:[#allocation3 + $0xa0] sm:$0xff] }
 0xb03   : > { %v5640_v3 = vsel %vm13243_vm3, %v11681_v23, %v5632_v45  ;;  %5664 = vst.msk [vmem:[#allocation3 + $0x238] sm:$0xff] %vm360_vm1, %v5632_v45  ;;  %v5634_v23 = vsel %vm13246_vm4, %v11639_v15, %v11809_v4  ;;  %vm13248_vm3 = vmmov %vm13247_vm12  ;;  %v6010_v15 = vld [vmem:[#allocation3 + $0x2e0] sm:$0xff]  ;;  %v5558_v4 = vsel %vm662_vm10, %v11632_v32, %v11866_v50  ;;  %vm13251_vm4 = vcmask 261120   ;;  %v5977_v49 = vld [vmem:[#allocation3 + $0x1d8] sm:$0xff] }
 0xb04   : > { %6162 = vmatpush.msrb.mxu3 %v5251_v25  ;;  %6187 = vmatpush.msra.mxu2 %v5640_v3  ;;  %vm13249_vm9 = vmmov %vm13248_vm3  ;;  %v5971_v45 = vld [vmem:[#allocation3 + $0x1a8] sm:$0xff]  ;;  %v5968_v3 = vld [vmem:[#allocation3 + $0x190] sm:$0xff] }
 0xb05   : > { %v5878_v27 = vsel %vm13249_vm9, %v5864_v36, %v5866_v29  ;;  %vm13250_vm5 = vmmov %vm13248_vm3  ;;  %v5953_v36 = vld [vmem:[#allocation3 + $0x118] sm:$0xff]  ;;  %v5980_v29 = vld [vmem:[#allocation3 + $0x1f0] sm:$0xff] }
 0xb06   : > { %6163 = vmatpush.msrb.mxu3 %v5248_v63  ;;  %6188 = vmatpush.msra.mxu2 %v5638_v22  ;;  %vm13253_vm9 = vmmov %vm13251_vm4  ;;  %v7865_v25 = vld [vmem:[%s12948_s1 + $0x1d8] sm:$0xff]  ;;  %v5932_v22 = vld [vmem:[#allocation3 + $0x70] sm:$0xff] }
 0xb07   : > { %v5929_v63 = vld [vmem:[#allocation3 + $0x58] sm:$0xff] }
 0xb08   : > { %6164 = vmatpush.msrb.mxu3 %v5245_v37  ;;  %6189 = vmatpush.msra.mxu2 %v5636_v40  ;;  %v5926_v40 = vld [vmem:[#allocation3 + $0x40] sm:$0xff]  ;;  %v5923_v37 = vld [vmem:[#allocation3 + $0x28] sm:$0xff] }
 0xb0a   : > { %v5856_v41 = vpop.permute.xlu0 %5855  ;;  %v5872_v20 = vpop.permute.xlu1 %5871  ;;  %6165 = vmatpush.msrb.mxu3 %v5242_v43  ;;  %6190 = vmatpush.msra.mxu2 %v5634_v23  ;;  %v5989_v17 = vld [vmem:[#allocation3 + $0x238] sm:$0xff]  ;;  %v5920_v23 = vld [vmem:[#allocation3 + $0x10] sm:$0xff] }
 0xb0b   : > { %v5875_v60 = vsel %vm13247_vm12, %v5856_v41, %v11948_v33  ;;  %v5880_v59 = vsel %vm13248_vm3, %v5870_v35, %v5872_v20  ;;  %5904 = vst.msk [vmem:[#allocation3 + $0x358] sm:$0xff] %vm360_vm1, %v5872_v20  ;;  %6166 = vmatmul.f32.vlgmr.msrb.gmra.mxu3 %v11857_v30  ;;  %vm13252_vm12 = vmmov %vm13248_vm3  ;;  %v11997_v35 = vld [vmem:[%s12948_s1 + $0x1a8] sm:$0xff]  ;;  %v12034_v41 = vpop.permute.xlu2 %6048 }
 0xb0c   : > { %6266 = vmatpush.msra.mxu3 %v6013_v9  ;;  %6135 = vmatpush.msra.mxu1 %v5875_v60 }
 0xb0d   : > { %6191 = vmatpush.msra.mxu2 %v5560_v11  ;;  %6220 = vmatpush.msra.mxu0 %v5880_v59  ;;  %v12039_v11 = vstv %s7882_s20 }
 0xb0e   : > { %6267 = vmatpush.msra.mxu3 %v6010_v15 }
 0xb0f   : > { %6192 = vmatpush.msra.mxu2 %v5558_v4  ;;  %6221 = vmatpush.msra.mxu0 %v5878_v27 }
 0xb10   : > { %6268 = vmatpush.msra.mxu3 %v6007_v2 }
 0xb11   : > { %6193 = vmatpush.msra.mxu2 %v5556_v53 }
 0xb12   : > { %v5852_v26 = vpop.permute.xlu0 %5851  ;;  %v5854_v0 = vpop.permute.xlu1 %5853  ;;  %6269 = vmatpush.msra.mxu3 %v6004_v39  ;;  %v6025_v32 = vld [vmem:[#allocation3 + $0x358] sm:$0xff] }
 0xb13   : > { %v5873_v50 = vsel %vm13250_vm5, %v11919_v24, %v5852_v26  ;;  %5895 = vst.msk [vmem:[#allocation3 + $0x310] sm:$0xff] %vm360_vm1, %v5854_v0  ;;  %6194 = vmatpush.msra.mxu2 %v5554_v54  ;;  %6169 = vmatmul.f32.gmra.mxu3 %v11882_v38  ;;  %v5986_v24 = vld [vmem:[#allocation3 + $0x220] sm:$0xff]  ;;  %v5874_v14 = vsel %vm13248_vm3, %v5852_v26, %v5854_v0  ;;  %vm13254_vm5 = vmmov %vm13251_vm4 }
 0xb14   : > { %6195 = vmatmul.f32.vlgmr.msra.gmra.mxu2 %v11797_v42  ;;  %6270 = vmatpush.msra.mxu3 %v6001_v28  ;;  %vm13256_vm3 = vmmov %vm13251_vm4 }
 0xb15   : > { %6307 = vmatpush.msrb.mxu2 %v6025_v32  ;;  %6136 = vmatpush.msra.mxu1 %v5873_v50 }
 0xb16   : > { %7870 = vmatmul.msk.f32.vlgmr.msra.gmra.mxu1 %vm13251_vm4, %v11985_v46  ;;  %6271 = vmatpush.msra.mxu3 %v5998_v58 }
 0xb17   : > { %6237 = vmatpush.msrb.mxu1 %v5965_v34  ;;  %6308 = vmatpush.msrb.mxu2 %v6022_v44 }
 0xb18   : > { %6272 = vmatpush.msra.mxu3 %v5995_v47 }
 0xb19   : > { %6238 = vmatpush.msrb.mxu1 %v5962_v19 }
 0xb1a   : > { %v5860_v61 = vpop.permute.xlu0 %5859  ;;  %6273 = vmatpush.msra.mxu3 %v5992_v31  ;;  %v6016_v6 = vld [vmem:[#allocation3 + $0x310] sm:$0xff]  ;;  %v12041_v15 = vpop.permute.xlu1 %6038 }
 0xb1b   : > { %v5876_v7 = vsel %vm13252_vm12, %v11948_v33, %v5860_v61  ;;  %5898 = vst.msk [vmem:[#allocation3 + $0x328] sm:$0xff] %vm360_vm1, %v5860_v61  ;;  %6239 = vmatpush.msrb.mxu1 %v5959_v62  ;;  %6172 = vmatmul.f32.gmra.mxu3 %v11905_v10  ;;  %vm13255_vm12 = vmmov %vm13251_vm4  ;;  %v5935_v33 = vld [vmem:[#allocation3 + $0x88] sm:$0xff] }
 0xb1c   : > { %6198 = vmatmul.f32.gmra.mxu2 %v11827_v51  ;;  %6274 = vmatpush.msra.mxu3 %v5989_v17 }
 0xb1d   : > { %6240 = vmatpush.msrb.mxu1 %v5956_v21  ;;  %6222 = vmatpush.msra.mxu0 %v5876_v7 }
 0xb1e   : > { %7871 = vmatmul.msk.f32.gmra.mxu1 %vm13253_vm9, %v11997_v35  ;;  %6275 = vmatpush.msra.mxu3 %v5986_v24  ;;  %vm13257_vm9 = vmmov %vm13256_vm3 }
 0xb1f   : > { %6241 = vmatpush.msrb.mxu1 %v5953_v36  ;;  %6223 = vmatpush.msra.mxu0 %v5874_v14 }
 0xb20   : > { %7874 = vmatmul.msk.f32.vlgmr.msra.gmra.mxu0 %vm13254_vm5, %v11985_v46  ;;  %6276 = vmatpush.msra.mxu3 %v5983_v16  ;;  %vm13258_vm5 = vmmov %vm13256_vm3 }
 0xb21   : > { %6242 = vmatpush.msrb.mxu1 %v5950_v48 }
 0xb22   : > { %v6019_v5 = vld [vmem:[#allocation3 + $0x328] sm:$0xff]  ;;  %6277 = vmatpush.msra.mxu3 %v5980_v29  ;;  %v12049_v34 = vpop.permute.xlu0 %6043 }
 0xb23   : > { %6309 = vmatpush.msrb.mxu2 %v6019_v5  ;;  %6243 = vmatpush.msrb.mxu1 %v5947_v12 }
 0xb24   : > { %6175 = vmatmul.f32.gmra.mxu3 %v11916_v18  ;;  %6201 = vmatmul.f32.gmra.mxu2 %v11849_v56 }
 0xb25   : > { %6310 = vmatpush.msrb.mxu2 %v6016_v6  ;;  %6244 = vmatpush.msrb.mxu1 %v5944_v52 }
 0xb26   : > { %6278 = vmatpush.msra.mxu3 %v5977_v49  ;;  %7872 = vmatmul.msk.f32.gmra.mxu1 %vm13251_vm4, %v7862_v55  ;;  %vm13259_vm4 = vmmov %vm13256_vm3 }
 0xb27   : > { %6245 = vmatpush.msrb.mxu1 %v5941_v57 }
 0xb28   : > { %6279 = vmatpush.msra.mxu3 %v5974_v8  ;;  %7875 = vmatmul.msk.f32.gmra.mxu0 %vm13255_vm12, %v11997_v35  ;;  %vm13260_vm12 = vmmov %vm13256_vm3 }
 0xb29   : > { %6246 = vmatpush.msrb.mxu1 %v5938_v13 }
 0xb2a   : > { %6280 = vmatpush.msra.mxu3 %v5971_v45 }
 0xb2b   : > { %6247 = vmatpush.msrb.mxu1 %v5935_v33 }
 0xb2c   : > { %6281 = vmatpush.msra.mxu3 %v5968_v3  ;;  %6204 = vmatmul.f32.gmra.mxu2 %v11875_v1 }
 0xb2d   : > { %6248 = vmatpush.msrb.mxu1 %v5932_v22  ;;  %6282 = vmatmul.f32.vlgmr.msra.gmra.mxu3 %v11797_v42 }
 0xb2e   : > { %7873 = vmatmul.msk.f32.gmra.mxu1 %vm13256_vm3, %v7865_v25 }
 0xb2f   : > { %6249 = vmatpush.msrb.mxu1 %v5929_v63 }
 0xb30   : > { %7876 = vmatmul.msk.f32.gmra.mxu0 %vm13257_vm9, %v7862_v55  ;;  %vm13261_vm9 = vmmov %vm13256_vm3 }
 0xb31   : > { %6250 = vmatpush.msrb.mxu1 %v5926_v40 }
 0xb33   : > { %6251 = vmatpush.msrb.mxu1 %v5923_v37 }
 0xb34   : > { %7878 = vmatmul.msk.f32.vlgmr.msrb.gmra.mxu2 %vm13258_vm5, %v11985_v46 }
 0xb35   : > { %6252 = vmatpush.msrb.mxu1 %v5920_v23  ;;  %6285 = vmatmul.f32.gmra.mxu3 %v11827_v51 }
 0xb36   : > { %6253 = vmatmul.f32.vlgmr.msrb.gmra.mxu1 %v11857_v30 }
 0xb38   : > { %7877 = vmatmul.msk.f32.gmra.mxu0 %vm13259_vm4, %v7865_v25 }
 0xb3c   : > { %7879 = vmatmul.msk.f32.gmra.mxu2 %vm13260_vm12, %v11997_v35 }
 0xb3d   : > { %6288 = vmatmul.f32.gmra.mxu3 %v11849_v56 }
 0xb3e   : > { %6256 = vmatmul.f32.gmra.mxu1 %v11882_v38  ;;  %v6109_v51 = vpop.f32.mrf.mxu0  ;;  %v12036_v38 = vpop.permute.xlu2 %6033 }
 0xb44   : > { %7880 = vmatmul.msk.f32.gmra.mxu2 %vm13256_vm3, %v7862_v55 }
 0xb45   : > { %6291 = vmatmul.f32.gmra.mxu3 %v11875_v1 }
 0xb46   : > { %6259 = vmatmul.f32.gmra.mxu1 %v11905_v10  ;;  %v6112_v43 = vpop.f32.mrf.mxu0 }
 0xb4c   : > { %7881 = vmatmul.msk.f32.gmra.mxu2 %vm13261_vm9, %v7865_v25 }
 0xb4e   : > { %6262 = vmatmul.f32.gmra.mxu1 %v11916_v18  ;;  %v6115_v56 = vpop.f32.mrf.mxu0 }
 0xb56   : > { %v6080_v42 = vpop.f32.mrf.mxu2  ;;  %v6118_v4 = vpop.f32.mrf.mxu0 }
 0xb57   : > { %v6081_v60 = vadd.f32 %v6080_v42, %v12036_v38 }
 0xb59   : > { %v6110_v10 = vadd.f32 %v6109_v51, %v6081_v60 }
 0xb5e   : > { %v6083_v30 = vpop.f32.mrf.mxu2 }
 0xb5f   : > { %v6084_v27 = vadd.f32 %v6083_v30, %v12041_v15 }
 0xb61   : > { %v6113_v32 = vadd.f32 %v6112_v43, %v6084_v27 }
 0xb66   : > { %v6086_v20 = vpop.f32.mrf.mxu2 }
 0xb67   : > { %v6087_v47 = vadd.f32 %v6086_v20, %v12049_v34 }
 0xb69   : > { %v6116_v35 = vadd.f32 %v6115_v56, %v6087_v47 }
 0xb6e   : > { %v6089_v59 = vpop.f32.mrf.mxu2 }
 0xb6f   : > { %v6090_v29 = vadd.f32 %v6089_v59, %v12034_v41 }
 0xb71   : > { %v6119_v13 = vadd.f32 %v6118_v4, %v6090_v29 }
 0xb8e   : > { %v6167_v1 = vpop.f32.mrf.mxu3 }
 0xb8f   : > { %v6168_v50 = vadd.f32 %v6167_v1, %v12036_v38 }
 0xb93   : > { %v6138_v9 = vpop.f32.mrf.mxu1 }
 0xb94   : > { %v6139_v18 = vadd.f32 %v6138_v9, %v6110_v10 }
 0xb96   : > { %vm6325_vm5 = vcmp.gt.f32.partialorder %v6139_v18, 0.0  ;;  %v6338_v2 = vmul.f32 %v12039_v11, %v6139_v18  ;;  %v6170_v53 = vpop.f32.mrf.mxu3 }
 0xb97   : > { %v6196_v39 = vpop.f32.mrf.mxu2  ;;  %v6171_v24 = vadd.f32 %v6170_v53, %v12041_v15 }
 0xb98   : > { %v6350_v54 = vsel %vm6325_vm5, %v6139_v18, %v6338_v2  ;;  %v6197_v46 = vadd.f32 %v6196_v39, %v6168_v50 }
 0xb99   : > { %v6362_v0 = vsel %vm8787_vm0, %v6350_v54, 0.0 }
 0xb9a   : > { %6386 = vrot.lane.b32.xlu0 %v6362_v0, %s8004_s12 }
 0xb9b   : > { %v6141_v28 = vpop.f32.mrf.mxu1 }
 0xb9c   : > { %v6142_v58 = vadd.f32 %v6141_v28, %v6113_v32 }
 0xb9d   : > { %v6225_v44 = vpop.f32.mrf.mxu0 }
 0xb9e   : > { %vm6328_vm4 = vcmp.gt.f32.partialorder %v6142_v58, 0.0  ;;  %v6341_v19 = vmul.f32 %v12039_v11, %v6142_v58  ;;  %v6226_v31 = vadd.f32 %v6225_v44, %v6197_v46  ;;  %v6173_v61 = vpop.f32.mrf.mxu3 }
 0xb9f   : > { %v6199_v62 = vpop.f32.mrf.mxu2  ;;  %v6174_v45 = vadd.f32 %v6173_v61, %v12049_v34 }
 0xba0   : > { %v6353_v7 = vsel %vm6328_vm4, %v6142_v58, %v6341_v19  ;;  %v6339_v21 = vmul.f32 %v12039_v11, %v6226_v31  ;;  %vm6326_vm12 = vcmp.gt.f32.partialorder %v6226_v31, 0.0  ;;  %v6200_v16 = vadd.f32 %v6199_v62, %v6171_v24 }
 0xba1   : > { %v6365_v17 = vsel %vm8787_vm0, %v6353_v7, 0.0 }
 0xba2   : > { %6392 = vrot.lane.b32.xlu1 %v6365_v17, %s8004_s12  ;;  %v6351_v12 = vsel %vm6326_vm12, %v6226_v31, %v6339_v21 }
 0xba3   : > { %v6144_v14 = vpop.f32.mrf.mxu1  ;;  %v6363_v8 = vsel %vm8771_vm11, %v6351_v12, 0.0 }
 0xba4   : > { %v6145_v36 = vadd.f32 %v6144_v14, %v6116_v35 }
 0xba5   : > { %v6228_v48 = vpop.f32.mrf.mxu0 }
 0xba6   : > { %vm6331_vm3 = vcmp.gt.f32.partialorder %v6145_v36, 0.0  ;;  %v6344_v5 = vmul.f32 %v12039_v11, %v6145_v36  ;;  %v6229_v55 = vadd.f32 %v6228_v48, %v6200_v16 }
 0xba7   : > { %v6202_v6 = vpop.f32.mrf.mxu2  ;;  %v6176_v52 = vpop.f32.mrf.mxu3 }
 0xba8   : > { %v6356_v49 = vsel %vm6331_vm3, %v6145_v36, %v6344_v5  ;;  %v6342_v3 = vmul.f32 %v12039_v11, %v6229_v55  ;;  %vm6329_vm9 = vcmp.gt.f32.partialorder %v6229_v55, 0.0  ;;  %v6203_v22 = vadd.f32 %v6202_v6, %v6174_v45 }
 0xba9   : > { %v6368_v33 = vsel %vm8787_vm0, %v6356_v49, 0.0  ;;  %v6177_v56 = vadd.f32 %v6176_v52, %v12034_v41 }
 0xbaa   : > { %6388 = vrot.lane.b32.xlu1 %v6363_v8, %s8004_s12  ;;  %6398 = vrot.lane.b32.xlu2 %v6368_v33, %s8004_s12  ;;  %v6354_v51 = vsel %vm6329_vm9, %v6229_v55, %v6342_v3 }
 0xbab   : > { %v6147_v25 = vpop.f32.mrf.mxu1  ;;  %v6366_v1 = vsel %vm8771_vm11, %v6354_v51, 0.0 }
 0xbac   : > { %v6148_v63 = vadd.f32 %v6147_v25, %v6119_v13 }
 0xbad   : > { %v6231_v40 = vpop.f32.mrf.mxu0 }
 0xbae   : > { %vm6334_vm5 = vcmp.gt.f32.partialorder %v6148_v63, 0.0  ;;  %v6347_v37 = vmul.f32 %v12039_v11, %v6148_v63  ;;  %v6232_v23 = vadd.f32 %v6231_v40, %v6203_v22 }
 0xbaf   : > { %v6205_v42 = vpop.f32.mrf.mxu2 }
 0xbb0   : > { %v6359_v30 = vsel %vm6334_vm5, %v6148_v63, %v6347_v37  ;;  %v6283_v43 = vpop.f32.mrf.mxu3  ;;  %v6345_v60 = vmul.f32 %v12039_v11, %v6232_v23  ;;  %vm6332_vm4 = vcmp.gt.f32.partialorder %v6232_v23, 0.0  ;;  %v6206_v10 = vadd.f32 %v6205_v42, %v6177_v56 }
 0xbb1   : > { %v6371_v20 = vsel %vm8787_vm0, %v6359_v30, 0.0 }
 0xbb2   : > { %6404 = vrot.lane.b32.xlu0 %v6371_v20, %s8004_s12  ;;  %6394 = vrot.lane.b32.xlu2 %v6366_v1, %s8004_s12  ;;  %v6357_v2 = vsel %vm6332_vm4, %v6232_v23, %v6345_v60 }
 0xbb3   : > { %v6254_v59 = vpop.f32.mrf.mxu1  ;;  %v6369_v32 = vsel %vm8771_vm11, %v6357_v2, 0.0 }
 0xbb4   : > { %v6255_v9 = vadd.f32 %v6254_v59, %v12036_v38 }
 0xbb5   : > { %v6234_v18 = vpop.f32.mrf.mxu0 }
 0xbb6   : > { %v6235_v4 = vadd.f32 %v6234_v18, %v6206_v10  ;;  %v6284_v27 = vadd.f32 %v6283_v43, %v6255_v9 }
 0xbb7   : > { %v6312_v53 = vpop.f32.mrf.mxu2 }
 0xbb8   : > { %vm6335_vm12 = vcmp.gt.f32.partialorder %v6235_v4, 0.0  ;;  %v6348_v39 = vmul.f32 %v12039_v11, %v6235_v4  ;;  %v6313_v54 = vadd.f32 %v6312_v53, %v6284_v27  ;;  %v6286_v0 = vpop.f32.mrf.mxu3 }
 0xbba   : > { %vm6327_vm3 = vcmp.gt.f32.partialorder %v6313_v54, 0.0  ;;  %v6340_v50 = vmul.f32 %v12039_v11, %v6313_v54  ;;  %6400 = vrot.lane.b32.xlu0 %v6369_v32, %s8004_s12  ;;  %v6360_v28 = vsel %vm6335_vm12, %v6235_v4, %v6348_v39  ;;  %vm13267_vm12 = vcmask 1039360  }
 0xbbb   : > { %v6257_v38 = vpop.f32.mrf.mxu1  ;;  %v6372_v46 = vsel %vm8771_vm11, %v6360_v28, 0.0 }
 0xbbc   : > { %v6258_v58 = vadd.f32 %v6257_v38, %v12041_v15  ;;  %6406 = vrot.lane.b32.xlu1 %v6372_v46, %s8004_s12  ;;  %v6352_v44 = vsel %vm6327_vm3, %v6313_v54, %v6340_v50  ;;  %vm13269_vm3 = vcmask 1031168  }
 0xbbd   : > { %v6364_v19 = vsel %vm8836_vm13, %v6352_v44, 0.0 }
 0xbbe   : > { %v6287_v31 = vadd.f32 %v6286_v0, %v6258_v58  ;;  %6390 = vrot.lane.b32.xlu2 %v6364_v19, %s8004_s12 }
 0xbbf   : > { %v6315_v61 = vpop.f32.mrf.mxu2 }
 0xbc0   : > { %v6316_v62 = vadd.f32 %v6315_v61, %v6287_v31  ;;  %v6289_v7 = vpop.f32.mrf.mxu3 }
 0xbc2   : > { %vm6330_vm9 = vcmp.gt.f32.partialorder %v6316_v62, 0.0  ;;  %v6343_v17 = vmul.f32 %v12039_v11, %v6316_v62 }
 0xbc3   : > { %v6260_v35 = vpop.f32.mrf.mxu1 }
 0xbc4   : > { %v6261_v21 = vadd.f32 %v6260_v35, %v12049_v34  ;;  %v6355_v24 = vsel %vm6330_vm9, %v6316_v62, %v6343_v17  ;;  %vm13270_vm9 = vcmask 736256  }
 0xbc5   : > { %v6367_v15 = vsel %vm8836_vm13, %v6355_v24, 0.0 }
 0xbc6   : > { %v6290_v14 = vadd.f32 %v6289_v7, %v6261_v21  ;;  %6396 = vrot.lane.b32.xlu1 %v6367_v15, %s8004_s12 }
 0xbc7   : > { %v6318_v36 = vpop.f32.mrf.mxu2 }
 0xbc8   : > { %v6319_v16 = vadd.f32 %v6318_v36, %v6290_v14  ;;  %v6292_v5 = vpop.f32.mrf.mxu3 }
 0xbca   : > { %vm6333_vm5 = vcmp.gt.f32.partialorder %v6319_v16, 0.0  ;;  %v6346_v48 = vmul.f32 %v12039_v11, %v6319_v16 }
 0xbcb   : > { %v6263_v29 = vpop.f32.mrf.mxu1 }
 0xbcc   : > { %v6264_v12 = vadd.f32 %v6263_v29, %v12034_v41  ;;  %v6358_v55 = vsel %vm6333_vm5, %v6319_v16, %v6346_v48  ;;  %vm13271_vm5 = vmmov %vm13270_vm9 }
 0xbcd   : > { %v6370_v34 = vsel %vm8836_vm13, %v6358_v55, 0.0 }
 0xbce   : > { %v6293_v6 = vadd.f32 %v6292_v5, %v6264_v12  ;;  %6402 = vrot.lane.b32.xlu0 %v6370_v34, %s8004_s12 }
 0xbcf   : > { %v6321_v52 = vpop.f32.mrf.mxu2 }
 0xbd0   : > { %v6322_v49 = vadd.f32 %v6321_v52, %v6293_v6 }
 0xbd2   : > { %vm6336_vm4 = vcmp.gt.f32.partialorder %v6322_v49, 0.0  ;;  %v6349_v8 = vmul.f32 %v12039_v11, %v6322_v49 }
 0xbd4   : > { %v6361_v13 = vsel %vm6336_vm4, %v6322_v49, %v6349_v8  ;;  %vm13272_vm4 = vmmov %vm13269_vm3 }
 0xbd5   : > { %v6373_v45 = vsel %vm8836_vm13, %v6361_v13, 0.0 }
 0xbd6   : > { %6408 = vrot.lane.b32.xlu2 %v6373_v45, %s8004_s12 }
 0xc04   : > { %v6399_v33 = vpop.permute.xlu2 %6398 }
 0xc05   : > { %6436 = vst.msk [vmem:[#allocation2 + $0x30] sm:$0xff] %vm1544_vm7, %v6399_v33 }
 0xc0c   : > { %v6387_v41 = vpop.permute.xlu0 %6386  ;;  %v12106_v3 = vld [vmem:[#allocation2 + $0x30] sm:$0xff]  ;;  %v6395_v25 = vpop.permute.xlu2 %6394 }
 0xc0d   : > { %6430 = vst.msk [vmem:[#allocation2] sm:$0xff] %vm1544_vm7, %v6387_v41 }
 0xc14   : > { %v6393_v22 = vpop.permute.xlu1 %6392  ;;  %v12108_v63 = vld [vmem:[#allocation2] sm:$0xff] }
 0xc15   : > { %v12111_v11 = vsel %vm1523_vm14, %v6393_v22, %v6395_v25  ;;  %6433 = vst.msk [vmem:[#allocation2 + $0x18] sm:$0xff] %vm1544_vm7, %v6393_v22  ;;  %6650 = vrot.lane.b32.xlu0 %v12108_v63, %s7997_s27  ;;  %6570 = vrot.lane.b32.xlu2 %v12108_v63, %s7996_s26 }
 0xc16   : > { %6434 = vst [vmem:[#allocation2 + $0x20] sm:$0xff] %v12111_v11  ;;  %6490 = vrot.lane.b32.xlu1 %v12108_v63, %s7995_s25 }
 0xc18   : > { %v6391_v40 = vpop.permute.xlu2 %6390 }
 0xc1c   : > { %v6389_v37 = vpop.permute.xlu1 %6388  ;;  %v12121_v23 = vld [vmem:[#allocation2 + $0x18] sm:$0xff] }
 0xc1d   : > { %v12124_v42 = vsel %vm1523_vm14, %v6387_v41, %v6389_v37  ;;  %v6411_v51 = vsel %vm1523_vm14, %v6389_v37, %v6391_v40  ;;  %6890 = vrot.lane.b32.xlu0 %v12108_v63, %s8002_s6  ;;  %6970 = vrot.lane.b32.xlu2 %v12108_v63, %s8001_s5  ;;  %v12131_v30 = vld [vmem:[#allocation2 + $0x20] sm:$0xff] }
 0xc1e   : > { %13265 = vst [vmem:[#allocation32_spill] sm:$0xff] %v12131_v30  ;;  %6656 = vrot.lane.b32.xlu1 %v12121_v23, %s7997_s27 }
 0xc1f   : > { %6431 = vst [vmem:[#allocation2 + $0x8] sm:$0xff] %v12124_v42 }
 0xc20   : > { %6432 = vst.msk [vmem:[#allocation2 + $0x10] sm:$0xff] %vm1547_vm15, %v6411_v51 }
 0xc24   : > { %v6405_v43 = vpop.permute.xlu0 %6404 }
 0xc25   : > { %6439 = vst.msk [vmem:[#allocation2 + $0x48] sm:$0xff] %vm1544_vm7, %v6405_v43  ;;  %7050 = vrot.lane.b32.xlu0 %v12108_v63, %s8000_s30  ;;  %6810 = vrot.lane.b32.xlu2 %v12108_v63, %s7999_s29 }
 0xc26   : > { %v12142_v20 = vld [vmem:[#allocation2 + $0x8] sm:$0xff]  ;;  %6976 = vrot.lane.b32.xlu1 %v12121_v23, %s8001_s5 }
 0xc27   : > { %13266 = vst [vmem:[#allocation27_spill] sm:$0xff] %v12142_v20  ;;  %v12146_v56 = vld [vmem:[#allocation2 + $0x10] sm:$0xff] }
 0xc28   : > { %6456 = vst.msk [vmem:[#allocation3 + $0x10] sm:$0xff] %vm360_vm1, %v12146_v56 }
 0xc2c   : > { %v6401_v60 = vpop.permute.xlu0 %6400  ;;  %v12150_v1 = vld [vmem:[#allocation2 + $0x48] sm:$0xff] }
 0xc2d   : > { %v12153_v59 = vsel %vm1523_vm14, %v6399_v33, %v6401_v60  ;;  %6576 = vrot.lane.b32.xlu0 %v12121_v23, %s7996_s26  ;;  %6496 = vrot.lane.b32.xlu2 %v12121_v23, %s7995_s25 }
 0xc2e   : > { %6437 = vst [vmem:[#allocation2 + $0x38] sm:$0xff] %v12153_v59  ;;  %7056 = vrot.lane.b32.xlu1 %v12121_v23, %s8000_s30  ;;  %v6407_v10 = vpop.permute.xlu1 %6406 }
 0xc2f   : > { %v12163_v9 = vsel %vm1523_vm14, %v6405_v43, %v6407_v10 }
 0xc30   : > { %6440 = vst [vmem:[#allocation2 + $0x50] sm:$0xff] %v12163_v9  ;;  %v6409_v18 = vpop.permute.xlu2 %6408 }
 0xc31   : > { %v6417_v4 = vsel %vm1523_vm14, %v6407_v10, %v6409_v18 }
 0xc32   : > { %6441 = vst.msk [vmem:[#allocation2 + $0x58] sm:$0xff] %vm1547_vm15, %v6417_v4 }
 0xc35   : > { %6816 = vrot.lane.b32.xlu0 %v12121_v23, %s7999_s29  ;;  %6896 = vrot.lane.b32.xlu2 %v12121_v23, %s8002_s6  ;;  %v12172_v27 = vld [vmem:[#allocation2 + $0x38] sm:$0xff] }
 0xc36   : > { %6582 = vrot.lane.b32.xlu1 %v12106_v3, %s7996_s26 }
 0xc37   : > { %v12176_v2 = vld [vmem:[#allocation2 + $0x50] sm:$0xff] }
 0xc38   : > { %v6397_v53 = vpop.permute.xlu1 %6396 }
 0xc39   : > { %v6413_v39 = vsel %vm1523_vm14, %v6395_v25, %v6397_v53  ;;  %v12179_v54 = vld [vmem:[#allocation2 + $0x58] sm:$0xff] }
 0xc3a   : > { %6435 = vst.msk [vmem:[#allocation2 + $0x28] sm:$0xff] %vm1547_vm15, %v6413_v39 }
 0xc3b   : > { %6465 = vst.msk [vmem:[#allocation3 + $0x58] sm:$0xff] %vm360_vm1, %v12179_v54 }
 0xc3d   : > { %6662 = vrot.lane.b32.xlu2 %v12106_v3, %s7997_s27  ;;  %6502 = vrot.lane.b32.xlu0 %v12106_v3, %s7995_s25 }
 0xc3e   : > { %6902 = vrot.lane.b32.xlu1 %v12106_v3, %s8002_s6 }
 0xc40   : > { %v6403_v0 = vpop.permute.xlu0 %6402 }
 0xc41   : > { %v6415_v32 = vsel %vm1523_vm14, %v6401_v60, %v6403_v0  ;;  %v12191_v50 = vld [vmem:[#allocation2 + $0x28] sm:$0xff] }
 0xc42   : > { %6438 = vst.msk [vmem:[#allocation2 + $0x40] sm:$0xff] %vm1547_vm15, %v6415_v32 }
 0xc43   : > { %6459 = vst.msk [vmem:[#allocation3 + $0x28] sm:$0xff] %vm360_vm1, %v12191_v50 }
 0xc45   : > { %7062 = vrot.lane.b32.xlu2 %v12106_v3, %s8000_s30  ;;  %6982 = vrot.lane.b32.xlu0 %v12106_v3, %s8001_s5 }
 0xc46   : > { %6822 = vrot.lane.b32.xlu1 %v12106_v3, %s7999_s29 }
 0xc49   : > { %v12202_v28 = vld [vmem:[#allocation2 + $0x40] sm:$0xff] }
 0xc4a   : > { %6462 = vst.msk [vmem:[#allocation3 + $0x40] sm:$0xff] %vm360_vm1, %v12202_v28 }
 0xc4d   : > { %6588 = vrot.lane.b32.xlu2 %v12150_v1, %s7996_s26  ;;  %6668 = vrot.lane.b32.xlu0 %v12150_v1, %s7997_s27 }
 0xc4e   : > { %6508 = vrot.lane.b32.xlu1 %v12150_v1, %s7995_s25 }
 0xc55   : > { %6988 = vrot.lane.b32.xlu2 %v12150_v1, %s8001_s5  ;;  %6908 = vrot.lane.b32.xlu0 %v12150_v1, %s8002_s6 }
 0xc56   : > { %6652 = vrot.lane.b32.xlu1 %v12124_v42, %s7997_s27 }
 0xc5d   : > { %6828 = vrot.lane.b32.xlu2 %v12150_v1, %s7999_s29  ;;  %7068 = vrot.lane.b32.xlu0 %v12150_v1, %s8000_s30 }
 0xc5e   : > { %6892 = vrot.lane.b32.xlu1 %v12124_v42, %s8002_s6 }
 0xc65   : > { %6492 = vrot.lane.b32.xlu2 %v12124_v42, %s7995_s25  ;;  %6572 = vrot.lane.b32.xlu0 %v12124_v42, %s7996_s26 }
 0xc66   : > { %7052 = vrot.lane.b32.xlu1 %v12124_v42, %s8000_s30 }
 0xc6d   : > { %6972 = vrot.lane.b32.xlu0 %v12124_v42, %s8001_s5  ;;  %6658 = vrot.lane.b32.xlu2 %v12111_v11, %s7997_s27 }
 0xc6e   : > { %6578 = vrot.lane.b32.xlu1 %v12111_v11, %s7996_s26 }
 0xc6f   : > { %v12236_v38 = vpop.permute.xlu2 %6570 }
 0xc75   : > { %6978 = vrot.lane.b32.xlu2 %v12111_v11, %s8001_s5  ;;  %6498 = vrot.lane.b32.xlu0 %v12111_v11, %s7995_s25 }
 0xc76   : > { %6818 = vrot.lane.b32.xlu1 %v12111_v11, %s7999_s29 }
 0xc77   : > { %v12244_v46 = vpop.permute.xlu2 %6970 }
 0xc7d   : > { %7058 = vrot.lane.b32.xlu2 %v12111_v11, %s8000_s30  ;;  %6898 = vrot.lane.b32.xlu0 %v12111_v11, %s8002_s6 }
 0xc7e   : > { %6504 = vrot.lane.b32.xlu1 %v12153_v59, %s7995_s25 }
 0xc7f   : > { %v12252_v58 = vpop.permute.xlu2 %6810 }
 0xc85   : > { %6584 = vrot.lane.b32.xlu2 %v12153_v59, %s7996_s26  ;;  %6664 = vrot.lane.b32.xlu0 %v12153_v59, %s7997_s27 }
 0xc86   : > { %6984 = vrot.lane.b32.xlu1 %v12153_v59, %s8001_s5 }
 0xc87   : > { %v6651_v44 = vpop.permute.xlu0 %6650  ;;  %v12260_v19 = vpop.permute.xlu2 %6496 }
 0xc88   : > { %v6491_v31 = vpop.permute.xlu1 %6490 }
 0xc8d   : > { %6904 = vrot.lane.b32.xlu2 %v12153_v59, %s8002_s6  ;;  %7064 = vrot.lane.b32.xlu0 %v12153_v59, %s8000_s30 }
 0xc8e   : > { %6670 = vrot.lane.b32.xlu1 %v12163_v9, %s7997_s27 }
 0xc8f   : > { %v6891_v61 = vpop.permute.xlu0 %6890  ;;  %v12268_v62 = vpop.permute.xlu2 %6896 }
 0xc90   : > { %v6657_v7 = vpop.permute.xlu1 %6656 }
 0xc95   : > { %6824 = vrot.lane.b32.xlu2 %v12153_v59, %s7999_s29  ;;  %6590 = vrot.lane.b32.xlu0 %v12163_v9, %s7996_s26 }
 0xc96   : > { %6910 = vrot.lane.b32.xlu1 %v12163_v9, %s8002_s6 }
 0xc97   : > { %v7051_v17 = vpop.permute.xlu0 %7050  ;;  %v12276_v35 = vpop.permute.xlu2 %6662 }
 0xc98   : > { %v6977_v21 = vpop.permute.xlu1 %6976 }
 0xc9d   : > { %6510 = vrot.lane.b32.xlu2 %v12163_v9, %s7995_s25  ;;  %6990 = vrot.lane.b32.xlu0 %v12163_v9, %s8001_s5 }
 0xc9e   : > { %7070 = vrot.lane.b32.xlu1 %v12163_v9, %s8000_s30 }
 0xc9f   : > { %v6577_v24 = vpop.permute.xlu0 %6576  ;;  %v12284_v15 = vpop.permute.xlu2 %7062 }
 0xca0   : > { %v7057_v14 = vpop.permute.xlu1 %7056 }
 0xca5   : > { %6830 = vrot.lane.b32.xlu0 %v12163_v9, %s7999_s29  ;;  %6494 = vrot.lane.b32.xlu2 %v12146_v56, %s7995_s25 }
 0xca6   : > { %6574 = vrot.lane.b32.xlu1 %v12146_v56, %s7996_s26 }
 0xca7   : > { %v12292_v36 = vpop.permute.xlu0 %6816  ;;  %v12294_v16 = vpop.permute.xlu2 %6588 }
 0xca8   : > { %v6583_v48 = vpop.permute.xlu1 %6582 }
 0xcad   : > { %6654 = vrot.lane.b32.xlu0 %v12146_v56, %s7997_s27  ;;  %6894 = vrot.lane.b32.xlu2 %v12146_v56, %s8002_s6 }
 0xcae   : > { %6974 = vrot.lane.b32.xlu1 %v12146_v56, %s8001_s5 }
 0xcaf   : > { %v12302_v29 = vpop.permute.xlu0 %6502  ;;  %v12304_v5 = vpop.permute.xlu2 %6988 }
 0xcb0   : > { %v6903_v12 = vpop.permute.xlu1 %6902 }
 0xcb5   : > { %6580 = vrot.lane.b32.xlu0 %v12191_v50, %s7996_s26  ;;  %6660 = vrot.lane.b32.xlu2 %v12191_v50, %s7997_s27 }
 0xcb6   : > { %6500 = vrot.lane.b32.xlu1 %v12191_v50, %s7995_s25 }
 0xcb7   : > { %v12312_v55 = vpop.permute.xlu0 %6982  ;;  %v12314_v34 = vpop.permute.xlu2 %6828 }
 0xcb8   : > { %v6823_v6 = vpop.permute.xlu1 %6822 }
 0xcbd   : > { %6980 = vrot.lane.b32.xlu0 %v12191_v50, %s8001_s5  ;;  %6820 = vrot.lane.b32.xlu2 %v12191_v50, %s7999_s29 }
 0xcbe   : > { %6900 = vrot.lane.b32.xlu1 %v12191_v50, %s8002_s6 }
 0xcbf   : > { %v12322_v52 = vpop.permute.xlu0 %6668  ;;  %v12324_v49 = vpop.permute.xlu2 %6492 }
 0xcc0   : > { %v6509_v8 = vpop.permute.xlu1 %6508  ;;  %v12328_v13 = vsel %vm13267_vm12, %v6491_v31, %v12324_v49  ;;  %vm13273_vm12 = vmmov %vm13269_vm3 }
 0xcc5   : > { %6506 = vrot.lane.b32.xlu0 %v12202_v28, %s7995_s25  ;;  %6586 = vrot.lane.b32.xlu2 %v12202_v28, %s7996_s26 }
 0xcc6   : > { %6666 = vrot.lane.b32.xlu1 %v12202_v28, %s7997_s27 }
 0xcc7   : > { %v12336_v45 = vpop.permute.xlu0 %6908  ;;  %v12338_v33 = vpop.permute.xlu2 %6658 }
 0xcc8   : > { %v12340_v41 = vpop.permute.xlu1 %6652  ;;  %v12344_v25 = vsel %vm581_vm2, %v6657_v7, %v12338_v33 }
 0xcc9   : > { %v12348_v22 = vsel %vm581_vm2, %v6651_v44, %v12340_v41 }
 0xccd   : > { %6906 = vrot.lane.b32.xlu0 %v12202_v28, %s8002_s6  ;;  %6986 = vrot.lane.b32.xlu2 %v12202_v28, %s8001_s5 }
 0xcce   : > { %6814 = vrot.lane.b32.xlu1 %v12146_v56, %s7999_s29 }
 0xccf   : > { %v12356_v40 = vpop.permute.xlu0 %7068  ;;  %v12358_v37 = vpop.permute.xlu2 %6978 }
 0xcd0   : > { %v12360_v51 = vpop.permute.xlu1 %6892  ;;  %v12364_v43 = vsel %vm905_vm6, %v6977_v21, %v12358_v37 }
 0xcd1   : > { %v12368_v60 = vsel %vm824_vm8, %v6891_v61, %v12360_v51 }
 0xcd5   : > { %6826 = vrot.lane.b32.xlu0 %v12202_v28, %s7999_s29  ;;  %6748 = vrot.lane.b32.xlu2 %v12150_v1, %s7998_s28 }
 0xcd6   : > { %6592 = vrot.lane.b32.xlu1 %v12179_v54, %s7996_s26 }
 0xcd7   : > { %v12376_v10 = vpop.permute.xlu0 %6572  ;;  %v12378_v18 = vpop.permute.xlu2 %7058 }
 0xcd8   : > { %13268 = vst [vmem:[#allocation36_spill] sm:$0xff] %v12378_v18  ;;  %v12380_v4 = vpop.permute.xlu1 %7052  ;;  %v12385_v53 = vsel %vm13269_vm3, %v12236_v38, %v12376_v10  ;;  %v12389_v39 = vsel %vm13270_vm9, %v7057_v14, %v12378_v18  ;;  %vm13274_vm3 = vcmask 1039360   ;;  %vm13275_vm9 = vcmask 883712  }
 0xcd9   : > { %v12393_v0 = vsel %vm13271_vm5, %v7051_v17, %v12380_v4  ;;  %vm13276_vm5 = vmmov %vm13275_vm9 }
 0xcdd   : > { %6672 = vrot.lane.b32.xlu0 %v12179_v54, %s7997_s27  ;;  %6512 = vrot.lane.b32.xlu2 %v12179_v54, %s7995_s25 }
 0xcde   : > { %6992 = vrot.lane.b32.xlu1 %v12179_v54, %s8001_s5 }
 0xcdf   : > { %v12401_v32 = vpop.permute.xlu0 %6972  ;;  %v12403_v38 = vpop.permute.xlu2 %6584 }
 0xce0   : > { %v12408_v44 = vsel %vm905_vm6, %v12244_v46, %v12401_v32  ;;  %v12410_v31 = vpop.permute.xlu1 %6578  ;;  %v6598_v61 = vsel %vm13272_vm4, %v6583_v48, %v12403_v38  ;;  %vm13277_vm4 = vmmov %vm13274_vm3 }
 0xce1   : > { %v6596_v7 = vsel %vm13273_vm12, %v6577_v24, %v12410_v31  ;;  %vm13278_vm12 = vmmov %vm13274_vm3 }
 0xce5   : > { %6812 = vrot.lane.b32.xlu0 %v12124_v42, %s7999_s29  ;;  %6912 = vrot.lane.b32.xlu2 %v12179_v54, %s8002_s6 }
 0xce6   : > { %6746 = vrot.lane.b32.xlu1 %v12202_v28, %s7998_s28 }
 0xce7   : > { %v12422_v17 = vpop.permute.xlu0 %6498  ;;  %v12424_v46 = vpop.permute.xlu2 %6904 }
 0xce8   : > { %v12426_v21 = vpop.permute.xlu1 %6818  ;;  %v12431_v14 = vsel %vm13274_vm3, %v12260_v19, %v12422_v17  ;;  %v12435_v24 = vsel %vm824_vm8, %v6903_v12, %v12424_v46  ;;  %vm13279_vm3 = vcmask 736256  }
 0xce9   : > { %v12440_v48 = vsel %vm13275_vm9, %v12292_v36, %v12426_v21  ;;  %vm13280_vm9 = vmmov %vm13277_vm4 }
 0xced   : > { %6750 = vrot.lane.b32.xlu0 %v12163_v9, %s7998_s28  ;;  %6742 = vrot.lane.b32.xlu2 %v12106_v3, %s7998_s28 }
 0xcee   : > { %6740 = vrot.lane.b32.xlu1 %v12191_v50, %s7998_s28 }
 0xcef   : > { %v12448_v19 = vpop.permute.xlu0 %6898  ;;  %v12450_v47 = vpop.permute.xlu2 %6824 }
 0xcf0   : > { %v12452_v12 = vpop.permute.xlu1 %6504  ;;  %v12457_v36 = vsel %vm824_vm8, %v12268_v62, %v12448_v19  ;;  %v12461_v9 = vsel %vm13276_vm5, %v6823_v6, %v12450_v47  ;;  %vm13281_vm5 = vcmask 1031168  }
 0xcf1   : > { %v6518_v57 = vsel %vm13277_vm4, %v12302_v29, %v12452_v12  ;;  %vm13282_vm4 = vmmov %vm13279_vm3 }
 0xcf5   : > { %6744 = vrot.lane.b32.xlu0 %v12153_v59, %s7998_s28  ;;  %6736 = vrot.lane.b32.xlu2 %v12121_v23, %s7998_s28 }
 0xcf6   : > { %6832 = vrot.lane.b32.xlu1 %v12179_v54, %s7999_s29 }
 0xcf7   : > { %v12472_v26 = vpop.permute.xlu0 %6664  ;;  %v12474_v62 = vpop.permute.xlu2 %6510 }
 0xcf8   : > { %v12476_v18 = vpop.permute.xlu1 %6984  ;;  %v6678_v6 = vsel %vm581_vm2, %v12276_v35, %v12472_v26  ;;  %v6520_v29 = vsel %vm13278_vm12, %v6509_v8, %v12474_v62  ;;  %vm13283_vm12 = vcmask 883712  }
 0xcf9   : > { %v6998_v59 = vsel %vm905_vm6, %v12312_v55, %v12476_v18 }
 0xcfd   : > { %6738 = vrot.lane.b32.xlu0 %v12111_v11, %s7998_s28  ;;  %6730 = vrot.lane.b32.xlu2 %v12108_v63, %s7998_s28 }
 0xcfe   : > { %6752 = vrot.lane.b32.xlu1 %v12179_v54, %s7998_s28 }
 0xcff   : > { %v12492_v20 = vpop.permute.xlu0 %7064  ;;  %v6495_v30 = vpop.permute.xlu2 %6494 }
 0xd00   : > { %v12494_v35 = vpop.permute.xlu1 %6670  ;;  %v7078_v8 = vsel %vm13279_vm3, %v12284_v15, %v12492_v20  ;;  %v12501_v55 = vsel %vm13280_vm9, %v12324_v49, %v6495_v30  ;;  %6536 = vst.msk [vmem:[#allocation3 + $0x70] sm:$0xff] %vm360_vm1, %v6495_v30  ;;  %vm13284_vm3 = vmmov %vm13281_vm5 }
 0xd01   : > { %v6680_v11 = vsel %vm581_vm2, %v12322_v52, %v12494_v35  ;;  %vm13285_vm9 = vmmov %vm13283_vm12 }
 0xd02   : > { %7264 = vmatpush.msrb.mxu0 %v6680_v11 }
 0xd04   : > { %7265 = vmatpush.msrb.mxu0 %v6678_v6 }
 0xd05   : > { %6732 = vrot.lane.b32.xlu0 %v12124_v42, %s7998_s28  ;;  %7072 = vrot.lane.b32.xlu2 %v12179_v54, %s8000_s30 }
 0xd06   : > { %6734 = vrot.lane.b32.xlu1 %v12146_v56, %s7998_s28  ;;  %7266 = vmatpush.msrb.mxu0 %v12344_v25 }
 0xd07   : > { %v12514_v15 = vpop.permute.xlu0 %6590  ;;  %v6895_v30 = vpop.permute.xlu2 %6894 }
 0xd08   : > { %v12516_v49 = vpop.permute.xlu1 %6910  ;;  %v6600_v52 = vsel %vm13281_vm5, %v12294_v16, %v12514_v15  ;;  %v12523_v42 = vsel %vm824_vm8, %v12360_v51, %v6895_v30  ;;  %6936 = vst.msk [vmem:[#allocation3 + $0x250] sm:$0xff] %vm360_vm1, %v6895_v30  ;;  %7267 = vmatpush.msrb.mxu0 %v12348_v22  ;;  %vm13286_vm5 = vmmov %vm13284_vm3  ;;  %v12685_v30 = vld [vmem:[%s12948_s1 + $0x208] sm:$0xff] }
 0xd09   : > { %v6920_v54 = vsel %vm824_vm8, %v12336_v45, %v12516_v49 }
 0xd0a   : > { %7268 = vmatpush.msrb.mxu0 %v6600_v52 }
 0xd0c   : > { %7269 = vmatpush.msrb.mxu0 %v6598_v61 }
 0xd0d   : > { %7066 = vrot.lane.b32.xlu0 %v12202_v28, %s8000_s30  ;;  %7054 = vrot.lane.b32.xlu2 %v12146_v56, %s8000_s30  ;;  %v7897_v28 = vld [vmem:[%s12949_s2 + $0xb0] sm:$0xff] }
 0xd0e   : > { %7060 = vrot.lane.b32.xlu1 %v12191_v50, %s8000_s30  ;;  %7270 = vmatpush.msrb.mxu0 %v6596_v7  ;;  %v7895_v50 = vld [vmem:[%s12949_s2 + $0xa0] sm:$0xff] }
 0xd0f   : > { %v12536_v16 = vpop.permute.xlu0 %6990  ;;  %v6661_v25 = vpop.permute.xlu2 %6660 }
 0xd10   : > { %v12538_v22 = vpop.permute.xlu1 %7070  ;;  %v7000_v45 = vsel %vm905_vm6, %v12304_v5, %v12536_v16  ;;  %v12545_v51 = vsel %vm581_vm2, %v12338_v33, %v6661_v25  ;;  %6699 = vst.msk [vmem:[#allocation3 + $0x148] sm:$0xff] %vm360_vm1, %v6661_v25  ;;  %7271 = vmatpush.msrb.mxu0 %v12385_v53  ;;  %v7896_v5 = vld [vmem:[%s12949_s2 + $0xa8] sm:$0xff] }
 0xd11   : > { %v7080_v56 = vsel %vm13282_vm4, %v12356_v40, %v12538_v22  ;;  %7293 = vmatpush.msra.mxu1 %v7000_v45  ;;  %vm13287_vm4 = vmmov %vm13284_vm3  ;;  %v12703_v45 = vld [vmem:[%s12948_s1 + $0x220] sm:$0xff] }
 0xd12   : > { %7272 = vmatpush.msrb.mxu0 %v6520_v29  ;;  %7334 = vmatpush.msrb.mxu3 %v7080_v56 }
 0xd13   : > { %7294 = vmatpush.msra.mxu1 %v6998_v59  ;;  %v12671_v59 = vld [vmem:[%s12948_s1 + $0x1f0] sm:$0xff] }
 0xd14   : > { %7273 = vmatpush.msrb.mxu0 %v6518_v57  ;;  %7335 = vmatpush.msrb.mxu3 %v7078_v8 }
 0xd15   : > { %7234 = vperm.xlu0 %7960, %v7895_v50   ;;  %7244 = vperm.xlu2 %7962, %v7897_v28  }
 0xd16   : > { %7239 = vperm.xlu1 %7961, %v7896_v5   ;;  %7274 = vmatpush.msrb.mxu0 %v12431_v14  ;;  %v12718_v5 = vld [vmem:[%s12948_s1 + $0x238] sm:$0xff] }
 0xd17   : > { %v12562_v33 = vpop.permute.xlu0 %6830  ;;  %v6821_v40 = vpop.permute.xlu2 %6820  ;;  %7295 = vmatpush.msra.mxu1 %v12364_v43  ;;  %7336 = vmatpush.msrb.mxu3 %v12389_v39 }
 0xd18   : > { %v6840_v53 = vsel %vm13283_vm12, %v12314_v34, %v12562_v33  ;;  %v6575_v61 = vpop.permute.xlu1 %6574  ;;  %6859 = vst.msk [vmem:[#allocation3 + $0x208] sm:$0xff] %vm360_vm1, %v6821_v40  ;;  %7275 = vmatpush.msrb.mxu0 %v12328_v13  ;;  %v12577_v7 = vsel %vm13285_vm9, %v12426_v21, %v6821_v40  ;;  %v7898_v34 = vld [vmem:[%s12949_s2 + $0xb8] sm:$0xff]  ;;  %v12592_v13 = vld [vmem:[%s12948_s1 + $0x1e0] sm:$0xff]  ;;  %vm13288_vm12 = vcmask 1039360  }
 0xd19   : > { %v12573_v57 = vsel %vm13284_vm3, %v12376_v10, %v6575_v61  ;;  %7296 = vmatpush.msra.mxu1 %v12408_v44  ;;  %7337 = vmatpush.msrb.mxu3 %v12393_v0  ;;  %6616 = vst.msk [vmem:[#allocation3 + $0xd0] sm:$0xff] %vm360_vm1, %v6575_v61  ;;  %vm13289_vm3 = vmmov %vm13288_vm12 }
 0xd1a   : > { %7276 = vmatpush.msrb.mxu0 %v12150_v1  ;;  %vm13290_vm9 = vmmov %vm13289_vm3 }
 0xd1b   : > { %7297 = vmatpush.msra.mxu1 %v6920_v54 }
 0xd1c   : > { %7277 = vmatpush.msrb.mxu0 %v12106_v3 }
 0xd1d   : > { %7249 = vperm.xlu0 %7960, %v7898_v34   ;;  %7298 = vmatpush.msra.mxu1 %v12435_v24 }
 0xd1e   : > { %7278 = vmatpush.msrb.mxu0 %v12121_v23 }
 0xd1f   : > { %v6655_v43 = vpop.permute.xlu0 %6654  ;;  %v6587_v10 = vpop.permute.xlu2 %6586  ;;  %7299 = vmatpush.msra.mxu1 %v12457_v36 }
 0xd20   : > { %v12597_v1 = vsel %vm581_vm2, %v12340_v41, %v6655_v43  ;;  %6696 = vst.msk [vmem:[#allocation3 + $0x130] sm:$0xff] %vm360_vm1, %v6655_v43  ;;  %v6975_v3 = vpop.permute.xlu1 %6974  ;;  %7279 = vmatpush.msrb.mxu0 %v12108_v63  ;;  %v12607_v39 = vsel %vm13286_vm5, %v12403_v38, %v6587_v10  ;;  %v12617_v63 = vld [vmem:[%s12948_s1 + $0x1f8] sm:$0xff]  ;;  %vm13291_vm5 = vcmask 261120  }
 0xd21   : > { %v12603_v23 = vsel %vm905_vm6, %v12401_v32, %v6975_v3  ;;  %7300 = vmatpush.msra.mxu1 %v12368_v60  ;;  %7280 = vmatmul.f32.vlgmr.msrb.gmra.mxu0 %v12592_v13  ;;  %7016 = vst.msk [vmem:[#allocation3 + $0x2b0] sm:$0xff] %vm360_vm1, %v6975_v3 }
 0xd22   : > { %6622 = vst.msk [vmem:[#allocation3 + $0x100] sm:$0xff] %vm360_vm1, %v6587_v10  ;;  %7899 = vmatmul.msk.f32.vlgmr.msrb.gmra.mxu3 %vm13291_vm5, %v12671_v59 }
 0xd23   : > { %7301 = vmatpush.msra.mxu1 %v6840_v53 }
 0xd25   : > { %7302 = vmatpush.msra.mxu1 %v12461_v9 }
 0xd27   : > { %v6581_v41 = vpop.permute.xlu0 %6580  ;;  %v6987_v0 = vpop.permute.xlu2 %6986  ;;  %7303 = vmatpush.msra.mxu1 %v12440_v48  ;;  %v12653_v48 = vld [vmem:[%s12948_s1 + $0x228] sm:$0xff] }
 0xd28   : > { %v12622_v60 = vsel %vm13287_vm4, %v12410_v31, %v6581_v41  ;;  %6619 = vst.msk [vmem:[#allocation3 + $0xe8] sm:$0xff] %vm360_vm1, %v6581_v41  ;;  %v6501_v32 = vpop.permute.xlu1 %6500  ;;  %v6999_v44 = vsel %vm905_vm6, %v12476_v18, %v6987_v0  ;;  %v12637_v31 = vld [vmem:[%s12948_s1 + $0x210] sm:$0xff]  ;;  %vm13292_vm4 = vmmov %vm13291_vm5  ;;  %vm13299_vm5 = vcmask 736256  }
 0xd29   : > { %v12627_v38 = vsel %vm13288_vm12, %v12422_v17, %v6501_v32  ;;  %7283 = vmatmul.f32.gmra.mxu0 %v12617_v63  ;;  %6539 = vst.msk [vmem:[#allocation3 + $0x88] sm:$0xff] %vm360_vm1, %v6501_v32  ;;  %vm13293_vm12 = vcmask 883712  }
 0xd2a   : > { %7022 = vst.msk [vmem:[#allocation3 + $0x2e0] sm:$0xff] %vm360_vm1, %v6987_v0  ;;  %7900 = vmatmul.msk.f32.gmra.mxu3 %vm13292_vm4, %v12685_v30  ;;  %v7151_v0 = vld [vmem:[#allocation3 + $0x100] sm:$0xff] }
 0xd2f   : > { %v6981_v21 = vpop.permute.xlu0 %6980  ;;  %v12639_v14 = vpop.permute.xlu2 %6748 }
 0xd30   : > { %v6997_v17 = vsel %vm905_vm6, %v12358_v37, %v6981_v21  ;;  %7019 = vst.msk [vmem:[#allocation3 + $0x2c8] sm:$0xff] %vm360_vm1, %v6981_v21  ;;  %v6901_v18 = vpop.permute.xlu1 %6900 }
 0xd31   : > { %v12646_v24 = vsel %vm824_vm8, %v12448_v19, %v6901_v18  ;;  %7286 = vmatmul.f32.gmra.mxu0 %v12637_v31  ;;  %6939 = vst.msk [vmem:[#allocation3 + $0x268] sm:$0xff] %vm360_vm1, %v6901_v18 }
 0xd37   : > { %v6507_v36 = vpop.permute.xlu0 %6506  ;;  %v6513_v9 = vpop.permute.xlu2 %6512 }
 0xd38   : > { %v12657_v37 = vsel %vm13289_vm3, %v12452_v12, %v6507_v36  ;;  %6542 = vst.msk [vmem:[#allocation3 + $0xa0] sm:$0xff] %vm360_vm1, %v6507_v36  ;;  %v6667_v6 = vpop.permute.xlu1 %6666  ;;  %v12664_v29 = vsel %vm13290_vm9, %v12474_v62, %v6513_v9  ;;  %vm13295_vm3 = vmmov %vm13292_vm4  ;;  %v7130_v36 = vld [vmem:[#allocation3 + $0x58] sm:$0xff] }
 0xd39   : > { %v6679_v19 = vsel %vm581_vm2, %v12472_v26, %v6667_v6  ;;  %7289 = vmatmul.f32.gmra.mxu0 %v12653_v48  ;;  %6702 = vst.msk [vmem:[#allocation3 + $0x160] sm:$0xff] %vm360_vm1, %v6667_v6  ;;  %7901 = vmatmul.msk.f32.gmra.mxu3 %vm13295_vm3, %v12703_v45  ;;  %vm13296_vm9 = vmmov %vm13295_vm3 }
 0xd3a   : > { %6545 = vst.msk [vmem:[#allocation3 + $0xb8] sm:$0xff] %vm360_vm1, %v6513_v9 }
 0xd3f   : > { %v6907_v12 = vpop.permute.xlu0 %6906  ;;  %v6913_v26 = vpop.permute.xlu2 %6912  ;;  %v7139_v18 = vld [vmem:[#allocation3 + $0xa0] sm:$0xff] }
 0xd40   : > { %v6919_v62 = vsel %vm824_vm8, %v12424_v46, %v6907_v12  ;;  %6942 = vst.msk [vmem:[#allocation3 + $0x280] sm:$0xff] %vm360_vm1, %v6907_v12  ;;  %v6815_v8 = vpop.permute.xlu1 %6814  ;;  %v6921_v11 = vsel %vm824_vm8, %v12516_v49, %v6913_v26  ;;  %vm13294_vm8 = vcmask 1031168   ;;  %v7163_v43 = vld [vmem:[#allocation3 + $0x160] sm:$0xff] }
 0xd41   : > { %6856 = vst.msk [vmem:[#allocation3 + $0x1f0] sm:$0xff] %vm360_vm1, %v6815_v8  ;;  %7902 = vmatmul.msk.f32.gmra.mxu3 %vm13296_vm9, %v12718_v5  ;;  %v7211_v12 = vld [vmem:[#allocation3 + $0x2e0] sm:$0xff] }
 0xd42   : > { %6945 = vst.msk [vmem:[#allocation3 + $0x298] sm:$0xff] %vm360_vm1, %v6913_v26  ;;  %v7121_v26 = vld [vmem:[#allocation3 + $0x10] sm:$0xff] }
 0xd47   : > { %v6827_v52 = vpop.permute.xlu0 %6826  ;;  %v12690_v46 = vpop.permute.xlu2 %6742 }
 0xd48   : > { %v12694_v54 = vsel %vm13293_vm12, %v12450_v47, %v6827_v52  ;;  %6862 = vst.msk [vmem:[#allocation3 + $0x220] sm:$0xff] %vm360_vm1, %v6827_v52  ;;  %v6593_v49 = vpop.permute.xlu1 %6592 }
 0xd49   : > { %v6601_v25 = vsel %vm13294_vm8, %v12514_v15, %v6593_v49  ;;  %6625 = vst.msk [vmem:[#allocation3 + $0x118] sm:$0xff] %vm360_vm1, %v6593_v49  ;;  %vm13306_vm8 = vmmov %vm13299_vm5 }
 0xd4f   : > { %v6673_v56 = vpop.permute.xlu0 %6672  ;;  %v12707_v50 = vpop.permute.xlu2 %6736 }
 0xd50   : > { %v6681_v47 = vsel %vm581_vm2, %v12494_v35, %v6673_v56  ;;  %6705 = vst.msk [vmem:[#allocation3 + $0x178] sm:$0xff] %vm360_vm1, %v6673_v56  ;;  %v6993_v28 = vpop.permute.xlu1 %6992  ;;  %vm13297_vm2 = vmmov %vm13293_vm12  ;;  %v7154_v3 = vld [vmem:[#allocation3 + $0x118] sm:$0xff] }
 0xd51   : > { %v7001_v15 = vsel %vm905_vm6, %v12536_v16, %v6993_v28  ;;  %7351 = vmatpush.msra.mxu2 %v6681_v47  ;;  %7025 = vst.msk [vmem:[#allocation3 + $0x2f8] sm:$0xff] %vm360_vm1, %v6993_v28  ;;  %vm13298_vm6 = vmmov %vm13297_vm2  ;;  %v7193_v28 = vld [vmem:[#allocation3 + $0x250] sm:$0xff] }
 0xd52   : > { %7380 = vmatpush.msra.mxu0 %v7001_v15  ;;  %vm13300_vm4 = vmmov %vm13297_vm2 }
 0xd53   : > { %7352 = vmatpush.msra.mxu2 %v6679_v19  ;;  %vm13301_vm12 = vmmov %vm13299_vm5  ;;  %v7127_v19 = vld [vmem:[#allocation3 + $0x40] sm:$0xff] }
 0xd54   : > { %7381 = vmatpush.msra.mxu0 %v6999_v44  ;;  %v7142_v44 = vld [vmem:[#allocation3 + $0xb8] sm:$0xff] }
 0xd55   : > { %7353 = vmatpush.msra.mxu2 %v12545_v51  ;;  %v7160_v51 = vld [vmem:[#allocation3 + $0x148] sm:$0xff] }
 0xd56   : > { %7382 = vmatpush.msra.mxu0 %v6997_v17 }
 0xd57   : > { %v6813_v35 = vpop.permute.xlu0 %6812  ;;  %v12723_v40 = vpop.permute.xlu2 %6730  ;;  %v7166_v16 = vld [vmem:[#allocation3 + $0x178] sm:$0xff]  ;;  %7354 = vmatpush.msra.mxu2 %v12597_v1 }
 0xd58   : > { %v6834_v53 = vsel %vm13297_vm2, %v12252_v58, %v6813_v35  ;;  %v12729_v61 = vsel %vm13298_vm6, %v6813_v35, %v6815_v8  ;;  %v6747_v34 = vpop.permute.xlu1 %6746  ;;  %7438 = vmatpush.msra.mxu3 %v7166_v16  ;;  %7383 = vmatpush.msra.mxu0 %v12603_v23  ;;  %v7157_v58 = vld [vmem:[#allocation3 + $0x130] sm:$0xff]  ;;  %v13305_v16 = vld [vmem:[#allocation36_spill] sm:$0xff] }
 0xd59   : > { %7304 = vmatpush.msra.mxu1 %v6834_v53  ;;  %7355 = vmatpush.msra.mxu2 %v6601_v25  ;;  %6782 = vst.msk [vmem:[#allocation3 + $0x1c0] sm:$0xff] %vm360_vm1, %v6747_v34  ;;  %v7202_v25 = vld [vmem:[#allocation3 + $0x298] sm:$0xff] }
 0xd5a   : > { %7439 = vmatpush.msra.mxu3 %v7163_v43  ;;  %7384 = vmatpush.msra.mxu0 %v6921_v11  ;;  %v7205_v11 = vld [vmem:[#allocation3 + $0x2b0] sm:$0xff] }
 0xd5b   : > { %7356 = vmatpush.msra.mxu2 %v12607_v39  ;;  %v7181_v43 = vld [vmem:[#allocation3 + $0x1f0] sm:$0xff] }
 0xd5c   : > { %7440 = vmatpush.msra.mxu3 %v7160_v51  ;;  %7385 = vmatpush.msra.mxu0 %v6919_v62  ;;  %v7208_v62 = vld [vmem:[#allocation3 + $0x2c8] sm:$0xff]  ;;  %v7890_v51 = vld [vmem:[%s12948_s1 + $0x218] sm:$0xff] }
 0xd5d   : > { %7357 = vmatpush.msra.mxu2 %v12622_v60  ;;  %v7145_v60 = vld [vmem:[#allocation3 + $0xd0] sm:$0xff] }
 0xd5e   : > { %7441 = vmatpush.msra.mxu3 %v7157_v58  ;;  %7386 = vmatpush.msra.mxu0 %v12646_v24  ;;  %v7133_v24 = vld [vmem:[#allocation3 + $0x70] sm:$0xff] }
 0xd5f   : > { %v6751_v10 = vpop.permute.xlu0 %6750  ;;  %v7073_v1 = vpop.permute.xlu2 %7072  ;;  %7358 = vmatpush.msra.mxu2 %v12573_v57  ;;  %v7148_v57 = vld [vmem:[#allocation3 + $0xe8] sm:$0xff] }
 0xd60   : > { %v6760_v23 = vsel %vm662_vm10, %v12639_v14, %v6751_v10  ;;  %v6741_v41 = vpop.permute.xlu1 %6740  ;;  %v12741_v39 = vsel %vm13299_vm5, %v12538_v22, %v7073_v1  ;;  %7105 = vst.msk [vmem:[#allocation3 + $0x358] sm:$0xff] %vm360_vm1, %v7073_v1  ;;  %7442 = vmatpush.msra.mxu3 %v7154_v3  ;;  %7387 = vmatpush.msra.mxu0 %v12523_v42  ;;  %v7175_v1 = vld [vmem:[#allocation3 + $0x1c0] sm:$0xff] }
 0xd61   : > { %7305 = vmatpush.msra.mxu1 %v6760_v23  ;;  %7359 = vmatpush.msra.mxu2 %v12664_v29  ;;  %6779 = vst.msk [vmem:[#allocation3 + $0x1a8] sm:$0xff] %vm360_vm1, %v6741_v41  ;;  %v7214_v29 = vld [vmem:[#allocation3 + $0x2f8] sm:$0xff] }
 0xd62   : > { %7443 = vmatpush.msra.mxu3 %v7151_v0 }
 0xd63   : > { %7360 = vmatpush.msra.mxu2 %v12657_v37 }
 0xd64   : > { %7444 = vmatpush.msra.mxu3 %v7148_v57 }
 0xd65   : > { %7361 = vmatpush.msra.mxu2 %v12627_v38 }
 0xd66   : > { %7445 = vmatpush.msra.mxu3 %v7145_v60 }
 0xd67   : > { %v6745_v22 = vpop.permute.xlu0 %6744  ;;  %v7055_v32 = vpop.permute.xlu2 %7054  ;;  %7362 = vmatpush.msra.mxu2 %v12501_v55  ;;  %v7136_v55 = vld [vmem:[#allocation3 + $0x88] sm:$0xff]  ;;  %v7226_v56 = vld [vmem:[#allocation3 + $0x358] sm:$0xff] }
 0xd68   : > { %v6758_v42 = vsel %vm662_vm10, %v12690_v46, %v6745_v22  ;;  %v6759_v21 = vsel %vm662_vm10, %v6745_v22, %v6747_v34  ;;  %v6833_v14 = vpop.permute.xlu1 %6832  ;;  %7096 = vst.msk [vmem:[#allocation3 + $0x310] sm:$0xff] %vm360_vm1, %v7055_v32  ;;  %7446 = vmatpush.msra.mxu3 %v7142_v44  ;;  %v12759_v38 = vsel %vm13301_vm12, %v12380_v4, %v7055_v32  ;;  %v13303_v4 = vld [vmem:[#allocation27_spill] sm:$0xff] }
 0xd69   : > { %v6841_v17 = vsel %vm13300_vm4, %v12562_v33, %v6833_v14  ;;  %7306 = vmatpush.msra.mxu1 %v6758_v42  ;;  %7363 = vmatpush.msra.mxu2 %v12176_v2  ;;  %6865 = vst.msk [vmem:[#allocation3 + $0x238] sm:$0xff] %vm360_vm1, %v6833_v14  ;;  %v13302_v33 = vld [vmem:[#allocation32_spill] sm:$0xff]  ;;  %v12821_v14 = vstv %s7911_s24 }
 0xd6a   : > { %7447 = vmatpush.msra.mxu3 %v7139_v18  ;;  %7388 = vmatpush.msra.mxu0 %v6841_v17 }
 0xd6b   : > { %7364 = vmatpush.msra.mxu2 %v12172_v27 }
 0xd6c   : > { %7448 = vmatpush.msra.mxu3 %v7136_v55  ;;  %7389 = vmatpush.msra.mxu0 %v12694_v54  ;;  %v7884_v54 = vld [vmem:[%s12948_s1 + $0x1e8] sm:$0xff] }
 0xd6d   : > { %7365 = vmatpush.msra.mxu2 %v13302_v33 }
 0xd6e   : > { %7449 = vmatpush.msra.mxu3 %v7133_v24  ;;  %7390 = vmatpush.msra.mxu0 %v12577_v7  ;;  %v7124_v7 = vld [vmem:[#allocation3 + $0x28] sm:$0xff] }
 0xd6f   : > { %v6739_v2 = vpop.permute.xlu0 %6738  ;;  %7366 = vmatpush.msra.mxu2 %v13303_v4  ;;  %v7217_v3 = vld [vmem:[#allocation3 + $0x310] sm:$0xff] }
 0xd70   : > { %v6756_v9 = vsel %vm662_vm10, %v12707_v50, %v6739_v2  ;;  %v6757_v27 = vsel %vm662_vm10, %v6739_v2, %v6741_v41  ;;  %v6753_v37 = vpop.permute.xlu1 %6752  ;;  %7450 = vmatpush.msra.mxu3 %v7130_v36  ;;  %7391 = vmatpush.msra.mxu0 %v12729_v61  ;;  %v7196_v50 = vld [vmem:[#allocation3 + $0x268] sm:$0xff]  ;;  %v7190_v61 = vld [vmem:[#allocation3 + $0x238] sm:$0xff]  ;;  %v7893_v41 = vld [vmem:[%s12948_s1 + $0x230] sm:$0xff] }
 0xd71   : > { %v6761_v6 = vsel %vm662_vm10, %v6751_v10, %v6753_v37  ;;  %7367 = vmatmul.f32.vlgmr.msra.gmra.mxu2 %v12592_v13  ;;  %7307 = vmatpush.msra.mxu1 %v6756_v9  ;;  %6785 = vst.msk [vmem:[#allocation3 + $0x1d8] sm:$0xff] %vm360_vm1, %v6753_v37 }
 0xd72   : > { %7451 = vmatpush.msra.mxu3 %v7127_v19  ;;  %7467 = vmatpush.msrb.mxu2 %v7214_v29 }
 0xd73   : > { %7392 = vmatpush.msra.mxu0 %v6761_v6 }
 0xd74   : > { %7452 = vmatpush.msra.mxu3 %v7124_v7  ;;  %7468 = vmatpush.msrb.mxu2 %v7211_v12  ;;  %v12831_v12 = vpop.permute.xlu2 %7244 }
 0xd75   : > { %7393 = vmatpush.msra.mxu0 %v6759_v21 }
 0xd76   : > { %7453 = vmatpush.msra.mxu3 %v7121_v26  ;;  %7469 = vmatpush.msrb.mxu2 %v7208_v62 }
 0xd77   : > { %v6733_v8 = vpop.permute.xlu0 %6732  ;;  %7454 = vmatmul.f32.vlgmr.msra.gmra.mxu3 %v12592_v13  ;;  %7394 = vmatpush.msra.mxu0 %v6757_v27  ;;  %v7199_v13 = vld [vmem:[#allocation3 + $0x280] sm:$0xff]  ;;  %v13316_v27 = vld [vmem:[#allocation10_spill] sm:$0xff] }
 0xd78   : > { %v6754_v52 = vsel %vm662_vm10, %v12723_v40, %v6733_v8  ;;  %v6735_v46 = vpop.permute.xlu1 %6734  ;;  %7470 = vmatpush.msrb.mxu2 %v7205_v11  ;;  %v7887_v40 = vld [vmem:[%s12948_s1 + $0x200] sm:$0xff]  ;;  %v7178_v58 = vld [vmem:[#allocation3 + $0x1d8] sm:$0xff] }
 0xd79   : > { %v6755_v49 = vsel %vm662_vm10, %v6733_v8, %v6735_v46  ;;  %7370 = vmatmul.f32.gmra.mxu2 %v12617_v63  ;;  %7308 = vmatpush.msra.mxu1 %v6754_v52  ;;  %6776 = vst.msk [vmem:[#allocation3 + $0x190] sm:$0xff] %vm360_vm1, %v6735_v46  ;;  %vm13304_vm10 = vmmov %vm13299_vm5 }
 0xd7a   : > { %7471 = vmatpush.msrb.mxu2 %v7202_v25  ;;  %7395 = vmatpush.msra.mxu0 %v6755_v49 }
 0xd7b   : > { %7309 = vmatmul.f32.vlgmr.msra.gmra.mxu1 %v7884_v54  ;;  %7396 = vmatmul.f32.vlgmr.msra.gmra.mxu0 %v7884_v54 }
 0xd7c   : > { %7421 = vmatpush.msrb.mxu1 %v12741_v39  ;;  %7472 = vmatpush.msrb.mxu2 %v7199_v13 }
 0xd7d   : > { %7508 = vmatpush.msrb.mxu0 %v7226_v56 }
 0xd7e   : > { %7473 = vmatpush.msrb.mxu2 %v7196_v50 }
 0xd7f   : > { %v7067_v47 = vpop.permute.xlu0 %7066  ;;  %7457 = vmatmul.f32.gmra.mxu3 %v12617_v63  ;;  %v7184_v63 = vld [vmem:[#allocation3 + $0x208] sm:$0xff] }
 0xd80   : > { %v7079_v15 = vsel %vm13304_vm10, %v12492_v20, %v7067_v47  ;;  %7102 = vst.msk [vmem:[#allocation3 + $0x340] sm:$0xff] %vm360_vm1, %v7067_v47  ;;  %v7061_v35 = vpop.permute.xlu1 %7060  ;;  %7474 = vmatpush.msrb.mxu2 %v7193_v28  ;;  %v7187_v20 = vld [vmem:[#allocation3 + $0x220] sm:$0xff]  ;;  %v7169_v23 = vld [vmem:[#allocation3 + $0x190] sm:$0xff] }
 0xd81   : > { %v7077_v53 = vsel %vm13306_vm8, %v13305_v16, %v7061_v35  ;;  %7373 = vmatmul.f32.gmra.mxu2 %v12637_v31  ;;  %7422 = vmatpush.msrb.mxu1 %v7079_v15  ;;  %7099 = vst.msk [vmem:[#allocation3 + $0x328] sm:$0xff] %vm360_vm1, %v7061_v35  ;;  %vm13307_vm1 = vmmov %vm13295_vm3 }
 0xd82   : > { %7475 = vmatpush.msrb.mxu2 %v7190_v61  ;;  %vm13308_vm3 = vmmov %vm13307_vm1  ;;  %v13318_v61 = vld [vmem:[#allocation19_spill] sm:$0xff] }
 0xd83   : > { %7312 = vmatmul.f32.gmra.mxu1 %v7887_v40  ;;  %7399 = vmatmul.f32.gmra.mxu0 %v7887_v40  ;;  %vm13309_vm9 = vmmov %vm13307_vm1 }
 0xd84   : > { %7476 = vmatpush.msrb.mxu2 %v7187_v20  ;;  %7423 = vmatpush.msrb.mxu1 %v7077_v53  ;;  %vm13310_vm2 = vmmov %vm13307_vm1 }
 0xd85   : > { %vm13311_vm6 = vmmov %vm13307_vm1 }
 0xd86   : > { %7477 = vmatpush.msrb.mxu2 %v7184_v63  ;;  %7424 = vmatpush.msrb.mxu1 %v12759_v38  ;;  %vm13312_vm5 = vmmov %vm13307_vm1 }
 0xd87   : > { %7460 = vmatmul.f32.gmra.mxu3 %v12637_v31  ;;  %v7223_v34 = vld [vmem:[#allocation3 + $0x340] sm:$0xff]  ;;  %v7172_v31 = vld [vmem:[#allocation3 + $0x1a8] sm:$0xff]  ;;  %vm13313_vm4 = vmmov %vm13307_vm1  ;;  %v7235_v22 = vpop.permute.xlu0 %7234 }
 0xd88   : > { %7509 = vmatpush.msrb.mxu0 %v7223_v34  ;;  %7478 = vmatpush.msrb.mxu2 %v7181_v43  ;;  %v7220_v10 = vld [vmem:[#allocation3 + $0x328] sm:$0xff]  ;;  %vm13314_vm12 = vmmov %vm13307_vm1  ;;  %v7240_v38 = vpop.permute.xlu1 %7239 }
 0xd89   : > { %7376 = vmatmul.f32.gmra.mxu2 %v12653_v48 }
 0xd8a   : > { %7479 = vmatpush.msrb.mxu2 %v7178_v58  ;;  %7510 = vmatpush.msrb.mxu0 %v7220_v10 }
 0xd8b   : > { %7315 = vmatmul.f32.gmra.mxu1 %v7890_v51  ;;  %7402 = vmatmul.f32.gmra.mxu0 %v7890_v51 }
 0xd8c   : > { %7480 = vmatpush.msrb.mxu2 %v7175_v1  ;;  %7511 = vmatpush.msrb.mxu0 %v7217_v3 }
 0xd8e   : > { %7481 = vmatpush.msrb.mxu2 %v7172_v31 }
 0xd8f   : > { %7463 = vmatmul.f32.gmra.mxu3 %v12653_v48  ;;  %v12843_v47 = vpop.permute.xlu0 %7249 }
 0xd90   : > { %7482 = vmatpush.msrb.mxu2 %v7169_v23 }
 0xd91   : > { %7483 = vmatmul.f32.vlgmr.msrb.gmra.mxu2 %v7884_v54  ;;  %v13317_v54 = vld [vmem:[#allocation16_spill] sm:$0xff] }
 0xd93   : > { %7318 = vmatmul.f32.gmra.mxu1 %v7893_v41  ;;  %7405 = vmatmul.f32.gmra.mxu0 %v7893_v41 }
 0xd99   : > { %7486 = vmatmul.f32.gmra.mxu2 %v7887_v40 }
 0xd9b   : > { %7903 = vmatmul.msk.f32.vlgmr.msrb.gmra.mxu1 %vm13307_vm1, %v12671_v59  ;;  %7907 = vmatmul.msk.f32.vlgmr.msrb.gmra.mxu0 %vm13308_vm3, %v12671_v59 }
 0xd9e   : > { %v7281_v48 = vpop.f32.mrf.mxu0 }
 0xd9f   : > { %v7282_v32 = vadd.f32 %v7281_v48, %v7235_v22 }
 0xda1   : > { %7489 = vmatmul.f32.gmra.mxu2 %v7890_v51 }
 0xda3   : > { %7904 = vmatmul.msk.f32.gmra.mxu1 %vm13309_vm9, %v12685_v30  ;;  %7908 = vmatmul.msk.f32.gmra.mxu0 %vm13310_vm2, %v12685_v30 }
 0xda5   : > { %v7339_v39 = vpop.f32.mrf.mxu3 }
 0xda6   : > { %v7284_v59 = vpop.f32.mrf.mxu0 }
 0xda7   : > { %v7285_v55 = vadd.f32 %v7284_v59, %v7240_v38 }
 0xda9   : > { %7492 = vmatmul.f32.gmra.mxu2 %v7893_v41 }
 0xdab   : > { %7905 = vmatmul.msk.f32.gmra.mxu1 %vm13311_vm6, %v12703_v45  ;;  %7909 = vmatmul.msk.f32.gmra.mxu0 %vm13312_vm5, %v12703_v45 }
 0xdad   : > { %v7342_v57 = vpop.f32.mrf.mxu3 }
 0xdae   : > { %v7287_v0 = vpop.f32.mrf.mxu0 }
 0xdaf   : > { %v7288_v26 = vadd.f32 %v7287_v0, %v12831_v12 }
 0xdb3   : > { %7906 = vmatmul.msk.f32.gmra.mxu1 %vm13313_vm4, %v12718_v5  ;;  %7910 = vmatmul.msk.f32.gmra.mxu0 %vm13314_vm12, %v12718_v5 }
 0xdb6   : > { %v7290_v60 = vpop.f32.mrf.mxu0 }
 0xdb7   : > { %v7291_v28 = vadd.f32 %v7290_v60, %v12843_v47 }
 0xdbc   : > { %v7345_v21 = vpop.f32.mrf.mxu3 }
 0xdc4   : > { %v7348_v6 = vpop.f32.mrf.mxu3 }
 0xdf4   : > { %v7368_v30 = vpop.f32.mrf.mxu2 }
 0xdf5   : > { %v7369_v43 = vadd.f32 %v7368_v30, %v7235_v22 }
 0xdf8   : > { %v7310_v44 = vpop.f32.mrf.mxu1  ;;  %v7397_v42 = vpop.f32.mrf.mxu0 }
 0xdf9   : > { %v7311_v45 = vadd.f32 %v7310_v44, %v7282_v32  ;;  %v7398_v10 = vadd.f32 %v7397_v42, %v7369_v43 }
 0xdfa   : > { %v7455_v56 = vpop.f32.mrf.mxu3 }
 0xdfb   : > { %v7340_v17 = vadd.f32 %v7339_v39, %v7311_v45  ;;  %v7456_v58 = vadd.f32 %v7455_v56, %v7235_v22  ;;  %v13319_v39 = vld [vmem:[#allocation14_spill] sm:$0xff] }
 0xdfc   : > { %v7371_v18 = vpop.f32.mrf.mxu2 }
 0xdfd   : > { %vm7526_vm10 = vcmp.gt.f32.partialorder %v7340_v17, 0.0  ;;  %v7539_v5 = vmul.f32 %v12821_v14, %v7340_v17  ;;  %v7372_v32 = vadd.f32 %v7371_v18, %v7240_v38 }
 0xdff   : > { %v7551_v24 = vsel %vm7526_vm10, %v7340_v17, %v7539_v5 }
 0xe00   : > { %v7563_v2 = vsel %vm8787_vm0, %v7551_v24, 0.0  ;;  %v7313_v36 = vpop.f32.mrf.mxu1  ;;  %v7400_v4 = vpop.f32.mrf.mxu0 }
 0xe01   : > { %v7314_v9 = vadd.f32 %v7313_v36, %v7285_v55  ;;  %v7575_v37 = vadd.f32 %v7563_v2, %v13316_v27  ;;  %v7401_v5 = vadd.f32 %v7400_v4, %v7372_v32  ;;  %v13321_v55 = vld [vmem:[#allocation18_spill] sm:$0xff]  ;;  %v13323_v36 = vld [vmem:[#allocation17_spill] sm:$0xff] }
 0xe02   : > { %v7458_v1 = vpop.f32.mrf.mxu3  ;;  %v13328_v32 = vld [vmem:[#allocation21_spill] sm:$0xff] }
 0xe03   : > { %v7343_v19 = vadd.f32 %v7342_v57, %v7314_v9  ;;  %7599 = vrot.lane.b32.xlu1 %v7575_v37, %s8004_s12  ;;  %v7459_v42 = vadd.f32 %v7458_v1, %v7240_v38 }
 0xe04   : > { %v12828_v29 = vpop.f32.mrf.mxu2 }
 0xe05   : > { %vm7529_vm8 = vcmp.gt.f32.partialorder %v7343_v19, 0.0  ;;  %v7542_v7 = vmul.f32 %v12821_v14, %v7343_v19 }
 0xe07   : > { %v7554_v62 = vsel %vm7529_vm8, %v7343_v19, %v7542_v7 }
 0xe08   : > { %v7566_v8 = vsel %vm8787_vm0, %v7554_v62, 0.0  ;;  %v7316_v11 = vpop.f32.mrf.mxu1  ;;  %v12836_v46 = vpop.f32.mrf.mxu0  ;;  %v7375_v62 = vadd.f32 %v12828_v29, %v12831_v12 }
 0xe09   : > { %v7317_v52 = vadd.f32 %v7316_v11, %v7288_v26  ;;  %v7578_v49 = vadd.f32 %v7566_v8, %v13317_v54 }
 0xe0b   : > { %v7346_v25 = vadd.f32 %v7345_v21, %v7317_v52  ;;  %7605 = vrot.lane.b32.xlu1 %v7578_v49, %s8004_s12  ;;  %v7404_v49 = vadd.f32 %v12836_v46, %v7375_v62 }
 0xe0c   : > { %v12840_v13 = vpop.f32.mrf.mxu2 }
 0xe0d   : > { %vm7532_vm1 = vcmp.gt.f32.partialorder %v7346_v25, 0.0  ;;  %v7545_v50 = vmul.f32 %v12821_v14, %v7346_v25 }
 0xe0f   : > { %v7557_v15 = vsel %vm7532_vm1, %v7346_v25, %v7545_v50  ;;  %v13324_v25 = vld [vmem:[#allocation12_spill] sm:$0xff] }
 0xe10   : > { %v7569_v35 = vsel %vm8787_vm0, %v7557_v15, 0.0  ;;  %v7319_v40 = vpop.f32.mrf.mxu1  ;;  %v12848_v53 = vpop.f32.mrf.mxu0 }
 0xe11   : > { %v7320_v16 = vadd.f32 %v7319_v40, %v7291_v28  ;;  %v7581_v20 = vadd.f32 %v7569_v35, %v13318_v61  ;;  %v13325_v28 = vld [vmem:[#allocation13_spill] sm:$0xff] }
 0xe13   : > { %v7349_v63 = vadd.f32 %v7348_v6, %v7320_v16  ;;  %7611 = vrot.lane.b32.xlu1 %v7581_v20, %s8004_s12  ;;  %v7461_v6 = vpop.f32.mrf.mxu3 }
 0xe14   : > { %v7484_v34 = vpop.f32.mrf.mxu2  ;;  %v7462_v11 = vadd.f32 %v7461_v6, %v12831_v12 }
 0xe15   : > { %vm7535_vm3 = vcmp.gt.f32.partialorder %v7349_v63, 0.0  ;;  %v7548_v51 = vmul.f32 %v12821_v14, %v7349_v63  ;;  %v7485_v23 = vadd.f32 %v7484_v34, %v7456_v58 }
 0xe17   : > { %v7560_v3 = vsel %vm7535_vm3, %v7349_v63, %v7548_v51  ;;  %v7378_v63 = vadd.f32 %v12840_v13, %v12843_v47 }
 0xe18   : > { %v7572_v31 = vsel %vm8787_vm0, %v7560_v3, 0.0  ;;  %v7426_v41 = vpop.f32.mrf.mxu1  ;;  %v7513_v59 = vpop.f32.mrf.mxu0  ;;  %v13326_v3 = vld [vmem:[#allocation11_spill] sm:$0xff] }
 0xe19   : > { %v7427_v48 = vadd.f32 %v7426_v41, %v7398_v10  ;;  %v7584_v0 = vadd.f32 %v7572_v31, %v13319_v39  ;;  %v7514_v57 = vadd.f32 %v7513_v59, %v7485_v23  ;;  %v7407_v1 = vadd.f32 %v12848_v53, %v7378_v63  ;;  %v13327_v41 = vld [vmem:[#allocation15_spill] sm:$0xff] }
 0xe1b   : > { %vm7527_vm9 = vcmp.gt.f32.partialorder %v7427_v48, 0.0  ;;  %v7540_v60 = vmul.f32 %v12821_v14, %v7427_v48  ;;  %7617 = vrot.lane.b32.xlu1 %v7584_v0, %s8004_s12  ;;  %vm7528_vm2 = vcmp.gt.f32.partialorder %v7514_v57, 0.0  ;;  %v7541_v30 = vmul.f32 %v12821_v14, %v7514_v57  ;;  %v7464_v61 = vpop.f32.mrf.mxu3 }
 0xe1c   : > { %v7487_v22 = vpop.f32.mrf.mxu2  ;;  %v7465_v51 = vadd.f32 %v7464_v61, %v12843_v47 }
 0xe1d   : > { %v7552_v44 = vsel %vm7527_vm9, %v7427_v48, %v7540_v60  ;;  %v7553_v17 = vsel %vm7528_vm2, %v7514_v57, %v7541_v30  ;;  %v7488_v27 = vadd.f32 %v7487_v22, %v7459_v42 }
 0xe1e   : > { %v7564_v45 = vsel %vm8771_vm11, %v7552_v44, 0.0  ;;  %v7565_v2 = vsel %vm8836_vm13, %v7553_v17, 0.0 }
 0xe1f   : > { %v7576_v24 = vadd.f32 %v7564_v45, %v13321_v55  ;;  %v7577_v9 = vadd.f32 %v7565_v2, %v13323_v36  ;;  %v13329_v45 = vld [vmem:[#allocation20_spill] sm:$0xff] }
 0xe20   : > { %v7429_v37 = vpop.f32.mrf.mxu1  ;;  %v7516_v7 = vpop.f32.mrf.mxu0 }
 0xe21   : > { %v7430_v19 = vadd.f32 %v7429_v37, %v7401_v5  ;;  %7601 = vrot.lane.b32.xlu2 %v7576_v24, %s8004_s12  ;;  %v7517_v18 = vadd.f32 %v7516_v7, %v7488_v27  ;;  %7603 = vrot.lane.b32.xlu0 %v7577_v9, %s8004_s12 }
 0xe23   : > { %vm7530_vm0 = vcmp.gt.f32.partialorder %v7430_v19, 0.0  ;;  %v7543_v38 = vmul.f32 %v12821_v14, %v7430_v19  ;;  %vm7531_vm6 = vcmp.gt.f32.partialorder %v7517_v18, 0.0  ;;  %v7544_v4 = vmul.f32 %v12821_v14, %v7517_v18 }
 0xe24   : > { %v7490_v26 = vpop.f32.mrf.mxu2 }
 0xe25   : > { %v7555_v8 = vsel %vm7530_vm0, %v7430_v19, %v7543_v38  ;;  %v7556_v54 = vsel %vm7531_vm6, %v7517_v18, %v7544_v4  ;;  %v7491_v35 = vadd.f32 %v7490_v26, %v7462_v11 }
 0xe26   : > { %v7567_v52 = vsel %vm8771_vm11, %v7555_v8, 0.0  ;;  %v7568_v50 = vsel %vm8836_vm13, %v7556_v54, 0.0 }
 0xe27   : > { %v7579_v56 = vadd.f32 %v7567_v52, %v13324_v25  ;;  %v7580_v15 = vadd.f32 %v7568_v50, %v13325_v28 }
 0xe28   : > { %v7432_v40 = vpop.f32.mrf.mxu1  ;;  %v7519_v29 = vpop.f32.mrf.mxu0 }
 0xe29   : > { %v7433_v16 = vadd.f32 %v7432_v40, %v7404_v49  ;;  %7607 = vrot.lane.b32.xlu2 %v7579_v56, %s8004_s12  ;;  %v7520_v12 = vadd.f32 %v7519_v29, %v7491_v35  ;;  %7609 = vrot.lane.b32.xlu0 %v7580_v15, %s8004_s12 }
 0xe2b   : > { %vm7533_vm5 = vcmp.gt.f32.partialorder %v7433_v16, 0.0  ;;  %v7546_v46 = vmul.f32 %v12821_v14, %v7433_v16  ;;  %vm7534_vm4 = vcmp.gt.f32.partialorder %v7520_v12, 0.0  ;;  %v7547_v20 = vmul.f32 %v12821_v14, %v7520_v12 }
 0xe2c   : > { %v7493_v43 = vpop.f32.mrf.mxu2 }
 0xe2d   : > { %v7558_v34 = vsel %vm7533_vm5, %v7433_v16, %v7546_v46  ;;  %v7559_v10 = vsel %vm7534_vm4, %v7520_v12, %v7547_v20  ;;  %v7494_v59 = vadd.f32 %v7493_v43, %v7465_v51 }
 0xe2e   : > { %v7570_v58 = vsel %vm8771_vm11, %v7558_v34, 0.0  ;;  %v7571_v23 = vsel %vm8836_vm13, %v7559_v10, 0.0 }
 0xe2f   : > { %v7582_v31 = vadd.f32 %v7570_v58, %v13326_v3  ;;  %v7583_v48 = vadd.f32 %v7571_v23, %v13327_v41 }
 0xe30   : > { %v7435_v39 = vpop.f32.mrf.mxu1  ;;  %v7522_v0 = vpop.f32.mrf.mxu0 }
 0xe31   : > { %v7436_v13 = vadd.f32 %v7435_v39, %v7407_v1  ;;  %7613 = vrot.lane.b32.xlu2 %v7582_v31, %s8004_s12  ;;  %v7523_v47 = vadd.f32 %v7522_v0, %v7494_v59  ;;  %7615 = vrot.lane.b32.xlu0 %v7583_v48, %s8004_s12 }
 0xe33   : > { %vm7536_vm12 = vcmp.gt.f32.partialorder %v7436_v13, 0.0  ;;  %v7549_v53 = vmul.f32 %v12821_v14, %v7436_v13  ;;  %vm7537_vm10 = vcmp.gt.f32.partialorder %v7523_v47, 0.0  ;;  %v7550_v57 = vmul.f32 %v12821_v14, %v7523_v47 }
 0xe35   : > { %v7561_v60 = vsel %vm7536_vm12, %v7436_v13, %v7549_v53  ;;  %v7562_v22 = vsel %vm7537_vm10, %v7523_v47, %v7550_v57 }
 0xe36   : > { %v7573_v30 = vsel %vm8771_vm11, %v7561_v60, 0.0  ;;  %v7574_v42 = vsel %vm8836_vm13, %v7562_v22, 0.0  ;;  %vm13330_vm11 = vcmask 556032  }
 0xe37   : > { %v7585_v44 = vadd.f32 %v7573_v30, %v13328_v32  ;;  %v7586_v17 = vadd.f32 %v7574_v42, %v13329_v45  ;;  %vm13331_vm13 = vmmov %vm13330_vm11 }
 0xe39   : > { %7619 = vrot.lane.b32.xlu2 %v7585_v44, %s8004_s12  ;;  %7621 = vrot.lane.b32.xlu0 %v7586_v17, %s8004_s12 }
 0xe75   : > { %v7600_v5 = vpop.permute.xlu1 %7599 }
 0xe76   : > { %7643 = vst.msk [vmem:[#allocation2] sm:$0xff] %vm1544_vm7, %v7600_v5 }
 0xe7b   : > { %v7602_v14 = vpop.permute.xlu2 %7601 }
 0xe7c   : > { %v7623_v21 = vsel %vm1523_vm14, %v7600_v5, %v7602_v14 }
 0xe7d   : > { %v7655_v55 = vld [vmem:[#allocation2] sm:$0xff]  ;;  %7644 = vst [vmem:[#allocation2 + $0x8] sm:$0xff] %v7623_v21  ;;  %v7606_v24 = vpop.permute.xlu1 %7605 }
 0xe7e   : > { %7667 = vst [vmem:[%s12911_s9] sm:$0xff] %v7655_v55 }
 0xe7f   : > { %7668 = vst [vmem:[%s12911_s9 + $0x8] sm:$0xff] %v7623_v21 }
 0xe80   : > { %7646 = vst.msk [vmem:[#allocation2 + $0x18] sm:$0xff] %vm1544_vm7, %v7606_v24 }
 0xe83   : > { %v7608_v33 = vpop.permute.xlu2 %7607 }
 0xe84   : > { %v7625_v2 = vsel %vm1523_vm14, %v7606_v24, %v7608_v33 }
 0xe85   : > { %7647 = vst [vmem:[#allocation2 + $0x20] sm:$0xff] %v7625_v2  ;;  %v7612_v36 = vpop.permute.xlu1 %7611 }
 0xe86   : > { %7671 = vst [vmem:[%s12911_s9 + $0x20] sm:$0xff] %v7625_v2 }
 0xe87   : > { %v7658_v9 = vld [vmem:[#allocation2 + $0x18] sm:$0xff]  ;;  %7649 = vst.msk [vmem:[#allocation2 + $0x30] sm:$0xff] %vm1544_vm7, %v7612_v36 }
 0xe88   : > { %7670 = vst [vmem:[%s12911_s9 + $0x18] sm:$0xff] %v7658_v9 }
 0xe8b   : > { %v7614_v27 = vpop.permute.xlu2 %7613 }
 0xe8c   : > { %v7627_v37 = vsel %vm1523_vm14, %v7612_v36, %v7614_v27 }
 0xe8d   : > { %7650 = vst [vmem:[#allocation2 + $0x38] sm:$0xff] %v7627_v37  ;;  %v7618_v6 = vpop.permute.xlu1 %7617 }
 0xe8e   : > { %v7661_v19 = vld [vmem:[#allocation2 + $0x30] sm:$0xff]  ;;  %7674 = vst [vmem:[%s12911_s9 + $0x38] sm:$0xff] %v7627_v37 }
 0xe8f   : > { %7673 = vst [vmem:[%s12911_s9 + $0x30] sm:$0xff] %v7661_v19 }
 0xe90   : > { %7652 = vst.msk [vmem:[#allocation2 + $0x48] sm:$0xff] %vm1544_vm7, %v7618_v6  ;;  %vm13332_vm7 = vmmov %vm13330_vm11 }
 0xe91   : > { %vm13333_vm8 = vmmov %vm13332_vm7 }
 0xe93   : > { %v7620_v7 = vpop.permute.xlu2 %7619  ;;  %v7604_v18 = vpop.permute.xlu0 %7603 }
 0xe94   : > { %v7629_v38 = vsel %vm1523_vm14, %v7618_v6, %v7620_v7  ;;  %v7624_v4 = vsel %vm1523_vm14, %v7602_v14, %v7604_v18 }
 0xe95   : > { %7653 = vst [vmem:[#allocation2 + $0x50] sm:$0xff] %v7629_v38 }
 0xe96   : > { %7645 = vst.msk [vmem:[#allocation2 + $0x10] sm:$0xff] %vm1547_vm15, %v7624_v4 }
 0xe97   : > { %v7664_v26 = vld [vmem:[#allocation2 + $0x48] sm:$0xff]  ;;  %7677 = vst [vmem:[%s12911_s9 + $0x50] sm:$0xff] %v7629_v38 }
 0xe98   : > { %7676 = vst [vmem:[%s12911_s9 + $0x48] sm:$0xff] %v7664_v26 }
 0xe9b   : > { %v7610_v62 = vpop.permute.xlu0 %7609 }
 0xe9c   : > { %v7626_v11 = vsel %vm1523_vm14, %v7608_v33, %v7610_v62 }
 0xe9d   : > { %v7657_v8 = vld [vmem:[#allocation2 + $0x10] sm:$0xff]  ;;  %7648 = vst.msk [vmem:[#allocation2 + $0x28] sm:$0xff] %vm1547_vm15, %v7626_v11 }
 0xe9e   : > { %7669 = vst.msk [vmem:[%s12911_s9 + $0x10] sm:$0xff] %vm13330_vm11, %v7657_v8 }
 0xea3   : > { %v7616_v52 = vpop.permute.xlu0 %7615 }
 0xea4   : > { %v7628_v54 = vsel %vm1523_vm14, %v7614_v27, %v7616_v52  ;;  %v7660_v49 = vld [vmem:[#allocation2 + $0x28] sm:$0xff] }
 0xea5   : > { %7651 = vst.msk [vmem:[#allocation2 + $0x40] sm:$0xff] %vm1547_vm15, %v7628_v54 }
 0xea6   : > { %7672 = vst.msk [vmem:[%s12911_s9 + $0x28] sm:$0xff] %vm13331_vm13, %v7660_v49 }
 0xeab   : > { %v7622_v25 = vpop.permute.xlu0 %7621 }
 0xeac   : > { %v7663_v56 = vld [vmem:[#allocation2 + $0x40] sm:$0xff]  ;;  %v7630_v50 = vsel %vm1523_vm14, %v7620_v7, %v7622_v25 }
 0xead   : > { %7675 = vst.msk [vmem:[%s12911_s9 + $0x40] sm:$0xff] %vm13332_vm7, %v7663_v56 }
 0xeae   : > { %7654 = vst.msk [vmem:[#allocation2 + $0x58] sm:$0xff] %vm1547_vm15, %v7630_v50 }
 0xeb5   : > { %v7666_v28 = vld [vmem:[#allocation2 + $0x58] sm:$0xff] }
 0xeb6   : > { %7678 = vst.msk [vmem:[%s12911_s9 + $0x58] sm:$0xff] %vm13333_vm8, %v7666_v28 }
 0xeb7 PF: > { %s15_s15 = sadd.s32 1, %s7992_s15  }
 0xeb8   : > { %p12_p7 = scmp.ge.s32.totalorder %s15_s15, 4  }
 0xeba   :  { %14 = sbr.rel (!%p12_p7) target bundleno = 1 (0x1), region = 81 }
 0xebf   :  { %7700 = vsyncpa [#allocation5], 1 }
 0xec0   :  { %7702 = vsyncpa [#allocation5 + $0x1], 1 }

</bundles_post_ra>
